<compile_context>
chip_gen: v7x
topology: tpu7x:2x2x1
jax: 0.10.0
libtpu: 0.0.40
codegen_flags: <defaults>
</compile_context>

<pallas_src>
import functools

import jax
import jax.numpy as jnp
from jax import lax
from jax.experimental import pallas as pl
from jax.experimental.pallas import tpu as pltpu


def _default_vmem_limit():
    # 3/4 of physical VMEM, capped at 100 MiB: ~96 MiB on v5e/v6e (128 MiB VMEM),
    # ~48 MiB on v7x (64 MiB VMEM).  Safe fallback if the query is unavailable.
    try:
        cap = pltpu.get_tpu_info().vmem_capacity_bytes
        return min(int(cap * 3 // 4), 100 * 1024 * 1024)
    except Exception:
        return 48 * 1024 * 1024


VMEM_LIMIT_BYTES = _default_vmem_limit()

DEFAULT_LOSS_PARAMS = dict(delta_v=0.5, delta_d=1.5,
                           w_var=1.0, w_dist=1.0, w_edge=1.0, w_reg=0.001)


# ----------------------------- Pallas kernels ------------------------------

def _encoder_kernel(x_ref, w1_ref, b1_ref, w2_ref, b2_ref, out_ref,
                    patch1_ref, patch2_ref, *, tile_h, H, W, W2a, hidden, E):
    """Fused conv3x3(ReLU) + conv3x3 on one row tile.

    x_ref     : (1, 1, tile_h+4, W2a+2, Cin)   input rows with 2-px halo (zero padded)
    out_ref   : (1, E, tile_h*W)               lane-dense features (module output == loss input)
    patch1_ref: (P2a, 9*Cin)   f32 VMEM scratch (conv1 im2col patches)
    patch2_ref: (P1, 9*hidden) f32 VMEM scratch (conv2 im2col patches)
    """
    TH2 = tile_h + 2
    P2a = TH2 * W2a
    P1 = tile_h * W
    t = pl.program_id(1)

    x = x_ref[0, 0]                                        # (tile_h+4, W2a+2, Cin)
    Cin = x.shape[-1]

    # ---- conv1: build (P2a, 9*Cin) patch matrix, one bf16 MXU dot (f32 accum) ----
    for kh in range(3):
        for kw in range(3):
            j = kh * 3 + kw
            xs = x[kh:kh + TH2, kw:kw + W2a, :].reshape(P2a, Cin)
            patch1_ref[:, j * Cin:(j + 1) * Cin] = xs.astype(patch1_ref.dtype)
    h = jnp.dot(patch1_ref[...].astype(jnp.bfloat16), w1_ref[...],
                preferred_element_type=jnp.float32)        # (P2a, hidden)
    h = jnp.maximum(h + b1_ref[...], 0.0)                  # bias + ReLU

    # zero conv1 outputs outside the image ('same' padding); mask built in-kernel.
    h_sp = h.reshape(TH2, W2a, hidden)
    r_io = lax.broadcasted_iota(jnp.int32, (TH2, W2a, 1), 0)
    c_io = lax.broadcasted_iota(jnp.int32, (TH2, W2a, 1), 1)
    grow = r_io + (t * tile_h - 1)
    inside = (grow >= 0) & (grow < H) & (c_io >= 1) & (c_io <= W)
    h_sp = h_sp * inside.astype(jnp.float32)

    # ---- conv2: build (P1, 9*hidden) patch matrix, one bf16 MXU dot ----
    for kh in range(3):
        for kw in range(3):
            j = kh * 3 + kw
            hs = h_sp[kh:kh + tile_h, kw:kw + W, :].reshape(P1, hidden)
            patch2_ref[:, j * hidden:(j + 1) * hidden] = hs.astype(patch2_ref.dtype)
    o = jnp.dot(patch2_ref[...].astype(jnp.bfloat16), w2_ref[...],
                preferred_element_type=jnp.float32) + b2_ref[...]   # (P1, E)

    out_ref[0] = o.T.astype(out_ref.dtype)                 # lane-dense (E, P1) store


def _loss_kernel(f_ref, lbl_ref, ew_ref, out_ref, *,
                 H, W, K, delta_v, delta_d, w_var, w_dist, w_edge, w_reg):
    """Per-image discriminative + edge loss on lane-dense (E, P) features.

    f_ref   : (1, E, P)   features (same buffer as the module output)
    lbl_ref : (1, 1, P)   int32 instance ids (labels outside [0, K) are ignored)
    ew_ref  : (1, 4, P)   bf16 edge weights [wx_edge, wx_smooth, wy_edge, wy_smooth]
    out_ref : (1, 1, 128) packed scalars [tot, var, dist, edge, reg] in lanes 0..4
    """
    eps = 1e-6
    f = f_ref[0].astype(jnp.float32)                       # (E, P)
    _, P = f.shape
    lbl = lbl_ref[0]                                       # (1, P) int32
    ew = ew_ref[0].astype(jnp.float32)                     # (4, P)

    # lane-dense one-hot instance mask
    m_kp = (lax.broadcasted_iota(jnp.int32, (K, P), 0) == lbl).astype(jnp.float32)

    # A @ B^T contractions over P (lane axis of both operands)
    dnums_bt = (((1,), (1,)), ((), ()))
    ones_1p = jnp.ones((1, P), jnp.float32)
    counts = lax.dot_general(ones_1p, m_kp, dnums_bt,
                             preferred_element_type=jnp.float32)      # (1, K)
    valid = (counts > 0.5).astype(jnp.float32)                        # (1, K)
    n_valid = jnp.maximum(jnp.sum(valid), 1.0)

    sums = lax.dot_general(f, m_kp, dnums_bt,
                           preferred_element_type=jnp.float32)        # (E, K)
    mu = sums / jnp.maximum(counts, 1.0)                              # (E, K)

    # -------- variance (pull) term --------
    mean_pp = jnp.dot(mu, m_kp, preferred_element_type=jnp.float32)   # (E, P)
    diff = f - mean_pp
    d = jnp.sqrt(jnp.sum(diff * diff, axis=0, keepdims=True) + eps)   # (1, P)
    hinge_v = jnp.maximum(d - delta_v, 0.0) ** 2
    per_k = lax.dot_general(hinge_v, m_kp, dnums_bt,
                            preferred_element_type=jnp.float32)       # (1, K)
    per_k = per_k / jnp.maximum(counts, 1.0)
    var_loss = jnp.sum(per_k * valid) / n_valid

    # -------- distance (push) term (all K-sized, tiny) --------
    sq = jnp.sum(mu * mu, axis=0, keepdims=True)                      # (1, K)
    gram = jnp.dot(mu.T, mu, preferred_element_type=jnp.float32)      # (K, K)
    d2 = jnp.maximum(sq.T + sq - 2.0 * gram, 0.0)
    dkk = jnp.sqrt(d2 + eps)
    ii = lax.broadcasted_iota(jnp.int32, (K, K), 0)
    jj = lax.broadcasted_iota(jnp.int32, (K, K), 1)
    pair_mask = (valid.T * valid) * (ii != jj).astype(jnp.float32)
    n_pairs = jnp.maximum(jnp.sum(pair_mask), 1.0)
    hinge_d = jnp.maximum(2.0 * delta_d - dkk, 0.0) ** 2
    dist_loss = jnp.sum(hinge_d * pair_mask) / n_pairs

    # -------- regularization term --------
    reg_loss = jnp.sum(jnp.sqrt(sq + eps) * valid) / n_valid

    # -------- edge term: lane-axis rolls (XLU), sublane reduce over E --------
    f_xn = pltpu.roll(f, P - 1, 1)          # f_xn[:, p] = f[:, p+1 (mod P)]
    f_yn = pltpu.roll(f, P - W, 1)          # f_yn[:, p] = f[:, p+W (mod P)]
    nx2 = jnp.sum((f_xn - f) ** 2, axis=0, keepdims=True)             # (1, P)
    ny2 = jnp.sum((f_yn - f) ** 2, axis=0, keepdims=True)             # (1, P)
    nx = jnp.sqrt(nx2 + eps)
    ny = jnp.sqrt(ny2 + eps)
    # wrap-around / last-column / last-row positions carry zero weights.
    lx = ew[0:1, :] * jnp.maximum(delta_d - nx, 0.0) ** 2 + ew[1:2, :] * (nx * nx)
    ly = ew[2:3, :] * jnp.maximum(delta_d - ny, 0.0) ** 2 + ew[3:4, :] * (ny * ny)
    denom = float(H * (W - 1) + (H - 1) * W)
    edge_loss = (jnp.sum(lx) + jnp.sum(ly)) / denom

    tot_loss = (w_var * var_loss + w_dist * dist_loss
                + w_edge * edge_loss + w_reg * reg_loss)

    # single packed scalar output block (lanes 0..4)
    lane = lax.broadcasted_iota(jnp.int32, (1, 128), 1)
    vec = (jnp.where(lane == 0, tot_loss, 0.0)
           + jnp.where(lane == 1, var_loss, 0.0)
           + jnp.where(lane == 2, dist_loss, 0.0)
           + jnp.where(lane == 3, edge_loss, 0.0)
           + jnp.where(lane == 4, reg_loss, 0.0))
    out_ref[0] = vec.astype(out_ref.dtype)


# ----------------------------- JAX-side glue --------------------------------

def _round_up(x, m):
    return ((x + m - 1) // m) * m


def _pick_tile_h(H, W, target_pixels=4096):
    """Largest row-tile height dividing H whose pixel tile is 128-lane aligned.

    Falls back to tile_h == H (single tile -> out block covers the full P dim,
    which is always a legal BlockSpec) when no aligned divisor exists.
    """
    if H * W <= target_pixels:
        return H
    cands = [th for th in range(1, H + 1)
             if H % th == 0 and th * W <= target_pixels and (th * W) % 128 == 0]
    return max(cands) if cands else H


def feature_extractor(params, imgBatch, *, tile_h=None):
    """Fused conv3x3(ReLU)+conv3x3 encoder.  Returns lane-dense (N, E, H*W) features."""
    N, Cin, H, W = imgBatch.shape
    hidden = params["w1"].shape[-1]
    E = params["w2"].shape[-1]
    assert W % 8 == 0, "W must be a multiple of 8"
    # TODO(synk): support W % 8 != 0 via extra right padding of the conv2 output.

    if tile_h is None:
        tile_h = _pick_tile_h(H, W)
    assert H % tile_h == 0
    T = H // tile_h
    TH4 = tile_h + 4
    TH2 = tile_h + 2
    W2a = _round_up(W + 2, 8)                 # conv1-output width, sublane aligned
    Wp_a = W2a + 2
    P2a = TH2 * W2a
    P = H * W
    TILE_P = tile_h * W

    # NCHW -> NHWC, zero pad by 2 (+ alignment pad on the right), row tiles with halo.
    x_nhwc = jnp.transpose(imgBatch.astype(jnp.float32), (0, 2, 3, 1))
    extra = W2a - (W + 2)
    xp = jnp.pad(x_nhwc, ((0, 0), (2, 2), (2, 2 + extra), (0, 0)))    # (N, H+4, Wp_a, Cin)
    if T == 1:
        x_tiles = xp[:, None]
    else:
        # TODO(synk): replace with overlapping pl.Element row windows to avoid this copy.
        x_tiles = jnp.stack(
            [xp[:, t * tile_h: t * tile_h + TH4, :, :] for t in range(T)], axis=1)

    w1 = params["w1"].reshape(9 * Cin, hidden).astype(jnp.bfloat16)
    b1 = params["b1"].reshape(1, hidden).astype(jnp.float32)
    w2 = params["w2"].reshape(9 * hidden, E).astype(jnp.bfloat16)
    b2 = params["b2"].reshape(1, E).astype(jnp.float32)

    kern = functools.partial(_encoder_kernel, tile_h=tile_h, H=H, W=W, W2a=W2a,
                             hidden=hidden, E=E)
    feat = pl.pallas_call(
        kern,
        out_shape=jax.ShapeDtypeStruct((N, E, P), jnp.float32),
        grid=(N, T),
        in_specs=[
            pl.BlockSpec((1, 1, TH4, Wp_a, Cin), lambda n, t: (n, t, 0, 0, 0)),
            pl.BlockSpec((9 * Cin, hidden), lambda n, t: (0, 0)),
            pl.BlockSpec((1, hidden), lambda n, t: (0, 0)),
            pl.BlockSpec((9 * hidden, E), lambda n, t: (0, 0)),
            pl.BlockSpec((1, E), lambda n, t: (0, 0)),
        ],
        out_specs=pl.BlockSpec((1, E, TILE_P), lambda n, t: (n, 0, t)),
        scratch_shapes=[pltpu.VMEM((P2a, 9 * Cin), jnp.float32),
                        pltpu.VMEM((TILE_P, 9 * hidden), jnp.float32)],
        compiler_params=pltpu.CompilerParams(
            dimension_semantics=("parallel", "parallel"),
            vmem_limit_bytes=VMEM_LIMIT_BYTES),
    )(x_tiles, w1, b1, w2, b2)
    return feat


def discriminative_edge_loss(feat, lblBatch, lblEdgBatch, *, num_instances,
                             H, W, delta_v, delta_d, w_var, w_dist, w_edge, w_reg):
    N, E, P = feat.shape
    K = num_instances
    lbl = lblBatch.astype(jnp.int32).reshape(N, 1, P)

    # Host-side (cheap XLA) edge weights with validity folded in:
    # rows = [wx_edge, wx_smooth, wy_edge, wy_smooth], zero at last col / last row.
    e = lblEdgBatch.astype(jnp.float32)                               # (N, H, W)
    ex = jnp.maximum(e[:, :, 1:], e[:, :, :-1])                       # (N, H, W-1)
    ey = jnp.maximum(e[:, 1:, :], e[:, :-1, :])                       # (N, H-1, W)
    ew = jnp.stack([
        jnp.pad(ex, ((0, 0), (0, 0), (0, 1))),
        jnp.pad(1.0 - ex, ((0, 0), (0, 0), (0, 1))),
        jnp.pad(ey, ((0, 0), (0, 1), (0, 0))),
        jnp.pad(1.0 - ey, ((0, 0), (0, 1), (0, 0))),
    ], axis=1).reshape(N, 4, P).astype(jnp.bfloat16)

    kern = functools.partial(_loss_kernel, H=H, W=W, K=K, delta_v=delta_v,
                             delta_d=delta_d, w_var=w_var, w_dist=w_dist,
                             w_edge=w_edge, w_reg=w_reg)
    # TODO(synk): for large images (P >~ 64k) tile the P axis with an "arbitrary"
    # grid dim + scratch accumulators (two passes over P) so the per-image block
    # fits v7x's 64 MiB VMEM and both TensorCores get work when N is small.
    out = pl.pallas_call(
        kern,
        out_shape=jax.ShapeDtypeStruct((N, 1, 128), jnp.float32),
        grid=(N,),
        in_specs=[
            pl.BlockSpec((1, E, P), lambda b: (b, 0, 0)),
            pl.BlockSpec((1, 1, P), lambda b: (b, 0, 0)),
            pl.BlockSpec((1, 4, P), lambda b: (b, 0, 0)),
        ],
        out_specs=pl.BlockSpec((1, 1, 128), lambda b: (b, 0, 0)),
        compiler_params=pltpu.CompilerParams(
            dimension_semantics=("parallel",),
            vmem_limit_bytes=VMEM_LIMIT_BYTES),
    )(feat, lbl, ew)

    per = jnp.mean(out[:, 0, :5], axis=0)                             # (5,)
    return per[0], per[1], per[2], per[3], per[4]


# ----------------------------- Model wrapper --------------------------------

def init_params(key, in_channels, hidden, embedding_dim):
    k1, k2, k3, k4 = jax.random.split(key, 4)
    return {
        "w1": 0.1 * jax.random.normal(k1, (3, 3, in_channels, hidden), jnp.float32),
        "b1": 0.01 * jax.random.normal(k2, (hidden,), jnp.float32),
        "w2": 0.1 * jax.random.normal(k3, (3, 3, hidden, embedding_dim), jnp.float32),
        "b2": 0.01 * jax.random.normal(k4, (embedding_dim,), jnp.float32),
    }


def complete_model_forward(params, imgBatch, lblBatch, lblEdgBatch, *,
                           num_instances=4, loss_params=None, training=True):
    """Mirrors CompleteModel.forward: returns (features, tot, var, dist, edge, reg)."""
    if loss_params is None:
        loss_params = DEFAULT_LOSS_PARAMS
    N, Cin, H, W = imgBatch.shape

    feat = feature_extractor(params, imgBatch)             # (N, E, H*W), lane-dense
    features = feat.reshape(N, -1, H, W)                   # NCHW (PyTorch convention)

    if not training:
        return features, None, None, None, None, None

    tot, var, dist, edg, reg = discriminative_edge_loss(
        feat, lblBatch, lblEdgBatch, num_instances=num_instances,
        H=H, W=W, **loss_params)
    return features, tot, var, dist, edg, reg


# --------------------------------- Demo --------------------------------------

if __name__ == "__main__":
    key = jax.random.PRNGKey(0)
    N, Cin, H, W = 2, 3, 16, 16
    embedding_dim, hidden, K = 8, 16, 4

    k_img, k_par = jax.random.split(key)
    imgBatch = jax.random.normal(k_img, (N, Cin, H, W), jnp.float32)   # NCHW

    # deterministic quadrant instance labels + derived edge maps
    yy, xx = jnp.meshgrid(jnp.arange(H), jnp.arange(W), indexing="ij")
    lbl0 = (yy >= H // 2).astype(jnp.int32) * 2 + (xx >= W // 2).astype(jnp.int32)
    lblBatch = jnp.stack([lbl0, (lbl0 + 1) % K], axis=0)               # (N, H, W)

    def make_edges(l):
        ex = jnp.zeros((H, W), bool).at[:, 1:].set(l[:, 1:] != l[:, :-1])
        ey = jnp.zeros((H, W), bool).at[1:, :].set(l[1:, :] != l[:-1, :])
        return (ex | ey).astype(jnp.float32)

    lblEdgBatch = jax.vmap(make_edges)(lblBatch)                       # (N, H, W)

    params = init_params(k_par, Cin, hidden, embedding_dim)

    outs = complete_model_forward(params, imgBatch, lblBatch, lblEdgBatch,
                                  num_instances=K, training=True)
    jax.block_until_ready(outs)
    print("KERNEL_OK")
</pallas_src>

<mosaic_0001>
module attributes {stable_mosaic.version = 11 : i64} {
  func.func @_encoder_kernel(%arg0: i32, %arg1: i32, %arg2: memref<1x1x20x26x3xf32, #tpu.memory_space<vmem>>, %arg3: memref<27x16xbf16, #tpu.memory_space<vmem>>, %arg4: memref<1x16xf32, #tpu.memory_space<vmem>>, %arg5: memref<144x8xbf16, #tpu.memory_space<vmem>>, %arg6: memref<1x8xf32, #tpu.memory_space<vmem>>, %arg7: memref<1x8x256xf32, #tpu.memory_space<vmem>>, %arg8: memref<432x27xf32, #tpu.memory_space<vmem>>, %arg9: memref<256x144xf32, #tpu.memory_space<vmem>>) attributes {dimension_semantics = [#tpu.dimension_semantics<parallel>, #tpu.dimension_semantics<parallel>], iteration_bounds = array<i64: 2, 1>, scalar_prefetch = 0 : i64, scratch_operands = 2 : i64, tpu.core_type = #tpu.core_type<tc>, window_params = [{transform_indices = @transform_0, window_bounds = array<i64: 1, 1, 20, 26, 3>}, {pipeline_mode = #tpu.pipeline_mode<synchronous>, transform_indices = @transform_1, window_bounds = array<i64: 27, 16>}, {pipeline_mode = #tpu.pipeline_mode<synchronous>, transform_indices = @transform_2, window_bounds = array<i64: 1, 16>}, {pipeline_mode = #tpu.pipeline_mode<synchronous>, transform_indices = @transform_3, window_bounds = array<i64: 144, 8>}, {pipeline_mode = #tpu.pipeline_mode<synchronous>, transform_indices = @transform_4, window_bounds = array<i64: 1, 8>}, {transform_indices = @transform_5, window_bounds = array<i64: 1, 8, 256>}]} {
    %c0 = arith.constant 0 : index
    %c0_0 = arith.constant 0 : index
    %c0_1 = arith.constant 0 : index
    %c0_2 = arith.constant 0 : index
    %c0_3 = arith.constant 0 : index
    %0 = vector.load %arg2[%c0, %c0_0, %c0_1, %c0_2, %c0_3] : memref<1x1x20x26x3xf32, #tpu.memory_space<vmem>>, vector<1x1x20x26x3xf32>
    %1 = vector.shape_cast %0 : vector<1x1x20x26x3xf32> to vector<20x26x3xf32>
    %2 = vector.extract_strided_slice %1 {offsets = [0, 0, 0], sizes = [18, 24, 3], strides = [1, 1, 1]} : vector<20x26x3xf32> to vector<18x24x3xf32>
    %3 = vector.shape_cast %2 : vector<18x24x3xf32> to vector<432x3xf32>
    %c0_4 = arith.constant 0 : index
    %c0_5 = arith.constant 0 : index
    %4 = vector.load %arg8[%c0_4, %c0_5] : memref<432x27xf32, #tpu.memory_space<vmem>>, vector<432x3xf32>
    tpu.vector_store %arg8[%c0_4, %c0_5], %3 {strides = array<i32>} : memref<432x27xf32, #tpu.memory_space<vmem>>, vector<432x3xf32>,
    %5 = vector.extract_strided_slice %1 {offsets = [0, 1, 0], sizes = [18, 24, 3], strides = [1, 1, 1]} : vector<20x26x3xf32> to vector<18x24x3xf32>
    %6 = vector.shape_cast %5 : vector<18x24x3xf32> to vector<432x3xf32>
    %c0_6 = arith.constant 0 : index
    %c3 = arith.constant 3 : index
    %7 = vector.load %arg8[%c0_6, %c3] : memref<432x27xf32, #tpu.memory_space<vmem>>, vector<432x3xf32>
    tpu.vector_store %arg8[%c0_6, %c3], %6 {strides = array<i32>} : memref<432x27xf32, #tpu.memory_space<vmem>>, vector<432x3xf32>,
    %8 = vector.extract_strided_slice %1 {offsets = [0, 2, 0], sizes = [18, 24, 3], strides = [1, 1, 1]} : vector<20x26x3xf32> to vector<18x24x3xf32>
    %9 = vector.shape_cast %8 : vector<18x24x3xf32> to vector<432x3xf32>
    %c0_7 = arith.constant 0 : index
    %c6 = arith.constant 6 : index
    %10 = vector.load %arg8[%c0_7, %c6] : memref<432x27xf32, #tpu.memory_space<vmem>>, vector<432x3xf32>
    tpu.vector_store %arg8[%c0_7, %c6], %9 {strides = array<i32>} : memref<432x27xf32, #tpu.memory_space<vmem>>, vector<432x3xf32>,
    %11 = vector.extract_strided_slice %1 {offsets = [1, 0, 0], sizes = [18, 24, 3], strides = [1, 1, 1]} : vector<20x26x3xf32> to vector<18x24x3xf32>
    %12 = vector.shape_cast %11 : vector<18x24x3xf32> to vector<432x3xf32>
    %c0_8 = arith.constant 0 : index
    %c9 = arith.constant 9 : index
    %13 = vector.load %arg8[%c0_8, %c9] : memref<432x27xf32, #tpu.memory_space<vmem>>, vector<432x3xf32>
    tpu.vector_store %arg8[%c0_8, %c9], %12 {strides = array<i32>} : memref<432x27xf32, #tpu.memory_space<vmem>>, vector<432x3xf32>,
    %14 = vector.extract_strided_slice %1 {offsets = [1, 1, 0], sizes = [18, 24, 3], strides = [1, 1, 1]} : vector<20x26x3xf32> to vector<18x24x3xf32>
    %15 = vector.shape_cast %14 : vector<18x24x3xf32> to vector<432x3xf32>
    %c0_9 = arith.constant 0 : index
    %c12 = arith.constant 12 : index
    %16 = vector.load %arg8[%c0_9, %c12] : memref<432x27xf32, #tpu.memory_space<vmem>>, vector<432x3xf32>
    tpu.vector_store %arg8[%c0_9, %c12], %15 {strides = array<i32>} : memref<432x27xf32, #tpu.memory_space<vmem>>, vector<432x3xf32>,
    %17 = vector.extract_strided_slice %1 {offsets = [1, 2, 0], sizes = [18, 24, 3], strides = [1, 1, 1]} : vector<20x26x3xf32> to vector<18x24x3xf32>
    %18 = vector.shape_cast %17 : vector<18x24x3xf32> to vector<432x3xf32>
    %c0_10 = arith.constant 0 : index
    %c15 = arith.constant 15 : index
    %19 = vector.load %arg8[%c0_10, %c15] : memref<432x27xf32, #tpu.memory_space<vmem>>, vector<432x3xf32>
    tpu.vector_store %arg8[%c0_10, %c15], %18 {strides = array<i32>} : memref<432x27xf32, #tpu.memory_space<vmem>>, vector<432x3xf32>,
    %20 = vector.extract_strided_slice %1 {offsets = [2, 0, 0], sizes = [18, 24, 3], strides = [1, 1, 1]} : vector<20x26x3xf32> to vector<18x24x3xf32>
    %21 = vector.shape_cast %20 : vector<18x24x3xf32> to vector<432x3xf32>
    %c0_11 = arith.constant 0 : index
    %c18 = arith.constant 18 : index
    %22 = vector.load %arg8[%c0_11, %c18] : memref<432x27xf32, #tpu.memory_space<vmem>>, vector<432x3xf32>
    tpu.vector_store %arg8[%c0_11, %c18], %21 {strides = array<i32>} : memref<432x27xf32, #tpu.memory_space<vmem>>, vector<432x3xf32>,
    %23 = vector.extract_strided_slice %1 {offsets = [2, 1, 0], sizes = [18, 24, 3], strides = [1, 1, 1]} : vector<20x26x3xf32> to vector<18x24x3xf32>
    %24 = vector.shape_cast %23 : vector<18x24x3xf32> to vector<432x3xf32>
    %c0_12 = arith.constant 0 : index
    %c21 = arith.constant 21 : index
    %25 = vector.load %arg8[%c0_12, %c21] : memref<432x27xf32, #tpu.memory_space<vmem>>, vector<432x3xf32>
    tpu.vector_store %arg8[%c0_12, %c21], %24 {strides = array<i32>} : memref<432x27xf32, #tpu.memory_space<vmem>>, vector<432x3xf32>,
    %26 = vector.extract_strided_slice %1 {offsets = [2, 2, 0], sizes = [18, 24, 3], strides = [1, 1, 1]} : vector<20x26x3xf32> to vector<18x24x3xf32>
    %27 = vector.shape_cast %26 : vector<18x24x3xf32> to vector<432x3xf32>
    %c0_13 = arith.constant 0 : index
    %c24 = arith.constant 24 : index
    %28 = vector.load %arg8[%c0_13, %c24] : memref<432x27xf32, #tpu.memory_space<vmem>>, vector<432x3xf32>
    tpu.vector_store %arg8[%c0_13, %c24], %27 {strides = array<i32>} : memref<432x27xf32, #tpu.memory_space<vmem>>, vector<432x3xf32>,
    %c0_14 = arith.constant 0 : index
    %c0_15 = arith.constant 0 : index
    %29 = vector.load %arg8[%c0_14, %c0_15] : memref<432x27xf32, #tpu.memory_space<vmem>>, vector<432x27xf32>
    %30 = arith.truncf %29 : vector<432x27xf32> to vector<432x27xbf16>
    %c0_16 = arith.constant 0 : index
    %c0_17 = arith.constant 0 : index
    %31 = vector.load %arg3[%c0_16, %c0_17] : memref<27x16xbf16, #tpu.memory_space<vmem>>, vector<27x16xbf16>
    %cst = arith.constant dense<0.000000e+00> : vector<432x16xf32>
    %32 = tpu.matmul %30, %31, %cst {dimension_numbers = #tpu.dot_dimension_numbers<[1], [0], [0], [1], [0, 0, 1, 1], [], []>} : vector<432x27xbf16>, vector<27x16xbf16>, vector<432x16xf32> -> vector<432x16xf32>
    %c0_18 = arith.constant 0 : index
    %c0_19 = arith.constant 0 : index
    %33 = vector.load %arg4[%c0_18, %c0_19] : memref<1x16xf32, #tpu.memory_space<vmem>>, vector<1x16xf32>
    %34 = vector.broadcast %33 : vector<1x16xf32> to vector<432x16xf32>
    %35 = arith.addf %32, %34 : vector<432x16xf32>
    %cst_20 = arith.constant 0.000000e+00 : f32
    %36 = vector.broadcast %cst_20 : f32 to vector<432x16xf32>
    %37 = arith.maximumf %35, %36 : vector<432x16xf32>
    %38 = vector.shape_cast %37 : vector<432x16xf32> to vector<18x24x16xf32>
    %39 = tpu.iota {dimensions = array<i32: 0>} : vector<18x24x1xi32>
    %40 = tpu.iota {dimensions = array<i32: 1>} : vector<18x24x1xi32>
    %c16_i32 = arith.constant 16 : i32
    %41 = arith.muli %arg1, %c16_i32 : i32
    %c1_i32 = arith.constant 1 : i32
    %42 = arith.subi %41, %c1_i32 : i32
    %43 = vector.broadcast %42 : i32 to vector<18x24x1xi32>
    %44 = arith.addi %39, %43 : vector<18x24x1xi32>
    %c0_i32 = arith.constant 0 : i32
    %45 = vector.broadcast %c0_i32 : i32 to vector<18x24x1xi32>
    %46 = arith.cmpi sge, %44, %45 : vector<18x24x1xi32>
    %c16_i32_21 = arith.constant 16 : i32
    %47 = vector.broadcast %c16_i32_21 : i32 to vector<18x24x1xi32>
    %48 = arith.cmpi slt, %44, %47 : vector<18x24x1xi32>
    %49 = arith.andi %46, %48 : vector<18x24x1xi1>
    %c1_i32_22 = arith.constant 1 : i32
    %50 = vector.broadcast %c1_i32_22 : i32 to vector<18x24x1xi32>
    %51 = arith.cmpi sge, %40, %50 : vector<18x24x1xi32>
    %52 = arith.andi %49, %51 : vector<18x24x1xi1>
    %c16_i32_23 = arith.constant 16 : i32
    %53 = vector.broadcast %c16_i32_23 : i32 to vector<18x24x1xi32>
    %54 = arith.cmpi sle, %40, %53 : vector<18x24x1xi32>
    %55 = arith.andi %52, %54 : vector<18x24x1xi1>
    %56 = arith.extui %55 : vector<18x24x1xi1> to vector<18x24x1xi32>
    %57 = arith.sitofp %56 : vector<18x24x1xi32> to vector<18x24x1xf32>
    %58 = vector.broadcast %57 : vector<18x24x1xf32> to vector<18x24x16xf32>
    %59 = arith.mulf %38, %58 : vector<18x24x16xf32>
    %60 = vector.extract_strided_slice %59 {offsets = [0, 0, 0], sizes = [16, 16, 16], strides = [1, 1, 1]} : vector<18x24x16xf32> to vector<16x16x16xf32>
    %61 = vector.shape_cast %60 : vector<16x16x16xf32> to vector<256x16xf32>
    %c0_24 = arith.constant 0 : index
    %c0_25 = arith.constant 0 : index
    %62 = vector.load %arg9[%c0_24, %c0_25] : memref<256x144xf32, #tpu.memory_space<vmem>>, vector<256x16xf32>
    tpu.vector_store %arg9[%c0_24, %c0_25], %61 {strides = array<i32>} : memref<256x144xf32, #tpu.memory_space<vmem>>, vector<256x16xf32>,
    %63 = vector.extract_strided_slice %59 {offsets = [0, 1, 0], sizes = [16, 16, 16], strides = [1, 1, 1]} : vector<18x24x16xf32> to vector<16x16x16xf32>
    %64 = vector.shape_cast %63 : vector<16x16x16xf32> to vector<256x16xf32>
    %c0_26 = arith.constant 0 : index
    %c16 = arith.constant 16 : index
    %65 = vector.load %arg9[%c0_26, %c16] : memref<256x144xf32, #tpu.memory_space<vmem>>, vector<256x16xf32>
    tpu.vector_store %arg9[%c0_26, %c16], %64 {strides = array<i32>} : memref<256x144xf32, #tpu.memory_space<vmem>>, vector<256x16xf32>,
    %66 = vector.extract_strided_slice %59 {offsets = [0, 2, 0], sizes = [16, 16, 16], strides = [1, 1, 1]} : vector<18x24x16xf32> to vector<16x16x16xf32>
    %67 = vector.shape_cast %66 : vector<16x16x16xf32> to vector<256x16xf32>
    %c0_27 = arith.constant 0 : index
    %c32 = arith.constant 32 : index
    %68 = vector.load %arg9[%c0_27, %c32] : memref<256x144xf32, #tpu.memory_space<vmem>>, vector<256x16xf32>
    tpu.vector_store %arg9[%c0_27, %c32], %67 {strides = array<i32>} : memref<256x144xf32, #tpu.memory_space<vmem>>, vector<256x16xf32>,
    %69 = vector.extract_strided_slice %59 {offsets = [1, 0, 0], sizes = [16, 16, 16], strides = [1, 1, 1]} : vector<18x24x16xf32> to vector<16x16x16xf32>
    %70 = vector.shape_cast %69 : vector<16x16x16xf32> to vector<256x16xf32>
    %c0_28 = arith.constant 0 : index
    %c48 = arith.constant 48 : index
    %71 = vector.load %arg9[%c0_28, %c48] : memref<256x144xf32, #tpu.memory_space<vmem>>, vector<256x16xf32>
    tpu.vector_store %arg9[%c0_28, %c48], %70 {strides = array<i32>} : memref<256x144xf32, #tpu.memory_space<vmem>>, vector<256x16xf32>,
    %72 = vector.extract_strided_slice %59 {offsets = [1, 1, 0], sizes = [16, 16, 16], strides = [1, 1, 1]} : vector<18x24x16xf32> to vector<16x16x16xf32>
    %73 = vector.shape_cast %72 : vector<16x16x16xf32> to vector<256x16xf32>
    %c0_29 = arith.constant 0 : index
    %c64 = arith.constant 64 : index
    %74 = vector.load %arg9[%c0_29, %c64] : memref<256x144xf32, #tpu.memory_space<vmem>>, vector<256x16xf32>
    tpu.vector_store %arg9[%c0_29, %c64], %73 {strides = array<i32>} : memref<256x144xf32, #tpu.memory_space<vmem>>, vector<256x16xf32>,
    %75 = vector.extract_strided_slice %59 {offsets = [1, 2, 0], sizes = [16, 16, 16], strides = [1, 1, 1]} : vector<18x24x16xf32> to vector<16x16x16xf32>
    %76 = vector.shape_cast %75 : vector<16x16x16xf32> to vector<256x16xf32>
    %c0_30 = arith.constant 0 : index
    %c80 = arith.constant 80 : index
    %77 = vector.load %arg9[%c0_30, %c80] : memref<256x144xf32, #tpu.memory_space<vmem>>, vector<256x16xf32>
    tpu.vector_store %arg9[%c0_30, %c80], %76 {strides = array<i32>} : memref<256x144xf32, #tpu.memory_space<vmem>>, vector<256x16xf32>,
    %78 = vector.extract_strided_slice %59 {offsets = [2, 0, 0], sizes = [16, 16, 16], strides = [1, 1, 1]} : vector<18x24x16xf32> to vector<16x16x16xf32>
    %79 = vector.shape_cast %78 : vector<16x16x16xf32> to vector<256x16xf32>
    %c0_31 = arith.constant 0 : index
    %c96 = arith.constant 96 : index
    %80 = vector.load %arg9[%c0_31, %c96] : memref<256x144xf32, #tpu.memory_space<vmem>>, vector<256x16xf32>
    tpu.vector_store %arg9[%c0_31, %c96], %79 {strides = array<i32>} : memref<256x144xf32, #tpu.memory_space<vmem>>, vector<256x16xf32>,
    %81 = vector.extract_strided_slice %59 {offsets = [2, 1, 0], sizes = [16, 16, 16], strides = [1, 1, 1]} : vector<18x24x16xf32> to vector<16x16x16xf32>
    %82 = vector.shape_cast %81 : vector<16x16x16xf32> to vector<256x16xf32>
    %c0_32 = arith.constant 0 : index
    %c112 = arith.constant 112 : index
    %83 = vector.load %arg9[%c0_32, %c112] : memref<256x144xf32, #tpu.memory_space<vmem>>, vector<256x16xf32>
    tpu.vector_store %arg9[%c0_32, %c112], %82 {strides = array<i32>} : memref<256x144xf32, #tpu.memory_space<vmem>>, vector<256x16xf32>,
    %84 = vector.extract_strided_slice %59 {offsets = [2, 2, 0], sizes = [16, 16, 16], strides = [1, 1, 1]} : vector<18x24x16xf32> to vector<16x16x16xf32>
    %85 = vector.shape_cast %84 : vector<16x16x16xf32> to vector<256x16xf32>
    %c0_33 = arith.constant 0 : index
    %c128 = arith.constant 128 : index
    %86 = vector.load %arg9[%c0_33, %c128] : memref<256x144xf32, #tpu.memory_space<vmem>>, vector<256x16xf32>
    tpu.vector_store %arg9[%c0_33, %c128], %85 {strides = array<i32>} : memref<256x144xf32, #tpu.memory_space<vmem>>, vector<256x16xf32>,
    %c0_34 = arith.constant 0 : index
    %c0_35 = arith.constant 0 : index
    %87 = vector.load %arg9[%c0_34, %c0_35] : memref<256x144xf32, #tpu.memory_space<vmem>>, vector<256x144xf32>
    %88 = arith.truncf %87 : vector<256x144xf32> to vector<256x144xbf16>
    %c0_36 = arith.constant 0 : index
    %c0_37 = arith.constant 0 : index
    %89 = vector.load %arg5[%c0_36, %c0_37] : memref<144x8xbf16, #tpu.memory_space<vmem>>, vector<144x8xbf16>
    %cst_38 = arith.constant dense<0.000000e+00> : vector<256x8xf32>
    %90 = tpu.matmul %88, %89, %cst_38 {dimension_numbers = #tpu.dot_dimension_numbers<[1], [0], [0], [1], [0, 0, 1, 1], [], []>} : vector<256x144xbf16>, vector<144x8xbf16>, vector<256x8xf32> -> vector<256x8xf32>
    %c0_39 = arith.constant 0 : index
    %c0_40 = arith.constant 0 : index
    %91 = vector.load %arg6[%c0_39, %c0_40] : memref<1x8xf32, #tpu.memory_space<vmem>>, vector<1x8xf32>
    %92 = vector.broadcast %91 : vector<1x8xf32> to vector<256x8xf32>
    %93 = arith.addf %90, %92 : vector<256x8xf32>
    %94 = tpu.transpose %93, [1, 0] : vector<256x8xf32> -> vector<8x256xf32>
    %c0_41 = arith.constant 0 : index
    %c0_42 = arith.constant 0 : index
    %c0_43 = arith.constant 0 : index
    %95 = vector.load %arg7[%c0_41, %c0_42, %c0_43] : memref<1x8x256xf32, #tpu.memory_space<vmem>>, vector<1x8x256xf32>
    %96 = vector.shape_cast %95 : vector<1x8x256xf32> to vector<8x256xf32>
    %97 = vector.shape_cast %94 : vector<8x256xf32> to vector<1x8x256xf32>
    tpu.vector_store %arg7[%c0_41, %c0_42, %c0_43], %97 {strides = array<i32>} : memref<1x8x256xf32, #tpu.memory_space<vmem>>, vector<1x8x256xf32>,
    return
  }
  func.func @transform_0(%arg0: i32, %arg1: i32) -> (i32, i32, i32, i32, i32) {
    %c0_i32 = arith.constant 0 : i32
    %c0_i32_0 = arith.constant 0 : i32
    %c0_i32_1 = arith.constant 0 : i32
    %c0_i32_2 = arith.constant 0 : i32
    return %arg0, %arg1, %c0_i32, %c0_i32_0, %c0_i32_1 : i32, i32, i32, i32, i32
  }
  func.func @transform_1(%arg0: i32, %arg1: i32) -> (i32, i32) {
    %c0_i32 = arith.constant 0 : i32
    %c0_i32_0 = arith.constant 0 : i32
    %c0_i32_1 = arith.constant 0 : i32
    return %c0_i32, %c0_i32_0 : i32, i32
  }
  func.func @transform_2(%arg0: i32, %arg1: i32) -> (i32, i32) {
    %c0_i32 = arith.constant 0 : i32
    %c0_i32_0 = arith.constant 0 : i32
    %c0_i32_1 = arith.constant 0 : i32
    return %c0_i32, %c0_i32_0 : i32, i32
  }
  func.func @transform_3(%arg0: i32, %arg1: i32) -> (i32, i32) {
    %c0_i32 = arith.constant 0 : i32
    %c0_i32_0 = arith.constant 0 : i32
    %c0_i32_1 = arith.constant 0 : i32
    return %c0_i32, %c0_i32_0 : i32, i32
  }
  func.func @transform_4(%arg0: i32, %arg1: i32) -> (i32, i32) {
    %c0_i32 = arith.constant 0 : i32
    %c0_i32_0 = arith.constant 0 : i32
    %c0_i32_1 = arith.constant 0 : i32
    return %c0_i32, %c0_i32_0 : i32, i32
  }
  func.func @transform_5(%arg0: i32, %arg1: i32) -> (i32, i32, i32) {
    %c0_i32 = arith.constant 0 : i32
    %c0_i32_0 = arith.constant 0 : i32
    return %arg0, %c0_i32, %arg1 : i32, i32, i32
  }
}

</mosaic_0001>

<bundles_post_ra>
// kernel: tpu_custom_call.1
= control target key start
LH: loop header
LB: loop body
LE: loop exit
PB: predicated region body
PF: predicated region fallthrough
CT: control target
= control target key end

     0   :  { %10 = vsyncpa [#allocation5], 0  ;;  %s9235_s0 = inlined_call_operand.vmem [shape: f32[2,1,20,26,3], index: 0, kind: input, shape index: {}]   ;;  %s9236_s1 = inlined_call_operand.vmem [shape: bf16[27,16], index: 1, kind: input, shape index: {}]   ;;  %s9237_s2 = inlined_call_operand.vmem [shape: f32[1,16], index: 2, kind: input, shape index: {}]   ;;  %s9238_s3 = inlined_call_operand.vmem [shape: bf16[144,8], index: 3, kind: input, shape index: {}]   ;;  %s9239_s4 = inlined_call_operand.vmem [shape: f32[1,8], index: 4, kind: input, shape index: {}]   ;;  %s9240_s5 = inlined_call_operand.hbm [shape: f32[2,8,256], index: 5, kind: output, shape index: {}]  }
   0x1   :  { %12 = vsyncpa [#allocation5 + $0x1], 0  ;;  %s5580_s18 = smov 0   ;;  %s5582_s19 = smov 0  }
   0x2   :  { %s5584_s20 = smov 0   ;;  %s5586_s21 = smov 0  }
   0x3   :  { %s5588_s22 = smov 0   ;;  %s5590_s23 = smov 0  }
   0x4 LB: > { %s5114_s24 = sadd.s32 4294967295, %s5528_s23   ;;  %s5115_s25 = sadd.s32 4294967294, %s5528_s23   ;;  %s5528_s23 = sphi %s5590_s23, %s18_s23   ;;  %s5524_s22 = sphi %s5588_s22, %s9981_s22   ;;  %s5520_s21 = sphi %s5586_s21, %s9980_s21   ;;  %s5516_s20 = sphi %s5584_s20, %s9979_s20   ;;  %s5512_s19 = sphi %s5582_s19, %s9978_s19   ;;  %s5508_s18 = sphi %s5580_s18, %s9977_s18  }
   0x5   : > { %s30_s26 = sadd.s32 1, %s5524_s22  ;;  %s151_s27 = sadd.s32 1, %s5516_s20 }
   0x6   : > { %p32_p0 = scmp.ge.s32.totalorder %s30_s26, 2  ;;  %p161_p1 = scmp.ne.s32.totalorder %s5516_s20, %s5512_s19 }
   0x7   : > { %p162_p2 = scmp.eq.s32.totalorder %s5114_s24, 1  ;;  %p167_p3 = scmp.ne.s32.totalorder %s5512_s19, %s5508_s18 }
   0x8   : > { %s9983_s26 = smov (%p32_p0, %s30_s26), 0  ;;  %p168_p5 = scmp.eq.s32.totalorder %s5115_s25, 1 }
   0x9   : > { %p5620_p4 = por %p162_p2, %p161_p1  ;;  %s146_s29 = ssub.s32 %s5524_s22, %s9983_s26 }
   0xa   : > { %p5118_p6 = scmp.ge.s32.totalorder %s5528_s23, 1  ;;  %p149_p7 = scmp.eq.s32.totalorder %s146_s29, 0 }
   0xb   : > { %p5627_p8 = por %p168_p5, %p167_p3  ;;  %p210_p9 = scmp.lt.s32.totalorder %s5528_s23, 3 }
   0xc   : > { %s5633_s6 = scalar_select %p149_p7, %s5516_s20, %s151_s27  }
   0xd   : > { %p211_p10 = pnand %p5118_p6, %p210_p9 }
   0xf   : > { %214 = sbr.rel (%p211_p10) target bundleno = 2032 (0x7f0), region = 40 }
  0x16   : > { %p242_p11 = scmp.lt.s32.totalorder %s5520_s21, 1  ;;  %vm333_vm0 = vcmask 23552   ;;  %vm460_vm1 = vcmask 1046528   ;;  %s5530_s12 = smov 3   ;;  %vm804_vm2 = vcmask 1045504   ;;  %vm749_vm3 = vcmask 48152  }
  0x17   : > { %s5531_s13 = smov 6   ;;  %s5532_s14 = smov 9   ;;  %vm1093_vm4 = vcmask 72752   ;;  %vm1313_vm5 = vcmask 97352   ;;  %vm1538_vm6 = vcmask 121952   ;;  %vm1762_vm7 = vcmask 146552  }
  0x18   : > { %s243_s7 = scalar_select %p242_p11, %s5520_s21, 1  ;;  %vm2671_vm8 = vcmask 1044480   ;;  %vm5540_vm9 = vmmov 0   ;;  %vm1982_vm10 = vcmask 171152   ;;  %vm2207_vm11 = vcmask 195752  }
  0x19   : > { %s5533_s15 = smov 12   ;;  %s5534_s16 = smov 15   ;;  %vm2431_vm12 = vcmask 220352   ;;  %vm2589_vm13 = vcmask 220160   ;;  %vm3334_vm14 = vcmask 130048  }
  0x1a   : > { %s5360_s8 = smul.u32 640, %s243_s7  ;;  %s5535_s17 = smov 18  }
  0x1b   : > { %s5538_s7 = smov 21   ;;  %s5544_s10 = smov 48  }
  0x1c   : > { %s5640_s11 = scalar_lea.vmem %s9235_s0, %s5360_s8  ;;  %s5539_s8 = smov 24  }
  0x1d   : > { %v5643_v0 = vld [vmem:[%s5640_s11 + $0x10] sm:$0xff]  ;;  %v5646_v1 = vld [vmem:[%s5640_s11 + $0x18] sm:$0x3]  ;;  %v5649_v2 = vld [vmem:[%s5640_s11] sm:$0xff]  ;;  %s5547_s27 = smov 96  }
  0x1e   : > { %v464_v3 = vrot.slane %v5643_v0, 1  ;;  %v466_v4 = vrot.slane %v5646_v1, 1  ;;  %v5654_v5 = vld [vmem:[%s5640_s11 + $0x8] sm:$0xff]  ;;  %v461_v6 = vrot.slane %v5649_v2, 1  ;;  %v5658_v7 = vld [vmem:[%s5640_s11 + $0x20] sm:$0xff]  ;;  %336 = vst.msk [vmem:[#allocation2 + $0x10] sm:$0xff] %vm333_vm0, %v5643_v0 }
  0x1f   : > { %v5661_v8 = vld [vmem:[%s5640_s11 + $0x28] sm:$0xff]  ;;  %334 = vst.msk [vmem:[#allocation2] sm:$0xff] %vm333_vm0, %v5649_v2  ;;  %v462_v9 = vrot.slane %v5654_v5, 1  ;;  %v468_v10 = vrot.slane %v5658_v7, 1  ;;  %v5671_v12 = vld [vmem:[%s5640_s11 + $0x30] sm:$0xff]  ;;  %335 = vst.msk [vmem:[#allocation2 + $0x8] sm:$0xff] %vm333_vm0, %v5654_v5 }
  0x20   : > { %v469_v11 = vrot.slane %v5661_v8, 1  ;;  %v5674_v13 = vld [vmem:[%s5640_s11 + $0x38] sm:$0x3]  ;;  %337 = vst.msk [vmem:[#allocation2 + $0x18] sm:$0xff] %vm333_vm0, %v5658_v7  ;;  %338 = vst.msk [vmem:[#allocation2 + $0x20] sm:$0xff] %vm333_vm0, %v5661_v8  ;;  %v467_v14 = vsel %vm460_vm1, %v464_v3, %v466_v4  ;;  %v5684_v15 = vld [vmem:[%s5640_s11 + $0x48] sm:$0xff] }
  0x21   : > { %v5687_v16 = vld [vmem:[%s5640_s11 + $0x50] sm:$0xff]  ;;  %v5690_v17 = vld [vmem:[%s5640_s11 + $0x40] sm:$0xff]  ;;  %339 = vst.msk [vmem:[#allocation2 + $0x28] sm:$0xff] %vm333_vm0, %v5671_v12  ;;  %591 = vrot.lane.b32.xlu1 %v467_v14, %s5530_s12  ;;  %v463_v18 = vsel %vm460_vm1, %v461_v6, %v462_v9  ;;  %v5700_v20 = vld [vmem:[%s5640_s11 + $0x68] sm:$0xff]  ;;  %v471_v22 = vrot.slane %v5671_v12, 1  ;;  %v473_v23 = vrot.slane %v5674_v13, 1  ;;  %v465_v26 = vsel %vm460_vm1, %v462_v9, %v464_v3 }
  0x22   : > { %v5697_v19 = vld [vmem:[%s5640_s11 + $0x60] sm:$0xff]  ;;  %340 = vst.msk [vmem:[#allocation2 + $0x30] sm:$0xff] %vm333_vm0, %v5690_v17  ;;  %341 = vst.msk [vmem:[#allocation2 + $0x38] sm:$0xff] %vm333_vm0, %v5684_v15  ;;  %587 = vrot.lane.b32.xlu0 %v463_v18, %s5530_s12  ;;  %v5710_v21 = vsel %vm460_vm1, %v468_v10, %v469_v11  ;;  %v5715_v24 = vld [vmem:[%s5640_s11 + $0x70] sm:$0xff]  ;;  %v476_v34 = vrot.slane %v5684_v15, 1  ;;  %v478_v35 = vrot.slane %v5687_v16, 1 }
  0x23   : > { %342 = vst.msk [vmem:[#allocation2 + $0x40] sm:$0xff] %vm333_vm0, %v5687_v16  ;;  %9562 = vst [vmem:[#allocation7_spill] sm:$0xff] %v5710_v21  ;;  %v5718_v25 = vld [vmem:[%s5640_s11 + $0x88] sm:$0xff]  ;;  %v5726_v27 = vld [vmem:[%s5640_s11 + $0x90] sm:$0xff]  ;;  %v5759_v33 = vsel %vm460_vm1, %v471_v22, %v473_v23  ;;  %v5777_v39 = vsel %vm460_vm1, %v469_v11, %v471_v22  ;;  %v475_v40 = vrot.slane %v5690_v17, 1  ;;  %v482_v49 = vrot.slane %v5697_v19, 1 }
  0x24   : > { %9563 = vst [vmem:[#allocation8_spill] sm:$0xff] %v5715_v24  ;;  %9564 = vst [vmem:[#allocation9_spill] sm:$0xff] %v5718_v25  ;;  %v5729_v28 = vld [vmem:[%s5640_s11 + $0x80] sm:$0xff]  ;;  %v5739_v30 = vld [vmem:[%s5640_s11 + $0xa8] sm:$0xff]  ;;  %v5818_v48 = vsel %vm460_vm1, %v476_v34, %v478_v35  ;;  %v483_v50 = vrot.slane %v5700_v20, 1  ;;  %v485_v62 = vrot.slane %v5715_v24, 1 }
  0x25   : > { %343 = vst.msk [vmem:[#allocation2 + $0x48] sm:$0xff] %vm333_vm0, %v5697_v19  ;;  %344 = vst.msk [vmem:[#allocation2 + $0x50] sm:$0xff] %vm333_vm0, %v5700_v20  ;;  %v5736_v29 = vld [vmem:[%s5640_s11 + $0xa0] sm:$0xff]  ;;  %593 = vrot.lane.b32.xlu1 %v5710_v21, %s5530_s12  ;;  %v5748_v31 = vld [vmem:[%s5640_s11 + $0xb0] sm:$0xff]  ;;  %v5832_v52 = vsel %vm460_vm1, %v475_v40, %v476_v34  ;;  %v490_v34 = vrot.slane %v5718_v25, 1 }
  0x26   : > { %9565 = vst [vmem:[#allocation10_spill] sm:$0xff] %v5726_v27  ;;  %9566 = vst [vmem:[#allocation11_spill] sm:$0xff] %v5729_v28  ;;  %v5751_v32 = vld [vmem:[%s5640_s11 + $0xc8] sm:$0xff]  ;;  %589 = vrot.lane.b32.xlu0 %v465_v26, %s5530_s12  ;;  %v5764_v36 = vld [vmem:[%s5640_s11 + $0xd0] sm:$0xff]  ;;  %v5871_v61 = vsel %vm460_vm1, %v482_v49, %v483_v50 }
  0x27   : > { %345 = vst.msk [vmem:[#allocation2 + $0x58] sm:$0xff] %vm333_vm0, %v5715_v24  ;;  %347 = vst.msk [vmem:[#allocation2 + $0x68] sm:$0xff] %vm333_vm0, %v5718_v25  ;;  %v5767_v37 = vld [vmem:[%s5640_s11 + $0xc0] sm:$0xff]  ;;  %v5781_v41 = vld [vmem:[%s5640_s11 + $0xe8] sm:$0xff] }
  0x28   : > { %9567 = vst [vmem:[#allocation12_spill] sm:$0xff] %v5736_v29  ;;  %9568 = vst [vmem:[#allocation13_spill] sm:$0xff] %v5739_v30  ;;  %v5770_v38 = vld [vmem:[%s5640_s11 + $0xe0] sm:$0xff]  ;;  %v5790_v42 = vld [vmem:[%s5640_s11 + $0x58] sm:$0x3] }
  0x29   : > { %346 = vst.msk [vmem:[#allocation2 + $0x60] sm:$0xff] %vm333_vm0, %v5729_v28  ;;  %348 = vst.msk [vmem:[#allocation2 + $0x70] sm:$0xff] %vm333_vm0, %v5726_v27  ;;  %v5793_v43 = vld [vmem:[%s5640_s11 + $0xf0] sm:$0xff]  ;;  %v5796_v44 = vld [vmem:[%s5640_s11 + $0x108] sm:$0xff]  ;;  %597 = vrot.lane.b32.xlu1 %v5759_v33, %s5530_s12  ;;  %v480_v53 = vrot.slane %v5790_v42, 1 }
  0x2a   : > { %349 = vst.msk [vmem:[#allocation2 + $0x78] sm:$0xff] %vm333_vm0, %v5736_v29  ;;  %350 = vst.msk [vmem:[#allocation2 + $0x80] sm:$0xff] %vm333_vm0, %v5739_v30  ;;  %v5803_v45 = vld [vmem:[%s5640_s11 + $0x110] sm:$0xff]  ;;  %v5806_v46 = vld [vmem:[%s5640_s11 + $0x100] sm:$0xff]  ;;  %595 = vrot.lane.b32.xlu0 %v5777_v39, %s5530_s12 }
  0x2b   : > { %9569 = vst [vmem:[#allocation14_spill] sm:$0xff] %v5759_v33  ;;  %351 = vst.msk [vmem:[#allocation2 + $0x88] sm:$0xff] %vm333_vm0, %v5748_v31  ;;  %v5809_v47 = vld [vmem:[%s5640_s11 + $0x120] sm:$0xff]  ;;  %v5823_v51 = vld [vmem:[%s5640_s11 + $0x128] sm:$0xff]  ;;  %v5886_v6 = vsel %vm460_vm1, %v478_v35, %v480_v53  ;;  %v492_v35 = vrot.slane %v5726_v27, 1 }
  0x2c   : > { %353 = vst.msk [vmem:[#allocation2 + $0x98] sm:$0xff] %vm333_vm0, %v5751_v32  ;;  %9570 = vst [vmem:[#allocation15_spill] sm:$0xff] %v5777_v39  ;;  %v5836_v54 = vld [vmem:[%s5640_s11 + $0x78] sm:$0x3]  ;;  %v5839_v55 = vld [vmem:[%s5640_s11 + $0x130] sm:$0xff] }
  0x2d   : > { %352 = vst.msk [vmem:[#allocation2 + $0x90] sm:$0xff] %vm333_vm0, %v5767_v37  ;;  %354 = vst.msk [vmem:[#allocation2 + $0xa0] sm:$0xff] %vm333_vm0, %v5764_v36  ;;  %v5844_v56 = vld [vmem:[%s5640_s11 + $0x148] sm:$0xff]  ;;  %v5847_v57 = vld [vmem:[%s5640_s11 + $0x150] sm:$0xff]  ;;  %601 = vrot.lane.b32.xlu1 %v5818_v48, %s5530_s12  ;;  %v487_v63 = vrot.slane %v5836_v54, 1  ;;  %v5989_v39 = vsel %vm460_vm1, %v490_v34, %v492_v35 }
  0x2e   : > { %355 = vst.msk [vmem:[#allocation2 + $0xa8] sm:$0xff] %vm333_vm0, %v5770_v38  ;;  %356 = vst.msk [vmem:[#allocation2 + $0xb0] sm:$0xff] %vm333_vm0, %v5781_v41  ;;  %v5850_v58 = vld [vmem:[%s5640_s11 + $0x140] sm:$0xff]  ;;  %v5860_v60 = vld [vmem:[%s5640_s11 + $0x168] sm:$0xff]  ;;  %599 = vrot.lane.b32.xlu0 %v5832_v52, %s5530_s12 }
  0x2f   : > { %9571 = vst [vmem:[#allocation16_spill] sm:$0xff] %v5806_v46  ;;  %357 = vst.msk [vmem:[#allocation2 + $0xb8] sm:$0xff] %vm333_vm0, %v5793_v43  ;;  %v5857_v59 = vld [vmem:[%s5640_s11 + $0x160] sm:$0xff]  ;;  %v5876_v3 = vld [vmem:[%s5640_s11 + $0x170] sm:$0xff]  ;;  %v5928_v26 = vsel %vm460_vm1, %v485_v62, %v487_v63  ;;  %v5946_v63 = vsel %vm460_vm1, %v483_v50, %v485_v62 }
  0x30   : > { %359 = vst.msk [vmem:[#allocation2 + $0xc8] sm:$0xff] %vm333_vm0, %v5796_v44  ;;  %9572 = vst [vmem:[#allocation17_spill] sm:$0xff] %v5818_v48  ;;  %v5879_v4 = vld [vmem:[%s5640_s11 + $0x188] sm:$0xff]  ;;  %v5889_v9 = vld [vmem:[%s5640_s11 + $0x190] sm:$0xff] }
  0x31   : > { %9573 = vst [vmem:[#allocation18_spill] sm:$0xff] %v5823_v51  ;;  %358 = vst.msk [vmem:[#allocation2 + $0xc0] sm:$0xff] %vm333_vm0, %v5806_v46  ;;  %v5892_v10 = vld [vmem:[%s5640_s11 + $0x180] sm:$0xff]  ;;  %v5902_v14 = vld [vmem:[%s5640_s11 + $0x1a8] sm:$0xff]  ;;  %605 = vrot.lane.b32.xlu1 %v5871_v61, %s5530_s12 }
  0x32   : > { %360 = vst.msk [vmem:[#allocation2 + $0xd0] sm:$0xff] %vm333_vm0, %v5803_v45  ;;  %361 = vst.msk [vmem:[#allocation2 + $0xd8] sm:$0xff] %vm333_vm0, %v5809_v47  ;;  %v5895_v11 = vld [vmem:[%s5640_s11 + $0x1a0] sm:$0xff]  ;;  %v5905_v18 = vld [vmem:[%s5640_s11 + $0x1b0] sm:$0xff]  ;;  %603 = vrot.lane.b32.xlu0 %v5886_v6, %s5530_s12 }
  0x33   : > { %9574 = vst [vmem:[#allocation19_spill] sm:$0xff] %v5832_v52  ;;  %9575 = vst [vmem:[#allocation20_spill] sm:$0xff] %v5836_v54  ;;  %v5916_v22 = vld [vmem:[%s5640_s11 + $0x1c8] sm:$0xff]  ;;  %v5919_v23 = vld [vmem:[%s5640_s11 + $0x1d0] sm:$0xff] }
  0x34   : > { %9576 = vst [vmem:[#allocation21_spill] sm:$0xff] %v5839_v55  ;;  %362 = vst.msk [vmem:[#allocation2 + $0xe0] sm:$0xff] %vm333_vm0, %v5823_v51  ;;  %v5933_v40 = vld [vmem:[%s5640_s11 + $0x1c0] sm:$0xff]  ;;  %v5939_v53 = vld [vmem:[%s5640_s11 + $0x1e8] sm:$0xff] }
  0x35   : > { %9577 = vst [vmem:[#allocation22_spill] sm:$0xff] %v5844_v56  ;;  %9578 = vst [vmem:[#allocation23_spill] sm:$0xff] %v5847_v57  ;;  %v5936_v49 = vld [vmem:[%s5640_s11 + $0x1e0] sm:$0xff]  ;;  %v5950_v48 = vld [vmem:[%s5640_s11 + $0x1f0] sm:$0xff]  ;;  %609 = vrot.lane.b32.xlu1 %v5928_v26, %s5530_s12 }
  0x36   : > { %9579 = vst [vmem:[#allocation24_spill] sm:$0xff] %v5850_v58  ;;  %363 = vst.msk [vmem:[#allocation2 + $0xe8] sm:$0xff] %vm333_vm0, %v5839_v55  ;;  %v5962_v33 = vld [vmem:[%s5640_s11 + $0x98] sm:$0x3]  ;;  %v5965_v50 = vld [vmem:[%s5640_s11 + $0x210] sm:$0xff]  ;;  %607 = vrot.lane.b32.xlu0 %v5946_v63, %s5530_s12 }
  0x37   : > { %9580 = vst [vmem:[#allocation25_spill] sm:$0xff] %v5857_v59  ;;  %9581 = vst [vmem:[#allocation26_spill] sm:$0xff] %v5860_v60  ;;  %v5968_v62 = vld [vmem:[%s5640_s11 + $0x200] sm:$0xff]  ;;  %v5980_v21 = vld [vmem:[%s5640_s11 + $0x228] sm:$0xff] }
  0x38   : > { %364 = vst.msk [vmem:[#allocation2 + $0xf0] sm:$0xff] %vm333_vm0, %v5850_v58  ;;  %365 = vst.msk [vmem:[#allocation2 + $0xf8] sm:$0xff] %vm333_vm0, %v5844_v56  ;;  %v5977_v52 = vld [vmem:[%s5640_s11 + $0x220] sm:$0xff]  ;;  %v5994_v27 = vld [vmem:[%s5640_s11 + $0xb8] sm:$0x3] }
  0x39   : > { %366 = vst.msk [vmem:[#allocation2 + $0x100] sm:$0xff] %vm333_vm0, %v5847_v57  ;;  %9582 = vst [vmem:[#allocation27_spill] sm:$0xff] %v5871_v61  ;;  %v489_v61 = vrot.slane %v5729_v28, 1  ;;  %v496_v28 = vrot.slane %v5736_v29, 1  ;;  %v5997_v25 = vld [vmem:[%s5640_s11 + $0x230] sm:$0xff]  ;;  %613 = vrot.lane.b32.xlu1 %v5989_v39, %s5530_s12  ;;  %v499_v29 = vrot.slane %v5748_v31, 1 }
  0x3a   : > { %9583 = vst [vmem:[#allocation28_spill] sm:$0xff] %v5876_v3  ;;  %9584 = vst [vmem:[#allocation29_spill] sm:$0xff] %v5879_v4  ;;  %v501_v24 = vrot.slane %v5994_v27, 1 }
  0x3b   : > { %367 = vst.msk [vmem:[#allocation2 + $0x108] sm:$0xff] %vm333_vm0, %v5857_v59  ;;  %368 = vst.msk [vmem:[#allocation2 + $0x110] sm:$0xff] %vm333_vm0, %v5860_v60  ;;  %v6004_v54 = vsel %vm460_vm1, %v489_v61, %v490_v34  ;;  %v806_v34 = vrot.slane %v5654_v5, 2  ;;  %v504_v5 = vrot.slane %v5751_v32, 1 }
  0x3c   : > { %9585 = vst [vmem:[#allocation30_spill] sm:$0xff] %v5886_v6  ;;  %9586 = vst [vmem:[#allocation31_spill] sm:$0xff] %v5889_v9  ;;  %v5953_v6 = vld [vmem:[%s5640_s11 + $0x208] sm:$0xff]  ;;  %611 = vrot.lane.b32.xlu0 %v6004_v54, %s5530_s12 }
  0x3d   : > { %9587 = vst [vmem:[#allocation32_spill] sm:$0xff] %v5892_v10  ;;  %9588 = vst [vmem:[#allocation33_spill] sm:$0xff] %v5895_v11 }
  0x3e   : > { %369 = vst.msk [vmem:[#allocation2 + $0x118] sm:$0xff] %vm333_vm0, %v5876_v3  ;;  %371 = vst.msk [vmem:[#allocation2 + $0x128] sm:$0xff] %vm333_vm0, %v5879_v4 }
  0x3f   : > { %9589 = vst [vmem:[#allocation34_spill] sm:$0xff] %v5902_v14  ;;  %9590 = vst [vmem:[#allocation35_spill] sm:$0xff] %v5905_v18 }
  0x40   : > { %370 = vst.msk [vmem:[#allocation2 + $0x120] sm:$0xff] %vm333_vm0, %v5892_v10  ;;  %372 = vst.msk [vmem:[#allocation2 + $0x130] sm:$0xff] %vm333_vm0, %v5889_v9 }
  0x41   : > { %373 = vst.msk [vmem:[#allocation2 + $0x138] sm:$0xff] %vm333_vm0, %v5895_v11  ;;  %9591 = vst [vmem:[#allocation36_spill] sm:$0xff] %v5916_v22 }
  0x42   : > { %9592 = vst [vmem:[#allocation37_spill] sm:$0xff] %v5919_v23  ;;  %374 = vst.msk [vmem:[#allocation2 + $0x140] sm:$0xff] %vm333_vm0, %v5902_v14 }
  0x43   : > { %375 = vst.msk [vmem:[#allocation2 + $0x148] sm:$0xff] %vm333_vm0, %v5905_v18  ;;  %9593 = vst [vmem:[#allocation38_spill] sm:$0xff] %v5928_v26  ;;  %v497_v26 = vrot.slane %v5739_v30, 1 }
  0x44   : > { %9594 = vst [vmem:[#allocation39_spill] sm:$0xff] %v5933_v40  ;;  %9595 = vst [vmem:[#allocation40_spill] sm:$0xff] %v5936_v49 }
  0x45   : > { %9596 = vst [vmem:[#allocation41_spill] sm:$0xff] %v5939_v53  ;;  %377 = vst.msk [vmem:[#allocation2 + $0x158] sm:$0xff] %vm333_vm0, %v5916_v22  ;;  %v6014_v30 = vsel %vm460_vm1, %v496_v28, %v497_v26  ;;  %v6029_v28 = vsel %vm460_vm1, %v499_v29, %v501_v24  ;;  %v6045_v24 = vld [vmem:[%s5640_s11 + $0xd8] sm:$0x3] }
  0x46   : > { %378 = vst.msk [vmem:[#allocation2 + $0x160] sm:$0xff] %vm333_vm0, %v5919_v23  ;;  %9597 = vst [vmem:[#allocation42_spill] sm:$0xff] %v5946_v63  ;;  %v494_v63 = vrot.slane %v5962_v33, 1  ;;  %617 = vrot.lane.b32.xlu1 %v6014_v30, %s5530_s12 }
  0x47   : > { %9598 = vst [vmem:[#allocation43_spill] sm:$0xff] %v5950_v48  ;;  %9599 = vst [vmem:[#allocation44_spill] sm:$0xff] %v5953_v6 }
  0x48   : > { %376 = vst.msk [vmem:[#allocation2 + $0x150] sm:$0xff] %vm333_vm0, %v5933_v40  ;;  %379 = vst.msk [vmem:[#allocation2 + $0x168] sm:$0xff] %vm333_vm0, %v5936_v49  ;;  %v6019_v61 = vsel %vm460_vm1, %v492_v35, %v494_v63  ;;  %v506_v35 = vrot.slane %v5764_v36, 1  ;;  %v503_v63 = vrot.slane %v5767_v37, 1 }
  0x49   : > { %380 = vst.msk [vmem:[#allocation2 + $0x170] sm:$0xff] %vm333_vm0, %v5939_v53  ;;  %9600 = vst [vmem:[#allocation45_spill] sm:$0xff] %v5965_v50  ;;  %615 = vrot.lane.b32.xlu0 %v6019_v61, %s5530_s12 }
  0x4a   : > { %9601 = vst [vmem:[#allocation46_spill] sm:$0xff] %v5968_v62  ;;  %381 = vst.msk [vmem:[#allocation2 + $0x178] sm:$0xff] %vm333_vm0, %v5950_v48  ;;  %621 = vrot.lane.b32.xlu1 %v6029_v28, %s5530_s12 }
  0x4b   : > { %383 = vst.msk [vmem:[#allocation2 + $0x188] sm:$0xff] %vm333_vm0, %v5953_v6  ;;  %9602 = vst [vmem:[#allocation47_spill] sm:$0xff] %v5977_v52 }
  0x4c   : > { %9603 = vst [vmem:[#allocation48_spill] sm:$0xff] %v5980_v21  ;;  %382 = vst.msk [vmem:[#allocation2 + $0x180] sm:$0xff] %vm333_vm0, %v5968_v62 }
  0x4d   : > { %384 = vst.msk [vmem:[#allocation2 + $0x190] sm:$0xff] %vm333_vm0, %v5965_v50  ;;  %9604 = vst [vmem:[#allocation49_spill] sm:$0xff] %v5989_v39  ;;  %v808_v39 = vrot.slane %v5643_v0, 2 }
  0x4e   : > { %9605 = vst [vmem:[#allocation50_spill] sm:$0xff] %v5994_v27  ;;  %9606 = vst [vmem:[#allocation51_spill] sm:$0xff] %v5997_v25  ;;  %v6032_v27 = vsel %vm460_vm1, %v497_v26, %v499_v29  ;;  %v6055_v26 = vsel %vm460_vm1, %v504_v5, %v506_v35 }
  0x4f   : > { %385 = vst.msk [vmem:[#allocation2 + $0x198] sm:$0xff] %vm333_vm0, %v5977_v52  ;;  %386 = vst.msk [vmem:[#allocation2 + $0x1a0] sm:$0xff] %vm333_vm0, %v5980_v21  ;;  %v6038_v0 = vsel %vm804_vm2, %v806_v34, %v808_v39  ;;  %619 = vrot.lane.b32.xlu0 %v6032_v27, %s5530_s12  ;;  %625 = vrot.lane.b32.xlu1 %v6055_v26, %s5530_s12 }
  0x50   : > { %9607 = vst [vmem:[#allocation52_spill] sm:$0xff] %v6004_v54  ;;  %387 = vst.msk [vmem:[#allocation2 + $0x1a8] sm:$0xff] %vm333_vm0, %v5997_v25  ;;  %v805_v54 = vrot.slane %v5649_v2, 2 }
  0x51   : > { %9608 = vst [vmem:[#allocation53_spill] sm:$0xff] %v6014_v30  ;;  %9609 = vst [vmem:[#allocation54_spill] sm:$0xff] %v6019_v61  ;;  %v810_v30 = vrot.slane %v5646_v1, 2  ;;  %v510_v61 = vrot.slane %v5770_v38, 1  ;;  %v6060_v1 = vsel %vm460_vm1, %v503_v63, %v504_v5 }
  0x52   : > { %9610 = vst [vmem:[#allocation55_spill] sm:$0xff] %v6029_v28  ;;  %9611 = vst [vmem:[#allocation56_spill] sm:$0xff] %v6032_v27  ;;  %v6041_v2 = vsel %vm804_vm2, %v805_v54, %v806_v34  ;;  %v511_v54 = vrot.slane %v5781_v41, 1  ;;  %v508_v34 = vrot.slane %v6045_v24, 1  ;;  %v6064_v28 = vld [vmem:[%s5640_s11 + $0xf8] sm:$0x3] }
  0x53   : > { %v6050_v29 = vsel %vm804_vm2, %v808_v39, %v810_v30  ;;  %9612 = vst [vmem:[#allocation57_spill] sm:$0xff] %v6055_v26  ;;  %9613 = vst [vmem:[#allocation58_spill] sm:$0xff] %v6060_v1  ;;  %623 = vrot.lane.b32.xlu0 %v6060_v1, %s5530_s12  ;;  %v513_v39 = vrot.slane %v5793_v43, 1  ;;  %v515_v27 = vrot.slane %v6064_v28, 1  ;;  %v520_v26 = vrot.slane %v5803_v45, 1 }
  0x54   : > { %v6071_v30 = vsel %vm460_vm1, %v510_v61, %v511_v54  ;;  %v6076_v5 = vsel %vm460_vm1, %v506_v35, %v508_v34  ;;  %v518_v61 = vrot.slane %v5796_v44, 1  ;;  %v517_v35 = vrot.slane %v5806_v46, 1  ;;  %v6092_v34 = vld [vmem:[%s5640_s11 + $0x118] sm:$0x3] }
  0x55   : > { %9614 = vst [vmem:[#allocation59_spill] sm:$0xff] %v6071_v30  ;;  %9615 = vst [vmem:[#allocation60_spill] sm:$0xff] %v6076_v5  ;;  %629 = vrot.lane.b32.xlu1 %v6071_v30, %s5530_s12  ;;  %v6083_v63 = vsel %vm460_vm1, %v513_v39, %v515_v27  ;;  %v6088_v1 = vsel %vm460_vm1, %v511_v54, %v513_v39  ;;  %v524_v30 = vrot.slane %v5809_v47, 1  ;;  %v522_v39 = vrot.slane %v6092_v34, 1  ;;  %v6108_v46 = vld [vmem:[%s5640_s11 + $0x138] sm:$0x3] }
  0x56   : > { %9616 = vst [vmem:[#allocation61_spill] sm:$0xff] %v6083_v63  ;;  %9617 = vst [vmem:[#allocation62_spill] sm:$0xff] %v6088_v1  ;;  %v6099_v27 = vsel %vm460_vm1, %v518_v61, %v520_v26  ;;  %v6104_v54 = vsel %vm460_vm1, %v517_v35, %v518_v61 }
  0x57   : > { %627 = vrot.lane.b32.xlu0 %v6076_v5, %s5530_s12  ;;  %9618 = vst [vmem:[#allocation63_spill] sm:$0xff] %v6099_v27  ;;  %v525_v5 = vrot.slane %v5823_v51, 1  ;;  %9619 = vst [vmem:[#allocation64_spill] sm:$0xff] %v6104_v54  ;;  %v529_v51 = vrot.slane %v6108_v46, 1  ;;  %v6120_v61 = vsel %vm460_vm1, %v520_v26, %v522_v39  ;;  %v531_v26 = vrot.slane %v5850_v58, 1 }
  0x58   : > { %9621 = vst [vmem:[#allocation66_spill] sm:$0xff] %v6120_v61  ;;  %v6136_v39 = vld [vmem:[%s5640_s11 + $0x158] sm:$0x3] }
  0x59   : > { %633 = vrot.lane.b32.xlu1 %v6083_v63, %s5530_s12  ;;  %v6115_v63 = vsel %vm460_vm1, %v524_v30, %v525_v5  ;;  %v532_v30 = vrot.slane %v5844_v56, 1  ;;  %v6152_v58 = vld [vmem:[%s5640_s11 + $0x178] sm:$0x3] }
  0x5a   : > { %9620 = vst [vmem:[#allocation65_spill] sm:$0xff] %v6115_v63 }
  0x5b   : > { %631 = vrot.lane.b32.xlu0 %v6088_v1, %s5530_s12  ;;  %v527_v1 = vrot.slane %v5839_v55, 1 }
  0x5d   : > { %637 = vrot.lane.b32.xlu1 %v6099_v27, %s5530_s12  ;;  %v6127_v35 = vsel %vm460_vm1, %v527_v1, %v529_v51  ;;  %v534_v27 = vrot.slane %v5847_v57, 1 }
  0x5e   : > { %9622 = vst [vmem:[#allocation67_spill] sm:$0xff] %v6127_v35 }
  0x5f   : > { %635 = vrot.lane.b32.xlu0 %v6104_v54, %s5530_s12  ;;  %v6132_v54 = vsel %vm460_vm1, %v525_v5, %v527_v1  ;;  %v6143_v51 = vsel %vm460_vm1, %v532_v30, %v534_v27  ;;  %v6148_v1 = vsel %vm460_vm1, %v531_v26, %v532_v30  ;;  %v536_v5 = vrot.slane %v6136_v39, 1 }
  0x60   : > { %9623 = vst [vmem:[#allocation68_spill] sm:$0xff] %v6132_v54  ;;  %9624 = vst [vmem:[#allocation69_spill] sm:$0xff] %v6143_v51 }
  0x61   : > { %641 = vrot.lane.b32.xlu1 %v6115_v63, %s5530_s12  ;;  %v538_v63 = vrot.slane %v5857_v59, 1  ;;  %9625 = vst [vmem:[#allocation70_spill] sm:$0xff] %v6148_v1  ;;  %v6164_v30 = vsel %vm460_vm1, %v534_v27, %v536_v5  ;;  %v545_v27 = vrot.slane %v5892_v10, 1  ;;  %v6180_v5 = vld [vmem:[%s5640_s11 + $0x198] sm:$0x3] }
  0x62   : > { %9627 = vst [vmem:[#allocation72_spill] sm:$0xff] %v6164_v30  ;;  %v6196_v10 = vld [vmem:[%s5640_s11 + $0x1b8] sm:$0x3] }
  0x63   : > { %639 = vrot.lane.b32.xlu0 %v6120_v61, %s5530_s12  ;;  %v539_v61 = vrot.slane %v5860_v60, 1  ;;  %v543_v60 = vrot.slane %v6152_v58, 1 }
  0x65   : > { %645 = vrot.lane.b32.xlu1 %v6127_v35, %s5530_s12  ;;  %v6159_v35 = vsel %vm460_vm1, %v538_v63, %v539_v61  ;;  %v546_v63 = vrot.slane %v5879_v4, 1 }
  0x66   : > { %9626 = vst [vmem:[#allocation71_spill] sm:$0xff] %v6159_v35 }
  0x67   : > { %643 = vrot.lane.b32.xlu0 %v6132_v54, %s5530_s12  ;;  %v541_v54 = vrot.slane %v5876_v3, 1 }
  0x69   : > { %649 = vrot.lane.b32.xlu1 %v6143_v51, %s5530_s12  ;;  %v6171_v26 = vsel %vm460_vm1, %v541_v54, %v543_v60  ;;  %v548_v51 = vrot.slane %v5889_v9, 1 }
  0x6a   : > { %9628 = vst [vmem:[#allocation73_spill] sm:$0xff] %v6171_v26 }
  0x6b   : > { %647 = vrot.lane.b32.xlu0 %v6148_v1, %s5530_s12  ;;  %v6176_v1 = vsel %vm460_vm1, %v539_v61, %v541_v54  ;;  %v6187_v60 = vsel %vm460_vm1, %v546_v63, %v548_v51  ;;  %v6192_v54 = vsel %vm460_vm1, %v545_v27, %v546_v63  ;;  %v550_v61 = vrot.slane %v6180_v5, 1 }
  0x6c   : > { %9629 = vst [vmem:[#allocation74_spill] sm:$0xff] %v6176_v1  ;;  %9630 = vst [vmem:[#allocation75_spill] sm:$0xff] %v6187_v60 }
  0x6d   : > { %653 = vrot.lane.b32.xlu1 %v6159_v35, %s5530_s12  ;;  %v552_v35 = vrot.slane %v5895_v11, 1  ;;  %9631 = vst [vmem:[#allocation76_spill] sm:$0xff] %v6192_v54  ;;  %v6208_v63 = vsel %vm460_vm1, %v548_v51, %v550_v61  ;;  %v559_v51 = vrot.slane %v5933_v40, 1  ;;  %v6224_v61 = vld [vmem:[%s5640_s11 + $0x1d8] sm:$0x3] }
  0x6e   : > { %9633 = vst [vmem:[#allocation78_spill] sm:$0xff] %v6208_v63  ;;  %v6240_v40 = vld [vmem:[%s5640_s11 + $0x1f8] sm:$0x3] }
  0x6f   : > { %651 = vrot.lane.b32.xlu0 %v6164_v30, %s5530_s12  ;;  %v553_v30 = vrot.slane %v5902_v14, 1  ;;  %v557_v14 = vrot.slane %v6196_v10, 1 }
  0x71   : > { %657 = vrot.lane.b32.xlu1 %v6171_v26, %s5530_s12  ;;  %v6203_v26 = vsel %vm460_vm1, %v552_v35, %v553_v30  ;;  %v560_v35 = vrot.slane %v5916_v22, 1 }
  0x72   : > { %9632 = vst [vmem:[#allocation77_spill] sm:$0xff] %v6203_v26 }
  0x73   : > { %655 = vrot.lane.b32.xlu0 %v6176_v1, %s5530_s12  ;;  %v555_v1 = vrot.slane %v5905_v18, 1 }
  0x75   : > { %661 = vrot.lane.b32.xlu1 %v6187_v60, %s5530_s12  ;;  %v6215_v27 = vsel %vm460_vm1, %v555_v1, %v557_v14  ;;  %v562_v60 = vrot.slane %v5919_v23, 1 }
  0x76   : > { %9634 = vst [vmem:[#allocation79_spill] sm:$0xff] %v6215_v27 }
  0x77   : > { %659 = vrot.lane.b32.xlu0 %v6192_v54, %s5530_s12  ;;  %v6220_v54 = vsel %vm460_vm1, %v553_v30, %v555_v1  ;;  %v6231_v14 = vsel %vm460_vm1, %v560_v35, %v562_v60  ;;  %v6236_v1 = vsel %vm460_vm1, %v559_v51, %v560_v35  ;;  %v564_v30 = vrot.slane %v6224_v61, 1 }
  0x78   : > { %9635 = vst [vmem:[#allocation80_spill] sm:$0xff] %v6220_v54  ;;  %9636 = vst [vmem:[#allocation81_spill] sm:$0xff] %v6231_v14 }
  0x79   : > { %665 = vrot.lane.b32.xlu1 %v6203_v26, %s5530_s12  ;;  %v566_v26 = vrot.slane %v5936_v49, 1  ;;  %9637 = vst [vmem:[#allocation82_spill] sm:$0xff] %v6236_v1  ;;  %v6252_v35 = vsel %vm460_vm1, %v562_v60, %v564_v30  ;;  %v573_v60 = vrot.slane %v5968_v62, 1  ;;  %v6268_v30 = vld [vmem:[%s5640_s11 + $0x218] sm:$0x3] }
  0x7a   : > { %9639 = vst [vmem:[#allocation84_spill] sm:$0xff] %v6252_v35  ;;  %v6284_v62 = vld [vmem:[%s5640_s11 + $0x238] sm:$0x3] }
  0x7b   : > { %663 = vrot.lane.b32.xlu0 %v6208_v63, %s5530_s12  ;;  %v567_v63 = vrot.slane %v5939_v53, 1  ;;  %v571_v53 = vrot.slane %v6240_v40, 1 }
  0x7d   : > { %669 = vrot.lane.b32.xlu1 %v6215_v27, %s5530_s12  ;;  %v6247_v27 = vsel %vm460_vm1, %v566_v26, %v567_v63  ;;  %v574_v26 = vrot.slane %v5953_v6, 1 }
  0x7e   : > { %9638 = vst [vmem:[#allocation83_spill] sm:$0xff] %v6247_v27 }
  0x7f   : > { %667 = vrot.lane.b32.xlu0 %v6220_v54, %s5530_s12  ;;  %v569_v54 = vrot.slane %v5950_v48, 1 }
  0x81   : > { %673 = vrot.lane.b32.xlu1 %v6231_v14, %s5530_s12  ;;  %v6259_v51 = vsel %vm460_vm1, %v569_v54, %v571_v53  ;;  %v576_v14 = vrot.slane %v5965_v50, 1 }
  0x82   : > { %9640 = vst [vmem:[#allocation85_spill] sm:$0xff] %v6259_v51 }
  0x83   : > { %671 = vrot.lane.b32.xlu0 %v6236_v1, %s5530_s12  ;;  %v6264_v1 = vsel %vm460_vm1, %v567_v63, %v569_v54  ;;  %v6275_v53 = vsel %vm460_vm1, %v574_v26, %v576_v14  ;;  %v6280_v54 = vsel %vm460_vm1, %v573_v60, %v574_v26  ;;  %v578_v63 = vrot.slane %v6268_v30, 1 }
  0x84   : > { %9641 = vst [vmem:[#allocation86_spill] sm:$0xff] %v6264_v1  ;;  %9642 = vst [vmem:[#allocation87_spill] sm:$0xff] %v6275_v53 }
  0x85   : > { %677 = vrot.lane.b32.xlu1 %v6247_v27, %s5530_s12  ;;  %v580_v27 = vrot.slane %v5977_v52, 1  ;;  %9643 = vst [vmem:[#allocation88_spill] sm:$0xff] %v6280_v54  ;;  %v6296_v26 = vsel %vm460_vm1, %v576_v14, %v578_v63  ;;  %v813_v14 = vrot.slane %v5661_v8, 2 }
  0x86   : > { %9645 = vst [vmem:[#allocation90_spill] sm:$0xff] %v6296_v26 }
  0x87   : > { %675 = vrot.lane.b32.xlu0 %v6252_v35, %s5530_s12  ;;  %v581_v35 = vrot.slane %v5980_v21, 1  ;;  %v585_v21 = vrot.slane %v6284_v62, 1 }
  0x89   : > { %681 = vrot.lane.b32.xlu1 %v6259_v51, %s5530_s12  ;;  %v6291_v51 = vsel %vm460_vm1, %v580_v27, %v581_v35  ;;  %v812_v27 = vrot.slane %v5658_v7, 2 }
  0x8a   : > { %9644 = vst [vmem:[#allocation89_spill] sm:$0xff] %v6291_v51 }
  0x8b   : > { %679 = vrot.lane.b32.xlu0 %v6264_v1, %s5530_s12  ;;  %v583_v1 = vrot.slane %v5997_v25, 1 }
  0x8d   : > { %685 = vrot.lane.b32.xlu1 %v6275_v53, %s5530_s12  ;;  %v6303_v60 = vsel %vm460_vm1, %v583_v1, %v585_v21  ;;  %v6306_v53 = vsel %vm460_vm1, %v581_v35, %v583_v1  ;;  %v6319_v21 = vsel %vm804_vm2, %v812_v27, %v813_v14  ;;  %v815_v1 = vrot.slane %v5671_v12, 2 }
  0x8e   : > { %9646 = vst [vmem:[#allocation91_spill] sm:$0xff] %v6303_v60  ;;  %9647 = vst [vmem:[#allocation92_spill] sm:$0xff] %v6306_v53  ;;  %v817_v35 = vrot.slane %v5674_v13, 2  ;;  %v819_v13 = vrot.slane %v5690_v17, 2 }
  0x8f   : > { %683 = vrot.lane.b32.xlu0 %v6280_v54, %s5530_s12  ;;  %9648 = vst [vmem:[#allocation93_spill] sm:$0xff] %v6319_v21 }
  0x90   : > { %v6328_v63 = vsel %vm804_vm2, %v815_v1, %v817_v35  ;;  %v826_v35 = vrot.slane %v5697_v19, 2 }
  0x91   : > { %689 = vrot.lane.b32.xlu1 %v6291_v51, %s5530_s12  ;;  %9649 = vst [vmem:[#allocation94_spill] sm:$0xff] %v6328_v63 }
  0x93   : > { %687 = vrot.lane.b32.xlu0 %v6296_v26, %s5530_s12  ;;  %v592_v27 = vpop.permute.xlu1 %591 }
  0x94   : > { %752 = vst.msk [vmem:[#allocation2 + $0x10] sm:$0xff] %vm749_vm3, %v592_v27  ;;  %v824_v27 = vrot.slane %v5790_v42, 2 }
  0x95   : > { %693 = vrot.lane.b32.xlu1 %v6303_v60, %s5530_s12  ;;  %v6333_v60 = vsel %vm804_vm2, %v813_v14, %v815_v1  ;;  %v827_v14 = vrot.slane %v5700_v20, 2 }
  0x96   : > { %9650 = vst [vmem:[#allocation95_spill] sm:$0xff] %v6333_v60 }
  0x97   : > { %691 = vrot.lane.b32.xlu0 %v6306_v53, %s5530_s12  ;;  %v594_v1 = vpop.permute.xlu1 %593 }
  0x98   : > { %753 = vst.msk [vmem:[#allocation2 + $0x18] sm:$0xff] %vm749_vm3, %v594_v1 }
  0x99   : > { %933 = vrot.lane.b32.xlu1 %v6038_v0, %s5531_s13  ;;  %v820_v0 = vrot.slane %v5684_v15, 2 }
  0x9b   : > { %931 = vrot.lane.b32.xlu0 %v6041_v2, %s5531_s13  ;;  %v822_v2 = vrot.slane %v5687_v16, 2  ;;  %v6348_v51 = vsel %vm804_vm2, %v819_v13, %v820_v0  ;;  %v598_v26 = vpop.permute.xlu1 %597 }
  0x9c   : > { %9652 = vst [vmem:[#allocation97_spill] sm:$0xff] %v6348_v51  ;;  %755 = vst.msk [vmem:[#allocation2 + $0x28] sm:$0xff] %vm749_vm3, %v598_v26  ;;  %v9661_v26 = vld [vmem:[#allocation11_spill] sm:$0xff] }
  0x9d   : > { %937 = vrot.lane.b32.xlu1 %v6319_v21, %s5531_s13  ;;  %v588_v21 = vpop.permute.xlu0 %587  ;;  %v6363_v42 = vsel %vm804_vm2, %v822_v2, %v824_v27  ;;  %v833_v54 = vrot.slane %v9661_v26, 2 }
  0x9e   : > { %750 = vst.msk [vmem:[#allocation2] sm:$0xff] %vm749_vm3, %v588_v21 }
  0x9f   : > { %935 = vrot.lane.b32.xlu0 %v6050_v29, %s5531_s13  ;;  %v6343_v29 = vsel %vm804_vm2, %v820_v0, %v822_v2  ;;  %v9655_v0 = vld [vmem:[#allocation20_spill] sm:$0xff]  ;;  %v602_v2 = vpop.permute.xlu1 %601 }
  0xa0   : > { %9651 = vst [vmem:[#allocation96_spill] sm:$0xff] %v6343_v29  ;;  %v831_v13 = vrot.slane %v9655_v0, 2  ;;  %757 = vst.msk [vmem:[#allocation2 + $0x38] sm:$0xff] %vm749_vm3, %v602_v2  ;;  %v838_v2 = vrot.slane %v5962_v33, 2 }
  0xa1   : > { %941 = vrot.lane.b32.xlu1 %v6328_v63, %s5531_s13  ;;  %v590_v21 = vpop.permute.xlu0 %589  ;;  %v6358_v63 = vsel %vm804_vm2, %v826_v35, %v827_v14 }
  0xa2   : > { %751 = vst.msk [vmem:[#allocation2 + $0x8] sm:$0xff] %vm749_vm3, %v590_v21  ;;  %9653 = vst [vmem:[#allocation98_spill] sm:$0xff] %v6358_v63  ;;  %v9658_v21 = vld [vmem:[#allocation9_spill] sm:$0xff] }
  0xa3   : > { %939 = vrot.lane.b32.xlu0 %v6333_v60, %s5531_s13  ;;  %v9654_v60 = vld [vmem:[#allocation8_spill] sm:$0xff]  ;;  %v834_v0 = vrot.slane %v9658_v21, 2  ;;  %v606_v21 = vpop.permute.xlu1 %605 }
  0xa4   : > { %v829_v53 = vrot.slane %v9654_v60, 2  ;;  %9656 = vst [vmem:[#allocation8_spill] sm:$0xff] %v6363_v42  ;;  %759 = vst.msk [vmem:[#allocation2 + $0x48] sm:$0xff] %vm749_vm3, %v606_v21 }
  0xa5   : > { %945 = vrot.lane.b32.xlu1 %v6343_v29, %s5531_s13  ;;  %v596_v1 = vpop.permute.xlu0 %595  ;;  %v9659_v29 = vld [vmem:[#allocation10_spill] sm:$0xff] }
  0xa6   : > { %754 = vst.msk [vmem:[#allocation2 + $0x20] sm:$0xff] %vm749_vm3, %v596_v1  ;;  %v6372_v35 = vsel %vm804_vm2, %v829_v53, %v831_v13  ;;  %v6377_v27 = vsel %vm804_vm2, %v827_v14, %v829_v53  ;;  %v9664_v53 = vld [vmem:[#allocation13_spill] sm:$0xff] }
  0xa7   : > { %943 = vrot.lane.b32.xlu0 %v6348_v51, %s5531_s13  ;;  %9657 = vst [vmem:[#allocation20_spill] sm:$0xff] %v6372_v35  ;;  %v836_v51 = vrot.slane %v9659_v29, 2  ;;  %9660 = vst [vmem:[#allocation99_spill] sm:$0xff] %v6377_v27  ;;  %v841_v14 = vrot.slane %v9664_v53, 2  ;;  %v6392_v29 = vsel %vm804_vm2, %v833_v54, %v834_v0  ;;  %v9666_v54 = vld [vmem:[#allocation50_spill] sm:$0xff] }
  0xa9   : > { %949 = vrot.lane.b32.xlu1 %v6358_v63, %s5531_s13  ;;  %v600_v1 = vpop.permute.xlu0 %599  ;;  %v6387_v13 = vsel %vm804_vm2, %v834_v0, %v836_v51  ;;  %v9663_v63 = vld [vmem:[#allocation12_spill] sm:$0xff]  ;;  %v845_v0 = vrot.slane %v9666_v54, 2  ;;  %v6407_v33 = vsel %vm804_vm2, %v836_v51, %v838_v2  ;;  %v850_v54 = vrot.slane %v5764_v36, 2 }
  0xaa   : > { %756 = vst.msk [vmem:[#allocation2 + $0x30] sm:$0xff] %vm749_vm3, %v600_v1  ;;  %9662 = vst [vmem:[#allocation11_spill] sm:$0xff] %v6387_v13 }
  0xab   : > { %947 = vrot.lane.b32.xlu0 %v6363_v42, %s5531_s13  ;;  %v840_v42 = vrot.slane %v9663_v63, 2  ;;  %v610_v63 = vpop.permute.xlu1 %609 }
  0xac   : > { %761 = vst.msk [vmem:[#allocation2 + $0x58] sm:$0xff] %vm749_vm3, %v610_v63  ;;  %v847_v63 = vrot.slane %v5767_v37, 2 }
  0xad   : > { %953 = vrot.lane.b32.xlu1 %v6372_v35, %s5531_s13  ;;  %v604_v1 = vpop.permute.xlu0 %603  ;;  %v6402_v35 = vsel %vm804_vm2, %v840_v42, %v841_v14 }
  0xae   : > { %758 = vst.msk [vmem:[#allocation2 + $0x40] sm:$0xff] %vm749_vm3, %v604_v1  ;;  %9665 = vst [vmem:[#allocation13_spill] sm:$0xff] %v6402_v35  ;;  %v848_v1 = vrot.slane %v5751_v32, 2 }
  0xaf   : > { %951 = vrot.lane.b32.xlu0 %v6377_v27, %s5531_s13  ;;  %v843_v27 = vrot.slane %v5748_v31, 2  ;;  %v614_v51 = vpop.permute.xlu1 %613 }
  0xb0   : > { %763 = vst.msk [vmem:[#allocation2 + $0x68] sm:$0xff] %vm749_vm3, %v614_v51  ;;  %v852_v51 = vrot.slane %v6045_v24, 2 }
  0xb1   : > { %957 = vrot.lane.b32.xlu1 %v6387_v13, %s5531_s13  ;;  %v608_v21 = vpop.permute.xlu0 %607  ;;  %v6416_v42 = vsel %vm804_vm2, %v843_v27, %v845_v0  ;;  %v6421_v2 = vsel %vm804_vm2, %v841_v14, %v843_v27  ;;  %v6431_v0 = vsel %vm804_vm2, %v848_v1, %v850_v54  ;;  %v855_v27 = vrot.slane %v5781_v41, 2 }
  0xb2   : > { %760 = vst.msk [vmem:[#allocation2 + $0x50] sm:$0xff] %vm749_vm3, %v608_v21  ;;  %9667 = vst [vmem:[#allocation50_spill] sm:$0xff] %v6416_v42  ;;  %v6436_v13 = vsel %vm804_vm2, %v847_v63, %v848_v1  ;;  %v859_v1 = vrot.slane %v6064_v28, 2  ;;  %v6451_v24 = vsel %vm804_vm2, %v850_v54, %v852_v51  ;;  %v862_v28 = vrot.slane %v5796_v44, 2 }
  0xb3   : > { %955 = vrot.lane.b32.xlu0 %v6392_v29, %s5531_s13  ;;  %9668 = vst [vmem:[#allocation100_spill] sm:$0xff] %v6421_v2  ;;  %9669 = vst [vmem:[#allocation101_spill] sm:$0xff] %v6431_v0 }
  0xb4   : > { %9670 = vst [vmem:[#allocation102_spill] sm:$0xff] %v6436_v13  ;;  %9672 = vst [vmem:[#allocation104_spill] sm:$0xff] %v6451_v24 }
  0xb5   : > { %961 = vrot.lane.b32.xlu1 %v6402_v35, %s5531_s13  ;;  %v612_v21 = vpop.permute.xlu0 %611  ;;  %v854_v35 = vrot.slane %v5770_v38, 2 }
  0xb6   : > { %762 = vst.msk [vmem:[#allocation2 + $0x60] sm:$0xff] %vm749_vm3, %v612_v21 }
  0xb7   : > { %959 = vrot.lane.b32.xlu0 %v6407_v33, %s5531_s13 }
  0xb8   : > { %v618_v14 = vpop.permute.xlu1 %617 }
  0xb9   : > { %965 = vrot.lane.b32.xlu1 %v6416_v42, %s5531_s13  ;;  %765 = vst.msk [vmem:[#allocation2 + $0x78] sm:$0xff] %vm749_vm3, %v618_v14  ;;  %v6446_v42 = vsel %vm804_vm2, %v854_v35, %v855_v27 }
  0xba   : > { %9671 = vst [vmem:[#allocation103_spill] sm:$0xff] %v6446_v42 }
  0xbb   : > { %963 = vrot.lane.b32.xlu0 %v6421_v2, %s5531_s13  ;;  %v616_v21 = vpop.permute.xlu0 %615  ;;  %v857_v2 = vrot.slane %v5793_v43, 2 }
  0xbc   : > { %764 = vst.msk [vmem:[#allocation2 + $0x70] sm:$0xff] %vm749_vm3, %v616_v21  ;;  %v622_v63 = vpop.permute.xlu1 %621  ;;  %v864_v21 = vrot.slane %v5803_v45, 2 }
  0xbd   : > { %969 = vrot.lane.b32.xlu1 %v6431_v0, %s5531_s13  ;;  %767 = vst.msk [vmem:[#allocation2 + $0x88] sm:$0xff] %vm749_vm3, %v622_v63  ;;  %v6460_v35 = vsel %vm804_vm2, %v857_v2, %v859_v1  ;;  %v6465_v51 = vsel %vm804_vm2, %v855_v27, %v857_v2  ;;  %v9675_v63 = vld [vmem:[#allocation16_spill] sm:$0xff]  ;;  %v9677_v2 = vld [vmem:[#allocation18_spill] sm:$0xff] }
  0xbe   : > { %9673 = vst [vmem:[#allocation105_spill] sm:$0xff] %v6460_v35  ;;  %9674 = vst [vmem:[#allocation106_spill] sm:$0xff] %v6465_v51  ;;  %v861_v0 = vrot.slane %v9675_v63, 2  ;;  %v6475_v1 = vsel %vm804_vm2, %v862_v28, %v864_v21  ;;  %v869_v27 = vrot.slane %v9677_v2, 2 }
  0xbf   : > { %967 = vrot.lane.b32.xlu0 %v6436_v13, %s5531_s13  ;;  %9676 = vst [vmem:[#allocation16_spill] sm:$0xff] %v6475_v1 }
  0xc0   : > { %v6480_v13 = vsel %vm804_vm2, %v861_v0, %v862_v28  ;;  %v873_v0 = vrot.slane %v6108_v46, 2  ;;  %v876_v46 = vrot.slane %v5844_v56, 2 }
  0xc1   : > { %v620_v14 = vpop.permute.xlu0 %619  ;;  %973 = vrot.lane.b32.xlu1 %v6446_v42, %s5531_s13  ;;  %v626_v54 = vpop.permute.xlu1 %625  ;;  %v868_v42 = vrot.slane %v5809_v47, 2  ;;  %9678 = vst [vmem:[#allocation18_spill] sm:$0xff] %v6480_v13 }
  0xc2   : > { %766 = vst.msk [vmem:[#allocation2 + $0x80] sm:$0xff] %vm749_vm3, %v620_v14  ;;  %769 = vst.msk [vmem:[#allocation2 + $0x98] sm:$0xff] %vm749_vm3, %v626_v54  ;;  %v866_v54 = vrot.slane %v6092_v34, 2 }
  0xc3   : > { %971 = vrot.lane.b32.xlu0 %v6451_v24, %s5531_s13 }
  0xc4   : > { %v6495_v34 = vsel %vm804_vm2, %v864_v21, %v866_v54 }
  0xc5   : > { %v624_v14 = vpop.permute.xlu0 %623  ;;  %977 = vrot.lane.b32.xlu1 %v6460_v35, %s5531_s13  ;;  %v6490_v35 = vsel %vm804_vm2, %v868_v42, %v869_v27  ;;  %9680 = vst [vmem:[#allocation108_spill] sm:$0xff] %v6495_v34 }
  0xc6   : > { %768 = vst.msk [vmem:[#allocation2 + $0x90] sm:$0xff] %vm749_vm3, %v624_v14  ;;  %9679 = vst [vmem:[#allocation107_spill] sm:$0xff] %v6490_v35 }
  0xc7   : > { %975 = vrot.lane.b32.xlu0 %v6465_v51, %s5531_s13  ;;  %v630_v24 = vpop.permute.xlu1 %629  ;;  %v871_v51 = vrot.slane %v5839_v55, 2 }
  0xc8   : > { %771 = vst.msk [vmem:[#allocation2 + $0xa8] sm:$0xff] %vm749_vm3, %v630_v24 }
  0xc9   : > { %v628_v14 = vpop.permute.xlu0 %627  ;;  %981 = vrot.lane.b32.xlu1 %v6475_v1, %s5531_s13  ;;  %v6504_v42 = vsel %vm804_vm2, %v871_v51, %v873_v0  ;;  %v6509_v54 = vsel %vm804_vm2, %v869_v27, %v871_v51  ;;  %v9685_v51 = vld [vmem:[#allocation26_spill] sm:$0xff] }
  0xca   : > { %770 = vst.msk [vmem:[#allocation2 + $0xa0] sm:$0xff] %vm749_vm3, %v628_v14  ;;  %9681 = vst [vmem:[#allocation109_spill] sm:$0xff] %v6504_v42  ;;  %v878_v14 = vrot.slane %v5847_v57, 2  ;;  %v883_v27 = vrot.slane %v9685_v51, 2 }
  0xcb   : > { %979 = vrot.lane.b32.xlu0 %v6480_v13, %s5531_s13  ;;  %v634_v28 = vpop.permute.xlu1 %633  ;;  %9682 = vst [vmem:[#allocation110_spill] sm:$0xff] %v6509_v54 }
  0xcc   : > { %773 = vst.msk [vmem:[#allocation2 + $0xb8] sm:$0xff] %vm749_vm3, %v634_v28  ;;  %v9683_v28 = vld [vmem:[#allocation24_spill] sm:$0xff]  ;;  %v6519_v0 = vsel %vm804_vm2, %v876_v46, %v878_v14 }
  0xcd   : > { %v632_v24 = vpop.permute.xlu0 %631  ;;  %985 = vrot.lane.b32.xlu1 %v6490_v35, %s5531_s13  ;;  %v875_v1 = vrot.slane %v9683_v28, 2  ;;  %9684 = vst [vmem:[#allocation111_spill] sm:$0xff] %v6519_v0  ;;  %v882_v35 = vrot.slane %v5857_v59, 2 }
  0xce   : > { %772 = vst.msk [vmem:[#allocation2 + $0xb0] sm:$0xff] %vm749_vm3, %v632_v24 }
  0xcf   : > { %983 = vrot.lane.b32.xlu0 %v6495_v34, %s5531_s13  ;;  %v638_v21 = vpop.permute.xlu1 %637  ;;  %v6524_v13 = vsel %vm804_vm2, %v875_v1, %v876_v46  ;;  %v887_v1 = vrot.slane %v6152_v58, 2  ;;  %v890_v58 = vrot.slane %v5879_v4, 2 }
  0xd0   : > { %775 = vst.msk [vmem:[#allocation2 + $0xc8] sm:$0xff] %vm749_vm3, %v638_v21  ;;  %9686 = vst [vmem:[#allocation112_spill] sm:$0xff] %v6524_v13  ;;  %v880_v21 = vrot.slane %v6136_v39, 2 }
  0xd1   : > { %v636_v24 = vpop.permute.xlu0 %635  ;;  %989 = vrot.lane.b32.xlu1 %v6504_v42, %s5531_s13  ;;  %v6534_v42 = vsel %vm804_vm2, %v882_v35, %v883_v27 }
  0xd2   : > { %774 = vst.msk [vmem:[#allocation2 + $0xc0] sm:$0xff] %vm749_vm3, %v636_v24  ;;  %9687 = vst [vmem:[#allocation113_spill] sm:$0xff] %v6534_v42  ;;  %v6539_v39 = vsel %vm804_vm2, %v878_v14, %v880_v21 }
  0xd3   : > { %987 = vrot.lane.b32.xlu0 %v6509_v54, %s5531_s13  ;;  %v642_v34 = vpop.permute.xlu1 %641  ;;  %v885_v54 = vrot.slane %v5876_v3, 2  ;;  %9688 = vst [vmem:[#allocation114_spill] sm:$0xff] %v6539_v39 }
  0xd4   : > { %777 = vst.msk [vmem:[#allocation2 + $0xd8] sm:$0xff] %vm749_vm3, %v642_v34 }
  0xd5   : > { %v640_v24 = vpop.permute.xlu0 %639  ;;  %993 = vrot.lane.b32.xlu1 %v6519_v0, %s5531_s13  ;;  %v6548_v35 = vsel %vm804_vm2, %v885_v54, %v887_v1  ;;  %v6553_v21 = vsel %vm804_vm2, %v883_v27, %v885_v54  ;;  %v9693_v54 = vld [vmem:[#allocation34_spill] sm:$0xff] }
  0xd6   : > { %776 = vst.msk [vmem:[#allocation2 + $0xd0] sm:$0xff] %vm749_vm3, %v640_v24  ;;  %9689 = vst [vmem:[#allocation115_spill] sm:$0xff] %v6548_v35  ;;  %v892_v24 = vrot.slane %v5889_v9, 2  ;;  %v897_v27 = vrot.slane %v9693_v54, 2 }
  0xd7   : > { %991 = vrot.lane.b32.xlu0 %v6524_v13, %s5531_s13  ;;  %v646_v46 = vpop.permute.xlu1 %645  ;;  %9690 = vst [vmem:[#allocation116_spill] sm:$0xff] %v6553_v21 }
  0xd8   : > { %779 = vst.msk [vmem:[#allocation2 + $0xe8] sm:$0xff] %vm749_vm3, %v646_v46  ;;  %v9691_v46 = vld [vmem:[#allocation32_spill] sm:$0xff]  ;;  %v6563_v1 = vsel %vm804_vm2, %v890_v58, %v892_v24 }
  0xd9   : > { %v644_v34 = vpop.permute.xlu0 %643  ;;  %997 = vrot.lane.b32.xlu1 %v6534_v42, %s5531_s13  ;;  %v889_v0 = vrot.slane %v9691_v46, 2  ;;  %9692 = vst [vmem:[#allocation117_spill] sm:$0xff] %v6563_v1  ;;  %v896_v42 = vrot.slane %v5895_v11, 2 }
  0xda   : > { %778 = vst.msk [vmem:[#allocation2 + $0xe0] sm:$0xff] %vm749_vm3, %v644_v34 }
  0xdb   : > { %995 = vrot.lane.b32.xlu0 %v6539_v39, %s5531_s13  ;;  %v650_v14 = vpop.permute.xlu1 %649  ;;  %v6568_v13 = vsel %vm804_vm2, %v889_v0, %v890_v58  ;;  %v901_v0 = vrot.slane %v6196_v10, 2  ;;  %v904_v10 = vrot.slane %v5916_v22, 2 }
  0xdc   : > { %781 = vst.msk [vmem:[#allocation2 + $0xf8] sm:$0xff] %vm749_vm3, %v650_v14  ;;  %9694 = vst [vmem:[#allocation118_spill] sm:$0xff] %v6568_v13  ;;  %v894_v14 = vrot.slane %v6180_v5, 2 }
  0xdd   : > { %v648_v34 = vpop.permute.xlu0 %647  ;;  %1001 = vrot.lane.b32.xlu1 %v6548_v35, %s5531_s13  ;;  %v6578_v35 = vsel %vm804_vm2, %v896_v42, %v897_v27 }
  0xde   : > { %780 = vst.msk [vmem:[#allocation2 + $0xf0] sm:$0xff] %vm749_vm3, %v648_v34  ;;  %9695 = vst [vmem:[#allocation119_spill] sm:$0xff] %v6578_v35  ;;  %v6583_v5 = vsel %vm804_vm2, %v892_v24, %v894_v14 }
  0xdf   : > { %999 = vrot.lane.b32.xlu0 %v6553_v21, %s5531_s13  ;;  %v654_v39 = vpop.permute.xlu1 %653  ;;  %v899_v21 = vrot.slane %v5905_v18, 2  ;;  %9696 = vst [vmem:[#allocation120_spill] sm:$0xff] %v6583_v5 }
  0xe0   : > { %783 = vst.msk [vmem:[#allocation2 + $0x108] sm:$0xff] %vm749_vm3, %v654_v39 }
  0xe1   : > { %v652_v34 = vpop.permute.xlu0 %651  ;;  %1005 = vrot.lane.b32.xlu1 %v6563_v1, %s5531_s13  ;;  %v6592_v42 = vsel %vm804_vm2, %v899_v21, %v901_v0  ;;  %v6597_v14 = vsel %vm804_vm2, %v897_v27, %v899_v21  ;;  %v9701_v21 = vld [vmem:[#allocation41_spill] sm:$0xff] }
  0xe2   : > { %782 = vst.msk [vmem:[#allocation2 + $0x100] sm:$0xff] %vm749_vm3, %v652_v34  ;;  %9697 = vst [vmem:[#allocation121_spill] sm:$0xff] %v6592_v42  ;;  %v906_v34 = vrot.slane %v5919_v23, 2  ;;  %v911_v27 = vrot.slane %v9701_v21, 2 }
  0xe3   : > { %1003 = vrot.lane.b32.xlu0 %v6568_v13, %s5531_s13  ;;  %v658_v58 = vpop.permute.xlu1 %657  ;;  %9698 = vst [vmem:[#allocation122_spill] sm:$0xff] %v6597_v14 }
  0xe4   : > { %785 = vst.msk [vmem:[#allocation2 + $0x118] sm:$0xff] %vm749_vm3, %v658_v58  ;;  %v9699_v58 = vld [vmem:[#allocation39_spill] sm:$0xff]  ;;  %v6607_v0 = vsel %vm804_vm2, %v904_v10, %v906_v34 }
  0xe5   : > { %v656_v39 = vpop.permute.xlu0 %655  ;;  %1009 = vrot.lane.b32.xlu1 %v6578_v35, %s5531_s13  ;;  %v903_v1 = vrot.slane %v9699_v58, 2  ;;  %9700 = vst [vmem:[#allocation123_spill] sm:$0xff] %v6607_v0  ;;  %v910_v35 = vrot.slane %v5936_v49, 2 }
  0xe6   : > { %784 = vst.msk [vmem:[#allocation2 + $0x110] sm:$0xff] %vm749_vm3, %v656_v39 }
  0xe7   : > { %1007 = vrot.lane.b32.xlu0 %v6583_v5, %s5531_s13  ;;  %v662_v24 = vpop.permute.xlu1 %661  ;;  %v6612_v13 = vsel %vm804_vm2, %v903_v1, %v904_v10  ;;  %v915_v1 = vrot.slane %v6240_v40, 2  ;;  %v918_v40 = vrot.slane %v5953_v6, 2 }
  0xe8   : > { %787 = vst.msk [vmem:[#allocation2 + $0x128] sm:$0xff] %vm749_vm3, %v662_v24  ;;  %9702 = vst [vmem:[#allocation124_spill] sm:$0xff] %v6612_v13  ;;  %v908_v24 = vrot.slane %v6224_v61, 2 }
  0xe9   : > { %v660_v39 = vpop.permute.xlu0 %659  ;;  %1013 = vrot.lane.b32.xlu1 %v6592_v42, %s5531_s13  ;;  %v6622_v42 = vsel %vm804_vm2, %v910_v35, %v911_v27 }
  0xea   : > { %786 = vst.msk [vmem:[#allocation2 + $0x120] sm:$0xff] %vm749_vm3, %v660_v39  ;;  %9703 = vst [vmem:[#allocation125_spill] sm:$0xff] %v6622_v42  ;;  %v6627_v61 = vsel %vm804_vm2, %v906_v34, %v908_v24 }
  0xeb   : > { %1011 = vrot.lane.b32.xlu0 %v6597_v14, %s5531_s13  ;;  %v666_v5 = vpop.permute.xlu1 %665  ;;  %v913_v14 = vrot.slane %v5950_v48, 2  ;;  %9704 = vst [vmem:[#allocation126_spill] sm:$0xff] %v6627_v61 }
  0xec   : > { %789 = vst.msk [vmem:[#allocation2 + $0x138] sm:$0xff] %vm749_vm3, %v666_v5 }
  0xed   : > { %v664_v39 = vpop.permute.xlu0 %663  ;;  %1017 = vrot.lane.b32.xlu1 %v6607_v0, %s5531_s13  ;;  %v6636_v35 = vsel %vm804_vm2, %v913_v14, %v915_v1  ;;  %v6641_v24 = vsel %vm804_vm2, %v911_v27, %v913_v14  ;;  %v9708_v14 = vld [vmem:[#allocation48_spill] sm:$0xff] }
  0xee   : > { %788 = vst.msk [vmem:[#allocation2 + $0x130] sm:$0xff] %vm749_vm3, %v664_v39  ;;  %9705 = vst [vmem:[#allocation127_spill] sm:$0xff] %v6636_v35  ;;  %v920_v39 = vrot.slane %v5965_v50, 2  ;;  %v925_v27 = vrot.slane %v9708_v14, 2 }
  0xef   : > { %1015 = vrot.lane.b32.xlu0 %v6612_v13, %s5531_s13  ;;  %v670_v10 = vpop.permute.xlu1 %669  ;;  %9706 = vst [vmem:[#allocation128_spill] sm:$0xff] %v6641_v24 }
  0xf0   : > { %791 = vst.msk [vmem:[#allocation2 + $0x148] sm:$0xff] %vm749_vm3, %v670_v10  ;;  %v9707_v10 = vld [vmem:[#allocation46_spill] sm:$0xff]  ;;  %v6651_v1 = vsel %vm804_vm2, %v918_v40, %v920_v39 }
  0xf1   : > { %v668_v5 = vpop.permute.xlu0 %667  ;;  %1021 = vrot.lane.b32.xlu1 %v6622_v42, %s5531_s13  ;;  %v917_v0 = vrot.slane %v9707_v10, 2  ;;  %v924_v42 = vrot.slane %v5977_v52, 2 }
  0xf2   : > { %790 = vst.msk [vmem:[#allocation2 + $0x140] sm:$0xff] %vm749_vm3, %v668_v5 }
  0xf3   : > { %1019 = vrot.lane.b32.xlu0 %v6627_v61, %s5531_s13  ;;  %v674_v34 = vpop.permute.xlu1 %673  ;;  %v6656_v13 = vsel %vm804_vm2, %v917_v0, %v918_v40  ;;  %v929_v0 = vrot.slane %v6284_v62, 2 }
  0xf4   : > { %793 = vst.msk [vmem:[#allocation2 + $0x158] sm:$0xff] %vm749_vm3, %v674_v34  ;;  %9709 = vst [vmem:[#allocation129_spill] sm:$0xff] %v6656_v13  ;;  %v922_v34 = vrot.slane %v6268_v30, 2 }
  0xf5   : > { %v672_v5 = vpop.permute.xlu0 %671  ;;  %1025 = vrot.lane.b32.xlu1 %v6636_v35, %s5531_s13  ;;  %v6666_v35 = vsel %vm804_vm2, %v924_v42, %v925_v27 }
  0xf6   : > { %792 = vst.msk [vmem:[#allocation2 + $0x150] sm:$0xff] %vm749_vm3, %v672_v5  ;;  %v6671_v30 = vsel %vm804_vm2, %v920_v39, %v922_v34 }
  0xf7   : > { %1023 = vrot.lane.b32.xlu0 %v6641_v24, %s5531_s13  ;;  %v678_v61 = vpop.permute.xlu1 %677  ;;  %v927_v24 = vrot.slane %v5997_v25, 2 }
  0xf8   : > { %795 = vst.msk [vmem:[#allocation2 + $0x168] sm:$0xff] %vm749_vm3, %v678_v61 }
  0xf9   : > { %v676_v5 = vpop.permute.xlu0 %675  ;;  %1029 = vrot.lane.b32.xlu1 %v6651_v1, %s5531_s13  ;;  %v6680_v42 = vsel %vm804_vm2, %v927_v24, %v929_v0  ;;  %v6683_v62 = vsel %vm804_vm2, %v925_v27, %v927_v24 }
  0xfa   : > { %794 = vst.msk [vmem:[#allocation2 + $0x160] sm:$0xff] %vm749_vm3, %v676_v5 }
  0xfb   : > { %1027 = vrot.lane.b32.xlu0 %v6656_v13, %s5531_s13  ;;  %v682_v40 = vpop.permute.xlu1 %681 }
  0xfc   : > { %797 = vst.msk [vmem:[#allocation2 + $0x178] sm:$0xff] %vm749_vm3, %v682_v40 }
  0xfd   : > { %v680_v61 = vpop.permute.xlu0 %679  ;;  %1033 = vrot.lane.b32.xlu1 %v6666_v35, %s5531_s13 }
  0xfe   : > { %796 = vst.msk [vmem:[#allocation2 + $0x170] sm:$0xff] %vm749_vm3, %v680_v61 }
  0xff   : > { %1031 = vrot.lane.b32.xlu0 %v6671_v30, %s5531_s13  ;;  %v686_v5 = vpop.permute.xlu1 %685 }
 0x100   : > { %799 = vst.msk [vmem:[#allocation2 + $0x188] sm:$0xff] %vm749_vm3, %v686_v5 }
 0x101   : > { %v684_v39 = vpop.permute.xlu0 %683  ;;  %1037 = vrot.lane.b32.xlu1 %v6680_v42, %s5531_s13 }
 0x102   : > { %798 = vst.msk [vmem:[#allocation2 + $0x180] sm:$0xff] %vm749_vm3, %v684_v39 }
 0x103   : > { %1035 = vrot.lane.b32.xlu0 %v6683_v62, %s5531_s13  ;;  %v690_v34 = vpop.permute.xlu1 %689  ;;  %s5545_s13 = smov 64  }
 0x104   : > { %801 = vst.msk [vmem:[#allocation2 + $0x198] sm:$0xff] %vm749_vm3, %v690_v34 }
 0x105   : > { %v688_v0 = vpop.permute.xlu0 %687  ;;  %1153 = vrot.lane.b32.xlu1 %v5661_v8, %s5532_s14 }
 0x106   : > { %800 = vst.msk [vmem:[#allocation2 + $0x190] sm:$0xff] %vm749_vm3, %v688_v0  ;;  %v9710_v0 = vld [vmem:[#allocation10_spill] sm:$0xff] }
 0x107   : > { %1151 = vrot.lane.b32.xlu0 %v5658_v7, %s5532_s14  ;;  %v694_v24 = vpop.permute.xlu1 %693 }
 0x108   : > { %803 = vst.msk [vmem:[#allocation2 + $0x1a8] sm:$0xff] %vm749_vm3, %v694_v24  ;;  %v9711_v24 = vld [vmem:[#allocation9_spill] sm:$0xff] }
 0x109   : > { %v692_v27 = vpop.permute.xlu0 %691  ;;  %1157 = vrot.lane.b32.xlu1 %v5690_v17, %s5532_s14 }
 0x10a   : > { %802 = vst.msk [vmem:[#allocation2 + $0x1a0] sm:$0xff] %vm749_vm3, %v692_v27  ;;  %vm3591_vm3 = vcmask 261248  }
 0x10b   : > { %1155 = vrot.lane.b32.xlu0 %v5671_v12, %s5532_s14  ;;  %v934_v40 = vpop.permute.xlu1 %933 }
 0x10c   : > { %1095 = vst.msk [vmem:[#allocation2 + $0x8] sm:$0xff] %vm1093_vm4, %v934_v40 }
 0x10d   : > { %v932_v8 = vpop.permute.xlu0 %931  ;;  %1161 = vrot.lane.b32.xlu1 %v5687_v16, %s5532_s14 }
 0x10e   : > { %1094 = vst.msk [vmem:[#allocation2] sm:$0xff] %vm1093_vm4, %v932_v8  ;;  %v9712_v8 = vld [vmem:[#allocation12_spill] sm:$0xff] }
 0x10f   : > { %1159 = vrot.lane.b32.xlu0 %v5684_v15, %s5532_s14  ;;  %v938_v7 = vpop.permute.xlu1 %937 }
 0x110   : > { %1097 = vst.msk [vmem:[#allocation2 + $0x18] sm:$0xff] %vm1093_vm4, %v938_v7 }
 0x111   : > { %v936_v61 = vpop.permute.xlu0 %935  ;;  %1165 = vrot.lane.b32.xlu1 %v5700_v20, %s5532_s14 }
 0x112   : > { %1096 = vst.msk [vmem:[#allocation2 + $0x10] sm:$0xff] %vm1093_vm4, %v936_v61 }
 0x113   : > { %1163 = vrot.lane.b32.xlu0 %v5697_v19, %s5532_s14  ;;  %v942_v12 = vpop.permute.xlu1 %941 }
 0x114   : > { %1099 = vst.msk [vmem:[#allocation2 + $0x28] sm:$0xff] %vm1093_vm4, %v942_v12 }
 0x115   : > { %v940_v5 = vpop.permute.xlu0 %939  ;;  %1169 = vrot.lane.b32.xlu1 %v9661_v26, %s5532_s14 }
 0x116   : > { %1098 = vst.msk [vmem:[#allocation2 + $0x20] sm:$0xff] %vm1093_vm4, %v940_v5 }
 0x117   : > { %1167 = vrot.lane.b32.xlu0 %v9654_v60, %s5532_s14  ;;  %v946_v39 = vpop.permute.xlu1 %945 }
 0x118   : > { %1101 = vst.msk [vmem:[#allocation2 + $0x38] sm:$0xff] %vm1093_vm4, %v946_v39 }
 0x119   : > { %v944_v34 = vpop.permute.xlu0 %943  ;;  %1173 = vrot.lane.b32.xlu1 %v9710_v0, %s5532_s14 }
 0x11a   : > { %1100 = vst.msk [vmem:[#allocation2 + $0x30] sm:$0xff] %vm1093_vm4, %v944_v34 }
 0x11b   : > { %1171 = vrot.lane.b32.xlu0 %v9711_v24, %s5532_s14  ;;  %v950_v27 = vpop.permute.xlu1 %949 }
 0x11c   : > { %1103 = vst.msk [vmem:[#allocation2 + $0x48] sm:$0xff] %vm1093_vm4, %v950_v27 }
 0x11d   : > { %v948_v40 = vpop.permute.xlu0 %947  ;;  %1177 = vrot.lane.b32.xlu1 %v9664_v53, %s5532_s14 }
 0x11e   : > { %1102 = vst.msk [vmem:[#allocation2 + $0x40] sm:$0xff] %vm1093_vm4, %v948_v40 }
 0x11f   : > { %1175 = vrot.lane.b32.xlu0 %v9712_v8, %s5532_s14  ;;  %v954_v7 = vpop.permute.xlu1 %953 }
 0x120   : > { %1105 = vst.msk [vmem:[#allocation2 + $0x58] sm:$0xff] %vm1093_vm4, %v954_v7 }
 0x121   : > { %v952_v61 = vpop.permute.xlu0 %951  ;;  %1181 = vrot.lane.b32.xlu1 %v5767_v37, %s5532_s14 }
 0x122   : > { %1104 = vst.msk [vmem:[#allocation2 + $0x50] sm:$0xff] %vm1093_vm4, %v952_v61 }
 0x123   : > { %1179 = vrot.lane.b32.xlu0 %v5748_v31, %s5532_s14  ;;  %v958_v12 = vpop.permute.xlu1 %957 }
 0x124   : > { %1107 = vst.msk [vmem:[#allocation2 + $0x68] sm:$0xff] %vm1093_vm4, %v958_v12 }
 0x125   : > { %v956_v5 = vpop.permute.xlu0 %955  ;;  %1185 = vrot.lane.b32.xlu1 %v5764_v36, %s5532_s14 }
 0x126   : > { %1106 = vst.msk [vmem:[#allocation2 + $0x60] sm:$0xff] %vm1093_vm4, %v956_v5 }
 0x127   : > { %1183 = vrot.lane.b32.xlu0 %v5751_v32, %s5532_s14  ;;  %v962_v39 = vpop.permute.xlu1 %961 }
 0x128   : > { %1109 = vst.msk [vmem:[#allocation2 + $0x78] sm:$0xff] %vm1093_vm4, %v962_v39 }
 0x129   : > { %v960_v34 = vpop.permute.xlu0 %959  ;;  %1189 = vrot.lane.b32.xlu1 %v5781_v41, %s5532_s14 }
 0x12a   : > { %1108 = vst.msk [vmem:[#allocation2 + $0x70] sm:$0xff] %vm1093_vm4, %v960_v34 }
 0x12b   : > { %1187 = vrot.lane.b32.xlu0 %v5770_v38, %s5532_s14  ;;  %v966_v27 = vpop.permute.xlu1 %965 }
 0x12c   : > { %1111 = vst.msk [vmem:[#allocation2 + $0x88] sm:$0xff] %vm1093_vm4, %v966_v27 }
 0x12d   : > { %v964_v40 = vpop.permute.xlu0 %963  ;;  %1193 = vrot.lane.b32.xlu1 %v9675_v63, %s5532_s14 }
 0x12e   : > { %1110 = vst.msk [vmem:[#allocation2 + $0x80] sm:$0xff] %vm1093_vm4, %v964_v40 }
 0x12f   : > { %1191 = vrot.lane.b32.xlu0 %v5793_v43, %s5532_s14  ;;  %v970_v7 = vpop.permute.xlu1 %969 }
 0x130   : > { %1113 = vst.msk [vmem:[#allocation2 + $0x98] sm:$0xff] %vm1093_vm4, %v970_v7 }
 0x131   : > { %v968_v61 = vpop.permute.xlu0 %967  ;;  %1197 = vrot.lane.b32.xlu1 %v5803_v45, %s5532_s14 }
 0x132   : > { %1112 = vst.msk [vmem:[#allocation2 + $0x90] sm:$0xff] %vm1093_vm4, %v968_v61 }
 0x133   : > { %1195 = vrot.lane.b32.xlu0 %v5796_v44, %s5532_s14  ;;  %v974_v12 = vpop.permute.xlu1 %973 }
 0x134   : > { %1115 = vst.msk [vmem:[#allocation2 + $0xa8] sm:$0xff] %vm1093_vm4, %v974_v12 }
 0x135   : > { %v972_v5 = vpop.permute.xlu0 %971  ;;  %1201 = vrot.lane.b32.xlu1 %v9677_v2, %s5532_s14 }
 0x136   : > { %1114 = vst.msk [vmem:[#allocation2 + $0xa0] sm:$0xff] %vm1093_vm4, %v972_v5 }
 0x137   : > { %1199 = vrot.lane.b32.xlu0 %v5809_v47, %s5532_s14  ;;  %v978_v39 = vpop.permute.xlu1 %977 }
 0x138   : > { %1117 = vst.msk [vmem:[#allocation2 + $0xb8] sm:$0xff] %vm1093_vm4, %v978_v39 }
 0x139   : > { %v976_v34 = vpop.permute.xlu0 %975  ;;  %1205 = vrot.lane.b32.xlu1 %v9683_v28, %s5532_s14  ;;  %v9739_v28 = vld [vmem:[#allocation70_spill] sm:$0xff] }
 0x13a   : > { %1116 = vst.msk [vmem:[#allocation2 + $0xb0] sm:$0xff] %vm1093_vm4, %v976_v34 }
 0x13b   : > { %1203 = vrot.lane.b32.xlu0 %v5839_v55, %s5532_s14  ;;  %v982_v27 = vpop.permute.xlu1 %981 }
 0x13c   : > { %1119 = vst.msk [vmem:[#allocation2 + $0xc8] sm:$0xff] %vm1093_vm4, %v982_v27 }
 0x13d   : > { %v980_v40 = vpop.permute.xlu0 %979  ;;  %1209 = vrot.lane.b32.xlu1 %v5847_v57, %s5532_s14  ;;  %v9737_v57 = vld [vmem:[#allocation68_spill] sm:$0xff] }
 0x13e   : > { %1118 = vst.msk [vmem:[#allocation2 + $0xc0] sm:$0xff] %vm1093_vm4, %v980_v40 }
 0x13f   : > { %1207 = vrot.lane.b32.xlu0 %v5844_v56, %s5532_s14  ;;  %v986_v7 = vpop.permute.xlu1 %985 }
 0x140   : > { %1121 = vst.msk [vmem:[#allocation2 + $0xd8] sm:$0xff] %vm1093_vm4, %v986_v7 }
 0x141   : > { %v984_v61 = vpop.permute.xlu0 %983  ;;  %1213 = vrot.lane.b32.xlu1 %v9685_v51, %s5532_s14  ;;  %v9735_v51 = vld [vmem:[#allocation66_spill] sm:$0xff] }
 0x142   : > { %1120 = vst.msk [vmem:[#allocation2 + $0xd0] sm:$0xff] %vm1093_vm4, %v984_v61 }
 0x143   : > { %1211 = vrot.lane.b32.xlu0 %v5857_v59, %s5532_s14  ;;  %v990_v12 = vpop.permute.xlu1 %989 }
 0x144   : > { %1123 = vst.msk [vmem:[#allocation2 + $0xe8] sm:$0xff] %vm1093_vm4, %v990_v12 }
 0x145   : > { %v988_v5 = vpop.permute.xlu0 %987  ;;  %1217 = vrot.lane.b32.xlu1 %v9691_v46, %s5532_s14  ;;  %v9733_v46 = vld [vmem:[#allocation64_spill] sm:$0xff] }
 0x146   : > { %1122 = vst.msk [vmem:[#allocation2 + $0xe0] sm:$0xff] %vm1093_vm4, %v988_v5 }
 0x147   : > { %1215 = vrot.lane.b32.xlu0 %v5876_v3, %s5532_s14  ;;  %v994_v39 = vpop.permute.xlu1 %993 }
 0x148   : > { %1125 = vst.msk [vmem:[#allocation2 + $0xf8] sm:$0xff] %vm1093_vm4, %v994_v39 }
 0x149   : > { %v992_v34 = vpop.permute.xlu0 %991  ;;  %1221 = vrot.lane.b32.xlu1 %v5889_v9, %s5532_s14  ;;  %v9731_v9 = vld [vmem:[#allocation62_spill] sm:$0xff] }
 0x14a   : > { %1124 = vst.msk [vmem:[#allocation2 + $0xf0] sm:$0xff] %vm1093_vm4, %v992_v34 }
 0x14b   : > { %1219 = vrot.lane.b32.xlu0 %v5879_v4, %s5532_s14  ;;  %v998_v27 = vpop.permute.xlu1 %997 }
 0x14c   : > { %1127 = vst.msk [vmem:[#allocation2 + $0x108] sm:$0xff] %vm1093_vm4, %v998_v27 }
 0x14d   : > { %v996_v40 = vpop.permute.xlu0 %995  ;;  %1225 = vrot.lane.b32.xlu1 %v9693_v54, %s5532_s14  ;;  %v9729_v54 = vld [vmem:[#allocation60_spill] sm:$0xff] }
 0x14e   : > { %1126 = vst.msk [vmem:[#allocation2 + $0x100] sm:$0xff] %vm1093_vm4, %v996_v40 }
 0x14f   : > { %1223 = vrot.lane.b32.xlu0 %v5895_v11, %s5532_s14  ;;  %v1002_v7 = vpop.permute.xlu1 %1001 }
 0x150   : > { %1129 = vst.msk [vmem:[#allocation2 + $0x118] sm:$0xff] %vm1093_vm4, %v1002_v7 }
 0x151   : > { %v1000_v61 = vpop.permute.xlu0 %999  ;;  %1229 = vrot.lane.b32.xlu1 %v9699_v58, %s5532_s14  ;;  %v9727_v58 = vld [vmem:[#allocation58_spill] sm:$0xff] }
 0x152   : > { %1128 = vst.msk [vmem:[#allocation2 + $0x110] sm:$0xff] %vm1093_vm4, %v1000_v61 }
 0x153   : > { %1227 = vrot.lane.b32.xlu0 %v5905_v18, %s5532_s14  ;;  %v1006_v12 = vpop.permute.xlu1 %1005 }
 0x154   : > { %1131 = vst.msk [vmem:[#allocation2 + $0x128] sm:$0xff] %vm1093_vm4, %v1006_v12 }
 0x155   : > { %v1004_v5 = vpop.permute.xlu0 %1003  ;;  %1233 = vrot.lane.b32.xlu1 %v5919_v23, %s5532_s14  ;;  %v9725_v23 = vld [vmem:[#allocation56_spill] sm:$0xff] }
 0x156   : > { %1130 = vst.msk [vmem:[#allocation2 + $0x120] sm:$0xff] %vm1093_vm4, %v1004_v5 }
 0x157   : > { %1231 = vrot.lane.b32.xlu0 %v5916_v22, %s5532_s14  ;;  %v1010_v39 = vpop.permute.xlu1 %1009 }
 0x158   : > { %1133 = vst.msk [vmem:[#allocation2 + $0x138] sm:$0xff] %vm1093_vm4, %v1010_v39  ;;  %v6842_v39 = vld [vmem:[%s5640_s11 + $0x240] sm:$0xff] }
 0x159   : > { %v1008_v34 = vpop.permute.xlu0 %1007  ;;  %1237 = vrot.lane.b32.xlu1 %v9701_v21, %s5532_s14  ;;  %v9723_v21 = vld [vmem:[#allocation54_spill] sm:$0xff] }
 0x15a   : > { %1132 = vst.msk [vmem:[#allocation2 + $0x130] sm:$0xff] %vm1093_vm4, %v1008_v34 }
 0x15b   : > { %1235 = vrot.lane.b32.xlu0 %v5936_v49, %s5532_s14  ;;  %v1014_v27 = vpop.permute.xlu1 %1013 }
 0x15c   : > { %1135 = vst.msk [vmem:[#allocation2 + $0x148] sm:$0xff] %vm1093_vm4, %v1014_v27 }
 0x15d   : > { %v1012_v40 = vpop.permute.xlu0 %1011  ;;  %1241 = vrot.lane.b32.xlu1 %v9707_v10, %s5532_s14 }
 0x15e   : > { %1134 = vst.msk [vmem:[#allocation2 + $0x140] sm:$0xff] %vm1093_vm4, %v1012_v40  ;;  %v6851_v40 = vld [vmem:[%s5640_s11 + $0x250] sm:$0xff] }
 0x15f   : > { %1239 = vrot.lane.b32.xlu0 %v5950_v48, %s5532_s14  ;;  %v1018_v7 = vpop.permute.xlu1 %1017 }
 0x160   : > { %1137 = vst.msk [vmem:[#allocation2 + $0x158] sm:$0xff] %vm1093_vm4, %v1018_v7 }
 0x161   : > { %v1016_v61 = vpop.permute.xlu0 %1015  ;;  %1245 = vrot.lane.b32.xlu1 %v5965_v50, %s5532_s14  ;;  %v9721_v50 = vld [vmem:[#allocation52_spill] sm:$0xff] }
 0x162   : > { %1136 = vst.msk [vmem:[#allocation2 + $0x150] sm:$0xff] %vm1093_vm4, %v1016_v61  ;;  %v6854_v61 = vld [vmem:[%s5640_s11 + $0x248] sm:$0xff] }
 0x163   : > { %1243 = vrot.lane.b32.xlu0 %v5953_v6, %s5532_s14  ;;  %v1022_v12 = vpop.permute.xlu1 %1021  ;;  %v9715_v6 = vld [vmem:[#allocation19_spill] sm:$0xff] }
 0x164   : > { %1139 = vst.msk [vmem:[#allocation2 + $0x168] sm:$0xff] %vm1093_vm4, %v1022_v12 }
 0x165   : > { %v1020_v5 = vpop.permute.xlu0 %1019  ;;  %1249 = vrot.lane.b32.xlu1 %v9708_v14, %s5532_s14 }
 0x166   : > { %1138 = vst.msk [vmem:[#allocation2 + $0x160] sm:$0xff] %vm1093_vm4, %v1020_v5 }
 0x167   : > { %1247 = vrot.lane.b32.xlu0 %v5977_v52, %s5532_s14  ;;  %v1026_v34 = vpop.permute.xlu1 %1025 }
 0x168   : > { %1141 = vst.msk [vmem:[#allocation2 + $0x178] sm:$0xff] %vm1093_vm4, %v1026_v34 }
 0x169   : > { %v1024_v27 = vpop.permute.xlu0 %1023  ;;  %1253 = vrot.lane.b32.xlu1 %v6842_v39, %s5532_s14 }
 0x16a   : > { %1140 = vst.msk [vmem:[#allocation2 + $0x170] sm:$0xff] %vm1093_vm4, %v1024_v27  ;;  %v9713_v27 = vld [vmem:[#allocation15_spill] sm:$0xff] }
 0x16b   : > { %1251 = vrot.lane.b32.xlu0 %v5997_v25, %s5532_s14  ;;  %v1030_v7 = vpop.permute.xlu1 %1029 }
 0x16c   : > { %1143 = vst.msk [vmem:[#allocation2 + $0x188] sm:$0xff] %vm1093_vm4, %v1030_v7  ;;  %v9714_v7 = vld [vmem:[#allocation7_spill] sm:$0xff] }
 0x16d   : > { %v1028_v12 = vpop.permute.xlu0 %1027  ;;  %1257 = vrot.lane.b32.xlu1 %v6851_v40, %s5532_s14 }
 0x16e   : > { %1142 = vst.msk [vmem:[#allocation2 + $0x180] sm:$0xff] %vm1093_vm4, %v1028_v12 }
 0x16f   : > { %1255 = vrot.lane.b32.xlu0 %v6854_v61, %s5532_s14  ;;  %v1034_v5 = vpop.permute.xlu1 %1033  ;;  %s5214_s14 = sshll.u32 %s5520_s21, 8  ;;  %s5549_s21 = smov [#allocation4]  }
 0x170   : > { %1145 = vst.msk [vmem:[#allocation2 + $0x198] sm:$0xff] %vm1093_vm4, %v1034_v5  ;;  %v9716_v5 = vld [vmem:[#allocation14_spill] sm:$0xff]  ;;  %s9187_s24 = scalar_lea.hbm %s9240_s5, %s5214_s14  ;;  %s5454_s29 = sshll.u32 %s5549_s21, 4  ;;  %s5455_s29 = int_to_ptr.vmem [resolvable:$false] %s5454_s29 }
 0x171   : > { %v1032_v34 = vpop.permute.xlu0 %1031  ;;  %1378 = vrot.lane.b32.xlu1 %v9713_v27, %s5533_s15 }
 0x172   : > { %1144 = vst.msk [vmem:[#allocation2 + $0x190] sm:$0xff] %vm1093_vm4, %v1032_v34 }
 0x173   : > { %1376 = vrot.lane.b32.xlu0 %v9714_v7, %s5533_s15  ;;  %v1038_v12 = vpop.permute.xlu1 %1037  ;;  %v9717_v7 = vld [vmem:[#allocation30_spill] sm:$0xff] }
 0x174   : > { %1147 = vst.msk [vmem:[#allocation2 + $0x1a8] sm:$0xff] %vm1093_vm4, %v1038_v12  ;;  %v9718_v12 = vld [vmem:[#allocation17_spill] sm:$0xff] }
 0x175   : > { %v1036_v10 = vpop.permute.xlu0 %1035  ;;  %1382 = vrot.lane.b32.xlu1 %v9715_v6, %s5533_s15 }
 0x176   : > { %1146 = vst.msk [vmem:[#allocation2 + $0x1a0] sm:$0xff] %vm1093_vm4, %v1036_v10  ;;  %vm3800_vm4 = vcmask 392448  }
 0x177   : > { %1380 = vrot.lane.b32.xlu0 %v9716_v5, %s5533_s15  ;;  %v1154_v34 = vpop.permute.xlu1 %1153  ;;  %v9719_v5 = vld [vmem:[#allocation42_spill] sm:$0xff] }
 0x178   : > { %1315 = vst.msk [vmem:[#allocation2 + $0x8] sm:$0xff] %vm1313_vm5, %v1154_v34  ;;  %v9720_v34 = vld [vmem:[#allocation27_spill] sm:$0xff] }
 0x179   : > { %v1152_v27 = vpop.permute.xlu0 %1151  ;;  %1386 = vrot.lane.b32.xlu1 %v9717_v7, %s5533_s15 }
 0x17a   : > { %1314 = vst.msk [vmem:[#allocation2] sm:$0xff] %vm1313_vm5, %v1152_v27 }
 0x17b   : > { %1384 = vrot.lane.b32.xlu0 %v9718_v12, %s5533_s15  ;;  %v1158_v10 = vpop.permute.xlu1 %1157 }
 0x17c   : > { %1317 = vst.msk [vmem:[#allocation2 + $0x18] sm:$0xff] %vm1313_vm5, %v1158_v10  ;;  %v9722_v10 = vld [vmem:[#allocation38_spill] sm:$0xff] }
 0x17d   : > { %v1156_v14 = vpop.permute.xlu0 %1155  ;;  %1390 = vrot.lane.b32.xlu1 %v9719_v5, %s5533_s15 }
 0x17e   : > { %1316 = vst.msk [vmem:[#allocation2 + $0x10] sm:$0xff] %vm1313_vm5, %v1156_v14 }
 0x17f   : > { %1388 = vrot.lane.b32.xlu0 %v9720_v34, %s5533_s15  ;;  %v1162_v25 = vpop.permute.xlu1 %1161 }
 0x180   : > { %1319 = vst.msk [vmem:[#allocation2 + $0x28] sm:$0xff] %vm1313_vm5, %v1162_v25  ;;  %v9724_v25 = vld [vmem:[#allocation49_spill] sm:$0xff] }
 0x181   : > { %v1160_v27 = vpop.permute.xlu0 %1159  ;;  %1394 = vrot.lane.b32.xlu1 %v9721_v50, %s5533_s15 }
 0x182   : > { %1318 = vst.msk [vmem:[#allocation2 + $0x20] sm:$0xff] %vm1313_vm5, %v1160_v27 }
 0x183   : > { %1392 = vrot.lane.b32.xlu0 %v9722_v10, %s5533_s15  ;;  %v1166_v52 = vpop.permute.xlu1 %1165 }
 0x184   : > { %1321 = vst.msk [vmem:[#allocation2 + $0x38] sm:$0xff] %vm1313_vm5, %v1166_v52  ;;  %v9726_v52 = vld [vmem:[#allocation53_spill] sm:$0xff] }
 0x185   : > { %v1164_v14 = vpop.permute.xlu0 %1163  ;;  %1398 = vrot.lane.b32.xlu1 %v9723_v21, %s5533_s15 }
 0x186   : > { %1320 = vst.msk [vmem:[#allocation2 + $0x30] sm:$0xff] %vm1313_vm5, %v1164_v14 }
 0x187   : > { %1396 = vrot.lane.b32.xlu0 %v9724_v25, %s5533_s15  ;;  %v1170_v48 = vpop.permute.xlu1 %1169 }
 0x188   : > { %1323 = vst.msk [vmem:[#allocation2 + $0x48] sm:$0xff] %vm1313_vm5, %v1170_v48  ;;  %v9728_v48 = vld [vmem:[#allocation55_spill] sm:$0xff] }
 0x189   : > { %v1168_v27 = vpop.permute.xlu0 %1167  ;;  %1402 = vrot.lane.b32.xlu1 %v9725_v23, %s5533_s15 }
 0x18a   : > { %1322 = vst.msk [vmem:[#allocation2 + $0x40] sm:$0xff] %vm1313_vm5, %v1168_v27 }
 0x18b   : > { %1400 = vrot.lane.b32.xlu0 %v9726_v52, %s5533_s15  ;;  %v1174_v49 = vpop.permute.xlu1 %1173 }
 0x18c   : > { %1325 = vst.msk [vmem:[#allocation2 + $0x58] sm:$0xff] %vm1313_vm5, %v1174_v49  ;;  %v9730_v49 = vld [vmem:[#allocation57_spill] sm:$0xff] }
 0x18d   : > { %v1172_v14 = vpop.permute.xlu0 %1171  ;;  %1406 = vrot.lane.b32.xlu1 %v9727_v58, %s5533_s15 }
 0x18e   : > { %1324 = vst.msk [vmem:[#allocation2 + $0x50] sm:$0xff] %vm1313_vm5, %v1172_v14 }
 0x18f   : > { %1404 = vrot.lane.b32.xlu0 %v9728_v48, %s5533_s15  ;;  %v1178_v22 = vpop.permute.xlu1 %1177 }
 0x190   : > { %1327 = vst.msk [vmem:[#allocation2 + $0x68] sm:$0xff] %vm1313_vm5, %v1178_v22  ;;  %v9732_v22 = vld [vmem:[#allocation59_spill] sm:$0xff] }
 0x191   : > { %v1176_v27 = vpop.permute.xlu0 %1175  ;;  %1410 = vrot.lane.b32.xlu1 %v9729_v54, %s5533_s15 }
 0x192   : > { %1326 = vst.msk [vmem:[#allocation2 + $0x60] sm:$0xff] %vm1313_vm5, %v1176_v27 }
 0x193   : > { %1408 = vrot.lane.b32.xlu0 %v9730_v49, %s5533_s15  ;;  %v1182_v18 = vpop.permute.xlu1 %1181  ;;  %v9781_v49 = vld [vmem:[#allocation104_spill] sm:$0xff] }
 0x194   : > { %1329 = vst.msk [vmem:[#allocation2 + $0x78] sm:$0xff] %vm1313_vm5, %v1182_v18  ;;  %v9734_v18 = vld [vmem:[#allocation61_spill] sm:$0xff] }
 0x195   : > { %v1180_v14 = vpop.permute.xlu0 %1179  ;;  %1414 = vrot.lane.b32.xlu1 %v9731_v9, %s5533_s15 }
 0x196   : > { %1328 = vst.msk [vmem:[#allocation2 + $0x70] sm:$0xff] %vm1313_vm5, %v1180_v14 }
 0x197   : > { %1412 = vrot.lane.b32.xlu0 %v9732_v22, %s5533_s15  ;;  %v1186_v11 = vpop.permute.xlu1 %1185  ;;  %v9779_v22 = vld [vmem:[#allocation102_spill] sm:$0xff] }
 0x198   : > { %1331 = vst.msk [vmem:[#allocation2 + $0x88] sm:$0xff] %vm1313_vm5, %v1186_v11  ;;  %v9736_v11 = vld [vmem:[#allocation63_spill] sm:$0xff] }
 0x199   : > { %v1184_v27 = vpop.permute.xlu0 %1183  ;;  %1418 = vrot.lane.b32.xlu1 %v9733_v46, %s5533_s15 }
 0x19a   : > { %1330 = vst.msk [vmem:[#allocation2 + $0x80] sm:$0xff] %vm1313_vm5, %v1184_v27 }
 0x19b   : > { %1416 = vrot.lane.b32.xlu0 %v9734_v18, %s5533_s15  ;;  %v1190_v4 = vpop.permute.xlu1 %1189  ;;  %v9777_v18 = vld [vmem:[#allocation100_spill] sm:$0xff] }
 0x19c   : > { %1333 = vst.msk [vmem:[#allocation2 + $0x98] sm:$0xff] %vm1313_vm5, %v1190_v4  ;;  %v9738_v4 = vld [vmem:[#allocation65_spill] sm:$0xff] }
 0x19d   : > { %v1188_v14 = vpop.permute.xlu0 %1187  ;;  %1422 = vrot.lane.b32.xlu1 %v9735_v51, %s5533_s15 }
 0x19e   : > { %1332 = vst.msk [vmem:[#allocation2 + $0x90] sm:$0xff] %vm1313_vm5, %v1188_v14 }
 0x19f   : > { %1420 = vrot.lane.b32.xlu0 %v9736_v11, %s5533_s15  ;;  %v1194_v3 = vpop.permute.xlu1 %1193 }
 0x1a0   : > { %1335 = vst.msk [vmem:[#allocation2 + $0xa8] sm:$0xff] %vm1313_vm5, %v1194_v3  ;;  %v9740_v3 = vld [vmem:[#allocation67_spill] sm:$0xff] }
 0x1a1   : > { %v1192_v27 = vpop.permute.xlu0 %1191  ;;  %1426 = vrot.lane.b32.xlu1 %v9737_v57, %s5533_s15  ;;  %v9741_v57 = vld [vmem:[#allocation72_spill] sm:$0xff] }
 0x1a2   : > { %1334 = vst.msk [vmem:[#allocation2 + $0xa0] sm:$0xff] %vm1313_vm5, %v1192_v27 }
 0x1a3   : > { %1424 = vrot.lane.b32.xlu0 %v9738_v4, %s5533_s15  ;;  %v1198_v59 = vpop.permute.xlu1 %1197  ;;  %v7009_v4 = vld [vmem:[%s5640_s11 + $0x258] sm:$0x3] }
 0x1a4   : > { %1337 = vst.msk [vmem:[#allocation2 + $0xb8] sm:$0xff] %vm1313_vm5, %v1198_v59  ;;  %v9742_v59 = vld [vmem:[#allocation69_spill] sm:$0xff] }
 0x1a5   : > { %v1196_v14 = vpop.permute.xlu0 %1195  ;;  %1430 = vrot.lane.b32.xlu1 %v9739_v28, %s5533_s15  ;;  %v9743_v28 = vld [vmem:[#allocation74_spill] sm:$0xff] }
 0x1a6   : > { %1336 = vst.msk [vmem:[#allocation2 + $0xb0] sm:$0xff] %vm1313_vm5, %v1196_v14 }
 0x1a7   : > { %1428 = vrot.lane.b32.xlu0 %v9740_v3, %s5533_s15  ;;  %v1202_v56 = vpop.permute.xlu1 %1201 }
 0x1a8   : > { %1339 = vst.msk [vmem:[#allocation2 + $0xc8] sm:$0xff] %vm1313_vm5, %v1202_v56  ;;  %v9744_v56 = vld [vmem:[#allocation71_spill] sm:$0xff] }
 0x1a9   : > { %v1200_v27 = vpop.permute.xlu0 %1199  ;;  %1434 = vrot.lane.b32.xlu1 %v9741_v57, %s5533_s15  ;;  %v9745_v57 = vld [vmem:[#allocation76_spill] sm:$0xff] }
 0x1aa   : > { %1338 = vst.msk [vmem:[#allocation2 + $0xc0] sm:$0xff] %vm1313_vm5, %v1200_v27 }
 0x1ab   : > { %1432 = vrot.lane.b32.xlu0 %v9742_v59, %s5533_s15  ;;  %v1206_v55 = vpop.permute.xlu1 %1205 }
 0x1ac   : > { %1341 = vst.msk [vmem:[#allocation2 + $0xd8] sm:$0xff] %vm1313_vm5, %v1206_v55  ;;  %v9746_v55 = vld [vmem:[#allocation73_spill] sm:$0xff] }
 0x1ad   : > { %v1204_v14 = vpop.permute.xlu0 %1203  ;;  %1438 = vrot.lane.b32.xlu1 %v9743_v28, %s5533_s15  ;;  %v9747_v28 = vld [vmem:[#allocation78_spill] sm:$0xff] }
 0x1ae   : > { %1340 = vst.msk [vmem:[#allocation2 + $0xd0] sm:$0xff] %vm1313_vm5, %v1204_v14 }
 0x1af   : > { %1436 = vrot.lane.b32.xlu0 %v9744_v56, %s5533_s15  ;;  %v1210_v3 = vpop.permute.xlu1 %1209 }
 0x1b0   : > { %1343 = vst.msk [vmem:[#allocation2 + $0xe8] sm:$0xff] %vm1313_vm5, %v1210_v3  ;;  %v9748_v3 = vld [vmem:[#allocation75_spill] sm:$0xff] }
 0x1b1   : > { %v1208_v27 = vpop.permute.xlu0 %1207  ;;  %1442 = vrot.lane.b32.xlu1 %v9745_v57, %s5533_s15  ;;  %v9749_v57 = vld [vmem:[#allocation80_spill] sm:$0xff] }
 0x1b2   : > { %1342 = vst.msk [vmem:[#allocation2 + $0xe0] sm:$0xff] %vm1313_vm5, %v1208_v27 }
 0x1b3   : > { %1440 = vrot.lane.b32.xlu0 %v9746_v55, %s5533_s15  ;;  %v1214_v59 = vpop.permute.xlu1 %1213 }
 0x1b4   : > { %1345 = vst.msk [vmem:[#allocation2 + $0xf8] sm:$0xff] %vm1313_vm5, %v1214_v59  ;;  %v9750_v59 = vld [vmem:[#allocation77_spill] sm:$0xff] }
 0x1b5   : > { %v1212_v14 = vpop.permute.xlu0 %1211  ;;  %1446 = vrot.lane.b32.xlu1 %v9747_v28, %s5533_s15  ;;  %v9751_v28 = vld [vmem:[#allocation82_spill] sm:$0xff] }
 0x1b6   : > { %1344 = vst.msk [vmem:[#allocation2 + $0xf0] sm:$0xff] %vm1313_vm5, %v1212_v14 }
 0x1b7   : > { %1444 = vrot.lane.b32.xlu0 %v9748_v3, %s5533_s15  ;;  %v1218_v56 = vpop.permute.xlu1 %1217 }
 0x1b8   : > { %1347 = vst.msk [vmem:[#allocation2 + $0x108] sm:$0xff] %vm1313_vm5, %v1218_v56  ;;  %v9752_v56 = vld [vmem:[#allocation79_spill] sm:$0xff] }
 0x1b9   : > { %v1216_v27 = vpop.permute.xlu0 %1215  ;;  %1450 = vrot.lane.b32.xlu1 %v9749_v57, %s5533_s15  ;;  %v9753_v57 = vld [vmem:[#allocation84_spill] sm:$0xff] }
 0x1ba   : > { %1346 = vst.msk [vmem:[#allocation2 + $0x100] sm:$0xff] %vm1313_vm5, %v1216_v27 }
 0x1bb   : > { %1448 = vrot.lane.b32.xlu0 %v9750_v59, %s5533_s15  ;;  %v1222_v55 = vpop.permute.xlu1 %1221 }
 0x1bc   : > { %1349 = vst.msk [vmem:[#allocation2 + $0x118] sm:$0xff] %vm1313_vm5, %v1222_v55  ;;  %v9754_v55 = vld [vmem:[#allocation81_spill] sm:$0xff] }
 0x1bd   : > { %v1220_v14 = vpop.permute.xlu0 %1219  ;;  %1454 = vrot.lane.b32.xlu1 %v9751_v28, %s5533_s15  ;;  %v9755_v28 = vld [vmem:[#allocation86_spill] sm:$0xff] }
 0x1be   : > { %1348 = vst.msk [vmem:[#allocation2 + $0x110] sm:$0xff] %vm1313_vm5, %v1220_v14 }
 0x1bf   : > { %1452 = vrot.lane.b32.xlu0 %v9752_v56, %s5533_s15  ;;  %v1226_v3 = vpop.permute.xlu1 %1225  ;;  %v1370_v56 = vrot.slane %v6854_v61, 1 }
 0x1c0   : > { %1351 = vst.msk [vmem:[#allocation2 + $0x128] sm:$0xff] %vm1313_vm5, %v1226_v3  ;;  %v9756_v3 = vld [vmem:[#allocation83_spill] sm:$0xff] }
 0x1c1   : > { %v1224_v27 = vpop.permute.xlu0 %1223  ;;  %1458 = vrot.lane.b32.xlu1 %v9753_v57, %s5533_s15 }
 0x1c2   : > { %1350 = vst.msk [vmem:[#allocation2 + $0x120] sm:$0xff] %vm1313_vm5, %v1224_v27 }
 0x1c3   : > { %1456 = vrot.lane.b32.xlu0 %v9754_v55, %s5533_s15  ;;  %v1230_v59 = vpop.permute.xlu1 %1229  ;;  %v9757_v55 = vld [vmem:[#allocation88_spill] sm:$0xff] }
 0x1c4   : > { %1353 = vst.msk [vmem:[#allocation2 + $0x138] sm:$0xff] %vm1313_vm5, %v1230_v59  ;;  %v9758_v59 = vld [vmem:[#allocation85_spill] sm:$0xff] }
 0x1c5   : > { %v1228_v14 = vpop.permute.xlu0 %1227  ;;  %1462 = vrot.lane.b32.xlu1 %v9755_v28, %s5533_s15 }
 0x1c6   : > { %1352 = vst.msk [vmem:[#allocation2 + $0x130] sm:$0xff] %vm1313_vm5, %v1228_v14 }
 0x1c7   : > { %1460 = vrot.lane.b32.xlu0 %v9756_v3, %s5533_s15  ;;  %v1234_v27 = vpop.permute.xlu1 %1233  ;;  %v9759_v3 = vld [vmem:[#allocation90_spill] sm:$0xff] }
 0x1c8   : > { %1355 = vst.msk [vmem:[#allocation2 + $0x148] sm:$0xff] %vm1313_vm5, %v1234_v27  ;;  %v1369_v27 = vrot.slane %v6842_v39, 1 }
 0x1c9   : > { %v1232_v57 = vpop.permute.xlu0 %1231  ;;  %1466 = vrot.lane.b32.xlu1 %v9757_v55, %s5533_s15 }
 0x1ca   : > { %1354 = vst.msk [vmem:[#allocation2 + $0x140] sm:$0xff] %vm1313_vm5, %v1232_v57  ;;  %v9760_v57 = vld [vmem:[#allocation87_spill] sm:$0xff]  ;;  %v7019_v51 = vsel %vm460_vm1, %v1369_v27, %v1370_v56 }
 0x1cb   : > { %1464 = vrot.lane.b32.xlu0 %v9758_v59, %s5533_s15  ;;  %v1238_v14 = vpop.permute.xlu1 %1237  ;;  %9763 = vst [vmem:[#allocation10_spill] sm:$0xff] %v7019_v51 }
 0x1cc   : > { %1357 = vst.msk [vmem:[#allocation2 + $0x158] sm:$0xff] %vm1313_vm5, %v1238_v14  ;;  %v1372_v14 = vrot.slane %v6851_v40, 1 }
 0x1cd   : > { %v1236_v28 = vpop.permute.xlu0 %1235  ;;  %1470 = vrot.lane.b32.xlu1 %v9759_v3, %s5533_s15  ;;  %v9762_v3 = vld [vmem:[#allocation89_spill] sm:$0xff] }
 0x1ce   : > { %1356 = vst.msk [vmem:[#allocation2 + $0x150] sm:$0xff] %vm1313_vm5, %v1236_v28  ;;  %v9761_v28 = vld [vmem:[#allocation92_spill] sm:$0xff]  ;;  %v7032_v27 = vsel %vm460_vm1, %v1370_v56, %v1372_v14  ;;  %v9767_v56 = vld [vmem:[#allocation95_spill] sm:$0xff] }
 0x1cf   : > { %1468 = vrot.lane.b32.xlu0 %v9760_v57, %s5533_s15  ;;  %v1242_v55 = vpop.permute.xlu1 %1241  ;;  %v1374_v57 = vrot.slane %v7009_v4, 1  ;;  %9766 = vst [vmem:[#allocation12_spill] sm:$0xff] %v7032_v27 }
 0x1d0   : > { %1359 = vst.msk [vmem:[#allocation2 + $0x168] sm:$0xff] %vm1313_vm5, %v1242_v55 }
 0x1d1   : > { %v1240_v59 = vpop.permute.xlu0 %1239  ;;  %1474 = vrot.lane.b32.xlu1 %v9761_v28, %s5533_s15  ;;  %v7029_v28 = vsel %vm460_vm1, %v1372_v14, %v1374_v57 }
 0x1d2   : > { %1358 = vst.msk [vmem:[#allocation2 + $0x160] sm:$0xff] %vm1313_vm5, %v1240_v59  ;;  %v9764_v59 = vld [vmem:[#allocation91_spill] sm:$0xff]  ;;  %9765 = vst [vmem:[#allocation9_spill] sm:$0xff] %v7029_v28 }
 0x1d3   : > { %1472 = vrot.lane.b32.xlu0 %v9762_v3, %s5533_s15  ;;  %v1246_v11 = vpop.permute.xlu1 %1245 }
 0x1d4   : > { %1361 = vst.msk [vmem:[#allocation2 + $0x178] sm:$0xff] %vm1313_vm5, %v1246_v11 }
 0x1d5   : > { %v1244_v55 = vpop.permute.xlu0 %1243  ;;  %1478 = vrot.lane.b32.xlu1 %v7019_v51, %s5533_s15 }
 0x1d6   : > { %1360 = vst.msk [vmem:[#allocation2 + $0x170] sm:$0xff] %vm1313_vm5, %v1244_v55  ;;  %v9769_v55 = vld [vmem:[#allocation97_spill] sm:$0xff] }
 0x1d7   : > { %1476 = vrot.lane.b32.xlu0 %v9764_v59, %s5533_s15  ;;  %v1250_v3 = vpop.permute.xlu1 %1249 }
 0x1d8   : > { %1363 = vst.msk [vmem:[#allocation2 + $0x188] sm:$0xff] %vm1313_vm5, %v1250_v3  ;;  %v9768_v3 = vld [vmem:[#allocation93_spill] sm:$0xff] }
 0x1d9   : > { %v1248_v46 = vpop.permute.xlu0 %1247  ;;  %1482 = vrot.lane.b32.xlu1 %v7029_v28, %s5533_s15 }
 0x1da   : > { %1362 = vst.msk [vmem:[#allocation2 + $0x180] sm:$0xff] %vm1313_vm5, %v1248_v46 }
 0x1db   : > { %1480 = vrot.lane.b32.xlu0 %v7032_v27, %s5533_s15  ;;  %v1254_v11 = vpop.permute.xlu1 %1253 }
 0x1dc   : > { %1365 = vst.msk [vmem:[#allocation2 + $0x198] sm:$0xff] %vm1313_vm5, %v1254_v11  ;;  %v9770_v11 = vld [vmem:[#allocation94_spill] sm:$0xff] }
 0x1dd   : > { %v1252_v57 = vpop.permute.xlu0 %1251  ;;  %1602 = vrot.lane.b32.xlu1 %v9767_v56, %s5534_s16 }
 0x1de   : > { %1364 = vst.msk [vmem:[#allocation2 + $0x190] sm:$0xff] %vm1313_vm5, %v1252_v57 }
 0x1df   : > { %1600 = vrot.lane.b32.xlu0 %v9768_v3, %s5534_s16  ;;  %v1258_v46 = vpop.permute.xlu1 %1257  ;;  %v9771_v3 = vld [vmem:[#allocation8_spill] sm:$0xff] }
 0x1e0   : > { %1367 = vst.msk [vmem:[#allocation2 + $0x1a8] sm:$0xff] %vm1313_vm5, %v1258_v46  ;;  %v9772_v46 = vld [vmem:[#allocation96_spill] sm:$0xff] }
 0x1e1   : > { %v1256_v14 = vpop.permute.xlu0 %1255  ;;  %1606 = vrot.lane.b32.xlu1 %v9769_v55, %s5534_s16 }
 0x1e2   : > { %1366 = vst.msk [vmem:[#allocation2 + $0x1a0] sm:$0xff] %vm1313_vm5, %v1256_v14  ;;  %vm3931_vm5 = vcmask 523648  }
 0x1e3   : > { %1604 = vrot.lane.b32.xlu0 %v9770_v11, %s5534_s16  ;;  %v1379_v57 = vpop.permute.xlu1 %1378  ;;  %v9773_v11 = vld [vmem:[#allocation99_spill] sm:$0xff] }
 0x1e4   : > { %1540 = vst.msk [vmem:[#allocation2 + $0x8] sm:$0xff] %vm1538_vm6, %v1379_v57  ;;  %v9774_v57 = vld [vmem:[#allocation98_spill] sm:$0xff] }
 0x1e5   : > { %v1377_v56 = vpop.permute.xlu0 %1376  ;;  %1610 = vrot.lane.b32.xlu1 %v9771_v3, %s5534_s16 }
 0x1e6   : > { %1539 = vst.msk [vmem:[#allocation2] sm:$0xff] %vm1538_vm6, %v1377_v56 }
 0x1e7   : > { %1608 = vrot.lane.b32.xlu0 %v9772_v46, %s5534_s16  ;;  %v1383_v14 = vpop.permute.xlu1 %1382 }
 0x1e8   : > { %1542 = vst.msk [vmem:[#allocation2 + $0x18] sm:$0xff] %vm1538_vm6, %v1383_v14  ;;  %v9775_v14 = vld [vmem:[#allocation20_spill] sm:$0xff] }
 0x1e9   : > { %v1381_v28 = vpop.permute.xlu0 %1380  ;;  %1614 = vrot.lane.b32.xlu1 %v9773_v11, %s5534_s16 }
 0x1ea   : > { %1541 = vst.msk [vmem:[#allocation2 + $0x10] sm:$0xff] %vm1538_vm6, %v1381_v28 }
 0x1eb   : > { %1612 = vrot.lane.b32.xlu0 %v9774_v57, %s5534_s16  ;;  %v1387_v51 = vpop.permute.xlu1 %1386 }
 0x1ec   : > { %1544 = vst.msk [vmem:[#allocation2 + $0x28] sm:$0xff] %vm1538_vm6, %v1387_v51  ;;  %v9776_v51 = vld [vmem:[#allocation11_spill] sm:$0xff] }
 0x1ed   : > { %v1385_v56 = vpop.permute.xlu0 %1384  ;;  %1618 = vrot.lane.b32.xlu1 %v6392_v29, %s5534_s16 }
 0x1ee   : > { %1543 = vst.msk [vmem:[#allocation2 + $0x20] sm:$0xff] %vm1538_vm6, %v1385_v56 }
 0x1ef   : > { %1616 = vrot.lane.b32.xlu0 %v9775_v14, %s5534_s16  ;;  %v1391_v27 = vpop.permute.xlu1 %1390 }
 0x1f0   : > { %1546 = vst.msk [vmem:[#allocation2 + $0x38] sm:$0xff] %vm1538_vm6, %v1391_v27  ;;  %v9778_v27 = vld [vmem:[#allocation13_spill] sm:$0xff] }
 0x1f1   : > { %v1389_v28 = vpop.permute.xlu0 %1388  ;;  %1622 = vrot.lane.b32.xlu1 %v6407_v33, %s5534_s16 }
 0x1f2   : > { %1545 = vst.msk [vmem:[#allocation2 + $0x30] sm:$0xff] %vm1538_vm6, %v1389_v28 }
 0x1f3   : > { %1620 = vrot.lane.b32.xlu0 %v9776_v51, %s5534_s16  ;;  %v1395_v59 = vpop.permute.xlu1 %1394 }
 0x1f4   : > { %1548 = vst.msk [vmem:[#allocation2 + $0x48] sm:$0xff] %vm1538_vm6, %v1395_v59  ;;  %v9780_v59 = vld [vmem:[#allocation50_spill] sm:$0xff] }
 0x1f5   : > { %v1393_v56 = vpop.permute.xlu0 %1392  ;;  %1626 = vrot.lane.b32.xlu1 %v9777_v18, %s5534_s16 }
 0x1f6   : > { %1547 = vst.msk [vmem:[#allocation2 + $0x40] sm:$0xff] %vm1538_vm6, %v1393_v56 }
 0x1f7   : > { %1624 = vrot.lane.b32.xlu0 %v9778_v27, %s5534_s16  ;;  %v1399_v9 = vpop.permute.xlu1 %1398 }
 0x1f8   : > { %1550 = vst.msk [vmem:[#allocation2 + $0x58] sm:$0xff] %vm1538_vm6, %v1399_v9  ;;  %v9782_v9 = vld [vmem:[#allocation101_spill] sm:$0xff] }
 0x1f9   : > { %v1397_v28 = vpop.permute.xlu0 %1396  ;;  %1630 = vrot.lane.b32.xlu1 %v9779_v22, %s5534_s16  ;;  %v9783_v22 = vld [vmem:[#allocation106_spill] sm:$0xff] }
 0x1fa   : > { %1549 = vst.msk [vmem:[#allocation2 + $0x50] sm:$0xff] %vm1538_vm6, %v1397_v28 }
 0x1fb   : > { %1628 = vrot.lane.b32.xlu0 %v9780_v59, %s5534_s16  ;;  %v1403_v54 = vpop.permute.xlu1 %1402 }
 0x1fc   : > { %1552 = vst.msk [vmem:[#allocation2 + $0x68] sm:$0xff] %vm1538_vm6, %v1403_v54  ;;  %v9784_v54 = vld [vmem:[#allocation103_spill] sm:$0xff] }
 0x1fd   : > { %v1401_v56 = vpop.permute.xlu0 %1400  ;;  %1634 = vrot.lane.b32.xlu1 %v9781_v49, %s5534_s16  ;;  %v9785_v49 = vld [vmem:[#allocation18_spill] sm:$0xff] }
 0x1fe   : > { %1551 = vst.msk [vmem:[#allocation2 + $0x60] sm:$0xff] %vm1538_vm6, %v1401_v56 }
 0x1ff   : > { %1632 = vrot.lane.b32.xlu0 %v9782_v9, %s5534_s16  ;;  %v1407_v58 = vpop.permute.xlu1 %1406 }
 0x200   : > { %1554 = vst.msk [vmem:[#allocation2 + $0x78] sm:$0xff] %vm1538_vm6, %v1407_v58  ;;  %v9786_v58 = vld [vmem:[#allocation105_spill] sm:$0xff] }
 0x201   : > { %v1405_v28 = vpop.permute.xlu0 %1404  ;;  %1638 = vrot.lane.b32.xlu1 %v9783_v22, %s5534_s16  ;;  %v9787_v22 = vld [vmem:[#allocation108_spill] sm:$0xff] }
 0x202   : > { %1553 = vst.msk [vmem:[#allocation2 + $0x70] sm:$0xff] %vm1538_vm6, %v1405_v28 }
 0x203   : > { %1636 = vrot.lane.b32.xlu0 %v9784_v54, %s5534_s16  ;;  %v1411_v59 = vpop.permute.xlu1 %1410 }
 0x204   : > { %1556 = vst.msk [vmem:[#allocation2 + $0x88] sm:$0xff] %vm1538_vm6, %v1411_v59  ;;  %v9788_v59 = vld [vmem:[#allocation16_spill] sm:$0xff] }
 0x205   : > { %v1409_v56 = vpop.permute.xlu0 %1408  ;;  %1642 = vrot.lane.b32.xlu1 %v9785_v49, %s5534_s16  ;;  %v9789_v49 = vld [vmem:[#allocation110_spill] sm:$0xff] }
 0x206   : > { %1555 = vst.msk [vmem:[#allocation2 + $0x80] sm:$0xff] %vm1538_vm6, %v1409_v56 }
 0x207   : > { %1640 = vrot.lane.b32.xlu0 %v9786_v58, %s5534_s16  ;;  %v1415_v9 = vpop.permute.xlu1 %1414 }
 0x208   : > { %1558 = vst.msk [vmem:[#allocation2 + $0x98] sm:$0xff] %vm1538_vm6, %v1415_v9  ;;  %v9790_v9 = vld [vmem:[#allocation107_spill] sm:$0xff] }
 0x209   : > { %v1413_v28 = vpop.permute.xlu0 %1412  ;;  %1646 = vrot.lane.b32.xlu1 %v9787_v22, %s5534_s16  ;;  %v9791_v22 = vld [vmem:[#allocation112_spill] sm:$0xff] }
 0x20a   : > { %1557 = vst.msk [vmem:[#allocation2 + $0x90] sm:$0xff] %vm1538_vm6, %v1413_v28 }
 0x20b   : > { %1644 = vrot.lane.b32.xlu0 %v9788_v59, %s5534_s16  ;;  %v1419_v54 = vpop.permute.xlu1 %1418 }
 0x20c   : > { %1560 = vst.msk [vmem:[#allocation2 + $0xa8] sm:$0xff] %vm1538_vm6, %v1419_v54  ;;  %v9792_v54 = vld [vmem:[#allocation109_spill] sm:$0xff] }
 0x20d   : > { %v1417_v56 = vpop.permute.xlu0 %1416  ;;  %1650 = vrot.lane.b32.xlu1 %v9789_v49, %s5534_s16  ;;  %v9793_v49 = vld [vmem:[#allocation114_spill] sm:$0xff] }
 0x20e   : > { %1559 = vst.msk [vmem:[#allocation2 + $0xa0] sm:$0xff] %vm1538_vm6, %v1417_v56 }
 0x20f   : > { %1648 = vrot.lane.b32.xlu0 %v9790_v9, %s5534_s16  ;;  %v1423_v58 = vpop.permute.xlu1 %1422 }
 0x210   : > { %1562 = vst.msk [vmem:[#allocation2 + $0xb8] sm:$0xff] %vm1538_vm6, %v1423_v58  ;;  %v9794_v58 = vld [vmem:[#allocation111_spill] sm:$0xff] }
 0x211   : > { %v1421_v28 = vpop.permute.xlu0 %1420  ;;  %1654 = vrot.lane.b32.xlu1 %v9791_v22, %s5534_s16  ;;  %v9795_v22 = vld [vmem:[#allocation116_spill] sm:$0xff] }
 0x212   : > { %1561 = vst.msk [vmem:[#allocation2 + $0xb0] sm:$0xff] %vm1538_vm6, %v1421_v28 }
 0x213   : > { %1652 = vrot.lane.b32.xlu0 %v9792_v54, %s5534_s16  ;;  %v1427_v59 = vpop.permute.xlu1 %1426 }
 0x214   : > { %1564 = vst.msk [vmem:[#allocation2 + $0xc8] sm:$0xff] %vm1538_vm6, %v1427_v59  ;;  %v9796_v59 = vld [vmem:[#allocation113_spill] sm:$0xff] }
 0x215   : > { %v1425_v56 = vpop.permute.xlu0 %1424  ;;  %1658 = vrot.lane.b32.xlu1 %v9793_v49, %s5534_s16  ;;  %v9797_v49 = vld [vmem:[#allocation118_spill] sm:$0xff] }
 0x216   : > { %1563 = vst.msk [vmem:[#allocation2 + $0xc0] sm:$0xff] %vm1538_vm6, %v1425_v56 }
 0x217   : > { %1656 = vrot.lane.b32.xlu0 %v9794_v58, %s5534_s16  ;;  %v1431_v9 = vpop.permute.xlu1 %1430 }
 0x218   : > { %1566 = vst.msk [vmem:[#allocation2 + $0xd8] sm:$0xff] %vm1538_vm6, %v1431_v9  ;;  %v9798_v9 = vld [vmem:[#allocation115_spill] sm:$0xff] }
 0x219   : > { %v1429_v28 = vpop.permute.xlu0 %1428  ;;  %1662 = vrot.lane.b32.xlu1 %v9795_v22, %s5534_s16  ;;  %v9799_v22 = vld [vmem:[#allocation120_spill] sm:$0xff] }
 0x21a   : > { %1565 = vst.msk [vmem:[#allocation2 + $0xd0] sm:$0xff] %vm1538_vm6, %v1429_v28 }
 0x21b   : > { %1660 = vrot.lane.b32.xlu0 %v9796_v59, %s5534_s16  ;;  %v1435_v54 = vpop.permute.xlu1 %1434 }
 0x21c   : > { %1568 = vst.msk [vmem:[#allocation2 + $0xe8] sm:$0xff] %vm1538_vm6, %v1435_v54  ;;  %v9800_v54 = vld [vmem:[#allocation117_spill] sm:$0xff] }
 0x21d   : > { %v1433_v56 = vpop.permute.xlu0 %1432  ;;  %1666 = vrot.lane.b32.xlu1 %v9797_v49, %s5534_s16  ;;  %v9801_v49 = vld [vmem:[#allocation122_spill] sm:$0xff] }
 0x21e   : > { %1567 = vst.msk [vmem:[#allocation2 + $0xe0] sm:$0xff] %vm1538_vm6, %v1433_v56 }
 0x21f   : > { %1664 = vrot.lane.b32.xlu0 %v9798_v9, %s5534_s16  ;;  %v1439_v58 = vpop.permute.xlu1 %1438 }
 0x220   : > { %1570 = vst.msk [vmem:[#allocation2 + $0xf8] sm:$0xff] %vm1538_vm6, %v1439_v58  ;;  %v9802_v58 = vld [vmem:[#allocation119_spill] sm:$0xff] }
 0x221   : > { %v1437_v28 = vpop.permute.xlu0 %1436  ;;  %1670 = vrot.lane.b32.xlu1 %v9799_v22, %s5534_s16  ;;  %v9803_v22 = vld [vmem:[#allocation124_spill] sm:$0xff] }
 0x222   : > { %1569 = vst.msk [vmem:[#allocation2 + $0xf0] sm:$0xff] %vm1538_vm6, %v1437_v28 }
 0x223   : > { %1668 = vrot.lane.b32.xlu0 %v9800_v54, %s5534_s16  ;;  %v1443_v59 = vpop.permute.xlu1 %1442 }
 0x224   : > { %1572 = vst.msk [vmem:[#allocation2 + $0x108] sm:$0xff] %vm1538_vm6, %v1443_v59  ;;  %v9804_v59 = vld [vmem:[#allocation121_spill] sm:$0xff] }
 0x225   : > { %v1441_v56 = vpop.permute.xlu0 %1440  ;;  %1674 = vrot.lane.b32.xlu1 %v9801_v49, %s5534_s16  ;;  %v9805_v49 = vld [vmem:[#allocation126_spill] sm:$0xff] }
 0x226   : > { %1571 = vst.msk [vmem:[#allocation2 + $0x100] sm:$0xff] %vm1538_vm6, %v1441_v56 }
 0x227   : > { %1672 = vrot.lane.b32.xlu0 %v9802_v58, %s5534_s16  ;;  %v1447_v9 = vpop.permute.xlu1 %1446 }
 0x228   : > { %1574 = vst.msk [vmem:[#allocation2 + $0x118] sm:$0xff] %vm1538_vm6, %v1447_v9  ;;  %v9806_v9 = vld [vmem:[#allocation123_spill] sm:$0xff] }
 0x229   : > { %v1445_v28 = vpop.permute.xlu0 %1444  ;;  %1678 = vrot.lane.b32.xlu1 %v9803_v22, %s5534_s16  ;;  %v9807_v22 = vld [vmem:[#allocation128_spill] sm:$0xff] }
 0x22a   : > { %1573 = vst.msk [vmem:[#allocation2 + $0x110] sm:$0xff] %vm1538_vm6, %v1445_v28 }
 0x22b   : > { %1676 = vrot.lane.b32.xlu0 %v9804_v59, %s5534_s16  ;;  %v1451_v54 = vpop.permute.xlu1 %1450 }
 0x22c   : > { %1576 = vst.msk [vmem:[#allocation2 + $0x128] sm:$0xff] %vm1538_vm6, %v1451_v54  ;;  %v9808_v54 = vld [vmem:[#allocation125_spill] sm:$0xff] }
 0x22d   : > { %v1449_v56 = vpop.permute.xlu0 %1448  ;;  %1682 = vrot.lane.b32.xlu1 %v9805_v49, %s5534_s16 }
 0x22e   : > { %1575 = vst.msk [vmem:[#allocation2 + $0x120] sm:$0xff] %vm1538_vm6, %v1449_v56 }
 0x22f   : > { %1680 = vrot.lane.b32.xlu0 %v9806_v9, %s5534_s16  ;;  %v1455_v58 = vpop.permute.xlu1 %1454 }
 0x230   : > { %1578 = vst.msk [vmem:[#allocation2 + $0x138] sm:$0xff] %vm1538_vm6, %v1455_v58  ;;  %v9809_v58 = vld [vmem:[#allocation127_spill] sm:$0xff] }
 0x231   : > { %v1453_v28 = vpop.permute.xlu0 %1452  ;;  %1686 = vrot.lane.b32.xlu1 %v9807_v22, %s5534_s16  ;;  %v1594_v22 = vrot.slane %v6854_v61, 2  ;;  %v1598_v61 = vrot.slane %v7009_v4, 2 }
 0x232   : > { %1577 = vst.msk [vmem:[#allocation2 + $0x130] sm:$0xff] %vm1538_vm6, %v1453_v28 }
 0x233   : > { %1684 = vrot.lane.b32.xlu0 %v9808_v54, %s5534_s16  ;;  %v1459_v59 = vpop.permute.xlu1 %1458 }
 0x234   : > { %1580 = vst.msk [vmem:[#allocation2 + $0x148] sm:$0xff] %vm1538_vm6, %v1459_v59  ;;  %v1593_v59 = vrot.slane %v6842_v39, 2 }
 0x235   : > { %v1457_v56 = vpop.permute.xlu0 %1456  ;;  %1690 = vrot.lane.b32.xlu1 %v6656_v13, %s5534_s16 }
 0x236   : > { %1579 = vst.msk [vmem:[#allocation2 + $0x140] sm:$0xff] %vm1538_vm6, %v1457_v56  ;;  %v7194_v39 = vsel %vm804_vm2, %v1593_v59, %v1594_v22 }
 0x237   : > { %1688 = vrot.lane.b32.xlu0 %v9809_v58, %s5534_s16  ;;  %v1463_v49 = vpop.permute.xlu1 %1462 }
 0x238   : > { %1582 = vst.msk [vmem:[#allocation2 + $0x158] sm:$0xff] %vm1538_vm6, %v1463_v49  ;;  %v1596_v49 = vrot.slane %v6851_v40, 2 }
 0x239   : > { %v1461_v28 = vpop.permute.xlu0 %1460  ;;  %1694 = vrot.lane.b32.xlu1 %v6671_v30, %s5534_s16 }
 0x23a   : > { %1581 = vst.msk [vmem:[#allocation2 + $0x150] sm:$0xff] %vm1538_vm6, %v1461_v28  ;;  %v7207_v59 = vsel %vm804_vm2, %v1594_v22, %v1596_v49 }
 0x23b   : > { %1692 = vrot.lane.b32.xlu0 %v6651_v1, %s5534_s16  ;;  %v1467_v56 = vpop.permute.xlu1 %1466 }
 0x23c   : > { %1584 = vst.msk [vmem:[#allocation2 + $0x168] sm:$0xff] %vm1538_vm6, %v1467_v56 }
 0x23d   : > { %v1465_v13 = vpop.permute.xlu0 %1464  ;;  %1698 = vrot.lane.b32.xlu1 %v6683_v62, %s5534_s16 }
 0x23e   : > { %1583 = vst.msk [vmem:[#allocation2 + $0x160] sm:$0xff] %vm1538_vm6, %v1465_v13  ;;  %v7204_v13 = vsel %vm804_vm2, %v1596_v49, %v1598_v61 }
 0x23f   : > { %1696 = vrot.lane.b32.xlu0 %v6666_v35, %s5534_s16  ;;  %v1471_v28 = vpop.permute.xlu1 %1470 }
 0x240   : > { %1586 = vst.msk [vmem:[#allocation2 + $0x178] sm:$0xff] %vm1538_vm6, %v1471_v28 }
 0x241   : > { %v1469_v56 = vpop.permute.xlu0 %1468  ;;  %1702 = vrot.lane.b32.xlu1 %v7194_v39, %s5534_s16 }
 0x242   : > { %1585 = vst.msk [vmem:[#allocation2 + $0x170] sm:$0xff] %vm1538_vm6, %v1469_v56 }
 0x243   : > { %1700 = vrot.lane.b32.xlu0 %v6680_v42, %s5534_s16  ;;  %v1475_v40 = vpop.permute.xlu1 %1474 }
 0x244   : > { %1588 = vst.msk [vmem:[#allocation2 + $0x188] sm:$0xff] %vm1538_vm6, %v1475_v40 }
 0x245   : > { %v1473_v4 = vpop.permute.xlu0 %1472  ;;  %1706 = vrot.lane.b32.xlu1 %v7204_v13, %s5534_s16 }
 0x246   : > { %1587 = vst.msk [vmem:[#allocation2 + $0x180] sm:$0xff] %vm1538_vm6, %v1473_v4 }
 0x247   : > { %1704 = vrot.lane.b32.xlu0 %v7207_v59, %s5534_s16  ;;  %v1479_v28 = vpop.permute.xlu1 %1478  ;;  %s5543_s16 = smov 32  }
 0x248   : > { %1590 = vst.msk [vmem:[#allocation2 + $0x198] sm:$0xff] %vm1538_vm6, %v1479_v28 }
 0x249   : > { %v1477_v61 = vpop.permute.xlu0 %1476  ;;  %1822 = vrot.lane.b32.xlu1 %v5684_v15, %s5535_s17 }
 0x24a   : > { %1589 = vst.msk [vmem:[#allocation2 + $0x190] sm:$0xff] %vm1538_vm6, %v1477_v61 }
 0x24b   : > { %1820 = vrot.lane.b32.xlu0 %v5690_v17, %s5535_s17  ;;  %v1483_v22 = vpop.permute.xlu1 %1482 }
 0x24c   : > { %1592 = vst.msk [vmem:[#allocation2 + $0x1a8] sm:$0xff] %vm1538_vm6, %v1483_v22 }
 0x24d   : > { %v1481_v49 = vpop.permute.xlu0 %1480  ;;  %1826 = vrot.lane.b32.xlu1 %v5697_v19, %s5535_s17 }
 0x24e   : > { %1591 = vst.msk [vmem:[#allocation2 + $0x1a0] sm:$0xff] %vm1538_vm6, %v1481_v49  ;;  %vm4066_vm6 = vcmask 654848  }
 0x24f   : > { %1824 = vrot.lane.b32.xlu0 %v5687_v16, %s5535_s17  ;;  %v1603_v56 = vpop.permute.xlu1 %1602 }
 0x250   : > { %1764 = vst.msk [vmem:[#allocation2 + $0x8] sm:$0xff] %vm1762_vm7, %v1603_v56 }
 0x251   : > { %v1601_v15 = vpop.permute.xlu0 %1600  ;;  %1830 = vrot.lane.b32.xlu1 %v9654_v60, %s5535_s17 }
 0x252   : > { %1763 = vst.msk [vmem:[#allocation2] sm:$0xff] %vm1762_vm7, %v1601_v15 }
 0x253   : > { %1828 = vrot.lane.b32.xlu0 %v5700_v20, %s5535_s17  ;;  %v1607_v17 = vpop.permute.xlu1 %1606 }
 0x254   : > { %1766 = vst.msk [vmem:[#allocation2 + $0x18] sm:$0xff] %vm1762_vm7, %v1607_v17 }
 0x255   : > { %v1605_v19 = vpop.permute.xlu0 %1604  ;;  %1834 = vrot.lane.b32.xlu1 %v9711_v24, %s5535_s17 }
 0x256   : > { %1765 = vst.msk [vmem:[#allocation2 + $0x10] sm:$0xff] %vm1762_vm7, %v1605_v19 }
 0x257   : > { %1832 = vrot.lane.b32.xlu0 %v9661_v26, %s5535_s17  ;;  %v1611_v16 = vpop.permute.xlu1 %1610 }
 0x258   : > { %1768 = vst.msk [vmem:[#allocation2 + $0x28] sm:$0xff] %vm1762_vm7, %v1611_v16 }
 0x259   : > { %v1609_v40 = vpop.permute.xlu0 %1608  ;;  %1838 = vrot.lane.b32.xlu1 %v9712_v8, %s5535_s17 }
 0x25a   : > { %1767 = vst.msk [vmem:[#allocation2 + $0x20] sm:$0xff] %vm1762_vm7, %v1609_v40 }
 0x25b   : > { %1836 = vrot.lane.b32.xlu0 %v9710_v0, %s5535_s17  ;;  %v1615_v20 = vpop.permute.xlu1 %1614 }
 0x25c   : > { %1770 = vst.msk [vmem:[#allocation2 + $0x38] sm:$0xff] %vm1762_vm7, %v1615_v20  ;;  %v9814_v20 = vld [vmem:[#allocation60_spill] sm:$0xff] }
 0x25d   : > { %v1613_v60 = vpop.permute.xlu0 %1612  ;;  %1842 = vrot.lane.b32.xlu1 %v5748_v31, %s5535_s17 }
 0x25e   : > { %1769 = vst.msk [vmem:[#allocation2 + $0x30] sm:$0xff] %vm1762_vm7, %v1613_v60  ;;  %v9815_v60 = vld [vmem:[#allocation101_spill] sm:$0xff] }
 0x25f   : > { %1840 = vrot.lane.b32.xlu0 %v9664_v53, %s5535_s17  ;;  %v1619_v26 = vpop.permute.xlu1 %1618 }
 0x260   : > { %1772 = vst.msk [vmem:[#allocation2 + $0x48] sm:$0xff] %vm1762_vm7, %v1619_v26 }
 0x261   : > { %v1617_v24 = vpop.permute.xlu0 %1616  ;;  %1846 = vrot.lane.b32.xlu1 %v5751_v32, %s5535_s17 }
 0x262   : > { %1771 = vst.msk [vmem:[#allocation2 + $0x40] sm:$0xff] %vm1762_vm7, %v1617_v24 }
 0x263   : > { %1844 = vrot.lane.b32.xlu0 %v5767_v37, %s5535_s17  ;;  %v1623_v0 = vpop.permute.xlu1 %1622 }
 0x264   : > { %1774 = vst.msk [vmem:[#allocation2 + $0x58] sm:$0xff] %vm1762_vm7, %v1623_v0  ;;  %v9816_v0 = vld [vmem:[#allocation104_spill] sm:$0xff] }
 0x265   : > { %v1621_v8 = vpop.permute.xlu0 %1620  ;;  %1850 = vrot.lane.b32.xlu1 %v5770_v38, %s5535_s17 }
 0x266   : > { %1773 = vst.msk [vmem:[#allocation2 + $0x50] sm:$0xff] %vm1762_vm7, %v1621_v8  ;;  %v9817_v8 = vld [vmem:[#allocation59_spill] sm:$0xff] }
 0x267   : > { %1848 = vrot.lane.b32.xlu0 %v5764_v36, %s5535_s17  ;;  %v1627_v31 = vpop.permute.xlu1 %1626 }
 0x268   : > { %1776 = vst.msk [vmem:[#allocation2 + $0x68] sm:$0xff] %vm1762_vm7, %v1627_v31 }
 0x269   : > { %v1625_v53 = vpop.permute.xlu0 %1624  ;;  %1854 = vrot.lane.b32.xlu1 %v5793_v43, %s5535_s17 }
 0x26a   : > { %1775 = vst.msk [vmem:[#allocation2 + $0x60] sm:$0xff] %vm1762_vm7, %v1625_v53 }
 0x26b   : > { %1852 = vrot.lane.b32.xlu0 %v5781_v41, %s5535_s17  ;;  %v1631_v32 = vpop.permute.xlu1 %1630  ;;  %v5435_v41 = vld [vmem:[%s9236_s1] sm:$0xff]  }
 0x26c   : > { %1778 = vst.msk [vmem:[#allocation2 + $0x78] sm:$0xff] %vm1762_vm7, %v1631_v32  ;;  %v9818_v32 = vld [vmem:[#allocation62_spill] sm:$0xff] }
 0x26d   : > { %v1629_v37 = vpop.permute.xlu0 %1628  ;;  %1858 = vrot.lane.b32.xlu1 %v5796_v44, %s5535_s17  ;;  %v5536_v44 = vmov 0.0  }
 0x26e   : > { %1777 = vst.msk [vmem:[#allocation2 + $0x70] sm:$0xff] %vm1762_vm7, %v1629_v37  ;;  %5244 = vmatprep.subr.bf16.mxu0 %v5536_v44  ;;  %5356 = vmatprep.subr.bf16.mxu1 %v5536_v44  ;;  %v9819_v37 = vld [vmem:[#allocation103_spill] sm:$0xff] }
 0x26f   : > { %1856 = vrot.lane.b32.xlu0 %v9675_v63, %s5535_s17  ;;  %v1635_v36 = vpop.permute.xlu1 %1634  ;;  %5245 = vmatpush3.bf16.msra.mxu0 %v5435_v41 }
 0x270   : > { %1780 = vst.msk [vmem:[#allocation2 + $0x88] sm:$0xff] %vm1762_vm7, %v1635_v36  ;;  %5358 = vmatpush3.bf16.msra.mxu1 %v5435_v41  ;;  %5246 = vmatprep.subr.bf16.mxu0 %v5536_v44  ;;  %v9820_v41 = vld [vmem:[#allocation106_spill] sm:$0xff] }
 0x271   : > { %v1633_v38 = vpop.permute.xlu0 %1632  ;;  %1862 = vrot.lane.b32.xlu1 %v5809_v47, %s5535_s17  ;;  %v5436_v47 = vld [vmem:[%s9236_s1 + $0x8] sm:$0x3f]   ;;  %5357 = vmatprep.subr.bf16.mxu1 %v5536_v44 }
 0x272   : > { %1779 = vst.msk [vmem:[#allocation2 + $0x80] sm:$0xff] %vm1762_vm7, %v1633_v38  ;;  %5248 = vmatprep.mubr.msk.bf16.mxu0 %vm5540_vm9, %v5536_v44  ;;  %5336 = vmatprep.mubr.msk.bf16.mxu1 %vm5540_vm9, %v5536_v44 }
 0x273   : > { %1860 = vrot.lane.b32.xlu0 %v5803_v45, %s5535_s17  ;;  %v1639_v43 = vpop.permute.xlu1 %1638  ;;  %v5537_v45 = vmov 65535  }
 0x274   : > { %1782 = vst.msk [vmem:[#allocation2 + $0x98] sm:$0xff] %vm1762_vm7, %v1639_v43  ;;  %v2672_v4 = vsel %vm2671_vm8, 4294967295, %v5537_v45  ;;  %v9821_v43 = vld [vmem:[#allocation61_spill] sm:$0xff]  ;;  %v9822_v45 = vld [vmem:[#allocation64_spill] sm:$0xff]  ;;  %vm4331_vm8 = vcmask 917248  }
 0x275   : > { %v1637_v63 = vpop.permute.xlu0 %1636  ;;  %2045 = vrot.lane.b32.xlu1 %v9715_v6, %s5538_s7  ;;  %v2673_v28 = vsel %vm804_vm2, %v2672_v4, 0  ;;  %v9823_v4 = vld [vmem:[#allocation105_spill] sm:$0xff] }
 0x276   : > { %1781 = vst.msk [vmem:[#allocation2 + $0x90] sm:$0xff] %vm1762_vm7, %v1637_v63  ;;  %v2675_v61 = vand.u32 %v5436_v47, %v2673_v28 }
 0x277   : > { %1864 = vrot.lane.b32.xlu0 %v9677_v2, %s5535_s17  ;;  %v1643_v22 = vpop.permute.xlu1 %1642 }
 0x278   : > { %1784 = vst.msk [vmem:[#allocation2 + $0xa8] sm:$0xff] %vm1762_vm7, %v1643_v22  ;;  %5247 = vmatpush3.bf16.msra.mxu0 %v2675_v61  ;;  %5359 = vmatpush3.bf16.msra.mxu1 %v2675_v61  ;;  %v9824_v22 = vld [vmem:[#allocation18_spill] sm:$0xff] }
 0x279   : > { %v1641_v49 = vpop.permute.xlu0 %1640  ;;  %2269 = vrot.lane.b32.xlu1 %v9769_v55, %s5539_s8 }
 0x27a   : > { %1783 = vst.msk [vmem:[#allocation2 + $0xa0] sm:$0xff] %vm1762_vm7, %v1641_v49  ;;  %v9825_v49 = vld [vmem:[#allocation63_spill] sm:$0xff] }
 0x27b   : > { %2047 = vrot.lane.b32.xlu0 %v9718_v12, %s5538_s7  ;;  %v1647_v6 = vpop.permute.xlu1 %1646 }
 0x27c   : > { %1786 = vst.msk [vmem:[#allocation2 + $0xb8] sm:$0xff] %vm1762_vm7, %v1647_v6 }
 0x27d   : > { %v1645_v2 = vpop.permute.xlu0 %1644  ;;  %2049 = vrot.lane.b32.xlu1 %v9717_v7, %s5538_s7 }
 0x27e   : > { %1785 = vst.msk [vmem:[#allocation2 + $0xb0] sm:$0xff] %vm1762_vm7, %v1645_v2 }
 0x27f   : > { %2271 = vrot.lane.b32.xlu0 %v9772_v46, %s5539_s8  ;;  %v1651_v12 = vpop.permute.xlu1 %1650 }
 0x280   : > { %1788 = vst.msk [vmem:[#allocation2 + $0xc8] sm:$0xff] %vm1762_vm7, %v1651_v12  ;;  %v9826_v12 = vld [vmem:[#allocation66_spill] sm:$0xff] }
 0x281   : > { %v1649_v55 = vpop.permute.xlu0 %1648  ;;  %2273 = vrot.lane.b32.xlu1 %v9771_v3, %s5539_s8 }
 0x282   : > { %1787 = vst.msk [vmem:[#allocation2 + $0xc0] sm:$0xff] %vm1762_vm7, %v1649_v55  ;;  %v9827_v55 = vld [vmem:[#allocation16_spill] sm:$0xff] }
 0x283   : > { %2051 = vrot.lane.b32.xlu0 %v9720_v34, %s5538_s7  ;;  %v1655_v56 = vpop.permute.xlu1 %1654 }
 0x284   : > { %1790 = vst.msk [vmem:[#allocation2 + $0xd8] sm:$0xff] %vm1762_vm7, %v1655_v56 }
 0x285   : > { %v1653_v15 = vpop.permute.xlu0 %1652  ;;  %2053 = vrot.lane.b32.xlu1 %v9719_v5, %s5538_s7 }
 0x286   : > { %1789 = vst.msk [vmem:[#allocation2 + $0xd0] sm:$0xff] %vm1762_vm7, %v1653_v15 }
 0x287   : > { %2275 = vrot.lane.b32.xlu0 %v9774_v57, %s5539_s8  ;;  %v1659_v7 = vpop.permute.xlu1 %1658 }
 0x288   : > { %1792 = vst.msk [vmem:[#allocation2 + $0xe8] sm:$0xff] %vm1762_vm7, %v1659_v7  ;;  %v9828_v7 = vld [vmem:[#allocation108_spill] sm:$0xff] }
 0x289   : > { %v1657_v46 = vpop.permute.xlu0 %1656  ;;  %2277 = vrot.lane.b32.xlu1 %v9773_v11, %s5539_s8 }
 0x28a   : > { %1791 = vst.msk [vmem:[#allocation2 + $0xe0] sm:$0xff] %vm1762_vm7, %v1657_v46  ;;  %v9829_v46 = vld [vmem:[#allocation65_spill] sm:$0xff] }
 0x28b   : > { %2055 = vrot.lane.b32.xlu0 %v9722_v10, %s5538_s7  ;;  %v1663_v34 = vpop.permute.xlu1 %1662 }
 0x28c   : > { %1794 = vst.msk [vmem:[#allocation2 + $0xf8] sm:$0xff] %vm1762_vm7, %v1663_v34 }
 0x28d   : > { %v1661_v3 = vpop.permute.xlu0 %1660  ;;  %2057 = vrot.lane.b32.xlu1 %v9721_v50, %s5538_s7 }
 0x28e   : > { %1793 = vst.msk [vmem:[#allocation2 + $0xf0] sm:$0xff] %vm1762_vm7, %v1661_v3 }
 0x28f   : > { %2279 = vrot.lane.b32.xlu0 %v9775_v14, %s5539_s8  ;;  %v1667_v5 = vpop.permute.xlu1 %1666 }
 0x290   : > { %1796 = vst.msk [vmem:[#allocation2 + $0x108] sm:$0xff] %vm1762_vm7, %v1667_v5  ;;  %v9830_v5 = vld [vmem:[#allocation21_spill] sm:$0xff] }
 0x291   : > { %v1665_v57 = vpop.permute.xlu0 %1664  ;;  %2281 = vrot.lane.b32.xlu1 %v6392_v29, %s5539_s8 }
 0x292   : > { %1795 = vst.msk [vmem:[#allocation2 + $0x100] sm:$0xff] %vm1762_vm7, %v1665_v57  ;;  %v9831_v57 = vld [vmem:[#allocation107_spill] sm:$0xff] }
 0x293   : > { %2059 = vrot.lane.b32.xlu0 %v9724_v25, %s5538_s7  ;;  %v1671_v10 = vpop.permute.xlu1 %1670 }
 0x294   : > { %1798 = vst.msk [vmem:[#allocation2 + $0x118] sm:$0xff] %vm1762_vm7, %v1671_v10 }
 0x295   : > { %v1669_v11 = vpop.permute.xlu0 %1668  ;;  %2061 = vrot.lane.b32.xlu1 %v9723_v21, %s5538_s7 }
 0x296   : > { %1797 = vst.msk [vmem:[#allocation2 + $0x110] sm:$0xff] %vm1762_vm7, %v1669_v11 }
 0x297   : > { %2283 = vrot.lane.b32.xlu0 %v9776_v51, %s5539_s8  ;;  %v1675_v50 = vpop.permute.xlu1 %1674 }
 0x298   : > { %1800 = vst.msk [vmem:[#allocation2 + $0x128] sm:$0xff] %vm1762_vm7, %v1675_v50  ;;  %v9832_v50 = vld [vmem:[#allocation67_spill] sm:$0xff] }
 0x299   : > { %v1673_v14 = vpop.permute.xlu0 %1672  ;;  %2285 = vrot.lane.b32.xlu1 %v6407_v33, %s5539_s8 }
 0x29a   : > { %1799 = vst.msk [vmem:[#allocation2 + $0x120] sm:$0xff] %vm1762_vm7, %v1673_v14  ;;  %v9833_v14 = vld [vmem:[#allocation68_spill] sm:$0xff] }
 0x29b   : > { %2063 = vrot.lane.b32.xlu0 %v9726_v52, %s5538_s7  ;;  %v1679_v29 = vpop.permute.xlu1 %1678 }
 0x29c   : > { %1802 = vst.msk [vmem:[#allocation2 + $0x138] sm:$0xff] %vm1762_vm7, %v1679_v29 }
 0x29d   : > { %v1677_v25 = vpop.permute.xlu0 %1676  ;;  %2065 = vrot.lane.b32.xlu1 %v9725_v23, %s5538_s7  ;;  %v9810_v23 = vld [vmem:[#allocation58_spill] sm:$0xff] }
 0x29e   : > { %1801 = vst.msk [vmem:[#allocation2 + $0x130] sm:$0xff] %vm1762_vm7, %v1677_v25 }
 0x29f   : > { %2287 = vrot.lane.b32.xlu0 %v9778_v27, %s5539_s8  ;;  %v1683_v21 = vpop.permute.xlu1 %1682  ;;  %v9811_v27 = vld [vmem:[#allocation50_spill] sm:$0xff] }
 0x2a0   : > { %1804 = vst.msk [vmem:[#allocation2 + $0x148] sm:$0xff] %vm1762_vm7, %v1683_v21  ;;  %v9834_v21 = vld [vmem:[#allocation109_spill] sm:$0xff] }
 0x2a1   : > { %v1681_v51 = vpop.permute.xlu0 %1680  ;;  %2289 = vrot.lane.b32.xlu1 %v9777_v18, %s5539_s8  ;;  %v9813_v18 = vld [vmem:[#allocation57_spill] sm:$0xff] }
 0x2a2   : > { %1803 = vst.msk [vmem:[#allocation2 + $0x140] sm:$0xff] %vm1762_vm7, %v1681_v51  ;;  %v9835_v51 = vld [vmem:[#allocation110_spill] sm:$0xff] }
 0x2a3   : > { %2067 = vrot.lane.b32.xlu0 %v9728_v48, %s5538_s7  ;;  %v1687_v33 = vpop.permute.xlu1 %1686  ;;  %v9812_v48 = vld [vmem:[#allocation102_spill] sm:$0xff] }
 0x2a4   : > { %1806 = vst.msk [vmem:[#allocation2 + $0x158] sm:$0xff] %vm1762_vm7, %v1687_v33 }
 0x2a5   : > { %v1685_v52 = vpop.permute.xlu0 %1684  ;;  %2069 = vrot.lane.b32.xlu1 %v9810_v23, %s5538_s7  ;;  %v9836_v23 = vld [vmem:[#allocation22_spill] sm:$0xff] }
 0x2a6   : > { %1805 = vst.msk [vmem:[#allocation2 + $0x150] sm:$0xff] %vm1762_vm7, %v1685_v52 }
 0x2a7   : > { %2291 = vrot.lane.b32.xlu0 %v9811_v27, %s5539_s8  ;;  %v1691_v17 = vpop.permute.xlu1 %1690  ;;  %v9837_v27 = vld [vmem:[#allocation24_spill] sm:$0xff] }
 0x2a8   : > { %1808 = vst.msk [vmem:[#allocation2 + $0x168] sm:$0xff] %vm1762_vm7, %v1691_v17 }
 0x2a9   : > { %v1689_v19 = vpop.permute.xlu0 %1688  ;;  %2293 = vrot.lane.b32.xlu1 %v9812_v48, %s5539_s8  ;;  %v9838_v48 = vld [vmem:[#allocation69_spill] sm:$0xff] }
 0x2aa   : > { %1807 = vst.msk [vmem:[#allocation2 + $0x160] sm:$0xff] %vm1762_vm7, %v1689_v19 }
 0x2ab   : > { %2071 = vrot.lane.b32.xlu0 %v9813_v18, %s5538_s7  ;;  %v1695_v16 = vpop.permute.xlu1 %1694  ;;  %v9839_v18 = vld [vmem:[#allocation70_spill] sm:$0xff] }
 0x2ac   : > { %1810 = vst.msk [vmem:[#allocation2 + $0x178] sm:$0xff] %vm1762_vm7, %v1695_v16 }
 0x2ad   : > { %v1693_v40 = vpop.permute.xlu0 %1692  ;;  %2073 = vrot.lane.b32.xlu1 %v9814_v20, %s5538_s7  ;;  %v9840_v20 = vld [vmem:[#allocation111_spill] sm:$0xff] }
 0x2ae   : > { %1809 = vst.msk [vmem:[#allocation2 + $0x170] sm:$0xff] %vm1762_vm7, %v1693_v40 }
 0x2af   : > { %2295 = vrot.lane.b32.xlu0 %v9815_v60, %s5539_s8  ;;  %v1699_v26 = vpop.permute.xlu1 %1698  ;;  %v9841_v60 = vld [vmem:[#allocation112_spill] sm:$0xff] }
 0x2b0   : > { %1812 = vst.msk [vmem:[#allocation2 + $0x188] sm:$0xff] %vm1762_vm7, %v1699_v26 }
 0x2b1   : > { %v1697_v24 = vpop.permute.xlu0 %1696  ;;  %2297 = vrot.lane.b32.xlu1 %v9816_v0, %s5539_s8  ;;  %v9842_v0 = vld [vmem:[#allocation25_spill] sm:$0xff] }
 0x2b2   : > { %1811 = vst.msk [vmem:[#allocation2 + $0x180] sm:$0xff] %vm1762_vm7, %v1697_v24 }
 0x2b3   : > { %2075 = vrot.lane.b32.xlu0 %v9817_v8, %s5538_s7  ;;  %v1703_v31 = vpop.permute.xlu1 %1702  ;;  %v9843_v8 = vld [vmem:[#allocation23_spill] sm:$0xff] }
 0x2b4   : > { %1814 = vst.msk [vmem:[#allocation2 + $0x198] sm:$0xff] %vm1762_vm7, %v1703_v31 }
 0x2b5   : > { %v1701_v53 = vpop.permute.xlu0 %1700  ;;  %2077 = vrot.lane.b32.xlu1 %v9818_v32, %s5538_s7  ;;  %v9844_v32 = vld [vmem:[#allocation71_spill] sm:$0xff] }
 0x2b6   : > { %1813 = vst.msk [vmem:[#allocation2 + $0x190] sm:$0xff] %vm1762_vm7, %v1701_v53 }
 0x2b7   : > { %2299 = vrot.lane.b32.xlu0 %v9819_v37, %s5539_s8  ;;  %v1707_v36 = vpop.permute.xlu1 %1706  ;;  %v9845_v37 = vld [vmem:[#allocation72_spill] sm:$0xff] }
 0x2b8   : > { %1816 = vst.msk [vmem:[#allocation2 + $0x1a8] sm:$0xff] %vm1762_vm7, %v1707_v36 }
 0x2b9   : > { %v1705_v38 = vpop.permute.xlu0 %1704  ;;  %2301 = vrot.lane.b32.xlu1 %v9820_v41, %s5539_s8  ;;  %v9846_v41 = vld [vmem:[#allocation113_spill] sm:$0xff] }
 0x2ba   : > { %1815 = vst.msk [vmem:[#allocation2 + $0x1a0] sm:$0xff] %vm1762_vm7, %v1705_v38  ;;  %vm4200_vm7 = vcmask 786048  }
 0x2bb   : > { %2079 = vrot.lane.b32.xlu0 %v9821_v43, %s5538_s7  ;;  %v1823_v63 = vpop.permute.xlu1 %1822  ;;  %v9847_v43 = vld [vmem:[#allocation114_spill] sm:$0xff] }
 0x2bc   : > { %1984 = vst.msk [vmem:[#allocation2 + $0x8] sm:$0xff] %vm1982_vm10, %v1823_v63 }
 0x2bd   : > { %v1821_v47 = vpop.permute.xlu0 %1820  ;;  %2081 = vrot.lane.b32.xlu1 %v9822_v45, %s5538_s7  ;;  %v9848_v45 = vld [vmem:[#allocation28_spill] sm:$0xff] }
 0x2be   : > { %1983 = vst.msk [vmem:[#allocation2] sm:$0xff] %vm1982_vm10, %v1821_v47 }
 0x2bf   : > { %2303 = vrot.lane.b32.xlu0 %v9823_v4, %s5539_s8  ;;  %v1827_v28 = vpop.permute.xlu1 %1826  ;;  %v9849_v4 = vld [vmem:[#allocation26_spill] sm:$0xff] }
 0x2c0   : > { %1986 = vst.msk [vmem:[#allocation2 + $0x18] sm:$0xff] %vm1982_vm10, %v1827_v28 }
 0x2c1   : > { %v1825_v61 = vpop.permute.xlu0 %1824  ;;  %2305 = vrot.lane.b32.xlu1 %v9824_v22, %s5539_s8  ;;  %v9850_v22 = vld [vmem:[#allocation73_spill] sm:$0xff] }
 0x2c2   : > { %1985 = vst.msk [vmem:[#allocation2 + $0x10] sm:$0xff] %vm1982_vm10, %v1825_v61 }
 0x2c3   : > { %2083 = vrot.lane.b32.xlu0 %v9825_v49, %s5538_s7  ;;  %v1831_v6 = vpop.permute.xlu1 %1830  ;;  %v9851_v49 = vld [vmem:[#allocation74_spill] sm:$0xff] }
 0x2c4   : > { %1988 = vst.msk [vmem:[#allocation2 + $0x28] sm:$0xff] %vm1982_vm10, %v1831_v6 }
 0x2c5   : > { %v1829_v2 = vpop.permute.xlu0 %1828  ;;  %2085 = vrot.lane.b32.xlu1 %v9826_v12, %s5538_s7 }
 0x2c6   : > { %1987 = vst.msk [vmem:[#allocation2 + $0x20] sm:$0xff] %vm1982_vm10, %v1829_v2 }
 0x2c7   : > { %2307 = vrot.lane.b32.xlu0 %v9827_v55, %s5539_s8  ;;  %v1835_v56 = vpop.permute.xlu1 %1834 }
 0x2c8   : > { %1990 = vst.msk [vmem:[#allocation2 + $0x38] sm:$0xff] %vm1982_vm10, %v1835_v56  ;;  %v9852_v56 = vld [vmem:[#allocation115_spill] sm:$0xff] }
 0x2c9   : > { %v1833_v15 = vpop.permute.xlu0 %1832  ;;  %2309 = vrot.lane.b32.xlu1 %v9828_v7, %s5539_s8  ;;  %v9853_v7 = vld [vmem:[#allocation116_spill] sm:$0xff] }
 0x2ca   : > { %1989 = vst.msk [vmem:[#allocation2 + $0x30] sm:$0xff] %vm1982_vm10, %v1833_v15 }
 0x2cb   : > { %2087 = vrot.lane.b32.xlu0 %v9829_v46, %s5538_s7  ;;  %v1839_v34 = vpop.permute.xlu1 %1838 }
 0x2cc   : > { %1992 = vst.msk [vmem:[#allocation2 + $0x48] sm:$0xff] %vm1982_vm10, %v1839_v34 }
 0x2cd   : > { %v1837_v3 = vpop.permute.xlu0 %1836  ;;  %1866 = vrot.lane.b32.xlu1 %v9830_v5, %s5535_s17  ;;  %v9855_v5 = vld [vmem:[#allocation32_spill] sm:$0xff] }
 0x2ce   : > { %1991 = vst.msk [vmem:[#allocation2 + $0x40] sm:$0xff] %vm1982_vm10, %v1837_v3  ;;  %v9854_v3 = vld [vmem:[#allocation29_spill] sm:$0xff] }
 0x2cf   : > { %2311 = vrot.lane.b32.xlu0 %v9831_v57, %s5539_s8  ;;  %v1843_v10 = vpop.permute.xlu1 %1842 }
 0x2d0   : > { %1994 = vst.msk [vmem:[#allocation2 + $0x58] sm:$0xff] %vm1982_vm10, %v1843_v10 }
 0x2d1   : > { %v1841_v11 = vpop.permute.xlu0 %1840  ;;  %2091 = vrot.lane.b32.xlu1 %v9832_v50, %s5538_s7 }
 0x2d2   : > { %1993 = vst.msk [vmem:[#allocation2 + $0x50] sm:$0xff] %vm1982_vm10, %v1841_v11 }
 0x2d3   : > { %2089 = vrot.lane.b32.xlu0 %v9833_v14, %s5538_s7  ;;  %v1847_v29 = vpop.permute.xlu1 %1846  ;;  %v9856_v14 = vld [vmem:[#allocation75_spill] sm:$0xff] }
 0x2d4   : > { %1996 = vst.msk [vmem:[#allocation2 + $0x68] sm:$0xff] %vm1982_vm10, %v1847_v29 }
 0x2d5   : > { %v1845_v25 = vpop.permute.xlu0 %1844  ;;  %2315 = vrot.lane.b32.xlu1 %v9834_v21, %s5539_s8 }
 0x2d6   : > { %1995 = vst.msk [vmem:[#allocation2 + $0x60] sm:$0xff] %vm1982_vm10, %v1845_v25  ;;  %v9857_v25 = vld [vmem:[#allocation76_spill] sm:$0xff] }
 0x2d7   : > { %2313 = vrot.lane.b32.xlu0 %v9835_v51, %s5539_s8  ;;  %v1851_v33 = vpop.permute.xlu1 %1850 }
 0x2d8   : > { %1998 = vst.msk [vmem:[#allocation2 + $0x78] sm:$0xff] %vm1982_vm10, %v1851_v33  ;;  %v9858_v33 = vld [vmem:[#allocation117_spill] sm:$0xff] }
 0x2d9   : > { %v1849_v52 = vpop.permute.xlu0 %1848  ;;  %1870 = vrot.lane.b32.xlu1 %v9836_v23, %s5535_s17 }
 0x2da   : > { %1997 = vst.msk [vmem:[#allocation2 + $0x70] sm:$0xff] %vm1982_vm10, %v1849_v52  ;;  %v9859_v52 = vld [vmem:[#allocation118_spill] sm:$0xff] }
 0x2db   : > { %1868 = vrot.lane.b32.xlu0 %v9837_v27, %s5535_s17  ;;  %v1855_v17 = vpop.permute.xlu1 %1854 }
 0x2dc   : > { %2000 = vst.msk [vmem:[#allocation2 + $0x88] sm:$0xff] %vm1982_vm10, %v1855_v17 }
 0x2dd   : > { %v1853_v19 = vpop.permute.xlu0 %1852  ;;  %2095 = vrot.lane.b32.xlu1 %v9838_v48, %s5538_s7  ;;  %v9860_v48 = vld [vmem:[#allocation33_spill] sm:$0xff] }
 0x2de   : > { %1999 = vst.msk [vmem:[#allocation2 + $0x80] sm:$0xff] %vm1982_vm10, %v1853_v19 }
 0x2df   : > { %2093 = vrot.lane.b32.xlu0 %v9839_v18, %s5538_s7  ;;  %v1859_v16 = vpop.permute.xlu1 %1858 }
 0x2e0   : > { %2002 = vst.msk [vmem:[#allocation2 + $0x98] sm:$0xff] %vm1982_vm10, %v1859_v16  ;;  %v9861_v16 = vld [vmem:[#allocation31_spill] sm:$0xff] }
 0x2e1   : > { %v1857_v40 = vpop.permute.xlu0 %1856  ;;  %2319 = vrot.lane.b32.xlu1 %v9840_v20, %s5539_s8 }
 0x2e2   : > { %2001 = vst.msk [vmem:[#allocation2 + $0x90] sm:$0xff] %vm1982_vm10, %v1857_v40 }
 0x2e3   : > { %2317 = vrot.lane.b32.xlu0 %v9841_v60, %s5539_s8  ;;  %v1863_v26 = vpop.permute.xlu1 %1862  ;;  %v9862_v60 = vld [vmem:[#allocation77_spill] sm:$0xff] }
 0x2e4   : > { %2004 = vst.msk [vmem:[#allocation2 + $0xa8] sm:$0xff] %vm1982_vm10, %v1863_v26  ;;  %v9863_v26 = vld [vmem:[#allocation78_spill] sm:$0xff] }
 0x2e5   : > { %v1861_v24 = vpop.permute.xlu0 %1860  ;;  %1874 = vrot.lane.b32.xlu1 %v9842_v0, %s5535_s17 }
 0x2e6   : > { %2003 = vst.msk [vmem:[#allocation2 + $0xa0] sm:$0xff] %vm1982_vm10, %v1861_v24 }
 0x2e7   : > { %1872 = vrot.lane.b32.xlu0 %v9843_v8, %s5535_s17  ;;  %v2046_v31 = vpop.permute.xlu1 %2045 }
 0x2e8   : > { %2208 = vst.msk [vmem:[#allocation2] sm:$0xff] %vm2207_vm11, %v2046_v31 }
 0x2e9   : > { %v1865_v53 = vpop.permute.xlu0 %1864  ;;  %2099 = vrot.lane.b32.xlu1 %v9844_v32, %s5538_s7 }
 0x2ea   : > { %2005 = vst.msk [vmem:[#allocation2 + $0xb0] sm:$0xff] %vm1982_vm10, %v1865_v53  ;;  %v9864_v53 = vld [vmem:[#allocation119_spill] sm:$0xff] }
 0x2eb   : > { %2097 = vrot.lane.b32.xlu0 %v9845_v37, %s5538_s7  ;;  %v2270_v36 = vpop.permute.xlu1 %2269  ;;  %v9865_v37 = vld [vmem:[#allocation120_spill] sm:$0xff] }
 0x2ec   : > { %2432 = vst.msk [vmem:[#allocation2] sm:$0xff] %vm2431_vm12, %v2270_v36 }
 0x2ed   : > { %v2048_v38 = vpop.permute.xlu0 %2047  ;;  %2323 = vrot.lane.b32.xlu1 %v9846_v41, %s5539_s8  ;;  %v9866_v41 = vld [vmem:[#allocation35_spill] sm:$0xff] }
 0x2ee   : > { %2209 = vst.msk [vmem:[#allocation2 + $0x8] sm:$0xff] %vm2207_vm11, %v2048_v38 }
 0x2ef   : > { %2321 = vrot.lane.b32.xlu0 %v9847_v43, %s5539_s8  ;;  %v2050_v63 = vpop.permute.xlu1 %2049  ;;  %v9867_v43 = vld [vmem:[#allocation34_spill] sm:$0xff] }
 0x2f0   : > { %2210 = vst.msk [vmem:[#allocation2 + $0x10] sm:$0xff] %vm2207_vm11, %v2050_v63 }
 0x2f1   : > { %v2272_v47 = vpop.permute.xlu0 %2271  ;;  %1878 = vrot.lane.b32.xlu1 %v9848_v45, %s5535_s17 }
 0x2f2   : > { %2433 = vst.msk [vmem:[#allocation2 + $0x8] sm:$0xff] %vm2431_vm12, %v2272_v47 }
 0x2f3   : > { %1876 = vrot.lane.b32.xlu0 %v9849_v4, %s5535_s17  ;;  %v2274_v28 = vpop.permute.xlu1 %2273  ;;  %v2486_v12 = vld [vmem:[#allocation2] sm:$0xff] }
 0x2f4   : > { %2434 = vst.msk [vmem:[#allocation2 + $0x10] sm:$0xff] %vm2431_vm12, %v2274_v28  ;;  %v9868_v28 = vld [vmem:[#allocation79_spill] sm:$0xff] }
 0x2f5   : > { %v2052_v61 = vpop.permute.xlu0 %2051  ;;  %2103 = vrot.lane.b32.xlu1 %v9850_v22, %s5538_s7  ;;  %v9869_v22 = vld [vmem:[#allocation80_spill] sm:$0xff] }
 0x2f6   : > { %2211 = vst.msk [vmem:[#allocation2 + $0x18] sm:$0xff] %vm2207_vm11, %v2052_v61 }
 0x2f7   : > { %2101 = vrot.lane.b32.xlu0 %v9851_v49, %s5538_s7  ;;  %v2054_v6 = vpop.permute.xlu1 %2053 }
 0x2f8   : > { %2212 = vst.msk [vmem:[#allocation2 + $0x20] sm:$0xff] %vm2207_vm11, %v2054_v6 }
 0x2f9   : > { %v2276_v2 = vpop.permute.xlu0 %2275  ;;  %v2487_v55 = vld [vmem:[#allocation2 + $0x8] sm:$0xff]  ;;  %2327 = vrot.lane.b32.xlu1 %v9852_v56, %s5539_s8 }
 0x2fa   : > { %2435 = vst.msk [vmem:[#allocation2 + $0x18] sm:$0xff] %vm2431_vm12, %v2276_v2  ;;  %v2540_v15 = vpack.c.bf16 %v2487_v55, %v2486_v12  ;;  %v9870_v2 = vld [vmem:[#allocation121_spill] sm:$0xff]  ;;  %v9871_v12 = vld [vmem:[#allocation122_spill] sm:$0xff] }
 0x2fb   : > { %2325 = vrot.lane.b32.xlu0 %v9853_v7, %s5539_s8  ;;  %v2278_v46 = vpop.permute.xlu1 %2277  ;;  %v2488_v11 = vld [vmem:[#allocation2 + $0x10] sm:$0xff] }
 0x2fc   : > { %5249 = vmatmul.mubr.msk.bf16.vlgmr.msra.gmra.mrb[0].mxu0 %vm2589_vm13, %v2540_v15  ;;  %2436 = vst.msk [vmem:[#allocation2 + $0x20] sm:$0xff] %vm2431_vm12, %v2278_v46  ;;  %v9872_v46 = vld [vmem:[#allocation36_spill] sm:$0xff] }
 0x2fd   : > { %v2056_v34 = vpop.permute.xlu0 %2055  ;;  %5252 = vmatprep.mubr.msk.bf16.mxu0 %vm5540_vm9, %v5536_v44  ;;  %1882 = vrot.lane.b32.xlu1 %v9854_v3, %s5535_s17  ;;  %v9873_v3 = vld [vmem:[#allocation39_spill] sm:$0xff] }
 0x2fe   : > { %2213 = vst.msk [vmem:[#allocation2 + $0x28] sm:$0xff] %vm2207_vm11, %v2056_v34 }
 0x2ff   : > { %1880 = vrot.lane.b32.xlu0 %v9855_v5, %s5535_s17  ;;  %v2058_v57 = vpop.permute.xlu1 %2057 }
 0x300   : > { %2214 = vst.msk [vmem:[#allocation2 + $0x30] sm:$0xff] %vm2207_vm11, %v2058_v57 }
 0x301   : > { %v2280_v10 = vpop.permute.xlu0 %2279  ;;  %v2489_v50 = vld [vmem:[#allocation2 + $0x18] sm:$0xff]  ;;  %2107 = vrot.lane.b32.xlu1 %v9856_v14, %s5538_s7 }
 0x302   : > { %2437 = vst.msk [vmem:[#allocation2 + $0x28] sm:$0xff] %vm2431_vm12, %v2280_v10  ;;  %v2541_v29 = vpack.c.bf16 %v2489_v50, %v2488_v11  ;;  %v9874_v10 = vld [vmem:[#allocation81_spill] sm:$0xff]  ;;  %v9875_v11 = vld [vmem:[#allocation82_spill] sm:$0xff] }
 0x303   : > { %2105 = vrot.lane.b32.xlu0 %v9857_v25, %s5538_s7  ;;  %v2282_v21 = vpop.permute.xlu1 %2281  ;;  %v2490_v17 = vld [vmem:[#allocation2 + $0x20] sm:$0xff] }
 0x304   : > { %5253 = vmatmul.mubr.msk.bf16.gmra.mrb[4].mxu0 %vm2589_vm13, %v2541_v29  ;;  %2438 = vst.msk [vmem:[#allocation2 + $0x30] sm:$0xff] %vm2431_vm12, %v2282_v21 }
 0x305   : > { %v2060_v51 = vpop.permute.xlu0 %2059  ;;  %5256 = vmatprep.mubr.msk.bf16.mxu0 %vm5540_vm9, %v5536_v44  ;;  %2331 = vrot.lane.b32.xlu1 %v9858_v33, %s5539_s8 }
 0x306   : > { %2215 = vst.msk [vmem:[#allocation2 + $0x38] sm:$0xff] %vm2207_vm11, %v2060_v51  ;;  %v9876_v51 = vld [vmem:[#allocation124_spill] sm:$0xff] }
 0x307   : > { %2329 = vrot.lane.b32.xlu0 %v9859_v52, %s5539_s8  ;;  %v2062_v23 = vpop.permute.xlu1 %2061 }
 0x308   : > { %2216 = vst.msk [vmem:[#allocation2 + $0x40] sm:$0xff] %vm2207_vm11, %v2062_v23  ;;  %v9877_v23 = vld [vmem:[#allocation40_spill] sm:$0xff] }
 0x309   : > { %v2284_v27 = vpop.permute.xlu0 %2283  ;;  %v2491_v19 = vld [vmem:[#allocation2 + $0x28] sm:$0xff]  ;;  %1886 = vrot.lane.b32.xlu1 %v9860_v48, %s5535_s17 }
 0x30a   : > { %2439 = vst.msk [vmem:[#allocation2 + $0x38] sm:$0xff] %vm2431_vm12, %v2284_v27  ;;  %v2542_v18 = vpack.c.bf16 %v2491_v19, %v2490_v17 }
 0x30b   : > { %1884 = vrot.lane.b32.xlu0 %v9861_v16, %s5535_s17  ;;  %v2286_v40 = vpop.permute.xlu1 %2285  ;;  %v2492_v8 = vld [vmem:[#allocation2 + $0x30] sm:$0xff] }
 0x30c   : > { %5257 = vmatmul.mubr.msk.bf16.gmra.mrb[8].mxu0 %vm2589_vm13, %v2542_v18  ;;  %2440 = vst.msk [vmem:[#allocation2 + $0x40] sm:$0xff] %vm2431_vm12, %v2286_v40  ;;  %v9879_v18 = vld [vmem:[#allocation83_spill] sm:$0xff]  ;;  %v9880_v40 = vld [vmem:[#allocation84_spill] sm:$0xff] }
 0x30d   : > { %v2064_v20 = vpop.permute.xlu0 %2063  ;;  %5260 = vmatprep.mubr.msk.bf16.mxu0 %vm5540_vm9, %v5536_v44  ;;  %2111 = vrot.lane.b32.xlu1 %v9862_v60, %s5538_s7 }
 0x30e   : > { %2217 = vst.msk [vmem:[#allocation2 + $0x48] sm:$0xff] %vm2207_vm11, %v2064_v20 }
 0x30f   : > { %2109 = vrot.lane.b32.xlu0 %v9863_v26, %s5538_s7  ;;  %v2066_v24 = vpop.permute.xlu1 %2065  ;;  %v9881_v26 = vld [vmem:[#allocation126_spill] sm:$0xff] }
 0x310   : > { %2218 = vst.msk [vmem:[#allocation2 + $0x50] sm:$0xff] %vm2207_vm11, %v2066_v24 }
 0x311   : > { %v2288_v0 = vpop.permute.xlu0 %2287  ;;  %v2493_v31 = vld [vmem:[#allocation2 + $0x38] sm:$0xff]  ;;  %2335 = vrot.lane.b32.xlu1 %v9864_v53, %s5539_s8  ;;  %v9882_v53 = vld [vmem:[#allocation43_spill] sm:$0xff] }
 0x312   : > { %2441 = vst.msk [vmem:[#allocation2 + $0x48] sm:$0xff] %vm2431_vm12, %v2288_v0  ;;  %v2543_v32 = vpack.c.bf16 %v2493_v31, %v2492_v8 }
 0x313   : > { %2333 = vrot.lane.b32.xlu0 %v9865_v37, %s5539_s8  ;;  %v2290_v36 = vpop.permute.xlu1 %2289  ;;  %v2494_v45 = vld [vmem:[#allocation2 + $0x40] sm:$0xff] }
 0x314   : > { %5261 = vmatmul.mubr.msk.bf16.gmra.mrb[12].mxu0 %vm2589_vm13, %v2543_v32  ;;  %2442 = vst.msk [vmem:[#allocation2 + $0x50] sm:$0xff] %vm2431_vm12, %v2290_v36  ;;  %v9883_v37 = vld [vmem:[#allocation41_spill] sm:$0xff] }
 0x315   : > { %v2068_v38 = vpop.permute.xlu0 %2067  ;;  %5264 = vmatprep.mubr.msk.bf16.mxu0 %vm5540_vm9, %v5536_v44  ;;  %1890 = vrot.lane.b32.xlu1 %v9866_v41, %s5535_s17  ;;  %v9885_v41 = vld [vmem:[#allocation45_spill] sm:$0xff] }
 0x316   : > { %2219 = vst.msk [vmem:[#allocation2 + $0x58] sm:$0xff] %vm2207_vm11, %v2068_v38  ;;  %v9884_v38 = vld [vmem:[#allocation47_spill] sm:$0xff] }
 0x317   : > { %1888 = vrot.lane.b32.xlu0 %v9867_v43, %s5535_s17  ;;  %v2070_v63 = vpop.permute.xlu1 %2069 }
 0x318   : > { %2220 = vst.msk [vmem:[#allocation2 + $0x60] sm:$0xff] %vm2207_vm11, %v2070_v63 }
 0x319   : > { %v2292_v47 = vpop.permute.xlu0 %2291  ;;  %v2495_v4 = vld [vmem:[#allocation2 + $0x48] sm:$0xff]  ;;  %2115 = vrot.lane.b32.xlu1 %v9868_v28, %s5538_s7 }
 0x31a   : > { %2443 = vst.msk [vmem:[#allocation2 + $0x58] sm:$0xff] %vm2431_vm12, %v2292_v47  ;;  %v2544_v61 = vpack.c.bf16 %v2495_v4, %v2494_v45  ;;  %v9886_v4 = vld [vmem:[#allocation85_spill] sm:$0xff] }
 0x31b   : > { %2113 = vrot.lane.b32.xlu0 %v9869_v22, %s5538_s7  ;;  %v2294_v49 = vpop.permute.xlu1 %2293  ;;  %v2496_v15 = vld [vmem:[#allocation2 + $0x50] sm:$0xff] }
 0x31c   : > { %5265 = vmatmul.mubr.msk.bf16.gmra.mrb[16].mxu0 %vm2589_vm13, %v2544_v61  ;;  %2444 = vst.msk [vmem:[#allocation2 + $0x60] sm:$0xff] %vm2431_vm12, %v2294_v49  ;;  %v9887_v61 = vld [vmem:[#allocation86_spill] sm:$0xff] }
 0x31d   : > { %v2072_v6 = vpop.permute.xlu0 %2071  ;;  %5268 = vmatprep.mubr.msk.bf16.mxu0 %vm5540_vm9, %v5536_v44  ;;  %2339 = vrot.lane.b32.xlu1 %v9870_v2, %s5539_s8  ;;  %v9889_v2 = vld [vmem:[#allocation90_spill] sm:$0xff] }
 0x31e   : > { %2221 = vst.msk [vmem:[#allocation2 + $0x68] sm:$0xff] %vm2207_vm11, %v2072_v6  ;;  %v9888_v6 = vld [vmem:[#allocation89_spill] sm:$0xff] }
 0x31f   : > { %2337 = vrot.lane.b32.xlu0 %v9871_v12, %s5539_s8  ;;  %v2074_v55 = vpop.permute.xlu1 %2073 }
 0x320   : > { %2222 = vst.msk [vmem:[#allocation2 + $0x70] sm:$0xff] %vm2207_vm11, %v2074_v55 }
 0x321   : > { %v2296_v56 = vpop.permute.xlu0 %2295  ;;  %v2497_v7 = vld [vmem:[#allocation2 + $0x58] sm:$0xff]  ;;  %1894 = vrot.lane.b32.xlu1 %v9872_v46, %s5535_s17 }
 0x322   : > { %2445 = vst.msk [vmem:[#allocation2 + $0x68] sm:$0xff] %vm2431_vm12, %v2296_v56  ;;  %v2545_v34 = vpack.c.bf16 %v2497_v7, %v2496_v15  ;;  %v9890_v46 = vld [vmem:[#allocation128_spill] sm:$0xff] }
 0x323   : > { %1892 = vrot.lane.b32.xlu0 %v9873_v3, %s5535_s17  ;;  %v2298_v5 = vpop.permute.xlu1 %2297  ;;  %v2498_v29 = vld [vmem:[#allocation2 + $0x60] sm:$0xff] }
 0x324   : > { %5269 = vmatmul.mubr.msk.bf16.gmra.mrb[20].mxu0 %vm2589_vm13, %v2545_v34  ;;  %2446 = vst.msk [vmem:[#allocation2 + $0x70] sm:$0xff] %vm2431_vm12, %v2298_v5 }
 0x325   : > { %v2076_v57 = vpop.permute.xlu0 %2075  ;;  %5272 = vmatprep.mubr.msk.bf16.mxu0 %vm5540_vm9, %v5536_v44  ;;  %2119 = vrot.lane.b32.xlu1 %v9874_v10, %s5538_s7 }
 0x326   : > { %2223 = vst.msk [vmem:[#allocation2 + $0x78] sm:$0xff] %vm2207_vm11, %v2076_v57 }
 0x327   : > { %2117 = vrot.lane.b32.xlu0 %v9875_v11, %s5538_s7  ;;  %v2078_v50 = vpop.permute.xlu1 %2077  ;;  %v9891_v11 = vld [vmem:[#allocation51_spill] sm:$0xff] }
 0x328   : > { %2224 = vst.msk [vmem:[#allocation2 + $0x80] sm:$0xff] %vm2207_vm11, %v2078_v50 }
 0x329   : > { %v2300_v14 = vpop.permute.xlu0 %2299  ;;  %v2499_v25 = vld [vmem:[#allocation2 + $0x68] sm:$0xff]  ;;  %2343 = vrot.lane.b32.xlu1 %v9806_v9, %s5539_s8  ;;  %v9878_v9 = vld [vmem:[#allocation37_spill] sm:$0xff] }
 0x32a   : > { %2447 = vst.msk [vmem:[#allocation2 + $0x78] sm:$0xff] %vm2431_vm12, %v2300_v14  ;;  %v2546_v21 = vpack.c.bf16 %v2499_v25, %v2498_v29  ;;  %v9892_v14 = vld [vmem:[#allocation48_spill] sm:$0xff]  ;;  %v9893_v29 = vld [vmem:[#allocation91_spill] sm:$0xff] }
 0x32b   : > { %2341 = vrot.lane.b32.xlu0 %v9876_v51, %s5539_s8  ;;  %v2302_v33 = vpop.permute.xlu1 %2301  ;;  %v2500_v19 = vld [vmem:[#allocation2 + $0x70] sm:$0xff]  ;;  %v9894_v25 = vld [vmem:[#allocation92_spill] sm:$0xff] }
 0x32c   : > { %5273 = vmatmul.mubr.msk.bf16.gmra.mrb[24].mxu0 %vm2589_vm13, %v2546_v21  ;;  %2448 = vst.msk [vmem:[#allocation2 + $0x80] sm:$0xff] %vm2431_vm12, %v2302_v33  ;;  %v9895_v33 = vld [vmem:[#allocation44_spill] sm:$0xff] }
 0x32d   : > { %v2080_v52 = vpop.permute.xlu0 %2079  ;;  %5276 = vmatprep.mubr.msk.bf16.mxu0 %vm5540_vm9, %v5536_v44  ;;  %1898 = vrot.lane.b32.xlu1 %v9877_v23, %s5535_s17 }
 0x32e   : > { %2225 = vst.msk [vmem:[#allocation2 + $0x88] sm:$0xff] %vm2207_vm11, %v2080_v52  ;;  %v9896_v52 = vld [vmem:[#allocation46_spill] sm:$0xff] }
 0x32f   : > { %1896 = vrot.lane.b32.xlu0 %v9878_v9, %s5535_s17  ;;  %v2082_v27 = vpop.permute.xlu1 %2081 }
 0x330   : > { %2226 = vst.msk [vmem:[#allocation2 + $0x90] sm:$0xff] %vm2207_vm11, %v2082_v27 }
 0x331   : > { %v2304_v17 = vpop.permute.xlu0 %2303  ;;  %v2501_v48 = vld [vmem:[#allocation2 + $0x78] sm:$0xff]  ;;  %2123 = vrot.lane.b32.xlu1 %v9879_v18, %s5538_s7 }
 0x332   : > { %2449 = vst.msk [vmem:[#allocation2 + $0x88] sm:$0xff] %vm2431_vm12, %v2304_v17  ;;  %v2547_v16 = vpack.c.bf16 %v2501_v48, %v2500_v19 }
 0x333   : > { %2121 = vrot.lane.b32.xlu0 %v9880_v40, %s5538_s7  ;;  %v2306_v20 = vpop.permute.xlu1 %2305  ;;  %v2502_v8 = vld [vmem:[#allocation2 + $0x80] sm:$0xff] }
 0x334   : > { %5277 = vmatmul.mubr.msk.bf16.gmra.mrb[28].mxu0 %vm2589_vm13, %v2547_v16  ;;  %2450 = vst.msk [vmem:[#allocation2 + $0x90] sm:$0xff] %vm2431_vm12, %v2306_v20  ;;  %v9897_v16 = vld [vmem:[#allocation87_spill] sm:$0xff]  ;;  %v9899_v20 = vld [vmem:[#allocation129_spill] sm:$0xff] }
 0x335   : > { %v2084_v60 = vpop.permute.xlu0 %2083  ;;  %5280 = vmatprep.mubr.msk.bf16.mxu0 %vm5540_vm9, %v5536_v44  ;;  %2347 = vrot.lane.b32.xlu1 %v9808_v54, %s5539_s8 }
 0x336   : > { %2227 = vst.msk [vmem:[#allocation2 + $0x98] sm:$0xff] %vm2207_vm11, %v2084_v60 }
 0x337   : > { %2345 = vrot.lane.b32.xlu0 %v9881_v26, %s5539_s8  ;;  %v2086_v24 = vpop.permute.xlu1 %2085 }
 0x338   : > { %2228 = vst.msk [vmem:[#allocation2 + $0xa0] sm:$0xff] %vm2207_vm11, %v2086_v24 }
 0x339   : > { %v2308_v0 = vpop.permute.xlu0 %2307  ;;  %v2503_v31 = vld [vmem:[#allocation2 + $0x88] sm:$0xff]  ;;  %1902 = vrot.lane.b32.xlu1 %v9882_v53, %s5535_s17  ;;  %v5447_v53 = vld [vmem:[%s5640_s11 + $0x240] sm:$0xff] }
 0x33a   : > { %2451 = vst.msk [vmem:[#allocation2 + $0x98] sm:$0xff] %vm2431_vm12, %v2308_v0  ;;  %v2548_v32 = vpack.c.bf16 %v2503_v31, %v2502_v8  ;;  %v5446_v8 = vld [vmem:[%s5640_s11 + $0x248] sm:$0xff] }
 0x33b   : > { %1900 = vrot.lane.b32.xlu0 %v9883_v37, %s5535_s17  ;;  %v2310_v54 = vpop.permute.xlu1 %2309  ;;  %v2504_v47 = vld [vmem:[#allocation2 + $0x90] sm:$0xff]  ;;  %v9900_v37 = vld [vmem:[#allocation12_spill] sm:$0xff] }
 0x33c   : > { %5281 = vmatmul.mubr.msk.bf16.gmra.mrb[32].mxu0 %vm2589_vm13, %v2548_v32  ;;  %2452 = vst.msk [vmem:[#allocation2 + $0xa0] sm:$0xff] %vm2431_vm12, %v2310_v54  ;;  %v9901_v54 = vld [vmem:[#allocation10_spill] sm:$0xff] }
 0x33d   : > { %v2088_v36 = vpop.permute.xlu0 %2087  ;;  %5284 = vmatprep.mubr.msk.bf16.mxu0 %vm5540_vm9, %v5536_v44  ;;  %1910 = vrot.lane.b32.xlu1 %v9884_v38, %s5535_s17  ;;  %v329_v38 = vld [vmem:[%s5640_s11 + $0x260] sm:$0xff] }
 0x33e   : > { %2229 = vst.msk [vmem:[#allocation2 + $0xa8] sm:$0xff] %vm2207_vm11, %v2088_v36 }
 0x33f   : > { %1908 = vrot.lane.b32.xlu0 %v9885_v41, %s5535_s17  ;;  %v1867_v43 = vpop.permute.xlu1 %1866  ;;  %v7718_v41 = vld [vmem:[%s5640_s11 + $0x268] sm:$0xff] }
 0x340   : > { %2006 = vst.msk [vmem:[#allocation2 + $0xb8] sm:$0xff] %vm1982_vm10, %v1867_v43 }
 0x341   : > { %v2312_v63 = vpop.permute.xlu0 %2311  ;;  %v2505_v45 = vld [vmem:[#allocation2 + $0x98] sm:$0xff]  ;;  %2127 = vrot.lane.b32.xlu1 %v9886_v4, %s5538_s7 }
 0x342   : > { %2453 = vst.msk [vmem:[#allocation2 + $0xa8] sm:$0xff] %vm2431_vm12, %v2312_v63  ;;  %v2549_v28 = vpack.c.bf16 %v2505_v45, %v2504_v47  ;;  %v2038_v63 = vrot.slane %v329_v38, 1  ;;  %v2039_v47 = vrot.slane %v7718_v41, 1 }
 0x343   : > { %2125 = vrot.lane.b32.xlu0 %v9887_v61, %s5538_s7  ;;  %v2092_v22 = vpop.permute.xlu1 %2091  ;;  %v2506_v56 = vld [vmem:[#allocation2 + $0xa0] sm:$0xff] }
 0x344   : > { %5285 = vmatmul.mubr.msk.bf16.gmra.mrb[36].mxu0 %vm2589_vm13, %v2549_v28  ;;  %2231 = vst.msk [vmem:[#allocation2 + $0xb8] sm:$0xff] %vm2207_vm11, %v2092_v22 }
 0x345   : > { %v2090_v49 = vpop.permute.xlu0 %2089  ;;  %5288 = vmatprep.mubr.msk.bf16.mxu0 %vm5540_vm9, %v5536_v44  ;;  %2135 = vrot.lane.b32.xlu1 %v9888_v6, %s5538_s7  ;;  %v2263_v6 = vrot.slane %v7718_v41, 2 }
 0x346   : > { %2230 = vst.msk [vmem:[#allocation2 + $0xb0] sm:$0xff] %vm2207_vm11, %v2090_v49  ;;  %v2262_v49 = vrot.slane %v329_v38, 2 }
 0x347   : > { %2133 = vrot.lane.b32.xlu0 %v9889_v2, %s5538_s7  ;;  %v2316_v12 = vpop.permute.xlu1 %2315 }
 0x348   : > { %2455 = vst.msk [vmem:[#allocation2 + $0xb8] sm:$0xff] %vm2431_vm12, %v2316_v12 }
 0x349   : > { %v2314_v55 = vpop.permute.xlu0 %2313  ;;  %v2507_v15 = vld [vmem:[#allocation2 + $0xa8] sm:$0xff]  ;;  %2351 = vrot.lane.b32.xlu1 %v9809_v58, %s5539_s8 }
 0x34a   : > { %2454 = vst.msk [vmem:[#allocation2 + $0xb0] sm:$0xff] %vm2431_vm12, %v2314_v55  ;;  %v2550_v7 = vpack.c.bf16 %v2507_v15, %v2506_v56  ;;  %v9902_v55 = vld [vmem:[#allocation9_spill] sm:$0xff]  ;;  %v2264_v56 = vsel %vm804_vm2, %v2262_v49, %v2263_v6 }
 0x34b   : > { %2349 = vrot.lane.b32.xlu0 %v9890_v46, %s5539_s8  ;;  %v1871_v34 = vpop.permute.xlu1 %1870  ;;  %v332_v46 = vld [vmem:[%s5640_s11 + $0x278] sm:$0x3] }
 0x34c   : > { %5289 = vmatmul.mubr.msk.bf16.gmra.mrb[40].mxu0 %vm2589_vm13, %v2550_v7  ;;  %2008 = vst.msk [vmem:[#allocation2 + $0xc8] sm:$0xff] %vm1982_vm10, %v1871_v34  ;;  %v331_v7 = vld [vmem:[%s5640_s11 + $0x270] sm:$0xff] }
 0x34d   : > { %v1869_v3 = vpop.permute.xlu0 %1868  ;;  %5292 = vmatprep.mubr.msk.bf16.mxu0 %vm5540_vm9, %v5536_v44  ;;  %2359 = vrot.lane.b32.xlu1 %v6666_v35, %s5539_s8 }
 0x34e   : > { %2007 = vst.msk [vmem:[#allocation2 + $0xc0] sm:$0xff] %vm1982_vm10, %v1869_v3  ;;  %v2041_v3 = vrot.slane %v331_v7, 1 }
 0x34f   : > { %2357 = vrot.lane.b32.xlu0 %v6671_v30, %s5539_s8  ;;  %v2096_v58 = vpop.permute.xlu1 %2095  ;;  %v2509_v5 = vld [vmem:[#allocation2 + $0xb8] sm:$0xff] }
 0x350   : > { %2233 = vst.msk [vmem:[#allocation2 + $0xc8] sm:$0xff] %vm2207_vm11, %v2096_v58  ;;  %v2043_v58 = vrot.slane %v332_v46, 1 }
 0x351   : > { %v2094_v57 = vpop.permute.xlu0 %2093  ;;  %v2508_v10 = vld [vmem:[#allocation2 + $0xb0] sm:$0xff]  ;;  %1914 = vrot.lane.b32.xlu1 %v9891_v11, %s5535_s17 }
 0x352   : > { %2232 = vst.msk [vmem:[#allocation2 + $0xc0] sm:$0xff] %vm2207_vm11, %v2094_v57  ;;  %v2551_v50 = vpack.c.bf16 %v2509_v5, %v2508_v10 }
 0x353   : > { %1912 = vrot.lane.b32.xlu0 %v9892_v14, %s5535_s17  ;;  %v2320_v35 = vpop.permute.xlu1 %2319  ;;  %v2265_v14 = vrot.slane %v331_v7, 2 }
 0x354   : > { %5293 = vmatmul.mubr.msk.bf16.gmra.mrb[44].mxu0 %vm2589_vm13, %v2551_v50  ;;  %2457 = vst.msk [vmem:[#allocation2 + $0xc8] sm:$0xff] %vm2431_vm12, %v2320_v35  ;;  %v2044_v35 = vsel %vm460_vm1, %v2041_v3, %v2043_v58 }
 0x355   : > { %v2318_v30 = vpop.permute.xlu0 %2317  ;;  %5296 = vmatprep.mubr.msk.bf16.mxu0 %vm5540_vm9, %v5536_v44  ;;  %2139 = vrot.lane.b32.xlu1 %v9893_v29, %s5538_s7  ;;  %v2042_v29 = vsel %vm460_vm1, %v2039_v47, %v2041_v3 }
 0x356   : > { %2456 = vst.msk [vmem:[#allocation2 + $0xc0] sm:$0xff] %vm2431_vm12, %v2318_v30 }
 0x357   : > { %2137 = vrot.lane.b32.xlu0 %v9894_v25, %s5538_s7  ;;  %v1875_v21 = vpop.permute.xlu1 %1874 }
 0x358   : > { %2010 = vst.msk [vmem:[#allocation2 + $0xd8] sm:$0xff] %vm1982_vm10, %v1875_v21 }
 0x359   : > { %v1873_v51 = vpop.permute.xlu0 %1872  ;;  %1906 = vrot.lane.b32.xlu1 %v9895_v33, %s5535_s17  ;;  %v2266_v33 = vsel %vm804_vm2, %v2263_v6, %v2265_v14 }
 0x35a   : > { %2009 = vst.msk [vmem:[#allocation2 + $0xd0] sm:$0xff] %vm1982_vm10, %v1873_v51 }
 0x35b   : > { %1904 = vrot.lane.b32.xlu0 %v9896_v52, %s5535_s17  ;;  %v2100_v23 = vpop.permute.xlu1 %2099  ;;  %v2511_v9 = vld [vmem:[#allocation2 + $0xc8] sm:$0xff] }
 0x35c   : > { %2235 = vst.msk [vmem:[#allocation2 + $0xd8] sm:$0xff] %vm2207_vm11, %v2100_v23 }
 0x35d   : > { %v2098_v27 = vpop.permute.xlu0 %2097  ;;  %v2510_v17 = vld [vmem:[#allocation2 + $0xc0] sm:$0xff]  ;;  %2363 = vrot.lane.b32.xlu1 %v6680_v42, %s5539_s8  ;;  %v9898_v42 = vld [vmem:[#allocation88_spill] sm:$0xff] }
 0x35e   : > { %2234 = vst.msk [vmem:[#allocation2 + $0xd0] sm:$0xff] %vm2207_vm11, %v2098_v27  ;;  %v2552_v19 = vpack.c.bf16 %v2511_v9, %v2510_v17 }
 0x35f   : > { %2361 = vrot.lane.b32.xlu0 %v6683_v62, %s5539_s8  ;;  %v2324_v48 = vpop.permute.xlu1 %2323 }
 0x360   : > { %5297 = vmatmul.mubr.msk.bf16.gmra.mrb[48].mxu0 %vm2589_vm13, %v2552_v19  ;;  %2459 = vst.msk [vmem:[#allocation2 + $0xd8] sm:$0xff] %vm2431_vm12, %v2324_v48 }
 0x361   : > { %v2322_v18 = vpop.permute.xlu0 %2321  ;;  %5300 = vmatprep.mubr.msk.bf16.mxu0 %vm5540_vm9, %v5536_v44  ;;  %2131 = vrot.lane.b32.xlu1 %v9897_v16, %s5538_s7 }
 0x362   : > { %2458 = vst.msk [vmem:[#allocation2 + $0xd0] sm:$0xff] %vm2431_vm12, %v2322_v18 }
 0x363   : > { %2129 = vrot.lane.b32.xlu0 %v9898_v42, %s5538_s7  ;;  %v1879_v62 = vpop.permute.xlu1 %1878 }
 0x364   : > { %2012 = vst.msk [vmem:[#allocation2 + $0xe8] sm:$0xff] %vm1982_vm10, %v1879_v62 }
 0x365   : > { %v1877_v40 = vpop.permute.xlu0 %1876  ;;  %2355 = vrot.lane.b32.xlu1 %v6651_v1, %s5539_s8 }
 0x366   : > { %2011 = vst.msk [vmem:[#allocation2 + $0xe0] sm:$0xff] %vm1982_vm10, %v1877_v40 }
 0x367   : > { %2353 = vrot.lane.b32.xlu0 %v9899_v20, %s5539_s8  ;;  %v2104_v60 = vpop.permute.xlu1 %2103  ;;  %v2513_v26 = vld [vmem:[#allocation2 + $0xd8] sm:$0xff] }
 0x368   : > { %2237 = vst.msk [vmem:[#allocation2 + $0xe8] sm:$0xff] %vm2207_vm11, %v2104_v60 }
 0x369   : > { %v2102_v24 = vpop.permute.xlu0 %2101  ;;  %v2512_v0 = vld [vmem:[#allocation2 + $0xd0] sm:$0xff]  ;;  %1918 = vrot.lane.b32.xlu1 %v5446_v8, %s5535_s17 }
 0x36a   : > { %2236 = vst.msk [vmem:[#allocation2 + $0xe0] sm:$0xff] %vm2207_vm11, %v2102_v24  ;;  %v2553_v31 = vpack.c.bf16 %v2513_v26, %v2512_v0 }
 0x36b   : > { %1916 = vrot.lane.b32.xlu0 %v5447_v53, %s5535_s17  ;;  %v2328_v1 = vpop.permute.xlu1 %2327 }
 0x36c   : > { %5301 = vmatmul.mubr.msk.bf16.gmra.mrb[52].mxu0 %vm2589_vm13, %v2553_v31  ;;  %2461 = vst.msk [vmem:[#allocation2 + $0xe8] sm:$0xff] %vm2431_vm12, %v2328_v1 }
 0x36d   : > { %v2326_v32 = vpop.permute.xlu0 %2325  ;;  %5304 = vmatprep.mubr.msk.bf16.mxu0 %vm5540_vm9, %v5536_v44  ;;  %2143 = vrot.lane.b32.xlu1 %v9900_v37, %s5538_s7 }
 0x36e   : > { %2460 = vst.msk [vmem:[#allocation2 + $0xe0] sm:$0xff] %vm2431_vm12, %v2326_v32 }
 0x36f   : > { %2141 = vrot.lane.b32.xlu0 %v9901_v54, %s5538_s7  ;;  %v1883_v36 = vpop.permute.xlu1 %1882 }
 0x370   : > { %2014 = vst.msk [vmem:[#allocation2 + $0xf8] sm:$0xff] %vm1982_vm10, %v1883_v36 }
 0x371   : > { %v1881_v43 = vpop.permute.xlu0 %1880  ;;  %2367 = vrot.lane.b32.xlu1 %v7207_v59, %s5539_s8  ;;  %v5448_v59 = vld [vmem:[%s5640_s11 + $0x250] sm:$0xff]  ;;  %s5541_s11 = smov 16  }
 0x372   : > { %2013 = vst.msk [vmem:[#allocation2 + $0xf0] sm:$0xff] %vm1982_vm10, %v1881_v43 }
 0x373   : > { %2365 = vrot.lane.b32.xlu0 %v7194_v39, %s5539_s8  ;;  %v2108_v45 = vpop.permute.xlu1 %2107  ;;  %v2515_v4 = vld [vmem:[#allocation2 + $0xe8] sm:$0xff]  ;;  %v2040_v39 = vsel %vm460_vm1, %v2038_v63, %v2039_v47 }
 0x374   : > { %2239 = vst.msk [vmem:[#allocation2 + $0xf8] sm:$0xff] %vm2207_vm11, %v2108_v45 }
 0x375   : > { %v2106_v28 = vpop.permute.xlu0 %2105  ;;  %v2514_v61 = vld [vmem:[#allocation2 + $0xe0] sm:$0xff]  ;;  %1922 = vrot.lane.b32.xlu1 %v329_v38, %s5535_s17 }
 0x376   : > { %2238 = vst.msk [vmem:[#allocation2 + $0xf0] sm:$0xff] %vm2207_vm11, %v2106_v28  ;;  %v2554_v22 = vpack.c.bf16 %v2515_v4, %v2514_v61 }
 0x377   : > { %1920 = vrot.lane.b32.xlu0 %v5448_v59, %s5535_s17  ;;  %v2332_v2 = vpop.permute.xlu1 %2331 }
 0x378   : > { %5305 = vmatmul.mubr.msk.bf16.gmra.mrb[56].mxu0 %vm2589_vm13, %v2554_v22  ;;  %2463 = vst.msk [vmem:[#allocation2 + $0xf8] sm:$0xff] %vm2431_vm12, %v2332_v2 }
 0x379   : > { %v2330_v12 = vpop.permute.xlu0 %2329  ;;  %5308 = vmatprep.mubr.msk.bf16.mxu0 %vm5540_vm9, %v5536_v44  ;;  %2147 = vrot.lane.b32.xlu1 %v2040_v39, %s5538_s7 }
 0x37a   : > { %2462 = vst.msk [vmem:[#allocation2 + $0xf0] sm:$0xff] %vm2431_vm12, %v2330_v12 }
 0x37b   : > { %2145 = vrot.lane.b32.xlu0 %v9902_v55, %s5538_s7  ;;  %v1887_v15 = vpop.permute.xlu1 %1886 }
 0x37c   : > { %2016 = vst.msk [vmem:[#allocation2 + $0x108] sm:$0xff] %vm1982_vm10, %v1887_v15 }
 0x37d   : > { %v1885_v34 = vpop.permute.xlu0 %1884  ;;  %2371 = vrot.lane.b32.xlu1 %v2264_v56, %s5539_s8 }
 0x37e   : > { %2015 = vst.msk [vmem:[#allocation2 + $0x100] sm:$0xff] %vm1982_vm10, %v1885_v34 }
 0x37f   : > { %2369 = vrot.lane.b32.xlu0 %v7204_v13, %s5539_s8  ;;  %v2112_v5 = vpop.permute.xlu1 %2111  ;;  %v2517_v57 = vld [vmem:[#allocation2 + $0xf8] sm:$0xff]  ;;  %v2267_v13 = vrot.slane %v332_v46, 2 }
 0x380   : > { %2241 = vst.msk [vmem:[#allocation2 + $0x108] sm:$0xff] %vm2207_vm11, %v2112_v5 }
 0x381   : > { %v2110_v10 = vpop.permute.xlu0 %2109  ;;  %v2516_v11 = vld [vmem:[#allocation2 + $0xf0] sm:$0xff]  ;;  %1926 = vrot.lane.b32.xlu1 %v331_v7, %s5535_s17  ;;  %v2268_v21 = vsel %vm804_vm2, %v2265_v14, %v2267_v13 }
 0x382   : > { %2240 = vst.msk [vmem:[#allocation2 + $0x100] sm:$0xff] %vm2207_vm11, %v2110_v10  ;;  %v2555_v50 = vpack.c.bf16 %v2517_v57, %v2516_v11 }
 0x383   : > { %1924 = vrot.lane.b32.xlu0 %v7718_v41, %s5535_s17  ;;  %v2336_v30 = vpop.permute.xlu1 %2335  ;;  %s5546_s17 = smov 80  }
 0x384   : > { %5309 = vmatmul.mubr.msk.bf16.gmra.mrb[60].mxu0 %vm2589_vm13, %v2555_v50  ;;  %2465 = vst.msk [vmem:[#allocation2 + $0x108] sm:$0xff] %vm2431_vm12, %v2336_v30  ;;  %v7822_v50 = vld [vmem:[%s9237_s2] ss:$0 sm:$0xff] }
 0x385   : > { %v2334_v25 = vpop.permute.xlu0 %2333  ;;  %5312 = vmatprep.mubr.msk.bf16.mxu0 %vm5540_vm9, %v5536_v44  ;;  %2151 = vrot.lane.b32.xlu1 %v2044_v35, %s5538_s7  ;;  %v2980_v35 = vlaneseq }
 0x386   : > { %2464 = vst.msk [vmem:[#allocation2 + $0x100] sm:$0xff] %vm2431_vm12, %v2334_v25 }
 0x387   : > { %2149 = vrot.lane.b32.xlu0 %v2042_v29, %s5538_s7  ;;  %v1891_v51 = vpop.permute.xlu1 %1890  ;;  %s5456_s7 = scalar_lea.vmem %s5455_s29, 512 }
 0x388   : > { %2018 = vst.msk [vmem:[#allocation2 + $0x118] sm:$0xff] %vm1982_vm10, %v1891_v51 }
 0x389   : > { %v1889_v52 = vpop.permute.xlu0 %1888  ;;  %2375 = vrot.lane.b32.xlu1 %v2268_v21, %s5539_s8 }
 0x38a   : > { %2017 = vst.msk [vmem:[#allocation2 + $0x110] sm:$0xff] %vm1982_vm10, %v1889_v52 }
 0x38b   : > { %2373 = vrot.lane.b32.xlu0 %v2266_v33, %s5539_s8  ;;  %v2116_v23 = vpop.permute.xlu1 %2115  ;;  %v2519_v9 = vld [vmem:[#allocation2 + $0x108] sm:$0xff]  ;;  %s5548_s8 = smov 112  }
 0x38c   : > { %2243 = vst.msk [vmem:[#allocation2 + $0x118] sm:$0xff] %vm2207_vm11, %v2116_v23  ;;  %v2981_v23 = vshrl.u32 %v2980_v35, 7 }
 0x38d   : > { %v2114_v27 = vpop.permute.xlu0 %2113  ;;  %v2518_v17 = vld [vmem:[#allocation2 + $0x100] sm:$0xff] }
 0x38e   : > { %2242 = vst.msk [vmem:[#allocation2 + $0x110] sm:$0xff] %vm2207_vm11, %v2114_v27  ;;  %v2556_v19 = vpack.c.bf16 %v2519_v9, %v2518_v17  ;;  %vm3058_vm15 = vcmp.ge.s32.totalorder %v2981_v23, 1 }
 0x38f   : > { %v2340_v48 = vpop.permute.xlu1 %2339 }
 0x390   : > { %5313 = vmatmul.mubr.msk.bf16.gmra.mrb[64].mxu0 %vm2589_vm13, %v2556_v19  ;;  %2467 = vst.msk [vmem:[#allocation2 + $0x118] sm:$0xff] %vm2431_vm12, %v2340_v48 }
 0x391   : > { %v2338_v18 = vpop.permute.xlu0 %2337  ;;  %5316 = vmatprep.mubr.msk.bf16.mxu0 %vm5540_vm9, %v5536_v44 }
 0x392   : > { %2466 = vst.msk [vmem:[#allocation2 + $0x110] sm:$0xff] %vm2431_vm12, %v2338_v18 }
 0x393   : > { %v1895_v16 = vpop.permute.xlu1 %1894 }
 0x394   : > { %2020 = vst.msk [vmem:[#allocation2 + $0x128] sm:$0xff] %vm1982_vm10, %v1895_v16 }
 0x395   : > { %v1893_v42 = vpop.permute.xlu0 %1892 }
 0x396   : > { %2019 = vst.msk [vmem:[#allocation2 + $0x120] sm:$0xff] %vm1982_vm10, %v1893_v42 }
 0x397   : > { %v2120_v62 = vpop.permute.xlu1 %2119  ;;  %v2521_v40 = vld [vmem:[#allocation2 + $0x118] sm:$0xff] }
 0x398   : > { %2245 = vst.msk [vmem:[#allocation2 + $0x128] sm:$0xff] %vm2207_vm11, %v2120_v62 }
 0x399   : > { %v2118_v20 = vpop.permute.xlu0 %2117  ;;  %v2520_v60 = vld [vmem:[#allocation2 + $0x110] sm:$0xff] }
 0x39a   : > { %2244 = vst.msk [vmem:[#allocation2 + $0x120] sm:$0xff] %vm2207_vm11, %v2118_v20  ;;  %v2557_v26 = vpack.c.bf16 %v2521_v40, %v2520_v60 }
 0x39b   : > { %v2344_v24 = vpop.permute.xlu1 %2343 }
 0x39c   : > { %5317 = vmatmul.mubr.msk.bf16.gmra.mrb[68].mxu0 %vm2589_vm13, %v2557_v26  ;;  %2469 = vst.msk [vmem:[#allocation2 + $0x128] sm:$0xff] %vm2431_vm12, %v2344_v24 }
 0x39d   : > { %v2342_v0 = vpop.permute.xlu0 %2341  ;;  %5320 = vmatprep.mubr.msk.bf16.mxu0 %vm5540_vm9, %v5536_v44 }
 0x39e   : > { %2468 = vst.msk [vmem:[#allocation2 + $0x120] sm:$0xff] %vm2431_vm12, %v2342_v0 }
 0x39f   : > { %v1899_v8 = vpop.permute.xlu1 %1898 }
 0x3a0   : > { %2022 = vst.msk [vmem:[#allocation2 + $0x138] sm:$0xff] %vm1982_vm10, %v1899_v8 }
 0x3a1   : > { %v1897_v31 = vpop.permute.xlu0 %1896 }
 0x3a2   : > { %2021 = vst.msk [vmem:[#allocation2 + $0x130] sm:$0xff] %vm1982_vm10, %v1897_v31 }
 0x3a3   : > { %v2124_v53 = vpop.permute.xlu1 %2123  ;;  %v2523_v1 = vld [vmem:[#allocation2 + $0x128] sm:$0xff] }
 0x3a4   : > { %2247 = vst.msk [vmem:[#allocation2 + $0x138] sm:$0xff] %vm2207_vm11, %v2124_v53 }
 0x3a5   : > { %v2122_v32 = vpop.permute.xlu0 %2121  ;;  %v2522_v37 = vld [vmem:[#allocation2 + $0x120] sm:$0xff] }
 0x3a6   : > { %2246 = vst.msk [vmem:[#allocation2 + $0x130] sm:$0xff] %vm2207_vm11, %v2122_v32  ;;  %v2558_v54 = vpack.c.bf16 %v2523_v1, %v2522_v37 }
 0x3a7   : > { %v2348_v36 = vpop.permute.xlu1 %2347 }
 0x3a8   : > { %5321 = vmatmul.mubr.msk.bf16.gmra.mrb[72].mxu0 %vm2589_vm13, %v2558_v54  ;;  %2471 = vst.msk [vmem:[#allocation2 + $0x138] sm:$0xff] %vm2431_vm12, %v2348_v36  ;;  %v7842_v36 = vsel %vm3058_vm15, 1.0, %v5536_v44 }
 0x3a9   : > { %v2346_v38 = vpop.permute.xlu0 %2345  ;;  %5324 = vmatprep.mubr.msk.bf16.mxu0 %vm5540_vm9, %v5536_v44 }
 0x3aa   : > { %2470 = vst.msk [vmem:[#allocation2 + $0x130] sm:$0xff] %vm2431_vm12, %v2346_v38 }
 0x3ab   : > { %v1903_v41 = vpop.permute.xlu1 %1902 }
 0x3ac   : > { %2024 = vst.msk [vmem:[#allocation2 + $0x148] sm:$0xff] %vm1982_vm10, %v1903_v41 }
 0x3ad   : > { %v1901_v43 = vpop.permute.xlu0 %1900 }
 0x3ae   : > { %2023 = vst.msk [vmem:[#allocation2 + $0x140] sm:$0xff] %vm1982_vm10, %v1901_v43 }
 0x3af   : > { %v1911_v63 = vpop.permute.xlu1 %1910  ;;  %v2525_v47 = vld [vmem:[#allocation2 + $0x138] sm:$0xff] }
 0x3b0   : > { %2028 = vst.msk [vmem:[#allocation2 + $0x168] sm:$0xff] %vm1982_vm10, %v1911_v63 }
 0x3b1   : > { %v1909_v45 = vpop.permute.xlu0 %1908  ;;  %v2524_v4 = vld [vmem:[#allocation2 + $0x130] sm:$0xff] }
 0x3b2   : > { %2027 = vst.msk [vmem:[#allocation2 + $0x160] sm:$0xff] %vm1982_vm10, %v1909_v45  ;;  %v2559_v28 = vpack.c.bf16 %v2525_v47, %v2524_v4  ;;  %v2983_v47 = vadd.s32 16, %v2981_v23 }
 0x3b3   : > { %v2128_v61 = vpop.permute.xlu1 %2127 }
 0x3b4   : > { %5325 = vmatmul.mubr.msk.bf16.gmra.mrb[76].mxu0 %vm2589_vm13, %v2559_v28  ;;  %2249 = vst.msk [vmem:[#allocation2 + $0x148] sm:$0xff] %vm2207_vm11, %v2128_v61  ;;  %vm3117_vm0 = vcmp.le.s32.totalorder %v2983_v47, 16 }
 0x3b5   : > { %v2126_v22 = vpop.permute.xlu0 %2125  ;;  %5328 = vmatprep.mubr.msk.bf16.mxu0 %vm5540_vm9, %v5536_v44 }
 0x3b6   : > { %2248 = vst.msk [vmem:[#allocation2 + $0x140] sm:$0xff] %vm2207_vm11, %v2126_v22 }
 0x3b7   : > { %v2136_v49 = vpop.permute.xlu1 %2135 }
 0x3b8   : > { %2253 = vst.msk [vmem:[#allocation2 + $0x168] sm:$0xff] %vm2207_vm11, %v2136_v49 }
 0x3b9   : > { %v2134_v59 = vpop.permute.xlu0 %2133 }
 0x3ba   : > { %2252 = vst.msk [vmem:[#allocation2 + $0x160] sm:$0xff] %vm2207_vm11, %v2134_v59 }
 0x3bb   : > { %v2352_v39 = vpop.permute.xlu1 %2351 }
 0x3bc   : > { %2473 = vst.msk [vmem:[#allocation2 + $0x148] sm:$0xff] %vm2431_vm12, %v2352_v39 }
 0x3bd   : > { %v2350_v6 = vpop.permute.xlu0 %2349 }
 0x3be   : > { %2472 = vst.msk [vmem:[#allocation2 + $0x140] sm:$0xff] %vm2431_vm12, %v2350_v6 }
 0x3bf   : > { %v2360_v2 = vpop.permute.xlu1 %2359 }
 0x3c0   : > { %2477 = vst.msk [vmem:[#allocation2 + $0x168] sm:$0xff] %vm2431_vm12, %v2360_v2 }
 0x3c1   : > { %v2358_v12 = vpop.permute.xlu0 %2357 }
 0x3c2   : > { %2476 = vst.msk [vmem:[#allocation2 + $0x160] sm:$0xff] %vm2431_vm12, %v2358_v12 }
 0x3c3   : > { %v1915_v55 = vpop.permute.xlu1 %1914  ;;  %v2527_v56 = vld [vmem:[#allocation2 + $0x148] sm:$0xff] }
 0x3c4   : > { %2030 = vst.msk [vmem:[#allocation2 + $0x178] sm:$0xff] %vm1982_vm10, %v1915_v55 }
 0x3c5   : > { %v1913_v15 = vpop.permute.xlu0 %1912  ;;  %v2526_v7 = vld [vmem:[#allocation2 + $0x140] sm:$0xff] }
 0x3c6   : > { %2029 = vst.msk [vmem:[#allocation2 + $0x170] sm:$0xff] %vm1982_vm10, %v1913_v15  ;;  %v2560_v46 = vpack.c.bf16 %v2527_v56, %v2526_v7 }
 0x3c7   : > { %v2140_v34 = vpop.permute.xlu1 %2139  ;;  %v2531_v3 = vld [vmem:[#allocation2 + $0x168] sm:$0xff] }
 0x3c8   : > { %5329 = vmatmul.mubr.msk.bf16.gmra.mrb[80].mxu0 %vm2589_vm13, %v2560_v46  ;;  %2255 = vst.msk [vmem:[#allocation2 + $0x178] sm:$0xff] %vm2207_vm11, %v2140_v34 }
 0x3c9   : > { %v2138_v58 = vpop.permute.xlu0 %2137  ;;  %v2530_v5 = vld [vmem:[#allocation2 + $0x160] sm:$0xff]  ;;  %5332 = vmatprep.mubr.msk.bf16.mxu0 %vm5540_vm9, %v5536_v44 }
 0x3ca   : > { %2254 = vst.msk [vmem:[#allocation2 + $0x170] sm:$0xff] %vm2207_vm11, %v2138_v58  ;;  %v2562_v57 = vpack.c.bf16 %v2531_v3, %v2530_v5  ;;  %v7870_v58 = vsel %vm3117_vm0, 1.0, %v5536_v44 }
 0x3cb   : > { %v1907_v10 = vpop.permute.xlu1 %1906 }
 0x3cc   : > { %5337 = vmatmul.mubr.msk.bf16.vlgmr.msra.gmra.mrb[0].mxu1 %vm2589_vm13, %v2562_v57  ;;  %2026 = vst.msk [vmem:[#allocation2 + $0x158] sm:$0xff] %vm1982_vm10, %v1907_v10 }
 0x3cd   : > { %v1905_v11 = vpop.permute.xlu0 %1904  ;;  %5340 = vmatprep.mubr.msk.bf16.mxu1 %vm5540_vm9, %v5536_v44 }
 0x3ce   : > { %2025 = vst.msk [vmem:[#allocation2 + $0x150] sm:$0xff] %vm1982_vm10, %v1905_v11 }
 0x3cf   : > { %v2711_v14 = vpop.f32.mrb[0].mxu0  ;;  %v2364_v29 = vpop.permute.xlu1 %2363 }
 0x3d0   : > { %v2712_v13 = vadd.f32 %v7822_v50, %v2711_v14  ;;  %v5250_v30 = vpop.f32.mrb[1].mxu0  ;;  %2479 = vst.msk [vmem:[#allocation2 + $0x178] sm:$0xff] %vm2431_vm12, %v2364_v29 }
 0x3d1   : > { %v2362_v25 = vpop.permute.xlu0 %2361  ;;  %v2714_v21 = vpop.f32.mrb[2].mxu0 }
 0x3d2   : > { %v2926_v51 = vmax.f32 %v2712_v13, 0.0  ;;  %2478 = vst.msk [vmem:[#allocation2 + $0x170] sm:$0xff] %vm2431_vm12, %v2362_v25  ;;  %v2715_v33 = vadd.f32 %v7822_v50, %v2714_v21  ;;  %v5251_v52 = vpop.f32.mrb[3].mxu0 }
 0x3d3   : > { %v2132_v17 = vpop.permute.xlu1 %2131 }
 0x3d4   : > { %v3280_v9 = vmul.f32 0.0, %v2926_v51  ;;  %v2927_v27 = vmax.f32 %v2715_v33, 0.0  ;;  %2251 = vst.msk [vmem:[#allocation2 + $0x158] sm:$0xff] %vm2207_vm11, %v2132_v17 }
 0x3d5   : > { %v2130_v19 = vpop.permute.xlu0 %2129 }
 0x3d6   : > { %v3281_v48 = vmul.f32 0.0, %v2927_v27  ;;  %2250 = vst.msk [vmem:[#allocation2 + $0x150] sm:$0xff] %vm2207_vm11, %v2130_v19  ;;  %v3415_v16 = vrot.slane %v3280_v9, 1  ;;  %v3624_v24 = vrot.slane %v3280_v9, 2 }
 0x3d7   : > { %3335 = vst.msk [vmem:[#allocation3] sm:$0xff] %vm3334_vm14, %v3280_v9  ;;  %v2719_v18 = vpop.f32.mrb[4].mxu0  ;;  %v2356_v60 = vpop.permute.xlu1 %2355  ;;  %v2533_v26 = vld [vmem:[#allocation2 + $0x178] sm:$0xff] }
 0x3d8   : > { %v3416_v42 = vrot.slane %v3281_v48, 1  ;;  %v3625_v62 = vrot.slane %v3281_v48, 2  ;;  %v2720_v40 = vadd.f32 %v7822_v50, %v2719_v18  ;;  %v5254_v20 = vpop.f32.mrb[5].mxu0  ;;  %3336 = vst.msk [vmem:[#allocation3 + $0x10] sm:$0xff] %vm3334_vm14, %v3281_v48 }
 0x3d9   : > { %2475 = vst.msk [vmem:[#allocation2 + $0x158] sm:$0xff] %vm2431_vm12, %v2356_v60  ;;  %v2354_v0 = vpop.permute.xlu0 %2353  ;;  %v2722_v8 = vpop.f32.mrb[6].mxu0  ;;  %v2532_v31 = vld [vmem:[#allocation2 + $0x170] sm:$0xff] }
 0x3da   : > { %v2928_v53 = vmax.f32 %v2720_v40, 0.0  ;;  %2474 = vst.msk [vmem:[#allocation2 + $0x150] sm:$0xff] %vm2431_vm12, %v2354_v0  ;;  %v2723_v1 = vadd.f32 %v7822_v50, %v2722_v8  ;;  %v5255_v32 = vpop.f32.mrb[7].mxu0  ;;  %v3417_v37 = vsel %vm460_vm1, %v3415_v16, %v3416_v42  ;;  %v2563_v54 = vpack.c.bf16 %v2533_v26, %v2532_v31 }
 0x3db   : > { %3495 = vrot.lane.b32.xlu0 %v3417_v37, %s5541_s11  ;;  %v7846_v38 = vsel %vm804_vm2, %v3624_v24, %v3625_v62  ;;  %v1919_v63 = vpop.permute.xlu1 %1918 }
 0x3dc   : > { %v3282_v41 = vmul.f32 0.0, %v2928_v53  ;;  %v2929_v43 = vmax.f32 %v2723_v1, 0.0  ;;  %5341 = vmatmul.mubr.msk.bf16.gmra.mrb[4].mxu1 %vm2589_vm13, %v2563_v54  ;;  %2032 = vst.msk [vmem:[#allocation2 + $0x188] sm:$0xff] %vm1982_vm10, %v1919_v63 }
 0x3dd   : > { %v1917_v45 = vpop.permute.xlu0 %1916  ;;  %5344 = vmatprep.mubr.msk.bf16.mxu1 %vm5540_vm9, %v5536_v44 }
 0x3de   : > { %v3418_v4 = vrot.slane %v3282_v41, 1  ;;  %v3627_v28 = vrot.slane %v3282_v41, 2  ;;  %v7853_v61 = vmul.f32 %v7842_v36, %v2929_v43  ;;  %2031 = vst.msk [vmem:[#allocation2 + $0x180] sm:$0xff] %vm1982_vm10, %v1917_v45 }
 0x3df   : > { %v2727_v22 = vpop.f32.mrb[8].mxu0  ;;  %v2144_v39 = vpop.permute.xlu1 %2143 }
 0x3e0   : > { %v2728_v49 = vadd.f32 %v7822_v50, %v2727_v22  ;;  %v5258_v59 = vpop.f32.mrb[9].mxu0  ;;  %v3419_v6 = vsel %vm460_vm1, %v3416_v42, %v3418_v4  ;;  %v2529_v2 = vld [vmem:[#allocation2 + $0x158] sm:$0xff]  ;;  %3337 = vst.msk [vmem:[#allocation3 + $0x20] sm:$0xff] %vm3334_vm14, %v7853_v61  ;;  %v7861_v12 = vsel %vm804_vm2, %v3625_v62, %v3627_v28  ;;  %v3420_v10 = vrot.slane %v7853_v61, 1 }
 0x3e1   : > { %2257 = vst.msk [vmem:[#allocation2 + $0x188] sm:$0xff] %vm2207_vm11, %v2144_v39  ;;  %v2142_v55 = vpop.permute.xlu0 %2141  ;;  %3497 = vrot.lane.b32.xlu1 %v3419_v6, %s5541_s11  ;;  %v2730_v56 = vpop.f32.mrb[10].mxu0  ;;  %v2528_v15 = vld [vmem:[#allocation2 + $0x150] sm:$0xff] }
 0x3e2   : > { %v7865_v7 = vmax.f32 %v2728_v49, 0.0  ;;  %2256 = vst.msk [vmem:[#allocation2 + $0x180] sm:$0xff] %vm2207_vm11, %v2142_v55  ;;  %v2731_v46 = vadd.f32 %v7822_v50, %v2730_v56  ;;  %v5259_v34 = vpop.f32.mrb[11].mxu0  ;;  %v2561_v3 = vpack.c.bf16 %v2529_v2, %v2528_v15 }
 0x3e3   : > { %v2368_v57 = vpop.permute.xlu1 %2367 }
 0x3e4   : > { %v2931_v5 = vmax.f32 %v2731_v46, 0.0  ;;  %5333 = vmatmul.mubr.msk.bf16.gmra.mrb[84].mxu0 %vm2589_vm13, %v2561_v3  ;;  %v3421_v11 = vrot.slane %v7865_v7, 1  ;;  %3338 = vst.msk [vmem:[#allocation3 + $0x30] sm:$0xff] %vm3334_vm14, %v7865_v7 }
 0x3e5   : > { %2481 = vst.msk [vmem:[#allocation2 + $0x188] sm:$0xff] %vm2431_vm12, %v2368_v57  ;;  %v2366_v14 = vpop.permute.xlu0 %2365 }
 0x3e6   : > { %v7879_v35 = vmul.f32 %v7870_v58, %v2931_v5  ;;  %2480 = vst.msk [vmem:[#allocation2 + $0x180] sm:$0xff] %vm2431_vm12, %v2366_v14  ;;  %v7883_v13 = vsel %vm460_vm1, %v3420_v10, %v3421_v11 }
 0x3e7   : > { %3499 = vrot.lane.b32.xlu0 %v7883_v13, %s5541_s11  ;;  %v2735_v30 = vpop.f32.mrb[12].mxu0  ;;  %v1923_v51 = vpop.permute.xlu1 %1922 }
 0x3e8   : > { %v3423_v29 = vrot.slane %v7879_v35, 1  ;;  %v2736_v25 = vadd.f32 %v7822_v50, %v2735_v30  ;;  %v5262_v21 = vpop.f32.mrb[13].mxu0  ;;  %2034 = vst.msk [vmem:[#allocation2 + $0x198] sm:$0xff] %vm1982_vm10, %v1923_v51 }
 0x3e9   : > { %v1921_v33 = vpop.permute.xlu0 %1920  ;;  %v2738_v52 = vpop.f32.mrb[14].mxu0 }
 0x3ea   : > { %v2932_v23 = vmax.f32 %v2736_v25, 0.0  ;;  %2033 = vst.msk [vmem:[#allocation2 + $0x190] sm:$0xff] %vm1982_vm10, %v1921_v33  ;;  %v2739_v9 = vadd.f32 %v7822_v50, %v2738_v52  ;;  %v5263_v27 = vpop.f32.mrb[15].mxu0  ;;  %v7893_v17 = vsel %vm460_vm1, %v3421_v11, %v3423_v29 }
 0x3eb   : > { %3501 = vrot.lane.b32.xlu1 %v7893_v17, %s5541_s11  ;;  %v2148_v18 = vpop.permute.xlu1 %2147 }
 0x3ec   : > { %v7898_v19 = vmul.f32 %v7842_v36, %v2932_v23  ;;  %v7900_v48 = vmax.f32 %v2739_v9, 0.0  ;;  %v2535_v16 = vld [vmem:[#allocation2 + $0x188] sm:$0xff]  ;;  %2259 = vst.msk [vmem:[#allocation2 + $0x198] sm:$0xff] %vm2207_vm11, %v2148_v18 }
 0x3ed   : > { %v2146_v42 = vpop.permute.xlu0 %2145  ;;  %v2534_v62 = vld [vmem:[#allocation2 + $0x180] sm:$0xff] }
 0x3ee   : > { %v3634_v40 = vrot.slane %v7898_v19, 2  ;;  %v3635_v20 = vrot.slane %v7900_v48, 2  ;;  %3339 = vst.msk [vmem:[#allocation3 + $0x40] sm:$0xff] %vm3334_vm14, %v7898_v19  ;;  %3340 = vst.msk [vmem:[#allocation3 + $0x50] sm:$0xff] %vm3334_vm14, %v7900_v48  ;;  %v3425_v60 = vrot.slane %v7898_v19, 1  ;;  %v3426_v26 = vrot.slane %v7900_v48, 1 }
 0x3ef   : > { %2258 = vst.msk [vmem:[#allocation2 + $0x190] sm:$0xff] %vm2207_vm11, %v2146_v42  ;;  %v2743_v24 = vpop.f32.mrb[16].mxu0  ;;  %v2564_v0 = vpack.c.bf16 %v2535_v16, %v2534_v62  ;;  %v2372_v1 = vpop.permute.xlu1 %2371 }
 0x3f0   : > { %v7913_v8 = vsel %vm804_vm2, %v3634_v40, %v3635_v20  ;;  %v2744_v31 = vadd.f32 %v7822_v50, %v2743_v24  ;;  %v5266_v53 = vpop.f32.mrb[17].mxu0  ;;  %v7917_v32 = vsel %vm460_vm1, %v3425_v60, %v3426_v26  ;;  %2483 = vst.msk [vmem:[#allocation2 + $0x198] sm:$0xff] %vm2431_vm12, %v2372_v1 }
 0x3f1   : > { %4536 = vst.msk [vmem:[#allocation3 + $0x8] sm:$0xff] %vm3334_vm14, %v7913_v8  ;;  %v2370_v37 = vpop.permute.xlu0 %2369  ;;  %3503 = vrot.lane.b32.xlu0 %v7917_v32, %s5541_s11  ;;  %v2746_v54 = vpop.f32.mrb[18].mxu0  ;;  %5345 = vmatmul.mubr.msk.bf16.gmra.mrb[8].mxu1 %vm2589_vm13, %v2564_v0 }
 0x3f2   : > { %v2934_v41 = vmax.f32 %v2744_v31, 0.0  ;;  %2482 = vst.msk [vmem:[#allocation2 + $0x190] sm:$0xff] %vm2431_vm12, %v2370_v37  ;;  %v2747_v43 = vadd.f32 %v7822_v50, %v2746_v54  ;;  %v5267_v63 = vpop.f32.mrb[19].mxu0  ;;  %5348 = vmatprep.mubr.msk.bf16.mxu1 %vm5540_vm9, %v5536_v44 }
 0x3f3   : > { %v1927_v4 = vpop.permute.xlu1 %1926 }
 0x3f4   : > { %v3288_v47 = vmul.f32 %v7870_v58, %v2934_v41  ;;  %v2935_v45 = vmax.f32 %v2747_v43, 0.0  ;;  %2036 = vst.msk [vmem:[#allocation2 + $0x1a8] sm:$0xff] %vm1982_vm10, %v1927_v4 }
 0x3f5   : > { %v1925_v28 = vpop.permute.xlu0 %1924 }
 0x3f6   : > { %v3428_v22 = vrot.slane %v3288_v47, 1  ;;  %v3637_v49 = vrot.slane %v3288_v47, 2  ;;  %v7932_v59 = vmul.f32 %v7842_v36, %v2935_v45  ;;  %2035 = vst.msk [vmem:[#allocation2 + $0x1a0] sm:$0xff] %vm1982_vm10, %v1925_v28 }
 0x3f7   : > { %v2751_v39 = vpop.f32.mrb[20].mxu0  ;;  %v2152_v56 = vpop.permute.xlu1 %2151  ;;  %v2537_v46 = vld [vmem:[#allocation2 + $0x198] sm:$0xff] }
 0x3f8   : > { %v7936_v6 = vsel %vm804_vm2, %v3635_v20, %v3637_v49  ;;  %3341 = vst.msk [vmem:[#allocation3 + $0x60] sm:$0xff] %vm3334_vm14, %v7932_v59  ;;  %v2752_v2 = vadd.f32 %v7822_v50, %v2751_v39  ;;  %v5270_v55 = vpop.f32.mrb[21].mxu0  ;;  %v7942_v15 = vsel %vm460_vm1, %v3426_v26, %v3428_v22  ;;  %v3430_v30 = vrot.slane %v7932_v59, 1  ;;  %v4569_v43 = vld [vmem:[#allocation3 + $0x8] sm:$0xff] }
 0x3f9   : > { %4537 = vst.msk [vmem:[#allocation3 + $0x18] sm:$0xff] %vm3334_vm14, %v7936_v6  ;;  %v2150_v34 = vpop.permute.xlu0 %2149  ;;  %3505 = vrot.lane.b32.xlu1 %v7942_v15, %s5541_s11  ;;  %v2754_v3 = vpop.f32.mrb[22].mxu0  ;;  %v2536_v5 = vld [vmem:[#allocation2 + $0x190] sm:$0xff]  ;;  %v3639_v33 = vrot.slane %v7932_v59, 2 }
 0x3fa   : > { %2261 = vst.msk [vmem:[#allocation2 + $0x1a8] sm:$0xff] %vm2207_vm11, %v2152_v56  ;;  %v7949_v57 = vmax.f32 %v2752_v2, 0.0  ;;  %2260 = vst.msk [vmem:[#allocation2 + $0x1a0] sm:$0xff] %vm2207_vm11, %v2150_v34  ;;  %v2755_v10 = vadd.f32 %v7822_v50, %v2754_v3  ;;  %v5271_v11 = vpop.f32.mrb[23].mxu0  ;;  %v2565_v14 = vpack.c.bf16 %v2537_v46, %v2536_v5 }
 0x3fb   : > { %v2376_v25 = vpop.permute.xlu1 %2375 }
 0x3fc   : > { %3342 = vst.msk [vmem:[#allocation3 + $0x70] sm:$0xff] %vm3334_vm14, %v7949_v57  ;;  %v2937_v29 = vmax.f32 %v2755_v10, 0.0  ;;  %v3431_v21 = vrot.slane %v7949_v57, 1  ;;  %5349 = vmatmul.mubr.msk.bf16.gmra.mrb[12].mxu1 %vm2589_vm13, %v2565_v14  ;;  %v3640_v51 = vrot.slane %v7949_v57, 2 }
 0x3fd   : > { %2485 = vst.msk [vmem:[#allocation2 + $0x1a8] sm:$0xff] %vm2431_vm12, %v2376_v25  ;;  %v2374_v52 = vpop.permute.xlu0 %2373  ;;  %5352 = vmatprep.mubr.msk.bf16.mxu1 %vm5540_vm9, %v5536_v44 }
 0x3fe   : > { %v3291_v23 = vmul.f32 %v7870_v58, %v2937_v29  ;;  %2484 = vst.msk [vmem:[#allocation2 + $0x1a0] sm:$0xff] %vm2431_vm12, %v2374_v52  ;;  %v7966_v9 = vsel %vm460_vm1, %v3430_v30, %v3431_v21  ;;  %v7969_v27 = vsel %vm804_vm2, %v3639_v33, %v3640_v51 }
 0x3ff   : > { %3507 = vrot.lane.b32.xlu0 %v7966_v9, %s5541_s11  ;;  %v2759_v18 = vpop.f32.mrb[24].mxu0  ;;  %4538 = vst.msk [vmem:[#allocation3 + $0x28] sm:$0xff] %vm3334_vm14, %v7969_v27 }
 0x400   : > { %v3433_v16 = vrot.slane %v3291_v23, 1  ;;  %v3642_v42 = vrot.slane %v3291_v23, 2  ;;  %v2760_v44 = vadd.f32 %v7822_v50, %v2759_v18  ;;  %v5274_v62 = vpop.f32.mrb[25].mxu0  ;;  %v4571_v37 = vld [vmem:[#allocation3 + $0x18] sm:$0xff] }
 0x401   : > { %v2762_v40 = vpop.f32.mrb[26].mxu0  ;;  %v4633_v28 = vpack.c.bf16 %v4571_v37, %v4569_v43 }
 0x402   : > { %v2938_v20 = vmax.f32 %v2760_v44, 0.0  ;;  %v2763_v60 = vadd.f32 %v7822_v50, %v2762_v40  ;;  %v5275_v26 = vpop.f32.mrb[27].mxu0  ;;  %v7978_v24 = vsel %vm460_vm1, %v3431_v21, %v3433_v16  ;;  %v7981_v0 = vsel %vm804_vm2, %v3640_v51, %v3642_v42 }
 0x403   : > { %3509 = vrot.lane.b32.xlu1 %v7978_v24, %s5541_s11  ;;  %4539 = vst.msk [vmem:[#allocation3 + $0x38] sm:$0xff] %vm3334_vm14, %v7981_v0 }
 0x404   : > { %v7988_v31 = vmul.f32 %v7842_v36, %v2938_v20  ;;  %v7990_v53 = vmax.f32 %v2763_v60, 0.0  ;;  %v2539_v1 = vld [vmem:[#allocation2 + $0x1a8] sm:$0xff] }
 0x405   : > { %v2538_v54 = vld [vmem:[#allocation2 + $0x1a0] sm:$0xff] }
 0x406   : > { %3343 = vst.msk [vmem:[#allocation3 + $0x80] sm:$0xff] %vm3334_vm14, %v7988_v31  ;;  %3344 = vst.msk [vmem:[#allocation3 + $0x90] sm:$0xff] %vm3334_vm14, %v7990_v53  ;;  %v2566_v41 = vpack.c.bf16 %v2539_v1, %v2538_v54  ;;  %v3435_v63 = vrot.slane %v7988_v31, 1  ;;  %v3436_v47 = vrot.slane %v7990_v53, 1  ;;  %v3644_v45 = vrot.slane %v7988_v31, 2 }
 0x407   : > { %v2767_v4 = vpop.f32.mrb[28].mxu0  ;;  %v3645_v22 = vrot.slane %v7990_v53, 2 }
 0x408   : > { %v2768_v49 = vadd.f32 %v7822_v50, %v2767_v4  ;;  %v5278_v39 = vpop.f32.mrb[29].mxu0  ;;  %5353 = vmatmul.mubr.msk.bf16.gmra.mrb[16].mxu1 %vm2589_vm13, %v2566_v41  ;;  %v8003_v2 = vsel %vm460_vm1, %v3435_v63, %v3436_v47 }
 0x409   : > { %5193 = vmatprep.mubr.msk.bf16.mxu1 %vm3334_vm14, %v4633_v28  ;;  %3511 = vrot.lane.b32.xlu0 %v8003_v2, %s5541_s11  ;;  %v2770_v55 = vpop.f32.mrb[30].mxu0  ;;  %v8009_v56 = vsel %vm804_vm2, %v3644_v45, %v3645_v22 }
 0x40a   : > { %v2940_v46 = vmax.f32 %v2768_v49, 0.0  ;;  %v2771_v34 = vadd.f32 %v7822_v50, %v2770_v55  ;;  %v5279_v3 = vpop.f32.mrb[31].mxu0  ;;  %4540 = vst.msk [vmem:[#allocation3 + $0x48] sm:$0xff] %vm3334_vm14, %v8009_v56 }
 0x40c   : > { %v3294_v5 = vmul.f32 %v7870_v58, %v2940_v46  ;;  %v2941_v10 = vmax.f32 %v2771_v34, 0.0 }
 0x40e   : > { %v3438_v11 = vrot.slane %v3294_v5, 1  ;;  %v3647_v14 = vrot.slane %v3294_v5, 2  ;;  %v8016_v30 = vmul.f32 %v7842_v36, %v2941_v10 }
 0x40f   : > { %v2775_v29 = vpop.f32.mrb[32].mxu0 }
 0x410   : > { %3345 = vst.msk [vmem:[#allocation3 + $0xa0] sm:$0xff] %vm3334_vm14, %v8016_v30  ;;  %v2776_v25 = vadd.f32 %v7822_v50, %v2775_v29  ;;  %v5282_v21 = vpop.f32.mrb[33].mxu0  ;;  %v8022_v51 = vsel %vm460_vm1, %v3436_v47, %v3438_v11  ;;  %v8025_v33 = vsel %vm804_vm2, %v3645_v22, %v3647_v14  ;;  %v3440_v42 = vrot.slane %v8016_v30, 1 }
 0x411   : > { %3513 = vrot.lane.b32.xlu1 %v8022_v51, %s5541_s11  ;;  %v2778_v52 = vpop.f32.mrb[34].mxu0  ;;  %4541 = vst.msk [vmem:[#allocation3 + $0x58] sm:$0xff] %vm3334_vm14, %v8025_v33  ;;  %v3649_v20 = vrot.slane %v8016_v30, 2 }
 0x412   : > { %v8031_v23 = vmax.f32 %v2776_v25, 0.0  ;;  %v2779_v18 = vadd.f32 %v7822_v50, %v2778_v52  ;;  %v5283_v16 = vpop.f32.mrb[35].mxu0 }
 0x414   : > { %3346 = vst.msk [vmem:[#allocation3 + $0xb0] sm:$0xff] %vm3334_vm14, %v8031_v23  ;;  %v2943_v44 = vmax.f32 %v2779_v18, 0.0  ;;  %v3441_v62 = vrot.slane %v8031_v23, 1  ;;  %v3650_v40 = vrot.slane %v8031_v23, 2 }
 0x416   : > { %v3297_v60 = vmul.f32 %v7870_v58, %v2943_v44  ;;  %v8042_v26 = vsel %vm460_vm1, %v3440_v42, %v3441_v62  ;;  %v8045_v1 = vsel %vm804_vm2, %v3649_v20, %v3650_v40 }
 0x417   : > { %3515 = vrot.lane.b32.xlu0 %v8042_v26, %s5541_s11  ;;  %v2783_v37 = vpop.f32.mrb[36].mxu0  ;;  %4542 = vst.msk [vmem:[#allocation3 + $0x68] sm:$0xff] %vm3334_vm14, %v8045_v1 }
 0x418   : > { %v3443_v54 = vrot.slane %v3297_v60, 1  ;;  %v3652_v41 = vrot.slane %v3297_v60, 2  ;;  %v2784_v43 = vadd.f32 %v7822_v50, %v2783_v37  ;;  %v5286_v63 = vpop.f32.mrb[37].mxu0 }
 0x419   : > { %v2786_v47 = vpop.f32.mrb[38].mxu0 }
 0x41a   : > { %v2944_v45 = vmax.f32 %v2784_v43, 0.0  ;;  %v2787_v4 = vadd.f32 %v7822_v50, %v2786_v47  ;;  %v5287_v28 = vpop.f32.mrb[39].mxu0  ;;  %v8054_v22 = vsel %vm460_vm1, %v3441_v62, %v3443_v54  ;;  %v8057_v49 = vsel %vm804_vm2, %v3650_v40, %v3652_v41 }
 0x41b   : > { %3517 = vrot.lane.b32.xlu1 %v8054_v22, %s5541_s11  ;;  %4543 = vst.msk [vmem:[#allocation3 + $0x78] sm:$0xff] %vm3334_vm14, %v8057_v49 }
 0x41c   : > { %v8064_v39 = vmul.f32 %v7842_v36, %v2944_v45  ;;  %v8066_v55 = vmax.f32 %v2787_v4, 0.0 }
 0x41e   : > { %3347 = vst.msk [vmem:[#allocation3 + $0xc0] sm:$0xff] %vm3334_vm14, %v8064_v39  ;;  %3348 = vst.msk [vmem:[#allocation3 + $0xd0] sm:$0xff] %vm3334_vm14, %v8066_v55  ;;  %v3445_v46 = vrot.slane %v8064_v39, 1  ;;  %v3446_v34 = vrot.slane %v8066_v55, 1  ;;  %v3655_v3 = vrot.slane %v8066_v55, 2  ;;  %v3654_v5 = vrot.slane %v8064_v39, 2 }
 0x41f   : > { %v2791_v10 = vpop.f32.mrb[40].mxu0 }
 0x420   : > { %v2792_v11 = vadd.f32 %v7822_v50, %v2791_v10  ;;  %v5290_v14 = vpop.f32.mrb[41].mxu0  ;;  %v8078_v29 = vsel %vm460_vm1, %v3445_v46, %v3446_v34  ;;  %v8081_v25 = vsel %vm804_vm2, %v3654_v5, %v3655_v3 }
 0x421   : > { %3519 = vrot.lane.b32.xlu0 %v8078_v29, %s5541_s11  ;;  %v2794_v21 = vpop.f32.mrb[42].mxu0  ;;  %4544 = vst.msk [vmem:[#allocation3 + $0x88] sm:$0xff] %vm3334_vm14, %v8081_v25 }
 0x422   : > { %v2946_v52 = vmax.f32 %v2792_v11, 0.0  ;;  %v2795_v18 = vadd.f32 %v7822_v50, %v2794_v21  ;;  %v5291_v16 = vpop.f32.mrb[43].mxu0 }
 0x424   : > { %v3300_v42 = vmul.f32 %v7870_v58, %v2946_v52  ;;  %v2947_v44 = vmax.f32 %v2795_v18, 0.0 }
 0x426   : > { %v3448_v62 = vrot.slane %v3300_v42, 1  ;;  %v3657_v40 = vrot.slane %v3300_v42, 2  ;;  %v8090_v20 = vmul.f32 %v7842_v36, %v2947_v44 }
 0x427   : > { %v2799_v60 = vpop.f32.mrb[44].mxu0 }
 0x428   : > { %3349 = vst.msk [vmem:[#allocation3 + $0xe0] sm:$0xff] %vm3334_vm14, %v8090_v20  ;;  %v2800_v37 = vadd.f32 %v7822_v50, %v2799_v60  ;;  %v5294_v54 = vpop.f32.mrb[45].mxu0  ;;  %v8096_v41 = vsel %vm460_vm1, %v3446_v34, %v3448_v62  ;;  %v8099_v43 = vsel %vm804_vm2, %v3655_v3, %v3657_v40  ;;  %v3450_v28 = vrot.slane %v8090_v20, 1 }
 0x429   : > { %3521 = vrot.lane.b32.xlu1 %v8096_v41, %s5541_s11  ;;  %v2802_v63 = vpop.f32.mrb[46].mxu0  ;;  %4545 = vst.msk [vmem:[#allocation3 + $0x98] sm:$0xff] %vm3334_vm14, %v8099_v43  ;;  %v3659_v5 = vrot.slane %v8090_v20, 2 }
 0x42a   : > { %v8105_v47 = vmax.f32 %v2800_v37, 0.0  ;;  %v2803_v45 = vadd.f32 %v7822_v50, %v2802_v63  ;;  %v5295_v4 = vpop.f32.mrb[47].mxu0 }
 0x42c   : > { %3350 = vst.msk [vmem:[#allocation3 + $0xf0] sm:$0xff] %vm3334_vm14, %v8105_v47  ;;  %v2949_v46 = vmax.f32 %v2803_v45, 0.0  ;;  %v3451_v34 = vrot.slane %v8105_v47, 1  ;;  %v3660_v3 = vrot.slane %v8105_v47, 2 }
 0x42e   : > { %v3303_v10 = vmul.f32 %v7870_v58, %v2949_v46  ;;  %v8116_v11 = vsel %vm460_vm1, %v3450_v28, %v3451_v34  ;;  %v8119_v14 = vsel %vm804_vm2, %v3659_v5, %v3660_v3 }
 0x42f   : > { %3523 = vrot.lane.b32.xlu0 %v8116_v11, %s5541_s11  ;;  %4546 = vst.msk [vmem:[#allocation3 + $0xa8] sm:$0xff] %vm3334_vm14, %v8119_v14 }
 0x430   : > { %v3453_v21 = vrot.slane %v3303_v10, 1  ;;  %v3662_v52 = vrot.slane %v3303_v10, 2 }
 0x432   : > { %v8126_v18 = vsel %vm460_vm1, %v3451_v34, %v3453_v21  ;;  %v8129_v16 = vsel %vm804_vm2, %v3660_v3, %v3662_v52 }
 0x433   : > { %3525 = vrot.lane.b32.xlu1 %v8126_v18, %s5541_s11  ;;  %v2807_v42 = vpop.f32.mrb[48].mxu0  ;;  %4547 = vst.msk [vmem:[#allocation3 + $0xb8] sm:$0xff] %vm3334_vm14, %v8129_v16 }
 0x434   : > { %v2808_v44 = vadd.f32 %v7822_v50, %v2807_v42  ;;  %v5298_v62 = vpop.f32.mrb[49].mxu0 }
 0x435   : > { %v2810_v40 = vpop.f32.mrb[50].mxu0 }
 0x436   : > { %v2950_v60 = vmax.f32 %v2808_v44, 0.0  ;;  %v2811_v37 = vadd.f32 %v7822_v50, %v2810_v40  ;;  %v5299_v54 = vpop.f32.mrb[51].mxu0 }
 0x438   : > { %v8138_v63 = vmul.f32 %v7842_v36, %v2950_v60  ;;  %v8140_v45 = vmax.f32 %v2811_v37, 0.0 }
 0x43a   : > { %9903 = vst [vmem:[#allocation15_spill] sm:$0xff] %v8138_v63  ;;  %9904 = vst [vmem:[#allocation7_spill] sm:$0xff] %v8140_v45  ;;  %v3455_v4 = vrot.slane %v8138_v63, 1  ;;  %v3456_v28 = vrot.slane %v8140_v45, 1  ;;  %v3665_v46 = vrot.slane %v8140_v45, 2  ;;  %v3664_v34 = vrot.slane %v8138_v63, 2 }
 0x43b   : > { %3351 = vst.msk [vmem:[#allocation3 + $0x100] sm:$0xff] %vm3334_vm14, %v8138_v63  ;;  %3352 = vst.msk [vmem:[#allocation3 + $0x110] sm:$0xff] %vm3334_vm14, %v8140_v45 }
 0x43c   : > { %v8151_v3 = vsel %vm460_vm1, %v3455_v4, %v3456_v28  ;;  %v8154_v5 = vsel %vm804_vm2, %v3664_v34, %v3665_v46 }
 0x43d   : > { %9905 = vst [vmem:[#allocation19_spill] sm:$0xff] %v8151_v3  ;;  %9906 = vst [vmem:[#allocation14_spill] sm:$0xff] %v8154_v5  ;;  %3527 = vrot.lane.b32.xlu0 %v8151_v3, %s5541_s11 }
 0x43e   : > { %4548 = vst.msk [vmem:[#allocation3 + $0xc8] sm:$0xff] %vm3334_vm14, %v8154_v5 }
 0x43f   : > { %v2815_v10 = vpop.f32.mrb[52].mxu0 }
 0x440   : > { %v2816_v21 = vadd.f32 %v7822_v50, %v2815_v10  ;;  %v5302_v52 = vpop.f32.mrb[53].mxu0 }
 0x441   : > { %v2818_v42 = vpop.f32.mrb[54].mxu0 }
 0x442   : > { %v2952_v44 = vmax.f32 %v2816_v21, 0.0  ;;  %v2819_v62 = vadd.f32 %v7822_v50, %v2818_v42  ;;  %v5303_v40 = vpop.f32.mrb[55].mxu0 }
 0x444   : > { %v3306_v60 = vmul.f32 %v7870_v58, %v2952_v44  ;;  %v2953_v37 = vmax.f32 %v2819_v62, 0.0 }
 0x446   : > { %v3458_v54 = vrot.slane %v3306_v60, 1  ;;  %v3667_v4 = vrot.slane %v3306_v60, 2  ;;  %v8164_v34 = vmul.f32 %v7842_v36, %v2953_v37 }
 0x448   : > { %9907 = vst [vmem:[#allocation30_spill] sm:$0xff] %v8164_v34  ;;  %3353 = vst.msk [vmem:[#allocation3 + $0x120] sm:$0xff] %vm3334_vm14, %v8164_v34  ;;  %v8169_v5 = vsel %vm460_vm1, %v3456_v28, %v3458_v54  ;;  %v8172_v10 = vsel %vm804_vm2, %v3665_v46, %v3667_v4  ;;  %v3460_v60 = vrot.slane %v8164_v34, 1 }
 0x449   : > { %9908 = vst [vmem:[#allocation17_spill] sm:$0xff] %v8169_v5  ;;  %9909 = vst [vmem:[#allocation42_spill] sm:$0xff] %v8172_v10  ;;  %3529 = vrot.lane.b32.xlu1 %v8169_v5, %s5541_s11 }
 0x44a   : > { %4549 = vst.msk [vmem:[#allocation3 + $0xd8] sm:$0xff] %vm3334_vm14, %v8172_v10 }
 0x44b   : > { %v2823_v21 = vpop.f32.mrb[56].mxu0 }
 0x44c   : > { %v2824_v52 = vadd.f32 %v7822_v50, %v2823_v21  ;;  %v5306_v42 = vpop.f32.mrb[57].mxu0  ;;  %v3669_v21 = vrot.slane %v8164_v34, 2 }
 0x44d   : > { %v3496_v44 = vpop.permute.xlu0 %3495  ;;  %v2826_v62 = vpop.f32.mrb[58].mxu0 }
 0x44e   : > { %v8179_v40 = vmax.f32 %v2824_v52, 0.0  ;;  %3592 = vst.msk [vmem:[#allocation3] sm:$0xff] %vm3591_vm3, %v3496_v44  ;;  %v2827_v28 = vadd.f32 %v7822_v50, %v2826_v62  ;;  %v5307_v46 = vpop.f32.mrb[59].mxu0 }
 0x450   : > { %9910 = vst [vmem:[#allocation27_spill] sm:$0xff] %v8179_v40  ;;  %3354 = vst.msk [vmem:[#allocation3 + $0x130] sm:$0xff] %vm3334_vm14, %v8179_v40  ;;  %v2955_v37 = vmax.f32 %v2827_v28, 0.0  ;;  %v3461_v54 = vrot.slane %v8179_v40, 1  ;;  %v3670_v4 = vrot.slane %v8179_v40, 2 }
 0x452   : > { %v3309_v52 = vmul.f32 %v7870_v58, %v2955_v37  ;;  %v8191_v42 = vsel %vm460_vm1, %v3460_v60, %v3461_v54  ;;  %v8194_v44 = vsel %vm804_vm2, %v3669_v21, %v3670_v4 }
 0x453   : > { %9911 = vst [vmem:[#allocation52_spill] sm:$0xff] %v8191_v42  ;;  %9912 = vst [vmem:[#allocation38_spill] sm:$0xff] %v8194_v44  ;;  %v3498_v62 = vpop.permute.xlu1 %3497  ;;  %3531 = vrot.lane.b32.xlu0 %v8191_v42, %s5541_s11 }
 0x454   : > { %4550 = vst.msk [vmem:[#allocation3 + $0xe8] sm:$0xff] %vm3334_vm14, %v8194_v44  ;;  %v3463_v28 = vrot.slane %v3309_v52, 1  ;;  %v3672_v46 = vrot.slane %v3309_v52, 2 }
 0x455   : > { %3593 = vst.msk [vmem:[#allocation3 + $0x10] sm:$0xff] %vm3591_vm3, %v3498_v62 }
 0x456   : > { %v8202_v34 = vsel %vm460_vm1, %v3461_v54, %v3463_v28  ;;  %v8205_v60 = vsel %vm804_vm2, %v3670_v4, %v3672_v46 }
 0x457   : > { %9913 = vst [vmem:[#allocation54_spill] sm:$0xff] %v8202_v34  ;;  %9914 = vst [vmem:[#allocation49_spill] sm:$0xff] %v8205_v60  ;;  %3533 = vrot.lane.b32.xlu1 %v8202_v34, %s5541_s11  ;;  %v2831_v37 = vpop.f32.mrb[60].mxu0 }
 0x458   : > { %4551 = vst.msk [vmem:[#allocation3 + $0xf8] sm:$0xff] %vm3334_vm14, %v8205_v60  ;;  %v2832_v21 = vadd.f32 %v7822_v50, %v2831_v37  ;;  %v5310_v44 = vpop.f32.mrb[61].mxu0 }
 0x459   : > { %v3500_v42 = vpop.permute.xlu0 %3499  ;;  %v2834_v52 = vpop.f32.mrb[62].mxu0 }
 0x45a   : > { %v2956_v40 = vmax.f32 %v2832_v21, 0.0  ;;  %3594 = vst.msk [vmem:[#allocation3 + $0x20] sm:$0xff] %vm3591_vm3, %v3500_v42  ;;  %v2835_v54 = vadd.f32 %v7822_v50, %v2834_v52  ;;  %v5311_v62 = vpop.f32.mrb[63].mxu0 }
 0x45c   : > { %v8215_v4 = vmul.f32 %v7842_v36, %v2956_v40  ;;  %v8217_v28 = vmax.f32 %v2835_v54, 0.0 }
 0x45d   : > { %v3502_v46 = vpop.permute.xlu1 %3501 }
 0x45e   : > { %9915 = vst [vmem:[#allocation56_spill] sm:$0xff] %v8215_v4  ;;  %9916 = vst [vmem:[#allocation53_spill] sm:$0xff] %v8217_v28  ;;  %v3465_v44 = vrot.slane %v8215_v4, 1  ;;  %v3466_v42 = vrot.slane %v8217_v28, 1  ;;  %v3675_v37 = vrot.slane %v8217_v28, 2  ;;  %v3674_v40 = vrot.slane %v8215_v4, 2 }
 0x45f   : > { %3355 = vst.msk [vmem:[#allocation3 + $0x140] sm:$0xff] %vm3334_vm14, %v8215_v4  ;;  %3356 = vst.msk [vmem:[#allocation3 + $0x150] sm:$0xff] %vm3334_vm14, %v8217_v28 }
 0x460   : > { %3595 = vst.msk [vmem:[#allocation3 + $0x30] sm:$0xff] %vm3591_vm3, %v3502_v46  ;;  %v8229_v21 = vsel %vm460_vm1, %v3465_v44, %v3466_v42  ;;  %v8232_v52 = vsel %vm804_vm2, %v3674_v40, %v3675_v37 }
 0x461   : > { %9917 = vst [vmem:[#allocation55_spill] sm:$0xff] %v8229_v21  ;;  %9918 = vst [vmem:[#allocation95_spill] sm:$0xff] %v8232_v52  ;;  %3535 = vrot.lane.b32.xlu0 %v8229_v21, %s5541_s11 }
 0x462   : > { %4552 = vst.msk [vmem:[#allocation3 + $0x108] sm:$0xff] %vm3334_vm14, %v8232_v52 }
 0x463   : > { %v3504_v54 = vpop.permute.xlu0 %3503  ;;  %v2839_v62 = vpop.f32.mrb[64].mxu0 }
 0x464   : > { %3596 = vst.msk [vmem:[#allocation3 + $0x40] sm:$0xff] %vm3591_vm3, %v3504_v54  ;;  %v2840_v46 = vadd.f32 %v7822_v50, %v2839_v62  ;;  %v5314_v28 = vpop.f32.mrb[65].mxu0 }
 0x465   : > { %v2842_v4 = vpop.f32.mrb[66].mxu0 }
 0x466   : > { %v2958_v60 = vmax.f32 %v2840_v46, 0.0  ;;  %v2843_v44 = vadd.f32 %v7822_v50, %v2842_v4  ;;  %v5315_v34 = vpop.f32.mrb[67].mxu0 }
 0x468   : > { %v3312_v40 = vmul.f32 %v7870_v58, %v2958_v60  ;;  %v2959_v10 = vmax.f32 %v2843_v44, 0.0 }
 0x46a   : > { %v3468_v3 = vrot.slane %v3312_v40, 1  ;;  %v3677_v21 = vrot.slane %v3312_v40, 2  ;;  %v8243_v5 = vmul.f32 %v7842_v36, %v2959_v10 }
 0x46b   : > { %v3506_v52 = vpop.permute.xlu1 %3505 }
 0x46c   : > { %9919 = vst [vmem:[#allocation93_spill] sm:$0xff] %v8243_v5  ;;  %3357 = vst.msk [vmem:[#allocation3 + $0x160] sm:$0xff] %vm3334_vm14, %v8243_v5  ;;  %v8249_v28 = vsel %vm460_vm1, %v3466_v42, %v3468_v3  ;;  %v8252_v4 = vsel %vm804_vm2, %v3675_v37, %v3677_v21  ;;  %v3470_v37 = vrot.slane %v8243_v5, 1  ;;  %v3679_v40 = vrot.slane %v8243_v5, 2 }
 0x46d   : > { %3597 = vst.msk [vmem:[#allocation3 + $0x50] sm:$0xff] %vm3591_vm3, %v3506_v52  ;;  %9920 = vst [vmem:[#allocation97_spill] sm:$0xff] %v8249_v28  ;;  %3537 = vrot.lane.b32.xlu1 %v8249_v28, %s5541_s11 }
 0x46e   : > { %9921 = vst [vmem:[#allocation94_spill] sm:$0xff] %v8252_v4  ;;  %4553 = vst.msk [vmem:[#allocation3 + $0x118] sm:$0xff] %vm3334_vm14, %v8252_v4 }
 0x46f   : > { %v2847_v34 = vpop.f32.mrb[68].mxu0 }
 0x470   : > { %v2848_v10 = vadd.f32 %v7822_v50, %v2847_v34  ;;  %v5318_v60 = vpop.f32.mrb[69].mxu0 }
 0x471   : > { %v3508_v54 = vpop.permute.xlu0 %3507  ;;  %v2850_v62 = vpop.f32.mrb[70].mxu0 }
 0x472   : > { %v8259_v46 = vmax.f32 %v2848_v10, 0.0  ;;  %3598 = vst.msk [vmem:[#allocation3 + $0x60] sm:$0xff] %vm3591_vm3, %v3508_v54  ;;  %v2851_v3 = vadd.f32 %v7822_v50, %v2850_v62  ;;  %v5319_v42 = vpop.f32.mrb[71].mxu0 }
 0x474   : > { %9922 = vst [vmem:[#allocation8_spill] sm:$0xff] %v8259_v46  ;;  %3358 = vst.msk [vmem:[#allocation3 + $0x170] sm:$0xff] %vm3334_vm14, %v8259_v46  ;;  %v2961_v21 = vmax.f32 %v2851_v3, 0.0  ;;  %v3471_v52 = vrot.slane %v8259_v46, 1  ;;  %v3680_v44 = vrot.slane %v8259_v46, 2 }
 0x475   : > { %v3510_v34 = vpop.permute.xlu1 %3509 }
 0x476   : > { %v3315_v10 = vmul.f32 %v7870_v58, %v2961_v21  ;;  %3599 = vst.msk [vmem:[#allocation3 + $0x70] sm:$0xff] %vm3591_vm3, %v3510_v34  ;;  %v8272_v60 = vsel %vm460_vm1, %v3470_v37, %v3471_v52  ;;  %v8275_v54 = vsel %vm804_vm2, %v3679_v40, %v3680_v44 }
 0x477   : > { %9923 = vst [vmem:[#allocation96_spill] sm:$0xff] %v8272_v60  ;;  %9924 = vst [vmem:[#allocation99_spill] sm:$0xff] %v8275_v54  ;;  %3539 = vrot.lane.b32.xlu0 %v8272_v60, %s5541_s11 }
 0x478   : > { %4554 = vst.msk [vmem:[#allocation3 + $0x128] sm:$0xff] %vm3334_vm14, %v8275_v54  ;;  %v3473_v62 = vrot.slane %v3315_v10, 1  ;;  %v3682_v3 = vrot.slane %v3315_v10, 2 }
 0x47a   : > { %v8282_v42 = vsel %vm460_vm1, %v3471_v52, %v3473_v62  ;;  %v8285_v21 = vsel %vm804_vm2, %v3680_v44, %v3682_v3 }
 0x47b   : > { %9925 = vst [vmem:[#allocation98_spill] sm:$0xff] %v8282_v42  ;;  %9926 = vst [vmem:[#allocation20_spill] sm:$0xff] %v8285_v21  ;;  %v3512_v34 = vpop.permute.xlu0 %3511  ;;  %3541 = vrot.lane.b32.xlu1 %v8282_v42, %s5541_s11  ;;  %v2855_v37 = vpop.f32.mrb[72].mxu0 }
 0x47c   : > { %4555 = vst.msk [vmem:[#allocation3 + $0x138] sm:$0xff] %vm3334_vm14, %v8285_v21  ;;  %v2856_v40 = vadd.f32 %v7822_v50, %v2855_v37  ;;  %v5322_v54 = vpop.f32.mrb[73].mxu0 }
 0x47d   : > { %3600 = vst.msk [vmem:[#allocation3 + $0x80] sm:$0xff] %vm3591_vm3, %v3512_v34  ;;  %v2858_v10 = vpop.f32.mrb[74].mxu0 }
 0x47e   : > { %v2962_v60 = vmax.f32 %v2856_v40, 0.0  ;;  %v2859_v52 = vadd.f32 %v7822_v50, %v2858_v10  ;;  %v5323_v62 = vpop.f32.mrb[75].mxu0 }
 0x480   : > { %v8295_v44 = vmul.f32 %v7842_v36, %v2962_v60  ;;  %v8297_v3 = vmax.f32 %v2859_v52, 0.0 }
 0x482   : > { %9927 = vst [vmem:[#allocation11_spill] sm:$0xff] %v8295_v44  ;;  %9928 = vst [vmem:[#allocation100_spill] sm:$0xff] %v8297_v3  ;;  %v3475_v34 = vrot.slane %v8295_v44, 1  ;;  %v3476_v54 = vrot.slane %v8297_v3, 1  ;;  %v3685_v37 = vrot.slane %v8297_v3, 2  ;;  %v3684_v40 = vrot.slane %v8295_v44, 2 }
 0x483   : > { %3359 = vst.msk [vmem:[#allocation3 + $0x180] sm:$0xff] %vm3334_vm14, %v8295_v44  ;;  %3360 = vst.msk [vmem:[#allocation3 + $0x190] sm:$0xff] %vm3334_vm14, %v8297_v3  ;;  %v3514_v10 = vpop.permute.xlu1 %3513 }
 0x484   : > { %3601 = vst.msk [vmem:[#allocation3 + $0x90] sm:$0xff] %vm3591_vm3, %v3514_v10  ;;  %v8309_v60 = vsel %vm460_vm1, %v3475_v34, %v3476_v54  ;;  %v8312_v52 = vsel %vm804_vm2, %v3684_v40, %v3685_v37 }
 0x485   : > { %9929 = vst [vmem:[#allocation13_spill] sm:$0xff] %v8309_v60  ;;  %9930 = vst [vmem:[#allocation123_spill] sm:$0xff] %v8312_v52  ;;  %3543 = vrot.lane.b32.xlu0 %v8309_v60, %s5541_s11 }
 0x486   : > { %4556 = vst.msk [vmem:[#allocation3 + $0x148] sm:$0xff] %vm3334_vm14, %v8312_v52 }
 0x487   : > { %v2863_v62 = vpop.f32.mrb[76].mxu0 }
 0x488   : > { %v2864_v3 = vadd.f32 %v7822_v50, %v2863_v62  ;;  %v5326_v21 = vpop.f32.mrb[77].mxu0 }
 0x489   : > { %v3516_v44 = vpop.permute.xlu0 %3515  ;;  %v2866_v42 = vpop.f32.mrb[78].mxu0 }
 0x48a   : > { %v2964_v5 = vmax.f32 %v2864_v3, 0.0  ;;  %3602 = vst.msk [vmem:[#allocation3 + $0xa0] sm:$0xff] %vm3591_vm3, %v3516_v44  ;;  %v2867_v34 = vadd.f32 %v7822_v50, %v2866_v42  ;;  %v5327_v10 = vpop.f32.mrb[79].mxu0 }
 0x48c   : > { %v3318_v40 = vmul.f32 %v7870_v58, %v2964_v5  ;;  %v2965_v46 = vmax.f32 %v2867_v34, 0.0 }
 0x48d   : > { %v3518_v4 = vpop.permute.xlu1 %3517 }
 0x48e   : > { %v3478_v60 = vrot.slane %v3318_v40, 1  ;;  %v3687_v28 = vrot.slane %v3318_v40, 2  ;;  %v8323_v52 = vmul.f32 %v7842_v36, %v2965_v46  ;;  %3603 = vst.msk [vmem:[#allocation3 + $0xb0] sm:$0xff] %vm3591_vm3, %v3518_v4 }
 0x490   : > { %9931 = vst [vmem:[#allocation125_spill] sm:$0xff] %v8323_v52  ;;  %3361 = vst.msk [vmem:[#allocation3 + $0x1a0] sm:$0xff] %vm3334_vm14, %v8323_v52  ;;  %v8329_v21 = vsel %vm460_vm1, %v3476_v54, %v3478_v60  ;;  %v8332_v42 = vsel %vm804_vm2, %v3685_v37, %v3687_v28  ;;  %v3480_v40 = vrot.slane %v8323_v52, 1 }
 0x491   : > { %9932 = vst [vmem:[#allocation127_spill] sm:$0xff] %v8329_v21  ;;  %9933 = vst [vmem:[#allocation58_spill] sm:$0xff] %v8332_v42  ;;  %3545 = vrot.lane.b32.xlu1 %v8329_v21, %s5541_s11 }
 0x492   : > { %4557 = vst.msk [vmem:[#allocation3 + $0x158] sm:$0xff] %vm3334_vm14, %v8332_v42 }
 0x493   : > { %v3520_v5 = vpop.permute.xlu0 %3519 }
 0x494   : > { %3604 = vst.msk [vmem:[#allocation3 + $0xc0] sm:$0xff] %vm3591_vm3, %v3520_v5 }
 0x49b   : > { %v3522_v46 = vpop.permute.xlu1 %3521  ;;  %v2871_v4 = vpop.f32.mrb[80].mxu0 }
 0x49c   : > { %3605 = vst.msk [vmem:[#allocation3 + $0xd0] sm:$0xff] %vm3591_vm3, %v3522_v46  ;;  %v2872_v44 = vadd.f32 %v7822_v50, %v2871_v4  ;;  %v5330_v3 = vpop.f32.mrb[81].mxu0 }
 0x49d   : > { %v2874_v54 = vpop.f32.mrb[82].mxu0 }
 0x49e   : > { %v8341_v60 = vmax.f32 %v2872_v44, 0.0  ;;  %v2875_v28 = vadd.f32 %v7822_v50, %v2874_v54  ;;  %v5331_v37 = vpop.f32.mrb[83].mxu0  ;;  %v3689_v44 = vrot.slane %v8323_v52, 2  ;;  %v8354_v50 = vld [vmem:[%s9237_s2] ss:$0 sm:$0xff] }
 0x49f   : > { %v2887_v62 = vpop.f32.mrb[0].mxu1 }
 0x4a0   : > { %9934 = vst [vmem:[#allocation50_spill] sm:$0xff] %v8341_v60  ;;  %3362 = vst.msk [vmem:[#allocation3 + $0x1b0] sm:$0xff] %vm3334_vm14, %v8341_v60  ;;  %v2967_v34 = vmax.f32 %v2875_v28, 0.0  ;;  %v5338_v10 = vpop.f32.mrb[1].mxu1  ;;  %v3481_v5 = vrot.slane %v8341_v60, 1  ;;  %v3690_v46 = vrot.slane %v8341_v60, 2 }
 0x4a1   : > { %v2890_v4 = vpop.f32.mrb[2].mxu1  ;;  %v3524_v3 = vpop.permute.xlu0 %3523 }
 0x4a2   : > { %v3321_v42 = vmul.f32 %v7870_v58, %v2967_v34  ;;  %v2891_v54 = vadd.f32 %v8354_v50, %v2890_v4  ;;  %3606 = vst.msk [vmem:[#allocation3 + $0xe0] sm:$0xff] %vm3591_vm3, %v3524_v3  ;;  %v5339_v28 = vpop.f32.mrb[3].mxu1  ;;  %v8359_v37 = vsel %vm460_vm1, %v3480_v40, %v3481_v5  ;;  %v8364_v10 = vsel %vm804_vm2, %v3689_v44, %v3690_v46 }
 0x4a3   : > { %9935 = vst [vmem:[#allocation102_spill] sm:$0xff] %v8359_v37  ;;  %3547 = vrot.lane.b32.xlu0 %v8359_v37, %s5541_s11  ;;  %9936 = vst [vmem:[#allocation57_spill] sm:$0xff] %v8364_v10 }
 0x4a4   : > { %v3483_v34 = vrot.slane %v3321_v42, 1  ;;  %v3692_v52 = vrot.slane %v3321_v42, 2  ;;  %v2971_v60 = vmax.f32 %v2891_v54, 0.0  ;;  %4558 = vst.msk [vmem:[#allocation3 + $0x168] sm:$0xff] %vm3334_vm14, %v8364_v10 }
 0x4a5   : > { %v3526_v21 = vpop.permute.xlu1 %3525 }
 0x4a6   : > { %v8369_v4 = vmul.f32 %v7842_v36, %v2971_v60  ;;  %3607 = vst.msk [vmem:[#allocation3 + $0xf0] sm:$0xff] %vm3591_vm3, %v3526_v21  ;;  %v8373_v40 = vsel %vm460_vm1, %v3481_v5, %v3483_v34  ;;  %v8378_v3 = vsel %vm804_vm2, %v3690_v46, %v3692_v52  ;;  %v2888_v5 = vadd.f32 %v8354_v50, %v2887_v62 }
 0x4a7   : > { %9937 = vst [vmem:[#allocation60_spill] sm:$0xff] %v8373_v40  ;;  %3549 = vrot.lane.b32.xlu1 %v8373_v40, %s5541_s11  ;;  %9938 = vst [vmem:[#allocation101_spill] sm:$0xff] %v8378_v3 }
 0x4a8   : > { %3365 = vst.msk [vmem:[#allocation3 + $0x1e0] sm:$0xff] %vm3334_vm14, %v8369_v4  ;;  %4559 = vst.msk [vmem:[#allocation3 + $0x178] sm:$0xff] %vm3334_vm14, %v8378_v3  ;;  %v3699_v3 = vrot.slane %v8369_v4, 2 }
 0x4af   : > { %v2895_v42 = vpop.f32.mrb[4].mxu1  ;;  %v3528_v60 = vpop.permute.xlu0 %3527 }
 0x4b0   : > { %v2896_v44 = vadd.f32 %v8354_v50, %v2895_v42  ;;  %3608 = vst.msk [vmem:[#allocation3 + $0x100] sm:$0xff] %vm3591_vm3, %v3528_v60  ;;  %v5342_v21 = vpop.f32.mrb[5].mxu1  ;;  %v2970_v42 = vmax.f32 %v2888_v5, 0.0 }
 0x4b1   : > { %v2898_v54 = vpop.f32.mrb[6].mxu1 }
 0x4b2   : > { %v8387_v28 = vmax.f32 %v2896_v44, 0.0  ;;  %v2899_v52 = vadd.f32 %v8354_v50, %v2898_v54  ;;  %v5343_v46 = vpop.f32.mrb[7].mxu1 }
 0x4b4   : > { %3366 = vst.msk [vmem:[#allocation3 + $0x1f0] sm:$0xff] %vm3334_vm14, %v8387_v28  ;;  %v2973_v34 = vmax.f32 %v2899_v52, 0.0  ;;  %v3700_v10 = vrot.slane %v8387_v28, 2  ;;  %v3324_v52 = vmul.f32 %v7870_v58, %v2970_v42 }
 0x4b6   : > { %v3327_v60 = vmul.f32 %v7870_v58, %v2973_v34  ;;  %v8396_v21 = vsel %vm804_vm2, %v3699_v3, %v3700_v10  ;;  %v3488_v42 = vrot.slane %v3324_v52, 1 }
 0x4b7   : > { %9939 = vst [vmem:[#allocation104_spill] sm:$0xff] %v8396_v21  ;;  %v2879_v62 = vpop.f32.mrb[84].mxu0  ;;  %4562 = vst.msk [vmem:[#allocation3 + $0x1a8] sm:$0xff] %vm3334_vm14, %v8396_v21 }
 0x4b8   : > { %v3702_v44 = vrot.slane %v3327_v60, 2  ;;  %v2880_v54 = vadd.f32 %v8354_v50, %v2879_v62  ;;  %v5334_v46 = vpop.f32.mrb[85].mxu0  ;;  %v3697_v62 = vrot.slane %v3324_v52, 2 }
 0x4b9   : > { %v2882_v37 = vpop.f32.mrb[86].mxu0 }
 0x4ba   : > { %v2968_v40 = vmax.f32 %v2880_v54, 0.0  ;;  %v2883_v63 = vadd.f32 %v8354_v50, %v2882_v37  ;;  %v5335_v5 = vpop.f32.mrb[87].mxu0  ;;  %v8404_v34 = vsel %vm804_vm2, %v3700_v10, %v3702_v44  ;;  %v3491_v54 = vrot.slane %v8387_v28, 1 }
 0x4bb   : > { %v3530_v3 = vpop.permute.xlu1 %3529  ;;  %4563 = vst.msk [vmem:[#allocation3 + $0x1b8] sm:$0xff] %vm3334_vm14, %v8404_v34 }
 0x4bc   : > { %v8409_v21 = vmul.f32 %v7842_v36, %v2968_v40  ;;  %v8411_v45 = vmax.f32 %v2883_v63, 0.0  ;;  %3609 = vst.msk [vmem:[#allocation3 + $0x110] sm:$0xff] %vm3591_vm3, %v3530_v3  ;;  %v3493_v63 = vrot.slane %v3327_v60, 1  ;;  %v3490_v60 = vrot.slane %v8369_v4, 1 }
 0x4be   : > { %3363 = vst.msk [vmem:[#allocation3 + $0x1c0] sm:$0xff] %vm3334_vm14, %v8409_v21  ;;  %3364 = vst.msk [vmem:[#allocation3 + $0x1d0] sm:$0xff] %vm3334_vm14, %v8411_v45  ;;  %v3486_v37 = vrot.slane %v8411_v45, 1  ;;  %v3485_v10 = vrot.slane %v8409_v21, 1  ;;  %v3695_v44 = vrot.slane %v8411_v45, 2  ;;  %v3694_v40 = vrot.slane %v8409_v21, 2 }
 0x4c0   : > { %v8424_v46 = vsel %vm460_vm1, %v3486_v37, %v3488_v42  ;;  %v8427_v52 = vsel %vm460_vm1, %v3485_v10, %v3486_v37  ;;  %v8430_v5 = vsel %vm804_vm2, %v3695_v44, %v3697_v62  ;;  %v8433_v3 = vsel %vm804_vm2, %v3694_v40, %v3695_v44  ;;  %v5437_v10 = vld [vmem:[%s9238_s3] sm:$0xff]  }
 0x4c1   : > { %3553 = vrot.lane.b32.xlu1 %v8424_v46, %s5541_s11  ;;  %3551 = vrot.lane.b32.xlu0 %v8427_v52, %s5541_s11  ;;  %4561 = vst.msk [vmem:[#allocation3 + $0x198] sm:$0xff] %vm3334_vm14, %v8430_v5  ;;  %4560 = vst.msk [vmem:[#allocation3 + $0x188] sm:$0xff] %vm3334_vm14, %v8433_v3  ;;  %v8445_v42 = vsel %vm460_vm1, %v3491_v54, %v3493_v63  ;;  %v8448_v62 = vsel %vm460_vm1, %v3490_v60, %v3491_v54  ;;  %v5542_v44 = vmov 0   ;;  %v3632_v40 = vrot.slane %v7879_v35, 2  ;;  %v5438_v60 = vld [vmem:[%s9238_s3 + $0x8] sm:$0xff]  }
 0x4c2   : > { %4791 = vmatprep.subr.bf16.mxu1 %v5542_v44  ;;  %v3630_v63 = vrot.slane %v7865_v7, 2 }
 0x4c3   : > { %4792 = vmatpush1.bf16.msra.mxu1 %v5437_v10 }
 0x4c4   : > { %4793 = vmatprep.subr.bf16.mxu1 %v5542_v44  ;;  %v3633_v35 = vsel %vm804_vm2, %v3630_v63, %v3632_v40 }
 0x4c5   : > { %v3532_v37 = vpop.permute.xlu0 %3531  ;;  %3557 = vrot.lane.b32.xlu1 %v8445_v42, %s5541_s11  ;;  %3555 = vrot.lane.b32.xlu0 %v8448_v62, %s5541_s11 }
 0x4c6   : > { %3610 = vst.msk [vmem:[#allocation3 + $0x120] sm:$0xff] %vm3591_vm3, %v3532_v37  ;;  %v3629_v37 = vrot.slane %v7853_v61, 2 }
 0x4c7   : > { %4794 = vmatpush1.bf16.msra.mxu1 %v5438_v60 }
 0x4c8   : > { %v3631_v10 = vsel %vm804_vm2, %v3629_v37, %v3630_v63  ;;  %4795 = vmatprep.subr.bf16.mxu1 %v5542_v44  ;;  %v5441_v63 = vld [vmem:[%s9238_s3 + $0x20] sm:$0xff]  }
 0x4c9   : > { %v3534_v54 = vpop.permute.xlu1 %3533  ;;  %3706 = vrot.lane.b32.xlu1 %v7861_v12, %s5543_s16  ;;  %3704 = vrot.lane.b32.xlu0 %v7846_v38, %s5543_s16  ;;  %v5439_v38 = vld [vmem:[%s9238_s3 + $0x10] sm:$0xff]   ;;  %v5440_v12 = vld [vmem:[%s9238_s3 + $0x18] sm:$0xff]  }
 0x4ca   : > { %3611 = vst.msk [vmem:[#allocation3 + $0x130] sm:$0xff] %vm3591_vm3, %v3534_v54  ;;  %v5442_v54 = vld [vmem:[%s9238_s3 + $0x28] sm:$0xff]  }
 0x4cb   : > { %4796 = vmatpush1.bf16.msra.mxu1 %v5439_v38 }
 0x4cc   : > { %4797 = vmatprep.subr.bf16.mxu1 %v5542_v44 }
 0x4cd   : > { %3710 = vrot.lane.b32.xlu1 %v3633_v35, %s5543_s16  ;;  %3708 = vrot.lane.b32.xlu0 %v3631_v10, %s5543_s16 }
 0x4cf   : > { %4798 = vmatpush1.bf16.msra.mxu1 %v5440_v12 }
 0x4d0   : > { %4799 = vmatprep.subr.bf16.mxu1 %v5542_v44 }
 0x4d1   : > { %3714 = vrot.lane.b32.xlu1 %v7936_v6, %s5543_s16  ;;  %3712 = vrot.lane.b32.xlu0 %v7913_v8, %s5543_s16 }
 0x4d3   : > { %v3536_v40 = vpop.permute.xlu0 %3535  ;;  %4800 = vmatpush1.bf16.msra.mxu1 %v5441_v63 }
 0x4d4   : > { %3612 = vst.msk [vmem:[#allocation3 + $0x140] sm:$0xff] %vm3591_vm3, %v3536_v40  ;;  %4801 = vmatprep.subr.bf16.mxu1 %v5542_v44 }
 0x4d5   : > { %3718 = vrot.lane.b32.xlu1 %v7981_v0, %s5543_s16  ;;  %3716 = vrot.lane.b32.xlu0 %v7969_v27, %s5543_s16 }
 0x4d7   : > { %4802 = vmatpush1.bf16.msra.mxu1 %v5442_v54 }
 0x4d8   : > { %4803 = vmatprep.subr.bf16.mxu1 %v5542_v44 }
 0x4d9   : > { %3835 = vrot.lane.b32.xlu1 %v7853_v61, %s5544_s10  ;;  %3720 = vrot.lane.b32.xlu0 %v8009_v56, %s5543_s16  ;;  %v5443_v61 = vld [vmem:[%s9238_s3 + $0x30] sm:$0xff]  }
 0x4db   : > { %4804 = vmatpush1.bf16.msra.mxu1 %v5443_v61 }
 0x4dc   : > { %4805 = vmatprep.subr.bf16.mxu1 %v5542_v44 }
 0x4dd   : > { %3970 = vrot.lane.b32.xlu1 %v7883_v13, %s5545_s13  ;;  %3837 = vrot.lane.b32.xlu0 %v7865_v7, %s5544_s10  ;;  %v5444_v13 = vld [vmem:[%s9238_s3 + $0x38] sm:$0xff]   ;;  %v5445_v7 = vld [vmem:[%s9238_s3 + $0x40] sm:$0xff]  }
 0x4df   : > { %v3538_v60 = vpop.permute.xlu1 %3537  ;;  %4806 = vmatpush1.bf16.msra.mxu1 %v5444_v13 }
 0x4e0   : > { %3613 = vst.msk [vmem:[#allocation3 + $0x150] sm:$0xff] %vm3591_vm3, %v3538_v60  ;;  %4807 = vmatprep.subr.bf16.mxu1 %v5542_v44 }
 0x4e1   : > { %4104 = vrot.lane.b32.xlu1 %v3631_v10, %s5546_s17  ;;  %3972 = vrot.lane.b32.xlu0 %v7893_v17, %s5545_s13 }
 0x4e3   : > { %4808 = vmatpush1.bf16.msra.mxu1 %v5445_v7 }
 0x4e5   : > { %4235 = vrot.lane.b32.xlu1 %v7898_v19, %s5547_s27  ;;  %4106 = vrot.lane.b32.xlu0 %v3633_v35, %s5546_s17 }
 0x4e9   : > { %v3540_v37 = vpop.permute.xlu0 %3539  ;;  %4370 = vrot.lane.b32.xlu1 %v7917_v32, %s5548_s8  ;;  %4237 = vrot.lane.b32.xlu0 %v7900_v48, %s5547_s27 }
 0x4ea   : > { %3614 = vst.msk [vmem:[#allocation3 + $0x160] sm:$0xff] %vm3591_vm3, %v3540_v37 }
 0x4ed   : > { %v3542_v17 = vpop.permute.xlu1 %3541  ;;  %3839 = vrot.lane.b32.xlu1 %v7898_v19, %s5544_s10  ;;  %4372 = vrot.lane.b32.xlu0 %v7942_v15, %s5548_s8 }
 0x4ee   : > { %3615 = vst.msk [vmem:[#allocation3 + $0x170] sm:$0xff] %vm3591_vm3, %v3542_v17 }
 0x4f1   : > { %3974 = vrot.lane.b32.xlu1 %v7917_v32, %s5545_s13  ;;  %3841 = vrot.lane.b32.xlu0 %v7900_v48, %s5544_s10 }
 0x4f5   : > { %4108 = vrot.lane.b32.xlu1 %v7913_v8, %s5546_s17  ;;  %3976 = vrot.lane.b32.xlu0 %v7942_v15, %s5545_s13 }
 0x4f7   : > { %v3544_v44 = vpop.permute.xlu0 %3543 }
 0x4f8   : > { %3616 = vst.msk [vmem:[#allocation3 + $0x180] sm:$0xff] %vm3591_vm3, %v3544_v44 }
 0x4f9   : > { %4239 = vrot.lane.b32.xlu1 %v7932_v59, %s5547_s27  ;;  %4110 = vrot.lane.b32.xlu0 %v7936_v6, %s5546_s17  ;;  %v2903_v6 = vpop.f32.mrb[8].mxu1 }
 0x4fa   : > { %v5346_v15 = vpop.f32.mrb[9].mxu1 }
 0x4fd   : > { %4374 = vrot.lane.b32.xlu1 %v7966_v9, %s5548_s8  ;;  %4241 = vrot.lane.b32.xlu0 %v7949_v57, %s5547_s27 }
 0x501   : > { %3843 = vrot.lane.b32.xlu1 %v7932_v59, %s5544_s10  ;;  %4376 = vrot.lane.b32.xlu0 %v7978_v24, %s5548_s8 }
 0x503   : > { %v3546_v19 = vpop.permute.xlu1 %3545 }
 0x504   : > { %3617 = vst.msk [vmem:[#allocation3 + $0x190] sm:$0xff] %vm3591_vm3, %v3546_v19 }
 0x505   : > { %3978 = vrot.lane.b32.xlu1 %v7966_v9, %s5545_s13  ;;  %3845 = vrot.lane.b32.xlu0 %v7949_v57, %s5544_s10 }
 0x509   : > { %4112 = vrot.lane.b32.xlu1 %v7969_v27, %s5546_s17  ;;  %3980 = vrot.lane.b32.xlu0 %v7978_v24, %s5545_s13  ;;  %v2904_v27 = vadd.f32 %v8354_v50, %v2903_v6  ;;  %v2906_v24 = vpop.f32.mrb[10].mxu1 }
 0x50d   : > { %4243 = vrot.lane.b32.xlu1 %v7988_v31, %s5547_s27  ;;  %4114 = vrot.lane.b32.xlu0 %v7981_v0, %s5546_s17  ;;  %v5347_v0 = vpop.f32.mrb[11].mxu1 }
 0x511   : > { %4378 = vrot.lane.b32.xlu1 %v8003_v2, %s5548_s8  ;;  %4245 = vrot.lane.b32.xlu0 %v7990_v53, %s5547_s27 }
 0x515   : > { %v3548_v48 = vpop.permute.xlu0 %3547  ;;  %3847 = vrot.lane.b32.xlu1 %v7988_v31, %s5544_s10  ;;  %4380 = vrot.lane.b32.xlu0 %v8022_v51, %s5548_s8  ;;  %v2911_v31 = vpop.f32.mrb[12].mxu1 }
 0x516   : > { %3618 = vst.msk [vmem:[#allocation3 + $0x1a0] sm:$0xff] %vm3591_vm3, %v3548_v48 }
 0x519   : > { %v3550_v8 = vpop.permute.xlu1 %3549  ;;  %3982 = vrot.lane.b32.xlu1 %v8003_v2, %s5545_s13  ;;  %3849 = vrot.lane.b32.xlu0 %v7990_v53, %s5544_s10 }
 0x51a   : > { %3619 = vst.msk [vmem:[#allocation3 + $0x1b0] sm:$0xff] %vm3591_vm3, %v3550_v8 }
 0x51d   : > { %4116 = vrot.lane.b32.xlu1 %v8009_v56, %s5546_s17  ;;  %3984 = vrot.lane.b32.xlu0 %v8022_v51, %s5545_s13  ;;  %v2974_v56 = vmax.f32 %v2904_v27, 0.0  ;;  %v2912_v51 = vadd.f32 %v8354_v50, %v2911_v31 }
 0x51f   : > { %v8622_v35 = vmul.f32 %v7842_v36, %v2974_v56 }
 0x521   : > { %4247 = vrot.lane.b32.xlu1 %v8016_v30, %s5547_s27  ;;  %4118 = vrot.lane.b32.xlu0 %v8025_v33, %s5546_s17  ;;  %v4099_v54 = vrot.slane %v8622_v35, 2 }
 0x525   : > { %4382 = vrot.lane.b32.xlu1 %v8042_v26, %s5548_s8  ;;  %4249 = vrot.lane.b32.xlu0 %v8031_v23, %s5547_s27 }
 0x529   : > { %3722 = vrot.lane.b32.xlu1 %v8025_v33, %s5543_s16  ;;  %4384 = vrot.lane.b32.xlu0 %v8054_v22, %s5548_s8  ;;  %v5350_v33 = vpop.f32.mrb[13].mxu1 }
 0x52d   : > { %3853 = vrot.lane.b32.xlu1 %v8031_v23, %s5544_s10  ;;  %3851 = vrot.lane.b32.xlu0 %v8016_v30, %s5544_s10  ;;  %v2907_v30 = vadd.f32 %v8354_v50, %v2906_v24  ;;  %v2976_v23 = vmax.f32 %v2912_v51, 0.0 }
 0x52f   : > { %v8624_v10 = vmax.f32 %v2907_v30, 0.0  ;;  %v8627_v38 = vmul.f32 %v7870_v58, %v2976_v23  ;;  %v2914_v58 = vpop.f32.mrb[14].mxu1 }
 0x531   : > { %3988 = vrot.lane.b32.xlu1 %v8054_v22, %s5545_s13  ;;  %3986 = vrot.lane.b32.xlu0 %v8042_v26, %s5545_s13  ;;  %v4102_v12 = vrot.slane %v8627_v38, 2  ;;  %v4100_v63 = vrot.slane %v8624_v10, 2 }
 0x533   : > { %v3554_v32 = vpop.permute.xlu1 %3553  ;;  %v3552_v59 = vpop.permute.xlu0 %3551  ;;  %v8646_v60 = vsel %vm804_vm2, %v4100_v63, %v4102_v12  ;;  %v8649_v13 = vsel %vm804_vm2, %v4099_v54, %v4100_v63  ;;  %v9941_v63 = vld [vmem:[#allocation15_spill] sm:$0xff] }
 0x534   : > { %3621 = vst.msk [vmem:[#allocation3 + $0x1d0] sm:$0xff] %vm3591_vm3, %v3554_v32  ;;  %3620 = vst.msk [vmem:[#allocation3 + $0x1c0] sm:$0xff] %vm3591_vm3, %v3552_v59 }
 0x535   : > { %4122 = vrot.lane.b32.xlu1 %v8057_v49, %s5546_s17  ;;  %4120 = vrot.lane.b32.xlu0 %v8045_v1, %s5546_s17  ;;  %4565 = vst.msk [vmem:[#allocation3 + $0x1d8] sm:$0xff] %vm3334_vm14, %v8646_v60  ;;  %4564 = vst.msk [vmem:[#allocation3 + $0x1c8] sm:$0xff] %vm3334_vm14, %v8649_v13 }
 0x537   : > { %v3558_v57 = vpop.permute.xlu1 %3557  ;;  %v3556_v9 = vpop.permute.xlu0 %3555 }
 0x538   : > { %3623 = vst.msk [vmem:[#allocation3 + $0x1f0] sm:$0xff] %vm3591_vm3, %v3558_v57  ;;  %3622 = vst.msk [vmem:[#allocation3 + $0x1e0] sm:$0xff] %vm3591_vm3, %v3556_v9 }
 0x539   : > { %4253 = vrot.lane.b32.xlu1 %v8066_v55, %s5547_s27  ;;  %4251 = vrot.lane.b32.xlu0 %v8064_v39, %s5547_s27 }
 0x53b   : > { %v3707_v53 = vpop.permute.xlu1 %3706  ;;  %v3705_v2 = vpop.permute.xlu0 %3704 }
 0x53c   : > { %3802 = vst.msk [vmem:[#allocation3 + $0x10] sm:$0xff] %vm3800_vm4, %v3707_v53  ;;  %3801 = vst.msk [vmem:[#allocation3] sm:$0xff] %vm3800_vm4, %v3705_v2 }
 0x53d   : > { %4388 = vrot.lane.b32.xlu1 %v8096_v41, %s5548_s8  ;;  %4386 = vrot.lane.b32.xlu0 %v8078_v29, %s5548_s8 }
 0x53f   : > { %v3711_v26 = vpop.permute.xlu1 %3710  ;;  %v3709_v22 = vpop.permute.xlu0 %3708 }
 0x540   : > { %3804 = vst.msk [vmem:[#allocation3 + $0x30] sm:$0xff] %vm3800_vm4, %v3711_v26  ;;  %3803 = vst.msk [vmem:[#allocation3 + $0x20] sm:$0xff] %vm3800_vm4, %v3709_v22 }
 0x541   : > { %3726 = vrot.lane.b32.xlu1 %v8057_v49, %s5543_s16  ;;  %3724 = vrot.lane.b32.xlu0 %v8045_v1, %s5543_s16  ;;  %v2915_v1 = vadd.f32 %v8354_v50, %v2914_v58  ;;  %v5351_v49 = vpop.f32.mrb[15].mxu1 }
 0x542   : > { %v2919_v61 = vpop.f32.mrb[16].mxu1  ;;  %v9942_v49 = vld [vmem:[#allocation17_spill] sm:$0xff] }
 0x543   : > { %v3715_v40 = vpop.permute.xlu1 %3714  ;;  %v3713_v36 = vpop.permute.xlu0 %3712  ;;  %v2977_v17 = vmax.f32 %v2915_v1, 0.0  ;;  %v2920_v44 = vadd.f32 %v8354_v50, %v2919_v61  ;;  %v9943_v61 = vld [vmem:[#allocation19_spill] sm:$0xff] }
 0x544   : > { %3806 = vst.msk [vmem:[#allocation3 + $0x50] sm:$0xff] %vm3800_vm4, %v3715_v40  ;;  %3805 = vst.msk [vmem:[#allocation3 + $0x40] sm:$0xff] %vm3800_vm4, %v3713_v36  ;;  %v4573_v40 = vld [vmem:[#allocation3 + $0x28] sm:$0xff]  ;;  %v9940_v36 = vld [vmem:[#allocation7_spill] sm:$0xff] }
 0x545   : > { %3857 = vrot.lane.b32.xlu1 %v8066_v55, %s5544_s10  ;;  %3855 = vrot.lane.b32.xlu0 %v8064_v39, %s5544_s10  ;;  %v5354_v39 = vpop.f32.mrb[17].mxu1  ;;  %v8662_v55 = vmul.f32 0.0, %v2977_v17  ;;  %v2978_v19 = vmax.f32 %v2920_v44, 0.0 }
 0x546   : > { %v2922_v48 = vpop.f32.mrb[18].mxu1 }
 0x547   : > { %v3719_v7 = vpop.permute.xlu1 %3718  ;;  %v3717_v37 = vpop.permute.xlu0 %3716  ;;  %v2923_v8 = vadd.f32 %v8354_v50, %v2922_v48  ;;  %v4499_v15 = vrot.slane %v8662_v55, 2  ;;  %v8666_v57 = vmul.f32 0.0, %v2978_v19 }
 0x548   : > { %3808 = vst.msk [vmem:[#allocation3 + $0x70] sm:$0xff] %vm3800_vm4, %v3719_v7  ;;  %3807 = vst.msk [vmem:[#allocation3 + $0x60] sm:$0xff] %vm3800_vm4, %v3717_v37  ;;  %v5355_v32 = vpop.f32.mrb[19].mxu1 }
 0x549   : > { %3992 = vrot.lane.b32.xlu1 %v8096_v41, %s5545_s13  ;;  %3990 = vrot.lane.b32.xlu0 %v8078_v29, %s5545_s13  ;;  %v2979_v41 = vmax.f32 %v2923_v8, 0.0  ;;  %v4500_v29 = vrot.slane %v8666_v57, 2 }
 0x54b   : > { %v3836_v59 = vpop.permute.xlu1 %3835  ;;  %v3721_v6 = vpop.permute.xlu0 %3720  ;;  %v8675_v50 = vmul.f32 0.0, %v2979_v41  ;;  %v4501_v24 = vsel %vm804_vm2, %v4499_v15, %v4500_v29  ;;  %v9944_v15 = vld [vmem:[#allocation42_spill] sm:$0xff] }
 0x54c   : > { %3932 = vst.msk [vmem:[#allocation3] sm:$0xff] %vm3931_vm5, %v3836_v59  ;;  %v9945_v41 = vld [vmem:[#allocation14_spill] sm:$0xff] }
 0x54d   : > { %3809 = vst.msk [vmem:[#allocation3 + $0x80] sm:$0xff] %vm3800_vm4, %v3721_v6  ;;  %4126 = vrot.lane.b32.xlu1 %v8099_v43, %s5546_s17  ;;  %4124 = vrot.lane.b32.xlu0 %v8081_v25, %s5546_s17  ;;  %v4502_v0 = vrot.slane %v8675_v50, 2  ;;  %v4577_v6 = vld [vmem:[#allocation3 + $0x48] sm:$0xff] }
 0x54e   : > { %4566 = vst.msk [vmem:[#allocation3 + $0x1e8] sm:$0xff] %vm3334_vm14, %v4501_v24  ;;  %v9946_v24 = vld [vmem:[#allocation27_spill] sm:$0xff] }
 0x54f   : > { %v3971_v9 = vpop.permute.xlu1 %3970  ;;  %v3838_v27 = vpop.permute.xlu0 %3837  ;;  %v4503_v31 = vsel %vm804_vm2, %v4500_v29, %v4502_v0  ;;  %vm4466_vm2 = vcmask 1048448   ;;  %v9947_v0 = vld [vmem:[#allocation30_spill] sm:$0xff] }
 0x550   : > { %4067 = vst.msk [vmem:[#allocation3] sm:$0xff] %vm4066_vm6, %v3971_v9 }
 0x551   : > { %3933 = vst.msk [vmem:[#allocation3 + $0x10] sm:$0xff] %vm3931_vm5, %v3838_v27  ;;  %4257 = vrot.lane.b32.xlu1 %v8105_v47, %s5547_s27  ;;  %4255 = vrot.lane.b32.xlu0 %v8090_v20, %s5547_s27 }
 0x552   : > { %4567 = vst.msk [vmem:[#allocation3 + $0x1f8] sm:$0xff] %vm3334_vm14, %v4503_v31 }
 0x553   : > { %v4105_v53 = vpop.permute.xlu1 %4104  ;;  %v3973_v2 = vpop.permute.xlu0 %3972 }
 0x554   : > { %4201 = vst.msk [vmem:[#allocation3] sm:$0xff] %vm4200_vm7, %v4105_v53 }
 0x555   : > { %4068 = vst.msk [vmem:[#allocation3 + $0x10] sm:$0xff] %vm4066_vm6, %v3973_v2  ;;  %4392 = vrot.lane.b32.xlu1 %v8126_v18, %s5548_s8  ;;  %4390 = vrot.lane.b32.xlu0 %v8116_v11, %s5548_s8  ;;  %v9948_v2 = vld [vmem:[#allocation54_spill] sm:$0xff] }
 0x557   : > { %v4236_v56 = vpop.permute.xlu1 %4235  ;;  %v4107_v30 = vpop.permute.xlu0 %4106 }
 0x558   : > { %4332 = vst.msk [vmem:[#allocation3] sm:$0xff] %vm4331_vm8, %v4236_v56  ;;  %v9949_v56 = vld [vmem:[#allocation52_spill] sm:$0xff] }
 0x559   : > { %4202 = vst.msk [vmem:[#allocation3 + $0x10] sm:$0xff] %vm4200_vm7, %v4107_v30  ;;  %3730 = vrot.lane.b32.xlu1 %v8099_v43, %s5543_s16  ;;  %3728 = vrot.lane.b32.xlu0 %v8081_v25, %s5543_s16 }
 0x55b   : > { %v4371_v51 = vpop.permute.xlu1 %4370  ;;  %v4238_v33 = vpop.permute.xlu0 %4237 }
 0x55c   : > { %4467 = vst.msk [vmem:[#allocation3] sm:$0xff] %vm4466_vm2, %v4371_v51 }
 0x55d   : > { %4333 = vst.msk [vmem:[#allocation3 + $0x10] sm:$0xff] %vm4331_vm8, %v4238_v33  ;;  %3861 = vrot.lane.b32.xlu1 %v8105_v47, %s5544_s10  ;;  %3859 = vrot.lane.b32.xlu0 %v8090_v20, %s5544_s10  ;;  %v4575_v20 = vld [vmem:[#allocation3 + $0x38] sm:$0xff] }
 0x55e   : > { %v4635_v54 = vpack.c.bf16 %v4575_v20, %v4573_v40 }
 0x55f   : > { %v3840_v23 = vpop.permute.xlu1 %3839  ;;  %v4373_v26 = vpop.permute.xlu0 %4372 }
 0x560   : > { %3934 = vst.msk [vmem:[#allocation3 + $0x20] sm:$0xff] %vm3931_vm5, %v3840_v23 }
 0x561   : > { %4468 = vst.msk [vmem:[#allocation3 + $0x10] sm:$0xff] %vm4466_vm2, %v4373_v26  ;;  %3996 = vrot.lane.b32.xlu1 %v8126_v18, %s5545_s13  ;;  %3994 = vrot.lane.b32.xlu0 %v8116_v11, %s5545_s13  ;;  %v4583_v26 = vld [vmem:[#allocation3 + $0x78] sm:$0xff] }
 0x563   : > { %v3975_v25 = vpop.permute.xlu1 %3974  ;;  %v3842_v43 = vpop.permute.xlu0 %3841  ;;  %v4568_v12 = vld [vmem:[#allocation3] sm:$0xff] }
 0x564   : > { %4069 = vst.msk [vmem:[#allocation3 + $0x20] sm:$0xff] %vm4066_vm6, %v3975_v25 }
 0x565   : > { %3935 = vst.msk [vmem:[#allocation3 + $0x30] sm:$0xff] %vm3931_vm5, %v3842_v43  ;;  %4130 = vrot.lane.b32.xlu1 %v8129_v16, %s5546_s17  ;;  %4128 = vrot.lane.b32.xlu0 %v8119_v14, %s5546_s17 }
 0x567   : > { %v4109_v47 = vpop.permute.xlu1 %4108  ;;  %v3977_v22 = vpop.permute.xlu0 %3976 }
 0x568   : > { %v4570_v18 = vld [vmem:[#allocation3 + $0x10] sm:$0xff]  ;;  %4203 = vst.msk [vmem:[#allocation3 + $0x20] sm:$0xff] %vm4200_vm7, %v4109_v47 }
 0x569   : > { %4070 = vst.msk [vmem:[#allocation3 + $0x30] sm:$0xff] %vm4066_vm6, %v3977_v22  ;;  %v4632_v11 = vpack.c.bf16 %v4570_v18, %v4568_v12  ;;  %4261 = vrot.lane.b32.xlu1 %v9940_v36, %s5547_s27  ;;  %4259 = vrot.lane.b32.xlu0 %v9941_v63, %s5547_s27  ;;  %v4581_v12 = vld [vmem:[#allocation3 + $0x68] sm:$0xff] }
 0x56a   : > { %v4639_v18 = vpack.c.bf16 %v4583_v26, %v4581_v12 }
 0x56b   : > { %4824 = vmatmul.mubr.bf16.vlgmr.msra.gmra.mrb[20].mxu1 %v4632_v11  ;;  %v4240_v58 = vpop.permute.xlu1 %4239  ;;  %v4111_v1 = vpop.permute.xlu0 %4110 }
 0x56c   : > { %5194 = vmatprep.mubr.msk.bf16.mxu1 %vm3334_vm14, %v4635_v54  ;;  %4334 = vst.msk [vmem:[#allocation3 + $0x20] sm:$0xff] %vm4331_vm8, %v4240_v58 }
 0x56d   : > { %4204 = vst.msk [vmem:[#allocation3 + $0x30] sm:$0xff] %vm4200_vm7, %v4111_v1  ;;  %4396 = vrot.lane.b32.xlu1 %v9942_v49, %s5548_s8  ;;  %4394 = vrot.lane.b32.xlu0 %v9943_v61, %s5548_s8  ;;  %v9952_v1 = vld [vmem:[#allocation53_spill] sm:$0xff] }
 0x56f   : > { %v4375_v7 = vpop.permute.xlu1 %4374  ;;  %v4242_v37 = vpop.permute.xlu0 %4241 }
 0x570   : > { %4469 = vst.msk [vmem:[#allocation3 + $0x20] sm:$0xff] %vm4466_vm2, %v4375_v7 }
 0x571   : > { %4335 = vst.msk [vmem:[#allocation3 + $0x30] sm:$0xff] %vm4331_vm8, %v4242_v37  ;;  %3734 = vrot.lane.b32.xlu1 %v8129_v16, %s5543_s16  ;;  %3732 = vrot.lane.b32.xlu0 %v8119_v14, %s5543_s16  ;;  %v4579_v14 = vld [vmem:[#allocation3 + $0x58] sm:$0xff]  ;;  %v9954_v37 = vld [vmem:[#allocation97_spill] sm:$0xff] }
 0x572   : > { %v4637_v29 = vpack.c.bf16 %v4579_v14, %v4577_v6 }
 0x573   : > { %v3844_v17 = vpop.permute.xlu1 %3843  ;;  %v4377_v44 = vpop.permute.xlu0 %4376 }
 0x574   : > { %3936 = vst.msk [vmem:[#allocation3 + $0x40] sm:$0xff] %vm3931_vm5, %v3844_v17  ;;  %v9955_v17 = vld [vmem:[#allocation55_spill] sm:$0xff] }
 0x575   : > { %4470 = vst.msk [vmem:[#allocation3 + $0x30] sm:$0xff] %vm4466_vm2, %v4377_v44  ;;  %3865 = vrot.lane.b32.xlu1 %v9940_v36, %s5544_s10  ;;  %3863 = vrot.lane.b32.xlu0 %v9941_v63, %s5544_s10  ;;  %v9950_v36 = vld [vmem:[#allocation49_spill] sm:$0xff]  ;;  %v9951_v63 = vld [vmem:[#allocation38_spill] sm:$0xff] }
 0x577   : > { %v3979_v39 = vpop.permute.xlu1 %3978  ;;  %v3846_v19 = vpop.permute.xlu0 %3845  ;;  %v4572_v8 = vld [vmem:[#allocation3 + $0x20] sm:$0xff] }
 0x578   : > { %4071 = vst.msk [vmem:[#allocation3 + $0x40] sm:$0xff] %vm4066_vm6, %v3979_v39 }
 0x579   : > { %3937 = vst.msk [vmem:[#allocation3 + $0x50] sm:$0xff] %vm3931_vm5, %v3846_v19  ;;  %4000 = vrot.lane.b32.xlu1 %v9942_v49, %s5545_s13  ;;  %3998 = vrot.lane.b32.xlu0 %v9943_v61, %s5545_s13  ;;  %v9953_v49 = vld [vmem:[#allocation56_spill] sm:$0xff]  ;;  %v4587_v19 = vld [vmem:[#allocation3 + $0x98] sm:$0xff] }
 0x57b   : > { %v4113_v16 = vpop.permute.xlu1 %4112  ;;  %v3981_v48 = vpop.permute.xlu0 %3980 }
 0x57c   : > { %v4574_v32 = vld [vmem:[#allocation3 + $0x30] sm:$0xff]  ;;  %4205 = vst.msk [vmem:[#allocation3 + $0x40] sm:$0xff] %vm4200_vm7, %v4113_v16 }
 0x57d   : > { %4072 = vst.msk [vmem:[#allocation3 + $0x50] sm:$0xff] %vm4066_vm6, %v3981_v48  ;;  %v4634_v59 = vpack.c.bf16 %v4574_v32, %v4572_v8  ;;  %4134 = vrot.lane.b32.xlu1 %v9944_v15, %s5546_s17  ;;  %4132 = vrot.lane.b32.xlu0 %v9945_v41, %s5546_s17 }
 0x57f   : > { %4832 = vmatmul.mubr.bf16.gmra.mrb[24].mxu1 %v4634_v59  ;;  %v4244_v9 = vpop.permute.xlu1 %4243  ;;  %v4115_v27 = vpop.permute.xlu0 %4114  ;;  %v4585_v59 = vld [vmem:[#allocation3 + $0x88] sm:$0xff] }
 0x580   : > { %5195 = vmatprep.mubr.msk.bf16.mxu1 %vm3334_vm14, %v4637_v29  ;;  %4336 = vst.msk [vmem:[#allocation3 + $0x40] sm:$0xff] %vm4331_vm8, %v4244_v9  ;;  %v4641_v6 = vpack.c.bf16 %v4587_v19, %v4585_v59  ;;  %v9967_v19 = vld [vmem:[#allocation13_spill] sm:$0xff] }
 0x581   : > { %4206 = vst.msk [vmem:[#allocation3 + $0x50] sm:$0xff] %vm4200_vm7, %v4115_v27  ;;  %4265 = vrot.lane.b32.xlu1 %v9946_v24, %s5547_s27  ;;  %4263 = vrot.lane.b32.xlu0 %v9947_v0, %s5547_s27  ;;  %v9956_v27 = vld [vmem:[#allocation94_spill] sm:$0xff] }
 0x583   : > { %v4379_v31 = vpop.permute.xlu1 %4378  ;;  %v4246_v53 = vpop.permute.xlu0 %4245 }
 0x584   : > { %4471 = vst.msk [vmem:[#allocation3 + $0x40] sm:$0xff] %vm4466_vm2, %v4379_v31 }
 0x585   : > { %4337 = vst.msk [vmem:[#allocation3 + $0x50] sm:$0xff] %vm4331_vm8, %v4246_v53  ;;  %4400 = vrot.lane.b32.xlu1 %v9948_v2, %s5548_s8  ;;  %4398 = vrot.lane.b32.xlu0 %v9949_v56, %s5548_s8  ;;  %v9958_v53 = vld [vmem:[#allocation8_spill] sm:$0xff] }
 0x587   : > { %v3848_v30 = vpop.permute.xlu1 %3847  ;;  %v4381_v51 = vpop.permute.xlu0 %4380 }
 0x588   : > { %3938 = vst.msk [vmem:[#allocation3 + $0x60] sm:$0xff] %vm3931_vm5, %v3848_v30 }
 0x589   : > { %4472 = vst.msk [vmem:[#allocation3 + $0x50] sm:$0xff] %vm4466_vm2, %v4381_v51  ;;  %3738 = vrot.lane.b32.xlu1 %v9944_v15, %s5543_s16  ;;  %3736 = vrot.lane.b32.xlu0 %v9945_v41, %s5543_s16  ;;  %v9960_v51 = vld [vmem:[#allocation98_spill] sm:$0xff] }
 0x58b   : > { %v3983_v33 = vpop.permute.xlu1 %3982  ;;  %v3850_v23 = vpop.permute.xlu0 %3849  ;;  %v4576_v20 = vld [vmem:[#allocation3 + $0x40] sm:$0xff] }
 0x58c   : > { %4073 = vst.msk [vmem:[#allocation3 + $0x60] sm:$0xff] %vm4066_vm6, %v3983_v33  ;;  %v9961_v33 = vld [vmem:[#allocation96_spill] sm:$0xff] }
 0x58d   : > { %3939 = vst.msk [vmem:[#allocation3 + $0x70] sm:$0xff] %vm3931_vm5, %v3850_v23  ;;  %3869 = vrot.lane.b32.xlu1 %v9946_v24, %s5544_s10  ;;  %3867 = vrot.lane.b32.xlu0 %v9947_v0, %s5544_s10  ;;  %v9957_v24 = vld [vmem:[#allocation95_spill] sm:$0xff]  ;;  %v4591_v23 = vld [vmem:[#allocation3 + $0xb8] sm:$0xff] }
 0x58f   : > { %v4117_v25 = vpop.permute.xlu1 %4116  ;;  %v3985_v43 = vpop.permute.xlu0 %3984 }
 0x590   : > { %v4578_v47 = vld [vmem:[#allocation3 + $0x50] sm:$0xff]  ;;  %4207 = vst.msk [vmem:[#allocation3 + $0x60] sm:$0xff] %vm4200_vm7, %v4117_v25 }
 0x591   : > { %4074 = vst.msk [vmem:[#allocation3 + $0x70] sm:$0xff] %vm4066_vm6, %v3985_v43  ;;  %v4636_v22 = vpack.c.bf16 %v4578_v47, %v4576_v20  ;;  %4004 = vrot.lane.b32.xlu1 %v9948_v2, %s5545_s13  ;;  %4002 = vrot.lane.b32.xlu0 %v9949_v56, %s5545_s13  ;;  %v9959_v2 = vld [vmem:[#allocation93_spill] sm:$0xff] }
 0x593   : > { %4840 = vmatmul.mubr.bf16.gmra.mrb[28].mxu1 %v4636_v22  ;;  %v4248_v11 = vpop.permute.xlu1 %4247  ;;  %v4119_v40 = vpop.permute.xlu0 %4118  ;;  %v4589_v22 = vld [vmem:[#allocation3 + $0xa8] sm:$0xff] }
 0x594   : > { %5196 = vmatprep.mubr.msk.bf16.mxu1 %vm3334_vm14, %v4639_v18  ;;  %4338 = vst.msk [vmem:[#allocation3 + $0x60] sm:$0xff] %vm4331_vm8, %v4248_v11  ;;  %v4643_v12 = vpack.c.bf16 %v4591_v23, %v4589_v22 }
 0x595   : > { %4208 = vst.msk [vmem:[#allocation3 + $0x70] sm:$0xff] %vm4200_vm7, %v4119_v40  ;;  %4138 = vrot.lane.b32.xlu1 %v9950_v36, %s5546_s17  ;;  %4136 = vrot.lane.b32.xlu0 %v9951_v63, %s5546_s17 }
 0x597   : > { %v4383_v54 = vpop.permute.xlu1 %4382  ;;  %v4250_v58 = vpop.permute.xlu0 %4249 }
 0x598   : > { %4473 = vst.msk [vmem:[#allocation3 + $0x60] sm:$0xff] %vm4466_vm2, %v4383_v54 }
 0x599   : > { %4339 = vst.msk [vmem:[#allocation3 + $0x70] sm:$0xff] %vm4331_vm8, %v4250_v58  ;;  %4269 = vrot.lane.b32.xlu1 %v9952_v1, %s5547_s27  ;;  %4267 = vrot.lane.b32.xlu0 %v9953_v49, %s5547_s27  ;;  %v9962_v58 = vld [vmem:[#allocation20_spill] sm:$0xff] }
 0x59b   : > { %v3723_v61 = vpop.permute.xlu1 %3722  ;;  %v4385_v7 = vpop.permute.xlu0 %4384 }
 0x59c   : > { %3810 = vst.msk [vmem:[#allocation3 + $0x90] sm:$0xff] %vm3800_vm4, %v3723_v61 }
 0x59d   : > { %4474 = vst.msk [vmem:[#allocation3 + $0x70] sm:$0xff] %vm4466_vm2, %v4385_v7  ;;  %4404 = vrot.lane.b32.xlu1 %v9954_v37, %s5548_s8  ;;  %4402 = vrot.lane.b32.xlu0 %v9955_v17, %s5548_s8  ;;  %v9964_v7 = vld [vmem:[#allocation100_spill] sm:$0xff] }
 0x59f   : > { %v3854_v44 = vpop.permute.xlu1 %3853  ;;  %v3852_v39 = vpop.permute.xlu0 %3851  ;;  %v4580_v48 = vld [vmem:[#allocation3 + $0x60] sm:$0xff] }
 0x5a0   : > { %3941 = vst.msk [vmem:[#allocation3 + $0x90] sm:$0xff] %vm3931_vm5, %v3854_v44  ;;  %3940 = vst.msk [vmem:[#allocation3 + $0x80] sm:$0xff] %vm3931_vm5, %v3852_v39  ;;  %v9966_v39 = vld [vmem:[#allocation127_spill] sm:$0xff] }
 0x5a1   : > { %3742 = vrot.lane.b32.xlu1 %v9950_v36, %s5543_s16  ;;  %3740 = vrot.lane.b32.xlu0 %v9951_v63, %s5543_s16 }
 0x5a3   : > { %v3989_v14 = vpop.permute.xlu1 %3988  ;;  %v3987_v16 = vpop.permute.xlu0 %3986 }
 0x5a4   : > { %v4582_v8 = vld [vmem:[#allocation3 + $0x70] sm:$0xff]  ;;  %4076 = vst.msk [vmem:[#allocation3 + $0x90] sm:$0xff] %vm4066_vm6, %v3989_v14  ;;  %4075 = vst.msk [vmem:[#allocation3 + $0x80] sm:$0xff] %vm4066_vm6, %v3987_v16  ;;  %v4595_v14 = vld [vmem:[#allocation3 + $0xd8] sm:$0xff] }
 0x5a5   : > { %v4638_v32 = vpack.c.bf16 %v4582_v8, %v4580_v48  ;;  %3873 = vrot.lane.b32.xlu1 %v9952_v1, %s5544_s10  ;;  %3871 = vrot.lane.b32.xlu0 %v9953_v49, %s5544_s10  ;;  %v9963_v1 = vld [vmem:[#allocation99_spill] sm:$0xff] }
 0x5a7   : > { %4848 = vmatmul.mubr.bf16.gmra.mrb[32].mxu1 %v4638_v32  ;;  %v4123_v15 = vpop.permute.xlu1 %4122  ;;  %v4121_v41 = vpop.permute.xlu0 %4120 }
 0x5a8   : > { %5197 = vmatprep.mubr.msk.bf16.mxu1 %vm3334_vm14, %v4641_v6  ;;  %4210 = vst.msk [vmem:[#allocation3 + $0x90] sm:$0xff] %vm4200_vm7, %v4123_v15  ;;  %4209 = vst.msk [vmem:[#allocation3 + $0x80] sm:$0xff] %vm4200_vm7, %v4121_v41  ;;  %v4593_v6 = vld [vmem:[#allocation3 + $0xc8] sm:$0xff] }
 0x5a9   : > { %4008 = vrot.lane.b32.xlu1 %v9954_v37, %s5545_s13  ;;  %4006 = vrot.lane.b32.xlu0 %v9955_v17, %s5545_s13  ;;  %v9965_v37 = vld [vmem:[#allocation11_spill] sm:$0xff]  ;;  %v4645_v15 = vpack.c.bf16 %v4595_v14, %v4593_v6 }
 0x5ab   : > { %v4254_v29 = vpop.permute.xlu1 %4253  ;;  %v4252_v9 = vpop.permute.xlu0 %4251 }
 0x5ac   : > { %4341 = vst.msk [vmem:[#allocation3 + $0x90] sm:$0xff] %vm4331_vm8, %v4254_v29  ;;  %4340 = vst.msk [vmem:[#allocation3 + $0x80] sm:$0xff] %vm4331_vm8, %v4252_v9 }
 0x5ad   : > { %4142 = vrot.lane.b32.xlu1 %v9956_v27, %s5546_s17  ;;  %4140 = vrot.lane.b32.xlu0 %v9957_v24, %s5546_s17 }
 0x5af   : > { %v4389_v0 = vpop.permute.xlu1 %4388  ;;  %v4387_v31 = vpop.permute.xlu0 %4386 }
 0x5b0   : > { %4476 = vst.msk [vmem:[#allocation3 + $0x90] sm:$0xff] %vm4466_vm2, %v4389_v0  ;;  %4475 = vst.msk [vmem:[#allocation3 + $0x80] sm:$0xff] %vm4466_vm2, %v4387_v31  ;;  %v9968_v31 = vld [vmem:[#allocation58_spill] sm:$0xff] }
 0x5b1   : > { %4273 = vrot.lane.b32.xlu1 %v9958_v53, %s5547_s27  ;;  %4271 = vrot.lane.b32.xlu0 %v9959_v2, %s5547_s27 }
 0x5b3   : > { %v3727_v56 = vpop.permute.xlu1 %3726  ;;  %v3725_v30 = vpop.permute.xlu0 %3724 }
 0x5b4   : > { %3812 = vst.msk [vmem:[#allocation3 + $0xb0] sm:$0xff] %vm3800_vm4, %v3727_v56  ;;  %3811 = vst.msk [vmem:[#allocation3 + $0xa0] sm:$0xff] %vm3800_vm4, %v3725_v30  ;;  %v9970_v30 = vld [vmem:[#allocation50_spill] sm:$0xff] }
 0x5b5   : > { %4408 = vrot.lane.b32.xlu1 %v9960_v51, %s5548_s8  ;;  %4406 = vrot.lane.b32.xlu0 %v9961_v33, %s5548_s8 }
 0x5b7   : > { %v3858_v26 = vpop.permute.xlu1 %3857  ;;  %v3856_v25 = vpop.permute.xlu0 %3855  ;;  %v4584_v43 = vld [vmem:[#allocation3 + $0x80] sm:$0xff]  ;;  %v4586_v20 = vld [vmem:[#allocation3 + $0x90] sm:$0xff] }
 0x5b8   : > { %3943 = vst.msk [vmem:[#allocation3 + $0xb0] sm:$0xff] %vm3931_vm5, %v3858_v26  ;;  %3942 = vst.msk [vmem:[#allocation3 + $0xa0] sm:$0xff] %vm3931_vm5, %v3856_v25  ;;  %v4640_v47 = vpack.c.bf16 %v4586_v20, %v4584_v43  ;;  %v9972_v26 = vld [vmem:[#allocation60_spill] sm:$0xff]  ;;  %v9973_v25 = vld [vmem:[#allocation102_spill] sm:$0xff] }
 0x5b9   : > { %3746 = vrot.lane.b32.xlu1 %v9956_v27, %s5543_s16  ;;  %3744 = vrot.lane.b32.xlu0 %v9957_v24, %s5543_s16  ;;  %v4599_v43 = vld [vmem:[#allocation3 + $0xf8] sm:$0xff] }
 0x5ba   : > { %4856 = vmatmul.mubr.bf16.gmra.mrb[36].mxu1 %v4640_v47 }
 0x5bb   : > { %v3993_v18 = vpop.permute.xlu1 %3992  ;;  %5198 = vmatprep.mubr.msk.bf16.mxu1 %vm3334_vm14, %v4643_v12  ;;  %v3991_v11 = vpop.permute.xlu0 %3990 }
 0x5bc   : > { %4078 = vst.msk [vmem:[#allocation3 + $0xb0] sm:$0xff] %vm4066_vm6, %v3993_v18  ;;  %4077 = vst.msk [vmem:[#allocation3 + $0xa0] sm:$0xff] %vm4066_vm6, %v3991_v11  ;;  %v4597_v11 = vld [vmem:[#allocation3 + $0xe8] sm:$0xff] }
 0x5bd   : > { %3877 = vrot.lane.b32.xlu1 %v9958_v53, %s5544_s10  ;;  %3875 = vrot.lane.b32.xlu0 %v9959_v2, %s5544_s10  ;;  %v9969_v53 = vld [vmem:[#allocation123_spill] sm:$0xff] }
 0x5bf   : > { %v4127_v40 = vpop.permute.xlu1 %4126  ;;  %v4125_v36 = vpop.permute.xlu0 %4124 }
 0x5c0   : > { %4212 = vst.msk [vmem:[#allocation3 + $0xb0] sm:$0xff] %vm4200_vm7, %v4127_v40  ;;  %4211 = vst.msk [vmem:[#allocation3 + $0xa0] sm:$0xff] %vm4200_vm7, %v4125_v36  ;;  %v4647_v40 = vpack.c.bf16 %v4599_v43, %v4597_v11  ;;  %v4611_v11 = vld [vmem:[#allocation3 + $0x158] sm:$0xff] }
 0x5c1   : > { %4012 = vrot.lane.b32.xlu1 %v9960_v51, %s5545_s13  ;;  %4010 = vrot.lane.b32.xlu0 %v9961_v33, %s5545_s13  ;;  %v9971_v51 = vld [vmem:[#allocation125_spill] sm:$0xff] }
 0x5c3   : > { %v4258_v63 = vpop.permute.xlu1 %4257  ;;  %v4256_v54 = vpop.permute.xlu0 %4255 }
 0x5c4   : > { %4343 = vst.msk [vmem:[#allocation3 + $0xb0] sm:$0xff] %vm4331_vm8, %v4258_v63  ;;  %4342 = vst.msk [vmem:[#allocation3 + $0xa0] sm:$0xff] %vm4331_vm8, %v4256_v54 }
 0x5c5   : > { %4146 = vrot.lane.b32.xlu1 %v9962_v58, %s5546_s17  ;;  %4144 = vrot.lane.b32.xlu0 %v9963_v1, %s5546_s17 }
 0x5c7   : > { %v4393_v49 = vpop.permute.xlu1 %4392  ;;  %v4391_v61 = vpop.permute.xlu0 %4390 }
 0x5c8   : > { %4478 = vst.msk [vmem:[#allocation3 + $0xb0] sm:$0xff] %vm4466_vm2, %v4393_v49  ;;  %4477 = vst.msk [vmem:[#allocation3 + $0xa0] sm:$0xff] %vm4466_vm2, %v4391_v61  ;;  %v9974_v61 = vld [vmem:[#allocation101_spill] sm:$0xff] }
 0x5c9   : > { %4277 = vrot.lane.b32.xlu1 %v9964_v7, %s5547_s27  ;;  %4275 = vrot.lane.b32.xlu0 %v9965_v37, %s5547_s27 }
 0x5cb   : > { %v3731_v17 = vpop.permute.xlu1 %3730  ;;  %v3729_v44 = vpop.permute.xlu0 %3728 }
 0x5cc   : > { %3814 = vst.msk [vmem:[#allocation3 + $0xd0] sm:$0xff] %vm3800_vm4, %v3731_v17  ;;  %3813 = vst.msk [vmem:[#allocation3 + $0xc0] sm:$0xff] %vm3800_vm4, %v3729_v44 }
 0x5cd   : > { %4412 = vrot.lane.b32.xlu1 %v9966_v39, %s5548_s8  ;;  %4410 = vrot.lane.b32.xlu0 %v9967_v19, %s5548_s8 }
 0x5cf   : > { %v3862_v16 = vpop.permute.xlu1 %3861  ;;  %v3860_v48 = vpop.permute.xlu0 %3859  ;;  %v4588_v8 = vld [vmem:[#allocation3 + $0xa0] sm:$0xff]  ;;  %v4590_v32 = vld [vmem:[#allocation3 + $0xb0] sm:$0xff] }
 0x5d0   : > { %3945 = vst.msk [vmem:[#allocation3 + $0xd0] sm:$0xff] %vm3931_vm5, %v3862_v16  ;;  %3944 = vst.msk [vmem:[#allocation3 + $0xc0] sm:$0xff] %vm3931_vm5, %v3860_v48  ;;  %v4642_v59 = vpack.c.bf16 %v4590_v32, %v4588_v8 }
 0x5d1   : > { %3750 = vrot.lane.b32.xlu1 %v9962_v58, %s5543_s16  ;;  %3748 = vrot.lane.b32.xlu0 %v9963_v1, %s5543_s16 }
 0x5d2   : > { %4864 = vmatmul.mubr.bf16.gmra.mrb[40].mxu1 %v4642_v59  ;;  %v4601_v59 = vld [vmem:[#allocation3 + $0x108] sm:$0xff] }
 0x5d3   : > { %v3997_v41 = vpop.permute.xlu1 %3996  ;;  %5199 = vmatprep.mubr.msk.bf16.mxu1 %vm3334_vm14, %v4645_v15  ;;  %v3995_v29 = vpop.permute.xlu0 %3994 }
 0x5d4   : > { %4080 = vst.msk [vmem:[#allocation3 + $0xd0] sm:$0xff] %vm4066_vm6, %v3997_v41  ;;  %4079 = vst.msk [vmem:[#allocation3 + $0xc0] sm:$0xff] %vm4066_vm6, %v3995_v29 }
 0x5d5   : > { %3881 = vrot.lane.b32.xlu1 %v9964_v7, %s5544_s10  ;;  %3879 = vrot.lane.b32.xlu0 %v9965_v37, %s5544_s10  ;;  %v9975_v7 = vld [vmem:[#allocation57_spill] sm:$0xff] }
 0x5d7   : > { %v4131_v9 = vpop.permute.xlu1 %4130  ;;  %v4129_v27 = vpop.permute.xlu0 %4128 }
 0x5d8   : > { %4214 = vst.msk [vmem:[#allocation3 + $0xd0] sm:$0xff] %vm4200_vm7, %v4131_v9  ;;  %4213 = vst.msk [vmem:[#allocation3 + $0xc0] sm:$0xff] %vm4200_vm7, %v4129_v27 }
 0x5d9   : > { %4016 = vrot.lane.b32.xlu1 %v9966_v39, %s5545_s13  ;;  %4014 = vrot.lane.b32.xlu0 %v9967_v19, %s5545_s13  ;;  %v4603_v19 = vld [vmem:[#allocation3 + $0x118] sm:$0xff] }
 0x5da   : > { %v4649_v6 = vpack.c.bf16 %v4603_v19, %v4601_v59 }
 0x5db   : > { %v4262_v24 = vpop.permute.xlu1 %4261  ;;  %v4260_v0 = vpop.permute.xlu0 %4259 }
 0x5dc   : > { %4345 = vst.msk [vmem:[#allocation3 + $0xd0] sm:$0xff] %vm4331_vm8, %v4262_v24  ;;  %4344 = vst.msk [vmem:[#allocation3 + $0xc0] sm:$0xff] %vm4331_vm8, %v4260_v0  ;;  %v4607_v0 = vld [vmem:[#allocation3 + $0x138] sm:$0xff] }
 0x5dd   : > { %4150 = vrot.lane.b32.xlu1 %v9968_v31, %s5546_s17  ;;  %4148 = vrot.lane.b32.xlu0 %v9969_v53, %s5546_s17 }
 0x5df   : > { %v4397_v2 = vpop.permute.xlu1 %4396  ;;  %v4395_v56 = vpop.permute.xlu0 %4394 }
 0x5e0   : > { %4480 = vst.msk [vmem:[#allocation3 + $0xd0] sm:$0xff] %vm4466_vm2, %v4397_v2  ;;  %4479 = vst.msk [vmem:[#allocation3 + $0xc0] sm:$0xff] %vm4466_vm2, %v4395_v56 }
 0x5e1   : > { %4281 = vrot.lane.b32.xlu1 %v9970_v30, %s5547_s27  ;;  %4279 = vrot.lane.b32.xlu0 %v9971_v51, %s5547_s27 }
 0x5e3   : > { %v3735_v33 = vpop.permute.xlu1 %3734  ;;  %v3733_v23 = vpop.permute.xlu0 %3732 }
 0x5e4   : > { %3816 = vst.msk [vmem:[#allocation3 + $0xf0] sm:$0xff] %vm3800_vm4, %v3735_v33  ;;  %3815 = vst.msk [vmem:[#allocation3 + $0xe0] sm:$0xff] %vm3800_vm4, %v3733_v23 }
 0x5e5   : > { %4416 = vrot.lane.b32.xlu1 %v9972_v26, %s5548_s8  ;;  %4414 = vrot.lane.b32.xlu0 %v9973_v25, %s5548_s8 }
 0x5e7   : > { %v3866_v20 = vpop.permute.xlu1 %3865  ;;  %v3864_v47 = vpop.permute.xlu0 %3863  ;;  %v4592_v22 = vld [vmem:[#allocation3 + $0xc0] sm:$0xff]  ;;  %v4594_v12 = vld [vmem:[#allocation3 + $0xd0] sm:$0xff] }
 0x5e8   : > { %3947 = vst.msk [vmem:[#allocation3 + $0xf0] sm:$0xff] %vm3931_vm5, %v3866_v20  ;;  %3946 = vst.msk [vmem:[#allocation3 + $0xe0] sm:$0xff] %vm3931_vm5, %v3864_v47  ;;  %v4644_v18 = vpack.c.bf16 %v4594_v12, %v4592_v22  ;;  %v3968_v47 = vrot.slane %v8627_v38, 1 }
 0x5e9   : > { %3754 = vrot.lane.b32.xlu1 %v9968_v31, %s5543_s16  ;;  %3752 = vrot.lane.b32.xlu0 %v9969_v53, %s5543_s16 }
 0x5ea   : > { %4872 = vmatmul.mubr.bf16.gmra.mrb[44].mxu1 %v4644_v18 }
 0x5eb   : > { %v4001_v36 = vpop.permute.xlu1 %4000  ;;  %5200 = vmatprep.mubr.msk.bf16.mxu1 %vm3334_vm14, %v4647_v40  ;;  %v3999_v63 = vpop.permute.xlu0 %3998 }
 0x5ec   : > { %4082 = vst.msk [vmem:[#allocation3 + $0xf0] sm:$0xff] %vm4066_vm6, %v4001_v36  ;;  %4081 = vst.msk [vmem:[#allocation3 + $0xe0] sm:$0xff] %vm4066_vm6, %v3999_v63 }
 0x5ed   : > { %3885 = vrot.lane.b32.xlu1 %v9970_v30, %s5544_s10  ;;  %3883 = vrot.lane.b32.xlu0 %v9971_v51, %s5544_s10  ;;  %v4605_v51 = vld [vmem:[#allocation3 + $0x128] sm:$0xff] }
 0x5ee   : > { %v4651_v33 = vpack.c.bf16 %v4607_v0, %v4605_v51 }
 0x5ef   : > { %v4135_v54 = vpop.permute.xlu1 %4134  ;;  %v4133_v58 = vpop.permute.xlu0 %4132 }
 0x5f0   : > { %4216 = vst.msk [vmem:[#allocation3 + $0xf0] sm:$0xff] %vm4200_vm7, %v4135_v54  ;;  %4215 = vst.msk [vmem:[#allocation3 + $0xe0] sm:$0xff] %vm4200_vm7, %v4133_v58 }
 0x5f1   : > { %4020 = vrot.lane.b32.xlu1 %v9972_v26, %s5545_s13  ;;  %4018 = vrot.lane.b32.xlu0 %v9973_v25, %s5545_s13 }
 0x5f3   : > { %v4266_v1 = vpop.permute.xlu1 %4265  ;;  %v4264_v49 = vpop.permute.xlu0 %4263 }
 0x5f4   : > { %4347 = vst.msk [vmem:[#allocation3 + $0xf0] sm:$0xff] %vm4331_vm8, %v4266_v1  ;;  %4346 = vst.msk [vmem:[#allocation3 + $0xe0] sm:$0xff] %vm4331_vm8, %v4264_v49  ;;  %v4609_v1 = vld [vmem:[#allocation3 + $0x148] sm:$0xff] }
 0x5f5   : > { %4154 = vrot.lane.b32.xlu1 %v9974_v61, %s5546_s17  ;;  %4152 = vrot.lane.b32.xlu0 %v9975_v7, %s5546_s17  ;;  %v4653_v49 = vpack.c.bf16 %v4611_v11, %v4609_v1 }
 0x5f7   : > { %v4401_v37 = vpop.permute.xlu1 %4400  ;;  %v4399_v17 = vpop.permute.xlu0 %4398 }
 0x5f8   : > { %4482 = vst.msk [vmem:[#allocation3 + $0xf0] sm:$0xff] %vm4466_vm2, %v4401_v37  ;;  %4481 = vst.msk [vmem:[#allocation3 + $0xe0] sm:$0xff] %vm4466_vm2, %v4399_v17 }
 0x5f9   : > { %4285 = vrot.lane.b32.xlu1 %v8411_v45, %s5547_s27  ;;  %4283 = vrot.lane.b32.xlu0 %v8409_v21, %s5547_s27 }
 0x5fb   : > { %v3739_v44 = vpop.permute.xlu1 %3738  ;;  %v3737_v39 = vpop.permute.xlu0 %3736 }
 0x5fc   : > { %3818 = vst.msk [vmem:[#allocation3 + $0x110] sm:$0xff] %vm3800_vm4, %v3739_v44  ;;  %3817 = vst.msk [vmem:[#allocation3 + $0x100] sm:$0xff] %vm3800_vm4, %v3737_v39 }
 0x5fd   : > { %4420 = vrot.lane.b32.xlu1 %v8424_v46, %s5548_s8  ;;  %4418 = vrot.lane.b32.xlu0 %v8427_v52, %s5548_s8 }
 0x5ff   : > { %v3870_v14 = vpop.permute.xlu1 %3869  ;;  %v3868_v16 = vpop.permute.xlu0 %3867  ;;  %v4596_v48 = vld [vmem:[#allocation3 + $0xe0] sm:$0xff]  ;;  %v4598_v8 = vld [vmem:[#allocation3 + $0xf0] sm:$0xff] }
 0x600   : > { %3949 = vst.msk [vmem:[#allocation3 + $0x110] sm:$0xff] %vm3931_vm5, %v3870_v14  ;;  %3948 = vst.msk [vmem:[#allocation3 + $0x100] sm:$0xff] %vm3931_vm5, %v3868_v16  ;;  %v4646_v32 = vpack.c.bf16 %v4598_v8, %v4596_v48  ;;  %v4365_v14 = vrot.slane %v8662_v55, 1  ;;  %v4366_v16 = vrot.slane %v8666_v57, 1  ;;  %v4368_v48 = vrot.slane %v8675_v50, 1 }
 0x601   : > { %3758 = vrot.lane.b32.xlu1 %v9974_v61, %s5543_s16  ;;  %3756 = vrot.lane.b32.xlu0 %v9975_v7, %s5543_s16 }
 0x602   : > { %4880 = vmatmul.mubr.bf16.gmra.mrb[48].mxu1 %v4646_v32  ;;  %v4369_v59 = vsel %vm460_vm1, %v4366_v16, %v4368_v48  ;;  %v4367_v50 = vsel %vm460_vm1, %v4365_v14, %v4366_v16 }
 0x603   : > { %v4005_v15 = vpop.permute.xlu1 %4004  ;;  %5201 = vmatprep.mubr.msk.bf16.mxu1 %vm3334_vm14, %v4649_v6  ;;  %v4003_v41 = vpop.permute.xlu0 %4002 }
 0x604   : > { %4084 = vst.msk [vmem:[#allocation3 + $0x110] sm:$0xff] %vm4066_vm6, %v4005_v15  ;;  %4083 = vst.msk [vmem:[#allocation3 + $0x100] sm:$0xff] %vm4066_vm6, %v4003_v41 }
 0x605   : > { %3889 = vrot.lane.b32.xlu1 %v8411_v45, %s5544_s10  ;;  %3887 = vrot.lane.b32.xlu0 %v8409_v21, %s5544_s10 }
 0x607   : > { %v4139_v29 = vpop.permute.xlu1 %4138  ;;  %v4137_v9 = vpop.permute.xlu0 %4136 }
 0x608   : > { %4218 = vst.msk [vmem:[#allocation3 + $0x110] sm:$0xff] %vm4200_vm7, %v4139_v29  ;;  %4217 = vst.msk [vmem:[#allocation3 + $0x100] sm:$0xff] %vm4200_vm7, %v4137_v9  ;;  %v4613_v9 = vld [vmem:[#allocation3 + $0x168] sm:$0xff] }
 0x609   : > { %4024 = vrot.lane.b32.xlu1 %v8424_v46, %s5545_s13  ;;  %4022 = vrot.lane.b32.xlu0 %v8427_v52, %s5545_s13 }
 0x60b   : > { %v4270_v27 = vpop.permute.xlu1 %4269  ;;  %v4268_v24 = vpop.permute.xlu0 %4267 }
 0x60c   : > { %4349 = vst.msk [vmem:[#allocation3 + $0x110] sm:$0xff] %vm4331_vm8, %v4270_v27  ;;  %4348 = vst.msk [vmem:[#allocation3 + $0x100] sm:$0xff] %vm4331_vm8, %v4268_v24 }
 0x60d   : > { %4158 = vrot.lane.b32.xlu1 %v8430_v5, %s5546_s17  ;;  %4156 = vrot.lane.b32.xlu0 %v8433_v3, %s5546_s17 }
 0x60f   : > { %v4405_v45 = vpop.permute.xlu1 %4404  ;;  %v4403_v21 = vpop.permute.xlu0 %4402 }
 0x610   : > { %4484 = vst.msk [vmem:[#allocation3 + $0x110] sm:$0xff] %vm4466_vm2, %v4405_v45  ;;  %4483 = vst.msk [vmem:[#allocation3 + $0x100] sm:$0xff] %vm4466_vm2, %v4403_v21 }
 0x611   : > { %4289 = vrot.lane.b32.xlu1 %v8387_v28, %s5547_s27  ;;  %4287 = vrot.lane.b32.xlu0 %v8369_v4, %s5547_s27 }
 0x613   : > { %v3743_v46 = vpop.permute.xlu1 %3742  ;;  %v3741_v52 = vpop.permute.xlu0 %3740 }
 0x614   : > { %3820 = vst.msk [vmem:[#allocation3 + $0x130] sm:$0xff] %vm3800_vm4, %v3743_v46  ;;  %3819 = vst.msk [vmem:[#allocation3 + $0x120] sm:$0xff] %vm3800_vm4, %v3741_v52 }
 0x615   : > { %4424 = vrot.lane.b32.xlu1 %v8445_v42, %s5548_s8  ;;  %4422 = vrot.lane.b32.xlu0 %v8448_v62, %s5548_s8 }
 0x617   : > { %v3874_v31 = vpop.permute.xlu1 %3873  ;;  %v3872_v53 = vpop.permute.xlu0 %3871  ;;  %v4600_v2 = vld [vmem:[#allocation3 + $0x100] sm:$0xff]  ;;  %v4602_v56 = vld [vmem:[#allocation3 + $0x110] sm:$0xff] }
 0x618   : > { %3951 = vst.msk [vmem:[#allocation3 + $0x130] sm:$0xff] %vm3931_vm5, %v3874_v31  ;;  %3950 = vst.msk [vmem:[#allocation3 + $0x120] sm:$0xff] %vm3931_vm5, %v3872_v53  ;;  %v4648_v30 = vpack.c.bf16 %v4602_v56, %v4600_v2 }
 0x619   : > { %3762 = vrot.lane.b32.xlu1 %v8430_v5, %s5543_s16  ;;  %3760 = vrot.lane.b32.xlu0 %v8433_v3, %s5543_s16 }
 0x61a   : > { %4888 = vmatmul.mubr.bf16.gmra.mrb[52].mxu1 %v4648_v30 }
 0x61b   : > { %v4009_v23 = vpop.permute.xlu1 %4008  ;;  %5202 = vmatprep.mubr.msk.bf16.mxu1 %vm3334_vm14, %v4651_v33  ;;  %v4007_v26 = vpop.permute.xlu0 %4006 }
 0x61c   : > { %4086 = vst.msk [vmem:[#allocation3 + $0x130] sm:$0xff] %vm4066_vm6, %v4009_v23  ;;  %4085 = vst.msk [vmem:[#allocation3 + $0x120] sm:$0xff] %vm4066_vm6, %v4007_v26  ;;  %v9088_v26 = vld [vmem:[%s9239_s4] ss:$0 sm:$0xff] }
 0x61d   : > { %3893 = vrot.lane.b32.xlu1 %v8387_v28, %s5544_s10  ;;  %3891 = vrot.lane.b32.xlu0 %v8369_v4, %s5544_s10  ;;  %v9976_v4 = vld [vmem:[#allocation104_spill] sm:$0xff] }
 0x61f   : > { %v4143_v5 = vpop.permute.xlu1 %4142  ;;  %v4141_v25 = vpop.permute.xlu0 %4140 }
 0x620   : > { %4220 = vst.msk [vmem:[#allocation3 + $0x130] sm:$0xff] %vm4200_vm7, %v4143_v5  ;;  %4219 = vst.msk [vmem:[#allocation3 + $0x120] sm:$0xff] %vm4200_vm7, %v4141_v25 }
 0x621   : > { %4028 = vrot.lane.b32.xlu1 %v8445_v42, %s5545_s13  ;;  %4026 = vrot.lane.b32.xlu0 %v8448_v62, %s5545_s13  ;;  %v3966_v42 = vrot.slane %v8624_v10, 1  ;;  %v3965_v62 = vrot.slane %v8622_v35, 1 }
 0x623   : > { %v4274_v3 = vpop.permute.xlu1 %4273  ;;  %v4272_v43 = vpop.permute.xlu0 %4271  ;;  %v3969_v38 = vsel %vm460_vm1, %v3966_v42, %v3968_v47  ;;  %v3967_v18 = vsel %vm460_vm1, %v3965_v62, %v3966_v42 }
 0x624   : > { %4351 = vst.msk [vmem:[#allocation3 + $0x130] sm:$0xff] %vm4331_vm8, %v4274_v3  ;;  %4350 = vst.msk [vmem:[#allocation3 + $0x120] sm:$0xff] %vm4331_vm8, %v4272_v43  ;;  %v4617_v3 = vld [vmem:[#allocation3 + $0x188] sm:$0xff]  ;;  %v4619_v43 = vld [vmem:[#allocation3 + $0x198] sm:$0xff] }
 0x625   : > { %4162 = vrot.lane.b32.xlu1 %v8404_v34, %s5546_s17  ;;  %4160 = vrot.lane.b32.xlu0 %v9976_v4, %s5546_s17  ;;  %v4657_v42 = vpack.c.bf16 %v4619_v43, %v4617_v3 }
 0x627   : > { %v4409_v28 = vpop.permute.xlu1 %4408  ;;  %v4407_v20 = vpop.permute.xlu0 %4406 }
 0x628   : > { %4486 = vst.msk [vmem:[#allocation3 + $0x130] sm:$0xff] %vm4466_vm2, %v4409_v28  ;;  %4485 = vst.msk [vmem:[#allocation3 + $0x120] sm:$0xff] %vm4466_vm2, %v4407_v20 }
 0x629   : > { %4293 = vrot.lane.b32.xlu1 %v8624_v10, %s5547_s27  ;;  %4291 = vrot.lane.b32.xlu0 %v8622_v35, %s5547_s27 }
 0x62b   : > { %v3747_v22 = vpop.permute.xlu1 %3746  ;;  %v3745_v12 = vpop.permute.xlu0 %3744 }
 0x62c   : > { %3822 = vst.msk [vmem:[#allocation3 + $0x150] sm:$0xff] %vm3800_vm4, %v3747_v22  ;;  %3821 = vst.msk [vmem:[#allocation3 + $0x140] sm:$0xff] %vm3800_vm4, %v3745_v12 }
 0x62d   : > { %4428 = vrot.lane.b32.xlu1 %v3969_v38, %s5548_s8  ;;  %4426 = vrot.lane.b32.xlu0 %v3967_v18, %s5548_s8 }
 0x62f   : > { %v3878_v40 = vpop.permute.xlu1 %3877  ;;  %v3876_v36 = vpop.permute.xlu0 %3875  ;;  %v4604_v63 = vld [vmem:[#allocation3 + $0x120] sm:$0xff]  ;;  %v4606_v54 = vld [vmem:[#allocation3 + $0x130] sm:$0xff] }
 0x630   : > { %3953 = vst.msk [vmem:[#allocation3 + $0x150] sm:$0xff] %vm3931_vm5, %v3878_v40  ;;  %3952 = vst.msk [vmem:[#allocation3 + $0x140] sm:$0xff] %vm3931_vm5, %v3876_v36  ;;  %v4650_v58 = vpack.c.bf16 %v4606_v54, %v4604_v63 }
 0x631   : > { %3766 = vrot.lane.b32.xlu1 %v8404_v34, %s5543_s16  ;;  %3764 = vrot.lane.b32.xlu0 %v9976_v4, %s5543_s16 }
 0x632   : > { %4896 = vmatmul.mubr.bf16.gmra.mrb[56].mxu1 %v4650_v58 }
 0x633   : > { %v4013_v61 = vpop.permute.xlu1 %4012  ;;  %5203 = vmatprep.mubr.msk.bf16.mxu1 %vm3334_vm14, %v4653_v49  ;;  %v4011_v7 = vpop.permute.xlu0 %4010 }
 0x634   : > { %4088 = vst.msk [vmem:[#allocation3 + $0x150] sm:$0xff] %vm4066_vm6, %v4013_v61  ;;  %4087 = vst.msk [vmem:[#allocation3 + $0x140] sm:$0xff] %vm4066_vm6, %v4011_v7 }
 0x635   : > { %3897 = vrot.lane.b32.xlu1 %v8624_v10, %s5544_s10  ;;  %3895 = vrot.lane.b32.xlu0 %v8622_v35, %s5544_s10  ;;  %s239_s10 = sand.u32 1, %s5512_s19  }
 0x636   : > { %s5119_s11 = sshll.u32 %s239_s10, 4  ;;  %s5019_s25 = scalar_lea.sflag [#allocation5], %s239_s10 }
 0x637   : > { %v4147_v34 = vpop.permute.xlu1 %4146  ;;  %v4145_v37 = vpop.permute.xlu0 %4144  ;;  %s9166_s12 = scalar_lea.vmem [#allocation4], %s5119_s11 }
 0x638   : > { %4222 = vst.msk [vmem:[#allocation3 + $0x150] sm:$0xff] %vm4200_vm7, %v4147_v34  ;;  %4221 = vst.msk [vmem:[#allocation3 + $0x140] sm:$0xff] %vm4200_vm7, %v4145_v37 }
 0x639   : > { %4032 = vrot.lane.b32.xlu1 %v3969_v38, %s5545_s13  ;;  %4030 = vrot.lane.b32.xlu0 %v3967_v18, %s5545_s13  ;;  %s5035_s13 = sshll.u32 %s9166_s12, 4  ;;  %s9182_s13 = int_to_ptr.vmem [resolvable:$true] %s5035_s13 }
 0x63a   : > { %p5457_p1 = scmp.lt.s32.totalorder %s9182_s13, %s5455_s29 }
 0x63b   : > { %v4278_v17 = vpop.permute.xlu1 %4277  ;;  %v4276_v44 = vpop.permute.xlu0 %4275 }
 0x63c   : > { %4353 = vst.msk [vmem:[#allocation3 + $0x150] sm:$0xff] %vm4331_vm8, %v4278_v17  ;;  %4352 = vst.msk [vmem:[#allocation3 + $0x140] sm:$0xff] %vm4331_vm8, %v4276_v44 }
 0x63d   : > { %4166 = vrot.lane.b32.xlu1 %v8646_v60, %s5546_s17  ;;  %4164 = vrot.lane.b32.xlu0 %v8649_v13, %s5546_s17 }
 0x63e   : > { %v9051_v35 = vpop.f32.mrb[20].mxu1 }
 0x63f   : > { %v4827_v10 = vpop.f32.mrb[21].mxu1  ;;  %v4413_v39 = vpop.permute.xlu1 %4412  ;;  %v4826_v20 = vadd.f32 %v9088_v26, %v9051_v35 }
 0x640   : > { %v9055_v19 = vpop.f32.mrb[22].mxu1  ;;  %4488 = vst.msk [vmem:[#allocation3 + $0x150] sm:$0xff] %vm4466_vm2, %v4413_v39  ;;  %v4411_v8 = vpop.permute.xlu0 %4410  ;;  %v4623_v39 = vld [vmem:[#allocation3 + $0x1b8] sm:$0xff] }
 0x641   : > { %v4830_v32 = vpop.f32.mrb[23].mxu1  ;;  %4487 = vst.msk [vmem:[#allocation3 + $0x140] sm:$0xff] %vm4466_vm2, %v4411_v8  ;;  %4297 = vrot.lane.b32.xlu1 %v8666_v57, %s5547_s27  ;;  %4295 = vrot.lane.b32.xlu0 %v8662_v55, %s5547_s27  ;;  %v4615_v57 = vld [vmem:[#allocation3 + $0x178] sm:$0xff]  ;;  %v4829_v12 = vadd.f32 %v9088_v26, %v9055_v19  ;;  %v4621_v8 = vld [vmem:[#allocation3 + $0x1a8] sm:$0xff]  ;;  %s5450_s27 = scalar_lea.vmem %s9182_s13, 256 }
 0x642   : > { %v4655_v27 = vpack.c.bf16 %v4615_v57, %v4613_v9  ;;  %p5451_p12 = scmp.ne.s32.totalorder %s9182_s13, %s5450_s27  ;;  %p5458_p2 = scmp.lt.s32.totalorder %s5456_s7, %s5450_s27 }
 0x643   : > { %v3751_v60 = vpop.permute.xlu1 %3750 }
 0x644   : > { %3824 = vst.msk [vmem:[#allocation3 + $0x170] sm:$0xff] %vm3800_vm4, %v3751_v60  ;;  %v3749_v13 = vpop.permute.xlu0 %3748  ;;  %p5452_p13 = pnand %p5451_p12, %p5620_p4  ;;  %p5459_p3 = por %p5458_p2, %p5457_p1 }
 0x645   : > { %3823 = vst.msk [vmem:[#allocation3 + $0x160] sm:$0xff] %vm3800_vm4, %v3749_v13  ;;  %4432 = vrot.lane.b32.xlu1 %v4369_v59, %s5548_s8  ;;  %4430 = vrot.lane.b32.xlu0 %v4367_v50, %s5548_s8  ;;  %v4659_v13 = vpack.c.bf16 %v4623_v39, %v4621_v8 }
 0x646   : > { %p5453_p0 = pneg %p5452_p13 }
 0x647   : > { %v3882_v6 = vpop.permute.xlu1 %3881  ;;  %v4610_v15 = vld [vmem:[#allocation3 + $0x150] sm:$0xff] }
 0x648   : > { %3955 = vst.msk [vmem:[#allocation3 + $0x170] sm:$0xff] %vm3931_vm5, %v3882_v6  ;;  %v3880_v55 = vpop.permute.xlu0 %3879  ;;  %v4608_v41 = vld [vmem:[#allocation3 + $0x140] sm:$0xff]  ;;  %p5460_p5 = pnand %p5459_p3, %p5453_p0 }
 0x649   : > { %3954 = vst.msk [vmem:[#allocation3 + $0x160] sm:$0xff] %vm3931_vm5, %v3880_v55  ;;  %v4652_v29 = vpack.c.bf16 %v4610_v15, %v4608_v41 }
 0x64b   : > { %4904 = vmatmul.mubr.bf16.gmra.mrb[60].mxu1 %v4652_v29  ;;  %v4017_v24 = vpop.permute.xlu1 %4016 }
 0x64c   : > { %4090 = vst.msk [vmem:[#allocation3 + $0x170] sm:$0xff] %vm4066_vm6, %v4017_v24  ;;  %5204 = vmatprep.mubr.msk.bf16.mxu1 %vm3334_vm14, %v4655_v27  ;;  %v4015_v45 = vpop.permute.xlu0 %4014 }
 0x64d   : > { %4089 = vst.msk [vmem:[#allocation3 + $0x160] sm:$0xff] %vm4066_vm6, %v4015_v45 }
 0x64f   : > { %v4151_v21 = vpop.permute.xlu1 %4150 }
 0x650   : > { %4224 = vst.msk [vmem:[#allocation3 + $0x170] sm:$0xff] %vm4200_vm7, %v4151_v21  ;;  %v4149_v46 = vpop.permute.xlu0 %4148 }
 0x651   : > { %4223 = vst.msk [vmem:[#allocation3 + $0x160] sm:$0xff] %vm4200_vm7, %v4149_v46 }
 0x652   : > { %v4833_v52 = vpop.f32.mrb[24].mxu1 }
 0x653   : > { %v4835_v0 = vpop.f32.mrb[25].mxu1  ;;  %v4282_v31 = vpop.permute.xlu1 %4281  ;;  %v4834_v54 = vadd.f32 %v9088_v26, %v4833_v52 }
 0x654   : > { %v4836_v53 = vpop.f32.mrb[26].mxu1  ;;  %4355 = vst.msk [vmem:[#allocation3 + $0x170] sm:$0xff] %vm4331_vm8, %v4282_v31  ;;  %v4280_v2 = vpop.permute.xlu0 %4279 }
 0x655   : > { %v4838_v56 = vpop.f32.mrb[27].mxu1  ;;  %4354 = vst.msk [vmem:[#allocation3 + $0x160] sm:$0xff] %vm4331_vm8, %v4280_v2  ;;  %v4837_v49 = vadd.f32 %v9088_v26, %v4836_v53 }
 0x656   : > { %v4625_v56 = vld [vmem:[#allocation3 + $0x1c8] sm:$0xff] }
 0x657   : > { %v4417_v30 = vpop.permute.xlu1 %4416 }
 0x658   : > { %4490 = vst.msk [vmem:[#allocation3 + $0x170] sm:$0xff] %vm4466_vm2, %v4417_v30  ;;  %v4415_v51 = vpop.permute.xlu0 %4414  ;;  %v4627_v30 = vld [vmem:[#allocation3 + $0x1d8] sm:$0xff] }
 0x659   : > { %4489 = vst.msk [vmem:[#allocation3 + $0x160] sm:$0xff] %vm4466_vm2, %v4415_v51  ;;  %v4661_v3 = vpack.c.bf16 %v4627_v30, %v4625_v56 }
 0x65b   : > { %v3755_v33 = vpop.permute.xlu1 %3754 }
 0x65c   : > { %3826 = vst.msk [vmem:[#allocation3 + $0x190] sm:$0xff] %vm3800_vm4, %v3755_v33  ;;  %v3753_v23 = vpop.permute.xlu0 %3752 }
 0x65d   : > { %3825 = vst.msk [vmem:[#allocation3 + $0x180] sm:$0xff] %vm3800_vm4, %v3753_v23 }
 0x65f   : > { %v3886_v5 = vpop.permute.xlu1 %3885  ;;  %v4614_v25 = vld [vmem:[#allocation3 + $0x170] sm:$0xff] }
 0x660   : > { %3957 = vst.msk [vmem:[#allocation3 + $0x190] sm:$0xff] %vm3931_vm5, %v3886_v5  ;;  %v3884_v4 = vpop.permute.xlu0 %3883  ;;  %v4612_v28 = vld [vmem:[#allocation3 + $0x160] sm:$0xff] }
 0x661   : > { %3956 = vst.msk [vmem:[#allocation3 + $0x180] sm:$0xff] %vm3931_vm5, %v3884_v4  ;;  %v4654_v47 = vpack.c.bf16 %v4614_v25, %v4612_v28 }
 0x663   : > { %4912 = vmatmul.mubr.bf16.gmra.mrb[64].mxu1 %v4654_v47  ;;  %v4021_v62 = vpop.permute.xlu1 %4020  ;;  %4952 = vxpose.xlu0.b32.start [1/16] (narrow) %v4826_v20, 8 }
 0x664   : > { %4092 = vst.msk [vmem:[#allocation3 + $0x190] sm:$0xff] %vm4066_vm6, %v4021_v62  ;;  %5205 = vmatprep.mubr.msk.bf16.mxu1 %vm3334_vm14, %v4657_v42  ;;  %v4019_v22 = vpop.permute.xlu0 %4018 }
 0x665   : > { %4091 = vst.msk [vmem:[#allocation3 + $0x180] sm:$0xff] %vm4066_vm6, %v4019_v22 }
 0x666   : > { %v4841_v38 = vpop.f32.mrb[28].mxu1 }
 0x667   : > { %v4843_v18 = vpop.f32.mrb[29].mxu1  ;;  %v4155_v11 = vpop.permute.xlu1 %4154  ;;  %4953 = vxpose.xlu0.b32.cont [2/16] (narrow) %v4829_v12, 8  ;;  %v4842_v34 = vadd.f32 %v9088_v26, %v4841_v38 }
 0x668   : > { %v4844_v40 = vpop.f32.mrb[30].mxu1  ;;  %4226 = vst.msk [vmem:[#allocation3 + $0x190] sm:$0xff] %vm4200_vm7, %v4155_v11  ;;  %v4153_v36 = vpop.permute.xlu0 %4152 }
 0x669   : > { %v4846_v63 = vpop.f32.mrb[31].mxu1  ;;  %4225 = vst.msk [vmem:[#allocation3 + $0x180] sm:$0xff] %vm4200_vm7, %v4153_v36  ;;  %v4845_v44 = vadd.f32 %v9088_v26, %v4844_v40 }
 0x66b   : > { %v4286_v58 = vpop.permute.xlu1 %4285  ;;  %4954 = vxpose.xlu0.b32.cont [3/16] (narrow) %v4834_v54, 8 }
 0x66c   : > { %4357 = vst.msk [vmem:[#allocation3 + $0x190] sm:$0xff] %vm4331_vm8, %v4286_v58  ;;  %v4284_v1 = vpop.permute.xlu0 %4283  ;;  %v4629_v58 = vld [vmem:[#allocation3 + $0x1e8] sm:$0xff] }
 0x66d   : > { %4356 = vst.msk [vmem:[#allocation3 + $0x180] sm:$0xff] %vm4331_vm8, %v4284_v1  ;;  %v4631_v1 = vld [vmem:[#allocation3 + $0x1f8] sm:$0xff] }
 0x66f   : > { %v4421_v61 = vpop.permute.xlu1 %4420  ;;  %4955 = vxpose.xlu0.b32.cont [4/16] (narrow) %v4837_v49, 8 }
 0x670   : > { %4492 = vst.msk [vmem:[#allocation3 + $0x190] sm:$0xff] %vm4466_vm2, %v4421_v61  ;;  %v4419_v7 = vpop.permute.xlu0 %4418 }
 0x671   : > { %4491 = vst.msk [vmem:[#allocation3 + $0x180] sm:$0xff] %vm4466_vm2, %v4419_v7 }
 0x673   : > { %v3759_v37 = vpop.permute.xlu1 %3758  ;;  %4956 = vxpose.xlu0.b32.cont [5/16] (narrow) %v4842_v34, 8 }
 0x674   : > { %3828 = vst.msk [vmem:[#allocation3 + $0x1b0] sm:$0xff] %vm3800_vm4, %v3759_v37  ;;  %v3757_v17 = vpop.permute.xlu0 %3756 }
 0x675   : > { %3827 = vst.msk [vmem:[#allocation3 + $0x1a0] sm:$0xff] %vm3800_vm4, %v3757_v17  ;;  %v4663_v17 = vpack.c.bf16 %v4631_v1, %v4629_v58 }
 0x677   : > { %v3890_v35 = vpop.permute.xlu1 %3889  ;;  %4957 = vxpose.xlu0.b32.cont [6/16] (narrow) %v4845_v44, 8  ;;  %v4618_v10 = vld [vmem:[#allocation3 + $0x190] sm:$0xff] }
 0x678   : > { %3959 = vst.msk [vmem:[#allocation3 + $0x1b0] sm:$0xff] %vm3931_vm5, %v3890_v35  ;;  %v3888_v19 = vpop.permute.xlu0 %3887  ;;  %v4616_v14 = vld [vmem:[#allocation3 + $0x180] sm:$0xff] }
 0x679   : > { %3958 = vst.msk [vmem:[#allocation3 + $0x1a0] sm:$0xff] %vm3931_vm5, %v3888_v19  ;;  %v4656_v48 = vpack.c.bf16 %v4618_v10, %v4616_v14 }
 0x67a   : > { %v4849_v16 = vpop.f32.mrb[32].mxu1 }
 0x67b   : > { %v4850_v32 = vadd.f32 %v9088_v26, %v4849_v16  ;;  %v4851_v60 = vpop.f32.mrb[33].mxu1  ;;  %4920 = vmatmul.mubr.bf16.gmra.mrb[68].mxu1 %v4656_v48  ;;  %v4025_v59 = vpop.permute.xlu1 %4024 }
 0x67c   : > { %v4852_v50 = vpop.f32.mrb[34].mxu1  ;;  %4094 = vst.msk [vmem:[#allocation3 + $0x1b0] sm:$0xff] %vm4066_vm6, %v4025_v59  ;;  %5206 = vmatprep.mubr.msk.bf16.mxu1 %vm3334_vm14, %v4659_v13  ;;  %v4023_v6 = vpop.permute.xlu0 %4022 }
 0x67d   : > { %v4854_v15 = vpop.f32.mrb[35].mxu1  ;;  %4958 = vxpose.xlu0.b32.cont [7/16] (narrow) %v4850_v32, 8  ;;  %4093 = vst.msk [vmem:[#allocation3 + $0x1a0] sm:$0xff] %vm4066_vm6, %v4023_v6  ;;  %v4853_v57 = vadd.f32 %v9088_v26, %v4852_v50 }
 0x67f   : > { %v4159_v55 = vpop.permute.xlu1 %4158 }
 0x680   : > { %4228 = vst.msk [vmem:[#allocation3 + $0x1b0] sm:$0xff] %vm4200_vm7, %v4159_v55  ;;  %v4157_v41 = vpop.permute.xlu0 %4156 }
 0x681   : > { %4959 = vxpose.xlu0.b32.cont [8/16] (narrow) %v4853_v57, 8  ;;  %4227 = vst.msk [vmem:[#allocation3 + $0x1a0] sm:$0xff] %vm4200_vm7, %v4157_v41 }
 0x683   : > { %v4290_v29 = vpop.permute.xlu1 %4289 }
 0x684   : > { %4359 = vst.msk [vmem:[#allocation3 + $0x1b0] sm:$0xff] %vm4331_vm8, %v4290_v29  ;;  %v4288_v9 = vpop.permute.xlu0 %4287 }
 0x685   : > { %4358 = vst.msk [vmem:[#allocation3 + $0x1a0] sm:$0xff] %vm4331_vm8, %v4288_v9 }
 0x687   : > { %v4425_v27 = vpop.permute.xlu1 %4424 }
 0x688   : > { %4494 = vst.msk [vmem:[#allocation3 + $0x1b0] sm:$0xff] %vm4466_vm2, %v4425_v27  ;;  %v4423_v24 = vpop.permute.xlu0 %4422 }
 0x689   : > { %4493 = vst.msk [vmem:[#allocation3 + $0x1a0] sm:$0xff] %vm4466_vm2, %v4423_v24 }
 0x68b   : > { %v3763_v45 = vpop.permute.xlu1 %3762 }
 0x68c   : > { %3830 = vst.msk [vmem:[#allocation3 + $0x1d0] sm:$0xff] %vm3800_vm4, %v3763_v45  ;;  %v3761_v21 = vpop.permute.xlu0 %3760 }
 0x68d   : > { %3829 = vst.msk [vmem:[#allocation3 + $0x1c0] sm:$0xff] %vm3800_vm4, %v3761_v21  ;;  %v4857_v46 = vpop.f32.mrb[36].mxu1 }
 0x68e   : > { %v4858_v52 = vadd.f32 %v9088_v26, %v4857_v46  ;;  %v4859_v0 = vpop.f32.mrb[37].mxu1 }
 0x68f   : > { %v3894_v31 = vpop.permute.xlu1 %3893  ;;  %v4860_v53 = vpop.f32.mrb[38].mxu1  ;;  %v4622_v2 = vld [vmem:[#allocation3 + $0x1b0] sm:$0xff] }
 0x690   : > { %3961 = vst.msk [vmem:[#allocation3 + $0x1d0] sm:$0xff] %vm3931_vm5, %v3894_v31  ;;  %v3892_v51 = vpop.permute.xlu0 %3891  ;;  %v4862_v33 = vpop.f32.mrb[39].mxu1  ;;  %4960 = vxpose.xlu0.b32.cont [9/16] (narrow) %v4858_v52, 8  ;;  %v4620_v23 = vld [vmem:[#allocation3 + $0x1a0] sm:$0xff]  ;;  %v4861_v25 = vadd.f32 %v9088_v26, %v4860_v53 }
 0x691   : > { %3960 = vst.msk [vmem:[#allocation3 + $0x1c0] sm:$0xff] %vm3931_vm5, %v3892_v51  ;;  %v4658_v5 = vpack.c.bf16 %v4622_v2, %v4620_v23 }
 0x693   : > { %4928 = vmatmul.mubr.bf16.gmra.mrb[72].mxu1 %v4658_v5  ;;  %v4029_v43 = vpop.permute.xlu1 %4028 }
 0x694   : > { %4096 = vst.msk [vmem:[#allocation3 + $0x1d0] sm:$0xff] %vm4066_vm6, %v4029_v43  ;;  %5207 = vmatprep.mubr.msk.bf16.mxu1 %vm3334_vm14, %v4661_v3  ;;  %v4027_v4 = vpop.permute.xlu0 %4026  ;;  %4961 = vxpose.xlu0.b32.cont [10/16] (narrow) %v4861_v25, 8 }
 0x695   : > { %4095 = vst.msk [vmem:[#allocation3 + $0x1c0] sm:$0xff] %vm4066_vm6, %v4027_v4 }
 0x697   : > { %v4163_v28 = vpop.permute.xlu1 %4162 }
 0x698   : > { %4230 = vst.msk [vmem:[#allocation3 + $0x1d0] sm:$0xff] %vm4200_vm7, %v4163_v28  ;;  %v4161_v20 = vpop.permute.xlu0 %4160 }
 0x699   : > { %4229 = vst.msk [vmem:[#allocation3 + $0x1c0] sm:$0xff] %vm4200_vm7, %v4161_v20 }
 0x69b   : > { %v4294_v47 = vpop.permute.xlu1 %4293 }
 0x69c   : > { %4361 = vst.msk [vmem:[#allocation3 + $0x1d0] sm:$0xff] %vm4331_vm8, %v4294_v47  ;;  %v4292_v42 = vpop.permute.xlu0 %4291 }
 0x69d   : > { %4360 = vst.msk [vmem:[#allocation3 + $0x1c0] sm:$0xff] %vm4331_vm8, %v4292_v42 }
 0x69f   : > { %v4429_v62 = vpop.permute.xlu1 %4428 }
 0x6a0   : > { %4496 = vst.msk [vmem:[#allocation3 + $0x1d0] sm:$0xff] %vm4466_vm2, %v4429_v62  ;;  %v4427_v22 = vpop.permute.xlu0 %4426 }
 0x6a1   : > { %4495 = vst.msk [vmem:[#allocation3 + $0x1c0] sm:$0xff] %vm4466_vm2, %v4427_v22 }
 0x6a3   : > { %v3767_v12 = vpop.permute.xlu1 %3766 }
 0x6a4   : > { %3832 = vst.msk [vmem:[#allocation3 + $0x1f0] sm:$0xff] %vm3800_vm4, %v3767_v12  ;;  %v3765_v38 = vpop.permute.xlu0 %3764 }
 0x6a5   : > { %3831 = vst.msk [vmem:[#allocation3 + $0x1e0] sm:$0xff] %vm3800_vm4, %v3765_v38  ;;  %v4865_v18 = vpop.f32.mrb[40].mxu1 }
 0x6a6   : > { %v4866_v11 = vadd.f32 %v9088_v26, %v4865_v18  ;;  %v4867_v40 = vpop.f32.mrb[41].mxu1 }
 0x6a7   : > { %v3898_v36 = vpop.permute.xlu1 %3897  ;;  %v4868_v63 = vpop.f32.mrb[42].mxu1  ;;  %v4626_v54 = vld [vmem:[#allocation3 + $0x1d0] sm:$0xff] }
 0x6a8   : > { %3963 = vst.msk [vmem:[#allocation3 + $0x1f0] sm:$0xff] %vm3931_vm5, %v3898_v36  ;;  %v3896_v49 = vpop.permute.xlu0 %3895  ;;  %v4870_v61 = vpop.f32.mrb[43].mxu1  ;;  %4962 = vxpose.xlu0.b32.cont [11/16] (narrow) %v4866_v11, 8  ;;  %v4624_v7 = vld [vmem:[#allocation3 + $0x1c0] sm:$0xff]  ;;  %v4869_v37 = vadd.f32 %v9088_v26, %v4868_v63 }
 0x6a9   : > { %3962 = vst.msk [vmem:[#allocation3 + $0x1e0] sm:$0xff] %vm3931_vm5, %v3896_v49  ;;  %v4660_v34 = vpack.c.bf16 %v4626_v54, %v4624_v7 }
 0x6ab   : > { %4936 = vmatmul.mubr.bf16.gmra.mrb[76].mxu1 %v4660_v34  ;;  %v4033_v44 = vpop.permute.xlu1 %4032 }
 0x6ac   : > { %4098 = vst.msk [vmem:[#allocation3 + $0x1f0] sm:$0xff] %vm4066_vm6, %v4033_v44  ;;  %v4031_v35 = vpop.permute.xlu0 %4030  ;;  %5208 = vmatprep.mubr.msk.bf16.mxu1 %vm3334_vm14, %v4663_v17  ;;  %4963 = vxpose.xlu0.b32.cont [12/16] (narrow) %v4869_v37, 8 }
 0x6ad   : > { %4097 = vst.msk [vmem:[#allocation3 + $0x1e0] sm:$0xff] %vm4066_vm6, %v4031_v35 }
 0x6af   : > { %v4167_v10 = vpop.permute.xlu1 %4166 }
 0x6b0   : > { %4232 = vst.msk [vmem:[#allocation3 + $0x1f0] sm:$0xff] %vm4200_vm7, %v4167_v10  ;;  %v4165_v39 = vpop.permute.xlu0 %4164 }
 0x6b1   : > { %4231 = vst.msk [vmem:[#allocation3 + $0x1e0] sm:$0xff] %vm4200_vm7, %v4165_v39 }
 0x6b3   : > { %v4298_v19 = vpop.permute.xlu1 %4297 }
 0x6b4   : > { %4363 = vst.msk [vmem:[#allocation3 + $0x1f0] sm:$0xff] %vm4331_vm8, %v4298_v19  ;;  %v4296_v14 = vpop.permute.xlu0 %4295 }
 0x6b5   : > { %4362 = vst.msk [vmem:[#allocation3 + $0x1e0] sm:$0xff] %vm4331_vm8, %v4296_v14 }
 0x6b7   : > { %v4433_v16 = vpop.permute.xlu1 %4432 }
 0x6b8   : > { %4498 = vst.msk [vmem:[#allocation3 + $0x1f0] sm:$0xff] %vm4466_vm2, %v4433_v16  ;;  %v4431_v48 = vpop.permute.xlu0 %4430 }
 0x6b9   : > { %4497 = vst.msk [vmem:[#allocation3 + $0x1e0] sm:$0xff] %vm4466_vm2, %v4431_v48 }
 0x6bd   : > { %v4873_v8 = vpop.f32.mrb[44].mxu1 }
 0x6be   : > { %v4874_v32 = vadd.f32 %v9088_v26, %v4873_v8  ;;  %v4875_v60 = vpop.f32.mrb[45].mxu1 }
 0x6bf   : > { %v4876_v13 = vpop.f32.mrb[46].mxu1  ;;  %v4630_v59 = vld [vmem:[#allocation3 + $0x1f0] sm:$0xff] }
 0x6c0   : > { %v4878_v50 = vpop.f32.mrb[47].mxu1  ;;  %4964 = vxpose.xlu0.b32.cont [13/16] (narrow) %v4874_v32, 8  ;;  %v4628_v6 = vld [vmem:[#allocation3 + $0x1e0] sm:$0xff]  ;;  %v4877_v57 = vadd.f32 %v9088_v26, %v4876_v13 }
 0x6c1   : > { %v4662_v15 = vpack.c.bf16 %v4630_v59, %v4628_v6 }
 0x6c3   : > { %4944 = vmatmul.mubr.bf16.gmra.mrb[80].mxu1 %v4662_v15 }
 0x6c4   : > { %4965 = vxpose.xlu0.b32.cont [14/16] (narrow) %v4877_v57, 8 }
 0x6d5   : > { %v4881_v55 = vpop.f32.mrb[48].mxu1 }
 0x6d6   : > { %v4882_v41 = vadd.f32 %v9088_v26, %v4881_v55  ;;  %v4883_v29 = vpop.f32.mrb[49].mxu1 }
 0x6d7   : > { %v4884_v9 = vpop.f32.mrb[50].mxu1 }
 0x6d8   : > { %v4886_v27 = vpop.f32.mrb[51].mxu1  ;;  %4966 = vxpose.xlu0.b32.cont [15/16] (narrow) %v4882_v41, 8  ;;  %v4885_v24 = vadd.f32 %v9088_v26, %v4884_v9 }
 0x6dc   : > { %4967 = vxpose.xlu0.b32.end [16/16] (narrow) %v4885_v24, 8 }
 0x6ed   : > { %v4889_v45 = vpop.f32.mrb[52].mxu1 }
 0x6ee   : > { %v4890_v21 = vadd.f32 %v9088_v26, %v4889_v45  ;;  %v4891_v46 = vpop.f32.mrb[53].mxu1 }
 0x6ef   : > { %v4892_v52 = vpop.f32.mrb[54].mxu1 }
 0x6f0   : > { %v4894_v0 = vpop.f32.mrb[55].mxu1  ;;  %4984 = vxpose.xlu1.b32.start [1/16] (narrow) %v4890_v21, 8  ;;  %v4893_v31 = vadd.f32 %v9088_v26, %v4892_v52 }
 0x6f4   : > { %4985 = vxpose.xlu1.b32.cont [2/16] (narrow) %v4893_v31, 8 }
 0x705   : > { %v4897_v53 = vpop.f32.mrb[56].mxu1 }
 0x706   : > { %v4898_v2 = vadd.f32 %v9088_v26, %v4897_v53  ;;  %v4899_v56 = vpop.f32.mrb[57].mxu1 }
 0x707   : > { %v4900_v30 = vpop.f32.mrb[58].mxu1 }
 0x708   : > { %v4902_v51 = vpop.f32.mrb[59].mxu1  ;;  %4986 = vxpose.xlu1.b32.cont [3/16] (narrow) %v4898_v2, 8  ;;  %v4901_v33 = vadd.f32 %v9088_v26, %v4900_v30 }
 0x70c   : > { %4987 = vxpose.xlu1.b32.cont [4/16] (narrow) %v4901_v33, 8 }
 0x71e   : > { %v4905_v23 = vpop.f32.mrb[60].mxu1 }
 0x71f   : > { %v4906_v5 = vadd.f32 %v9088_v26, %v4905_v23  ;;  %v4907_v25 = vpop.f32.mrb[61].mxu1 }
 0x720   : > { %v4908_v3 = vpop.f32.mrb[62].mxu1  ;;  %v4968_v43 = vpop.trf.xlu0 }
 0x721   : > { %v4910_v4 = vpop.f32.mrb[63].mxu1  ;;  %4988 = vxpose.xlu1.b32.cont [5/16] (narrow) %v4906_v5, 8  ;;  %5016 = vst [vmem:[%s9166_s12] sm:$0xff] %v4968_v43  ;;  %v4909_v28 = vadd.f32 %v9088_v26, %v4908_v3 }
 0x725   : > { %4989 = vxpose.xlu1.b32.cont [6/16] (narrow) %v4909_v28, 8 }
 0x736   : > { %v4913_v20 = vpop.f32.mrb[64].mxu1 }
 0x737   : > { %v4914_v47 = vadd.f32 %v9088_v26, %v4913_v20  ;;  %v4915_v42 = vpop.f32.mrb[65].mxu1 }
 0x738   : > { %v4916_v62 = vpop.f32.mrb[66].mxu1 }
 0x739   : > { %v4918_v22 = vpop.f32.mrb[67].mxu1  ;;  %4990 = vxpose.xlu1.b32.cont [7/16] (narrow) %v4914_v47, 8  ;;  %v4917_v12 = vadd.f32 %v9088_v26, %v4916_v62 }
 0x73d   : > { %4991 = vxpose.xlu1.b32.cont [8/16] (narrow) %v4917_v12, 8 }
 0x74e   : > { %v4921_v38 = vpop.f32.mrb[68].mxu1 }
 0x74f   : > { %v4922_v18 = vadd.f32 %v9088_v26, %v4921_v38  ;;  %v4923_v11 = vpop.f32.mrb[69].mxu1 }
 0x750   : > { %v4924_v40 = vpop.f32.mrb[70].mxu1 }
 0x751   : > { %v4926_v36 = vpop.f32.mrb[71].mxu1  ;;  %4992 = vxpose.xlu1.b32.cont [9/16] (narrow) %v4922_v18, 8  ;;  %v4925_v63 = vadd.f32 %v9088_v26, %v4924_v40 }
 0x755   : > { %4993 = vxpose.xlu1.b32.cont [10/16] (narrow) %v4925_v63, 8 }
 0x766   : > { %v4929_v54 = vpop.f32.mrb[72].mxu1 }
 0x767   : > { %v4930_v58 = vadd.f32 %v9088_v26, %v4929_v54  ;;  %v4931_v1 = vpop.f32.mrb[73].mxu1 }
 0x768   : > { %v4932_v49 = vpop.f32.mrb[74].mxu1 }
 0x769   : > { %v4934_v61 = vpop.f32.mrb[75].mxu1  ;;  %4994 = vxpose.xlu1.b32.cont [11/16] (narrow) %v4930_v58, 8  ;;  %v4933_v7 = vadd.f32 %v9088_v26, %v4932_v49 }
 0x76d   : > { %4995 = vxpose.xlu1.b32.cont [12/16] (narrow) %v4933_v7, 8 }
 0x77e   : > { %v4937_v34 = vpop.f32.mrb[76].mxu1 }
 0x77f   : > { %v4938_v37 = vadd.f32 %v9088_v26, %v4937_v34  ;;  %v4939_v17 = vpop.f32.mrb[77].mxu1 }
 0x780   : > { %v4940_v44 = vpop.f32.mrb[78].mxu1 }
 0x781   : > { %v4942_v35 = vpop.f32.mrb[79].mxu1  ;;  %4996 = vxpose.xlu1.b32.cont [13/16] (narrow) %v4938_v37, 8  ;;  %v4941_v10 = vadd.f32 %v9088_v26, %v4940_v44 }
 0x785   : > { %4997 = vxpose.xlu1.b32.cont [14/16] (narrow) %v4941_v10, 8 }
 0x796   : > { %v4945_v39 = vpop.f32.mrb[80].mxu1 }
 0x797   : > { %v4946_v19 = vadd.f32 %v9088_v26, %v4945_v39  ;;  %v4947_v14 = vpop.f32.mrb[81].mxu1 }
 0x798   : > { %v4948_v16 = vpop.f32.mrb[82].mxu1 }
 0x799   : > { %v4950_v48 = vpop.f32.mrb[83].mxu1  ;;  %4998 = vxpose.xlu1.b32.cont [15/16] (narrow) %v4946_v19, 8  ;;  %v4949_v8 = vadd.f32 %v9088_v26, %v4948_v16 }
 0x79d   : > { %4999 = vxpose.xlu1.b32.end [16/16] (narrow) %v4949_v8, 8 }
 0x7e1   : > { %v5000_v32 = vpop.trf.xlu1 }
 0x7e2   : > { %5017 = vst [vmem:[%s9166_s12 + $0x8] sm:$0xff] %v5000_v32 }
 0x7e3   : > { %5463 = shalt.err (!%p5460_p5)
}
 0x7e4   : > { %s5464_s8 = scalar_lea.hbm %s9187_s24, 256  ;;  %s5468_s10 = scalar_lea.hbm %s9240_s5, 512 }
 0x7e5   : > { %p5465_p6 = scmp.ne.s32.totalorder %s9187_s24, %s5464_s8  ;;  %p5469_p10 = scmp.lt.u32.totalorder %s9187_s24, %s9240_s5 }
 0x7e6   : > { %p5470_p11 = scmp.lt.u32.totalorder %s5468_s10, %s5464_s8  ;;  %p5472_p13 = scmp.lt.u32.totalorder %s5464_s8, %s9187_s24 }
 0x7e7   : > { %p5466_p7 = pnand %p5465_p6, %p5620_p4 }
 0x7e8   : > { %p5471_p12 = por %p5470_p11, %p5469_p10 }
 0x7e9   : > { %p5467_p9 = pneg %p5466_p7 }
 0x7ea   : > { %p5473_p0 = por %p5472_p13, %p5471_p12 }
 0x7ec   : > { %p5474_p1 = pnand %p5473_p0, %p5467_p9 }
 0x7ee   : > { %5477 = shalt.err (!%p5474_p1)
}
 0x7ef   : > { %5361 = dma.vmem_to_hbm [thread:$0]  (%p5620_p4), %s9182_s13, 256, %s9187_s24, %s5019_s25  }
 0x7f0 PF: > { %p5367_p2 = scmp.ge.s32.totalorder %s5528_s23, 2  ;;  %s5047_s14 = sand.u32 1, %s5508_s18  }
 0x7f1   : > { %s5048_s15 = scalar_lea.sflag [#allocation5], %s5047_s14 }
 0x7f2   : > { %p5364_p3 = pnand %p5367_p2, %p5627_p8 }
 0x7f4   : > { %5503 = dma.done.wait (!%p5364_p3), %s5048_s15, 256  }
 0x7f5   : > { %5505 = vsyncadd (!%p5364_p3), %s5048_s15, 4294967040  ;;  %s18_s23 = sadd.s32 1, %s5528_s23   ;;  %s9977_s18 = smov %s5512_s19 }
 0x7f6   : > { %p15_p5 = scmp.ge.s32.totalorder %s18_s23, 4   ;;  %s9978_s19 = smov %s5516_s20 }
 0x7f7   : > { %s9979_s20 = smov %s5633_s6  ;;  %s9980_s21 = smov %s5524_s22 }
 0x7f8   : > { %s9981_s22 = smov %s9983_s26  ;;  %17 = sbr.rel (!%p15_p5) target bundleno = 4 (0x4), region = 75 }
 0x7ff   :  { %5053 = vsyncpa [#allocation5], 1 }
 0x800   :  { %5055 = vsyncpa [#allocation5 + $0x1], 1 }

</bundles_post_ra>
